<compile_context>
chip_gen: v7x
topology: tpu7x:2x2x1
jax: 0.10.0
libtpu: 0.0.40
codegen_flags: <defaults>
</compile_context>

<pallas_src>
import functools

import jax
import jax.numpy as jnp
from jax.experimental import pallas as pl
from jax.experimental.pallas import tpu as pltpu

LANE = 128
MAX_TILE_K = 512                     # K-reduction tile (multiple of 128) for large Ci*kh*kw


def _round_up(x, m):
    return (x + m - 1) // m * m


def _vmem_capacity():
    try:
        return int(pltpu.get_tpu_info().vmem_capacity_bytes)
    except Exception:
        return 64 * 1024 * 1024      # conservative (v7x) default


VMEM_CAP = _vmem_capacity()
TILE_BUDGET = min(int(VMEM_CAP * 0.15), 20 * 1024 * 1024)


def _vmem_limit(fp):
    want = max(32 << 20, 3 * fp + (4 << 20))
    return int(max(16 << 20, min(want, int(VMEM_CAP * 0.55))))


def _pick_matmul_tile_m(mp, co, tile_k):
    for cand in (2048, 1024, 512, 256, 128):
        if cand > mp or mp % cand:
            continue
        fp = (2 * co * tile_k * 2 + 2 * tile_k * cand * 2
              + 2 * co * cand * 4 + co * cand * 4)
        if fp <= TILE_BUDGET:
            return cand
    return LANE


def _pick_ew_tile(mp, rows):
    for cand in (2048, 1024, 512, 256, 128):
        if cand <= mp and mp % cand == 0 and rows * cand * 4 * 8 <= TILE_BUDGET:
            return cand
    return LANE


# ----------------------------------------------------------------------------
# Batched conv-as-matmul kernel:  out[n] = A @ B[n]   (+ relu)
# Optional epilogue: per-(n, co) sum & max over the valid pixel columns
# (CBAM channel pooling fused into the matmul -- no extra HBM pass).
# ----------------------------------------------------------------------------
def _make_conv_kernel(relu, stats, tile_m, hw):
    if stats:
        def kern(a_ref, b_ref, o_ref, sum_ref, max_ref, acc_ref, s_sum, s_max):
            j = pl.program_id(1)
            k = pl.program_id(2)

            @pl.when(k == 0)
            def _():
                acc_ref[...] = jnp.zeros_like(acc_ref)

            acc_ref[...] += jnp.dot(a_ref[...], b_ref[0],
                                    preferred_element_type=jnp.float32)

            @pl.when(k == pl.num_programs(2) - 1)
            def _():
                acc = acc_ref[...]
                if relu:
                    acc = jnp.maximum(acc, 0.0)
                o_ref[0] = acc.astype(o_ref.dtype)
                lane = jax.lax.broadcasted_iota(jnp.int32, acc.shape, 1) + j * tile_m
                valid = lane < hw
                psum = jnp.sum(jnp.where(valid, acc, 0.0), axis=1, keepdims=True)
                pmax = jnp.max(jnp.where(valid, acc, -jnp.inf), axis=1, keepdims=True)
                first = j == 0
                tsum = jnp.where(first, psum, s_sum[...] + psum)
                tmax = jnp.where(first, pmax, jnp.maximum(s_max[...], pmax))
                s_sum[...] = tsum
                s_max[...] = tmax
                sum_ref[0] = tsum
                max_ref[0] = tmax
        return kern

    def kern(a_ref, b_ref, o_ref, acc_ref):
        k = pl.program_id(2)

        @pl.when(k == 0)
        def _():
            acc_ref[...] = jnp.zeros_like(acc_ref)

        acc_ref[...] += jnp.dot(a_ref[...], b_ref[0],
                                preferred_element_type=jnp.float32)

        @pl.when(k == pl.num_programs(2) - 1)
        def _():
            acc = acc_ref[...]
            if relu:
                acc = jnp.maximum(acc, 0.0)
            o_ref[0] = acc.astype(o_ref.dtype)
    return kern


def conv_matmul(a, b, *, relu=False, stats=False, hw=None, out_dtype=jnp.float32):
    """a: (Co, K) weights; b: (N, K, M) activations. Returns (N, Co, M) f32
    and, when stats=True, (per-(n,co) sum, per-(n,co) max) over the first `hw`
    columns (CBAM channel pooling fused into the matmul epilogue)."""
    Co, K = a.shape
    N, K2, M = b.shape
    assert K2 == K
    if stats:
        assert hw is not None and hw <= M
    a = a.astype(jnp.bfloat16)
    b = b.astype(jnp.bfloat16)
    Mp = _round_up(M, LANE)
    if Mp != M:
        b = jnp.pad(b, ((0, 0), (0, 0), (0, Mp - M)))
    if K <= MAX_TILE_K:
        Kp, tile_k = K, K
    else:
        tile_k = MAX_TILE_K
        Kp = _round_up(K, tile_k)
        a = jnp.pad(a, ((0, 0), (0, Kp - K)))
        b = jnp.pad(b, ((0, 0), (0, Kp - K), (0, 0)))
    tile_m = _pick_matmul_tile_m(Mp, Co, tile_k)
    nj, nk = Mp // tile_m, Kp // tile_k
    fp = (2 * Co * tile_k * 2 + 2 * tile_k * tile_m * 2
          + 2 * Co * tile_m * 4 + Co * tile_m * 4)

    kern = _make_conv_kernel(relu, stats, tile_m, hw)
    in_specs = [pl.BlockSpec((Co, tile_k), lambda n, j, k: (0, k)),
                pl.BlockSpec((1, tile_k, tile_m), lambda n, j, k: (n, k, j))]
    out_shapes = [jax.ShapeDtypeStruct((N, Co, Mp), out_dtype)]
    out_specs = [pl.BlockSpec((1, Co, tile_m), lambda n, j, k: (n, 0, j))]
    scratch = [pltpu.VMEM((Co, tile_m), jnp.float32)]
    if stats:
        out_shapes += [jax.ShapeDtypeStruct((N, Co, 1), jnp.float32),
                       jax.ShapeDtypeStruct((N, Co, 1), jnp.float32)]
        out_specs += [pl.BlockSpec((1, Co, 1), lambda n, j, k: (n, 0, 0)),
                      pl.BlockSpec((1, Co, 1), lambda n, j, k: (n, 0, 0))]
        scratch += [pltpu.VMEM((Co, 1), jnp.float32),
                    pltpu.VMEM((Co, 1), jnp.float32)]

    res = pl.pallas_call(
        kern,
        grid=(N, nj, nk),
        in_specs=in_specs,
        out_specs=tuple(out_specs) if stats else out_specs[0],
        out_shape=tuple(out_shapes) if stats else out_shapes[0],
        scratch_shapes=scratch,
        compiler_params=pltpu.CompilerParams(
            dimension_semantics=("parallel",
                                 "arbitrary" if stats else "parallel",
                                 "arbitrary"),
            vmem_limit_bytes=_vmem_limit(fp)),
    )(a, b)

    if stats:
        out, ssum, smax = res
    else:
        out = res
    if Mp != M:
        out = out[:, :, :M]
    if stats:
        return out, (ssum[:, :, 0], smax[:, :, 0])
    return out


# ----------------------------------------------------------------------------
# im2col for the 3x3 reflect-pad convs, built directly in (N, Ci*9, H*W) bf16
# (layout-compatible with w.reshape(Co, Ci*9); no HBM transpose).
# ----------------------------------------------------------------------------
def _im2col3x3_reflect(x):
    N, Ci, H, W = x.shape
    xp = jnp.pad(x, ((0, 0), (0, 0), (1, 1), (1, 1)), mode="reflect")
    xp = xp.astype(jnp.bfloat16)
    cols = [xp[:, :, dy:dy + H, dx:dx + W] for dy in range(3) for dx in range(3)]
    patches = jnp.stack(cols, axis=2)                       # (N, Ci, 9, H, W)
    return patches.reshape(N, Ci * 9, H * W)


# ----------------------------------------------------------------------------
# CBAM kernels
# ----------------------------------------------------------------------------
def _plane_stats_kernel(x_ref, att_ref, mean_ref, max_ref):
    # channel-attended feature -> per-pixel mean/max over channels (lane-dense)
    xa = x_ref[0].astype(jnp.float32) * att_ref[0]           # (C, T) * (C, 1)
    inv_c = 1.0 / xa.shape[0]
    mean_ref[0] = jnp.sum(xa, axis=0, keepdims=True) * inv_c
    max_ref[0] = jnp.max(xa, axis=0, keepdims=True)


def _make_spatial7_kernel(H, W):
    # Co=1, Ci=2 7x7 conv (zero pad 3) as a VPU weighted sum of shifted
    # windows; weights live in SMEM (scalar reads), planes stay in VMEM.
    def kern(w_ref, planes_ref, o_ref):
        acc = jnp.zeros((H, W), jnp.float32)
        for c in range(2):
            for dy in range(7):
                for dx in range(7):
                    tap = planes_ref[0, c, dy:dy + H, dx:dx + W]
                    acc = acc + w_ref[c * 49 + dy * 7 + dx] * tap
        o_ref[0, 0] = acc
    return kern


def _make_finish_kernel(with_add, with_bn):
    # out = x * channel_att * sigmoid(spatial_logits) [+ addend]
    # optional epilogue: per-(n, c) BatchNorm partial sum / sum-of-squares.
    def kern(*refs):
        x_ref, att_ref, sp_ref = refs[0], refs[1], refs[2]
        idx = 3
        add_ref = None
        if with_add:
            add_ref = refs[idx]
            idx += 1
        o_ref = refs[idx]
        idx += 1
        out = (x_ref[0].astype(jnp.float32) * att_ref[0]
               * jax.nn.sigmoid(sp_ref[0].astype(jnp.float32)))
        if with_add:
            out = out + add_ref[0].astype(jnp.float32)
        o_ref[0] = out.astype(o_ref.dtype)
        if with_bn:
            bsum_ref, bsq_ref, s_sum, s_sq = refs[idx], refs[idx + 1], refs[idx + 2], refs[idx + 3]
            j = pl.program_id(1)
            psum = jnp.sum(out, axis=1, keepdims=True)
            psq = jnp.sum(out * out, axis=1, keepdims=True)
            first = j == 0
            tsum = jnp.where(first, psum, s_sum[...] + psum)
            tsq = jnp.where(first, psq, s_sq[...] + psq)
            s_sum[...] = tsum
            s_sq[...] = tsq
            bsum_ref[0] = tsum
            bsq_ref[0] = tsq
    return kern


def _make_pool_kernel(tile_m, hw):
    # per-(n, c) sum & max over valid pixel columns (for CBAM inputs that are
    # not conv outputs, e.g. the stacked FFT real/imag planes).
    def kern(x_ref, sum_ref, max_ref, s_sum, s_max):
        j = pl.program_id(1)
        x = x_ref[0].astype(jnp.float32)
        lane = jax.lax.broadcasted_iota(jnp.int32, x.shape, 1) + j * tile_m
        valid = lane < hw
        psum = jnp.sum(jnp.where(valid, x, 0.0), axis=1, keepdims=True)
        pmax = jnp.max(jnp.where(valid, x, -jnp.inf), axis=1, keepdims=True)
        first = j == 0
        tsum = jnp.where(first, psum, s_sum[...] + psum)
        tmax = jnp.where(first, pmax, jnp.maximum(s_max[...], pmax))
        s_sum[...] = tsum
        s_max[...] = tmax
        sum_ref[0] = tsum
        max_ref[0] = tmax
    return kern


def channel_pool(x, hw):
    """x: (N, C, M) -> per-(n, c) (sum, max) over the first hw columns."""
    N, C, M = x.shape
    Mp = _round_up(M, LANE)
    if Mp != M:
        x = jnp.pad(x, ((0, 0), (0, 0), (0, Mp - M)))
    tile = _pick_ew_tile(Mp, max(C, 8))
    nj = Mp // tile
    psum, pmax = pl.pallas_call(
        _make_pool_kernel(tile, hw),
        grid=(N, nj),
        in_specs=[pl.BlockSpec((1, C, tile), lambda n, j: (n, 0, j))],
        out_specs=(pl.BlockSpec((1, C, 1), lambda n, j: (n, 0, 0)),
                   pl.BlockSpec((1, C, 1), lambda n, j: (n, 0, 0))),
        out_shape=(jax.ShapeDtypeStruct((N, C, 1), jnp.float32),
                   jax.ShapeDtypeStruct((N, C, 1), jnp.float32)),
        scratch_shapes=[pltpu.VMEM((C, 1), jnp.float32),
                        pltpu.VMEM((C, 1), jnp.float32)],
        compiler_params=pltpu.CompilerParams(
            dimension_semantics=("parallel", "arbitrary")),
    )(x)
    return psum[:, :, 0], pmax[:, :, 0]


def cbam_channel_att(psum, pmax, hw, p):
    """Tiny channel-attention MLP (a handful of lanes) kept on the VPU in XLA."""
    N = psum.shape[0]
    avg = psum / hw
    hid, C = p["w1"].shape[:2]
    w1 = p["w1"].reshape(hid, C)
    w2 = p["w2"].reshape(C, hid)
    pools = jnp.concatenate([pmax, avg], axis=0)             # (2N, C)
    hdn = jnp.maximum(pools @ w1.T, 0.0)
    logits = hdn @ w2.T
    return jax.nn.sigmoid(logits[:N] + logits[N:])           # (N, C)


def cbam_apply(x, ch_att, p, H, W, *, C, cblk=0, addend=None, bn_stats=False,
               out_dtype=jnp.float32):
    """Apply CBAM (given the channel attention) to channels
    [cblk*C, (cblk+1)*C) of x (N, Ctot, M).  Optionally fuse an addend and the
    per-(n,c) BatchNorm partial statistics of the result into the same pass."""
    N = x.shape[0]
    HW = H * W
    Mp = _round_up(HW, LANE)
    xin = x
    if xin.shape[2] != Mp:
        xin = jnp.pad(xin, ((0, 0), (0, 0), (0, Mp - xin.shape[2])))
    att3 = ch_att.reshape(N, C, 1).astype(jnp.float32)
    tile = _pick_ew_tile(Mp, max(C, 8))
    nj = Mp // tile

    # 1) per-pixel channel mean/max of the channel-attended feature (lane-dense)
    meanp, maxp = pl.pallas_call(
        _plane_stats_kernel,
        grid=(N, nj),
        in_specs=[pl.BlockSpec((1, C, tile), lambda n, j: (n, cblk, j)),
                  pl.BlockSpec((1, C, 1), lambda n, j: (n, 0, 0))],
        out_specs=(pl.BlockSpec((1, 1, tile), lambda n, j: (n, 0, j)),
                   pl.BlockSpec((1, 1, tile), lambda n, j: (n, 0, j))),
        out_shape=(jax.ShapeDtypeStruct((N, 1, Mp), jnp.float32),
                   jax.ShapeDtypeStruct((N, 1, Mp), jnp.float32)),
        compiler_params=pltpu.CompilerParams(
            dimension_semantics=("parallel", "parallel")),
    )(xin, att3)

    # 2) 7x7 spatial-attention conv on the (max, mean) planes (VPU kernel)
    planes = jnp.stack([maxp[:, 0, :HW], meanp[:, 0, :HW]], axis=1)
    planes = planes.reshape(N, 2, H, W)
    planes = jnp.pad(planes, ((0, 0), (0, 0), (3, 3), (3, 3)))
    wflat = p["wsp"].reshape(-1).astype(jnp.float32)          # (98,)
    sp = pl.pallas_call(
        _make_spatial7_kernel(H, W),
        grid=(N,),
        in_specs=[pl.BlockSpec(memory_space=pltpu.MemorySpace.SMEM),
                  pl.BlockSpec((1, 2, H + 6, W + 6), lambda n: (n, 0, 0, 0))],
        out_specs=pl.BlockSpec((1, 1, H, W), lambda n: (n, 0, 0, 0)),
        out_shape=jax.ShapeDtypeStruct((N, 1, H, W), jnp.float32),
        compiler_params=pltpu.CompilerParams(dimension_semantics=("parallel",)),
    )(wflat, planes)
    sp = sp.reshape(N, 1, HW)
    if Mp != HW:
        sp = jnp.pad(sp, ((0, 0), (0, 0), (0, Mp - HW)))

    # 3) finish: x*att*sigmoid(sp) [+ addend] [+ BN partial stats] in one pass
    in_specs = [pl.BlockSpec((1, C, tile), lambda n, j: (n, cblk, j)),
                pl.BlockSpec((1, C, 1), lambda n, j: (n, 0, 0)),
                pl.BlockSpec((1, 1, tile), lambda n, j: (n, 0, j))]
    operands = [xin, att3, sp]
    if addend is not None:
        add = addend
        if add.shape[2] != Mp:
            add = jnp.pad(add, ((0, 0), (0, 0), (0, Mp - add.shape[2])))
        in_specs.append(pl.BlockSpec((1, C, tile), lambda n, j: (n, 0, j)))
        operands.append(add)
    out_shapes = [jax.ShapeDtypeStruct((N, C, Mp), out_dtype)]
    out_specs = [pl.BlockSpec((1, C, tile), lambda n, j: (n, 0, j))]
    scratch = []
    if bn_stats:
        out_shapes += [jax.ShapeDtypeStruct((N, C, 1), jnp.float32),
                       jax.ShapeDtypeStruct((N, C, 1), jnp.float32)]
        out_specs += [pl.BlockSpec((1, C, 1), lambda n, j: (n, 0, 0)),
                      pl.BlockSpec((1, C, 1), lambda n, j: (n, 0, 0))]
        scratch = [pltpu.VMEM((C, 1), jnp.float32),
                   pltpu.VMEM((C, 1), jnp.float32)]

    res = pl.pallas_call(
        _make_finish_kernel(addend is not None, bn_stats),
        grid=(N, nj),
        in_specs=in_specs,
        out_specs=tuple(out_specs) if bn_stats else out_specs[0],
        out_shape=tuple(out_shapes) if bn_stats else out_shapes[0],
        scratch_shapes=scratch,
        compiler_params=pltpu.CompilerParams(
            dimension_semantics=("parallel",
                                 "arbitrary" if bn_stats else "parallel")),
    )(*operands)

    if bn_stats:
        out, bsum, bsq = res
    else:
        out = res
    if Mp != HW:
        out = out[:, :, :HW]
    if bn_stats:
        return out, bsum[:, :, 0], bsq[:, :, 0]
    return out


# ----------------------------------------------------------------------------
# Fourier / spectral transform
# ----------------------------------------------------------------------------
def fourier_unit(x4d, p, H, W):
    """MAM_FourierUnit (spa_mask=None, use_se=True, fft_norm='ortho')."""
    N, c = x4d.shape[:2]
    HW = H * W
    f = jnp.fft.fftn(x4d, axes=(-2, -1), norm="ortho")
    # torch stacks (real, imag) last then permutes -> interleaved 2*c channels
    ff = jnp.stack([jnp.real(f), jnp.imag(f)], axis=2).reshape(N, 2 * c, HW)
    ff = ff.astype(jnp.float32)
    psum, pmax = channel_pool(ff, HW)
    att = cbam_channel_att(psum, pmax, HW, p["cbam"])
    # bf16 output: it feeds the MXU matmul (which would cast anyway)
    ff_att = cbam_apply(ff, att, p["cbam"], H, W, C=2 * c, out_dtype=jnp.bfloat16)
    g = conv_matmul(p["conv_w"].reshape(2 * c, 2 * c), ff_att, relu=True)
    g = g.reshape(N, c, 2, H, W)
    gc = jax.lax.complex(g[:, :, 0], g[:, :, 1])
    return jnp.fft.ifftn(gc, s=(H, W), axes=(-2, -1), norm="ortho")


def spectral_transform(x_g, p, H, W):
    """MAM_SpectralTransform (stride=1, enable_lfu=True).  Returns (N, cg, H*W)."""
    N, cg = x_g.shape[:2]
    HW = H * W
    x1 = conv_matmul(p["conv1_w"].reshape(cg // 2, cg),
                     x_g.reshape(N, cg, HW), relu=True)       # (N, cg//2, HW)
    c = cg // 2
    x1_4d = x1.reshape(N, c, H, W)
    output = jnp.real(fourier_unit(x1_4d, p["fu"], H, W))     # torch .float() -> real
    assert H == W and H % 2 == 0 and c % 4 == 0 and c >= 4
    s = H // 2
    xs = x1_4d[:, : c // 4]
    xs = jnp.concatenate([xs[:, :, :s, :], xs[:, :, s:, :]], axis=1)
    xs = jnp.concatenate([xs[:, :, :, :s], xs[:, :, :, s:]], axis=1)
    xs = jnp.real(fourier_unit(xs, p["lfu"], s, s))
    xs = jnp.tile(xs, (1, 1, 2, 2))
    z = (x1_4d + output + xs).reshape(N, c, HW)
    return conv_matmul(p["conv2_w"].reshape(cg, c), z)        # (N, cg, HW)


# ----------------------------------------------------------------------------
# BatchNorm (training-mode batch stats, identity affine) fused with the
# residual fold: final_half = 3 * gen_half + (conv_out - mean_c) * rsqrt(var_c+eps)
# ----------------------------------------------------------------------------
def _bn_affine(bsum, bsq, count, eps=1e-5):
    s = jnp.sum(bsum, axis=0)                                 # (C,)
    sq = jnp.sum(bsq, axis=0)
    mean = s / count
    var = jnp.maximum(sq / count - mean * mean, 0.0)          # clamp cancellation
    scale = jax.lax.rsqrt(var + eps)
    return mean.reshape(-1, 1), scale.reshape(-1, 1)


def _bn_residual_kernel(g_ref, x_ref, mu_ref, sc_ref, o_ref):
    o_ref[0] = (3.0 * g_ref[0]
                + (x_ref[0] - mu_ref[...]) * sc_ref[...]).astype(o_ref.dtype)


def bn_residual_final(gen_half, conv_out, mean_c, scale_c, H, W):
    N, C = conv_out.shape[:2]
    HW = H * W
    Mp = _round_up(HW, LANE)
    g = gen_half.reshape(N, C, HW)
    xo = conv_out
    if Mp != HW:
        g = jnp.pad(g, ((0, 0), (0, 0), (0, Mp - HW)))
        xo = jnp.pad(xo, ((0, 0), (0, 0), (0, Mp - HW)))
    tile = _pick_ew_tile(Mp, max(C, 8))
    out = pl.pallas_call(
        _bn_residual_kernel,
        grid=(N, Mp // tile),
        in_specs=[pl.BlockSpec((1, C, tile), lambda n, j: (n, 0, j)),
                  pl.BlockSpec((1, C, tile), lambda n, j: (n, 0, j)),
                  pl.BlockSpec((C, 1), lambda n, j: (0, 0)),
                  pl.BlockSpec((C, 1), lambda n, j: (0, 0))],
        out_specs=pl.BlockSpec((1, C, tile), lambda n, j: (n, 0, j)),
        out_shape=jax.ShapeDtypeStruct((N, C, Mp), jnp.float32),
        compiler_params=pltpu.CompilerParams(
            dimension_semantics=("parallel", "parallel")),
    )(g, xo, mean_c, scale_c)
    if Mp != HW:
        out = out[:, :, :HW]
    return out.reshape(N, C, H, W)


# ----------------------------------------------------------------------------
# Parameters
# ----------------------------------------------------------------------------
def init_cbam(key, channels, reduction=16):
    hid = max(channels // reduction, 1)
    k1, k2, k3 = jax.random.split(key, 3)
    return dict(
        w1=0.1 * jax.random.normal(k1, (hid, channels, 1, 1), jnp.float32),
        w2=0.1 * jax.random.normal(k2, (channels, hid, 1, 1), jnp.float32),
        wsp=0.1 * jax.random.normal(k3, (1, 2, 7, 7), jnp.float32),
    )


def init_params(key, dim):
    cl = dim - dim // 2
    cg = dim // 2
    keys = iter(jax.random.split(key, 16))

    def w(shape):
        return 0.1 * jax.random.normal(next(keys), shape, jnp.float32)

    return dict(
        w_l2l=w((cl, cl, 3, 3)),
        w_l2g=w((cg, cl, 3, 3)),
        w_g2l=w((cl, cg, 3, 3)),
        cbam_l2l=init_cbam(next(keys), cl),
        cbam_l2g=init_cbam(next(keys), cg),
        cbam_g2l=init_cbam(next(keys), cl),
        spec=dict(
            conv1_w=w((cg // 2, cg, 1, 1)),
            fu=dict(conv_w=w((cg, cg, 1, 1)), cbam=init_cbam(next(keys), cg)),
            lfu=dict(conv_w=w((cg, cg, 1, 1)), cbam=init_cbam(next(keys), cg)),
            conv2_w=w((cg, cg // 2, 1, 1)),
        ),
    )


# ----------------------------------------------------------------------------
# MAM_FFC_Block forward (ratio_gin=ratio_gout=0.5, gated=False, spa_mask=None)
# ----------------------------------------------------------------------------
def mam_ffc_block_forward(gen_ft, params, dim):
    x = gen_ft.astype(jnp.float32)
    N, D, H, W = x.shape
    assert D == dim
    cg = dim // 2
    cl = dim - cg
    HW = H * W
    x_l = x[:, :cl]
    x_g = x[:, cl:]

    # ---- 3x3 reflect-pad convs; l2l and l2g fused into one matmul ----
    b_l = _im2col3x3_reflect(x_l)
    b_g = _im2col3x3_reflect(x_g)
    w_l2l = params["w_l2l"].reshape(cl, -1)
    w_l2g = params["w_l2g"].reshape(cg, -1)
    w_g2l = params["w_g2l"].reshape(cl, -1)
    if cl == cg:
        conv_lg, (s_lg, m_lg) = conv_matmul(
            jnp.concatenate([w_l2l, w_l2g], axis=0), b_l, stats=True, hw=HW)
        src_l2l, blk_l2l, s_l2l, m_l2l = conv_lg, 0, s_lg[:, :cl], m_lg[:, :cl]
        src_l2g, blk_l2g, s_l2g, m_l2g = conv_lg, 1, s_lg[:, cl:], m_lg[:, cl:]
    else:
        src_l2l, (s_l2l, m_l2l) = conv_matmul(w_l2l, b_l, stats=True, hw=HW)
        src_l2g, (s_l2g, m_l2g) = conv_matmul(w_l2g, b_l, stats=True, hw=HW)
        blk_l2l = blk_l2g = 0
    conv_g2l, (s_g2l, m_g2l) = conv_matmul(w_g2l, b_g, stats=True, hw=HW)

    # ---- CBAM channel attentions (pooled stats came from the matmul epilogue)
    att_l2l = cbam_channel_att(s_l2l, m_l2l, HW, params["cbam_l2l"])
    att_l2g = cbam_channel_att(s_l2g, m_l2g, HW, params["cbam_l2g"])
    att_g2l = cbam_channel_att(s_g2l, m_g2l, HW, params["cbam_g2l"])

    # ---- out_xl = cbam_l2l(convl2l) + cbam_g2l(convg2l)  (add + BN stats fused)
    r_l2l = cbam_apply(src_l2l, att_l2l, params["cbam_l2l"], H, W,
                       C=cl, cblk=blk_l2l)
    out_xl, bsum_l, bsq_l = cbam_apply(conv_g2l, att_g2l, params["cbam_g2l"],
                                       H, W, C=cl, cblk=0,
                                       addend=r_l2l, bn_stats=True)

    # ---- out_xg = cbam_l2g(convl2g) + spectral_transform(x_g)
    spec_x = spectral_transform(x_g, params["spec"], H, W)
    out_xg, bsum_g, bsq_g = cbam_apply(src_l2g, att_l2g, params["cbam_l2g"],
                                       H, W, C=cg, cblk=blk_l2g,
                                       addend=spec_x, bn_stats=True)

    # ---- BN (training-mode batch stats, identity affine) + residual fold:
    #      final = 3 * gen_ft + concat(BN(out_xl), BN(out_xg))
    mu_l, sc_l = _bn_affine(bsum_l, bsq_l, N * HW)
    mu_g, sc_g = _bn_affine(bsum_g, bsq_g, N * HW)
    fin_l = bn_residual_final(x_l, out_xl, mu_l, sc_l, H, W)
    fin_g = bn_residual_final(x_g, out_xg, mu_g, sc_g, H, W)
    return jnp.concatenate([fin_l, fin_g], axis=1)


if __name__ == "__main__":
    key = jax.random.PRNGKey(0)
    kx, kp = jax.random.split(key)
    # dim must be a multiple of 16 so the LFU channel split (c // 4) is non-empty.
    N, dim, H, W = 2, 16, 16, 16
    gen_ft = jax.random.normal(kx, (N, dim, H, W), jnp.float32)
    params = init_params(kp, dim)

    fwd = jax.jit(functools.partial(mam_ffc_block_forward, dim=dim))
    out = jax.block_until_ready(fwd(gen_ft, params))

    assert out.shape == (N, dim, H, W)
    assert bool(jnp.all(jnp.isfinite(out)))
    print("KERNEL_OK")
</pallas_src>

<mosaic_0001>
module attributes {stable_mosaic.version = 11 : i64} {
  func.func @kern(%arg0: i32, %arg1: i32, %arg2: i32, %arg3: memref<16x72xbf16, #tpu.memory_space<vmem>>, %arg4: memref<1x72x256xbf16, #tpu.memory_space<vmem>>, %arg5: memref<1x16x256xf32, #tpu.memory_space<vmem>>, %arg6: memref<1x16x1xf32, #tpu.memory_space<vmem>>, %arg7: memref<1x16x1xf32, #tpu.memory_space<vmem>>, %arg8: memref<16x256xf32, #tpu.memory_space<vmem>>, %arg9: memref<16x1xf32, #tpu.memory_space<vmem>>, %arg10: memref<16x1xf32, #tpu.memory_space<vmem>>) attributes {dimension_semantics = [#tpu.dimension_semantics<parallel>, #tpu.dimension_semantics<arbitrary>, #tpu.dimension_semantics<arbitrary>], iteration_bounds = array<i64: 2, 1, 1>, scalar_prefetch = 0 : i64, scratch_operands = 3 : i64, tpu.core_type = #tpu.core_type<tc>, window_params = [{transform_indices = @transform_0, window_bounds = array<i64: 16, 72>}, {transform_indices = @transform_1, window_bounds = array<i64: 1, 72, 256>}, {transform_indices = @transform_2, window_bounds = array<i64: 1, 16, 256>}, {transform_indices = @transform_3, window_bounds = array<i64: 1, 16, 1>}, {transform_indices = @transform_4, window_bounds = array<i64: 1, 16, 1>}]} {
    %c0_i32 = arith.constant 0 : i32
    %0 = arith.cmpi eq, %arg2, %c0_i32 : i32
    %1 = arith.extui %0 : i1 to i32
    %c0_i32_0 = arith.constant 0 : i32
    %2 = arith.cmpi ne, %1, %c0_i32_0 : i32
    scf.if %2 {
      %cst_11 = arith.constant 0.000000e+00 : f32
      %13 = vector.broadcast %cst_11 : f32 to vector<16x256xf32>
      %c0_12 = arith.constant 0 : index
      %c0_13 = arith.constant 0 : index
      %14 = vector.load %arg8[%c0_12, %c0_13] : memref<16x256xf32, #tpu.memory_space<vmem>>, vector<16x256xf32>
      tpu.vector_store %arg8[%c0_12, %c0_13], %13 {strides = array<i32>} : memref<16x256xf32, #tpu.memory_space<vmem>>, vector<16x256xf32>,
    } else {
    }
    %c0 = arith.constant 0 : index
    %c0_1 = arith.constant 0 : index
    %3 = vector.load %arg8[%c0, %c0_1] : memref<16x256xf32, #tpu.memory_space<vmem>>, vector<16x256xf32>
    %c0_2 = arith.constant 0 : index
    %c0_3 = arith.constant 0 : index
    %4 = vector.load %arg3[%c0_2, %c0_3] : memref<16x72xbf16, #tpu.memory_space<vmem>>, vector<16x72xbf16>
    %c0_4 = arith.constant 0 : index
    %c0_5 = arith.constant 0 : index
    %c0_6 = arith.constant 0 : index
    %5 = vector.load %arg4[%c0_4, %c0_5, %c0_6] : memref<1x72x256xbf16, #tpu.memory_space<vmem>>, vector<1x72x256xbf16>
    %6 = vector.shape_cast %5 : vector<1x72x256xbf16> to vector<72x256xbf16>
    %cst = arith.constant dense<0.000000e+00> : vector<16x256xf32>
    %7 = tpu.matmul %4, %6, %cst {dimension_numbers = #tpu.dot_dimension_numbers<[1], [0], [0], [1], [0, 0, 1, 1], [], []>} : vector<16x72xbf16>, vector<72x256xbf16>, vector<16x256xf32> -> vector<16x256xf32>
    %8 = arith.addf %3, %7 : vector<16x256xf32>
    %c0_7 = arith.constant 0 : index
    %c0_8 = arith.constant 0 : index
    %9 = vector.load %arg8[%c0_7, %c0_8] : memref<16x256xf32, #tpu.memory_space<vmem>>, vector<16x256xf32>
    tpu.vector_store %arg8[%c0_7, %c0_8], %8 {strides = array<i32>} : memref<16x256xf32, #tpu.memory_space<vmem>>, vector<16x256xf32>,
    %c0_i32_9 = arith.constant 0 : i32
    %10 = arith.cmpi eq, %arg2, %c0_i32_9 : i32
    %11 = arith.extui %10 : i1 to i32
    %c0_i32_10 = arith.constant 0 : i32
    %12 = arith.cmpi ne, %11, %c0_i32_10 : i32
    scf.if %12 {
      %c0_11 = arith.constant 0 : index
      %c0_12 = arith.constant 0 : index
      %13 = vector.load %arg8[%c0_11, %c0_12] : memref<16x256xf32, #tpu.memory_space<vmem>>, vector<16x256xf32>
      %c0_13 = arith.constant 0 : index
      %c0_14 = arith.constant 0 : index
      %c0_15 = arith.constant 0 : index
      %14 = vector.load %arg5[%c0_13, %c0_14, %c0_15] : memref<1x16x256xf32, #tpu.memory_space<vmem>>, vector<1x16x256xf32>
      %15 = vector.shape_cast %14 : vector<1x16x256xf32> to vector<16x256xf32>
      %16 = vector.shape_cast %13 : vector<16x256xf32> to vector<1x16x256xf32>
      tpu.vector_store %arg5[%c0_13, %c0_14, %c0_15], %16 {strides = array<i32>} : memref<1x16x256xf32, #tpu.memory_space<vmem>>, vector<1x16x256xf32>,
      %17 = tpu.iota {dimensions = array<i32: 1>} : vector<16x256xi32>
      %c256_i32 = arith.constant 256 : i32
      %18 = arith.muli %arg1, %c256_i32 : i32
      %19 = vector.broadcast %18 : i32 to vector<16x256xi32>
      %20 = arith.addi %17, %19 : vector<16x256xi32>
      %c256_i32_16 = arith.constant 256 : i32
      %21 = vector.broadcast %c256_i32_16 : i32 to vector<16x256xi32>
      %22 = arith.cmpi slt, %20, %21 : vector<16x256xi32>
      %cst_17 = arith.constant 0.000000e+00 : f32
      %23 = vector.broadcast %cst_17 : f32 to vector<16x256xf32>
      %24 = arith.select %22, %13, %23 : vector<16x256xi1>, vector<16x256xf32>
      %cst_18 = arith.constant dense<0.000000e+00> : vector<16xf32>
      %25 = vector.multi_reduction <add>, %24, %cst_18 [1] : vector<16x256xf32> to vector<16xf32>
      %26 = vector.shape_cast %25 : vector<16xf32> to vector<16x1xf32>
      %cst_19 = arith.constant 0xFF800000 : f32
      %27 = vector.broadcast %cst_19 : f32 to vector<16x256xf32>
      %28 = arith.select %22, %13, %27 : vector<16x256xi1>, vector<16x256xf32>
      %cst_20 = arith.constant dense<0xFF800000> : vector<16xf32>
      %29 = vector.multi_reduction <maximumf>, %28, %cst_20 [1] : vector<16x256xf32> to vector<16xf32>
      %30 = vector.shape_cast %29 : vector<16xf32> to vector<16x1xf32>
      %c0_i32_21 = arith.constant 0 : i32
      %31 = arith.cmpi eq, %arg1, %c0_i32_21 : i32
      %c0_22 = arith.constant 0 : index
      %c0_23 = arith.constant 0 : index
      %32 = vector.load %arg9[%c0_22, %c0_23] : memref<16x1xf32, #tpu.memory_space<vmem>>, vector<16x1xf32>
      %33 = arith.addf %32, %26 : vector<16x1xf32>
      %34 = arith.select %31, %26, %33 : vector<16x1xf32>
      %c0_24 = arith.constant 0 : index
      %c0_25 = arith.constant 0 : index
      %35 = vector.load %arg10[%c0_24, %c0_25] : memref<16x1xf32, #tpu.memory_space<vmem>>, vector<16x1xf32>
      %36 = arith.maximumf %35, %30 : vector<16x1xf32>
      %37 = arith.select %31, %30, %36 : vector<16x1xf32>
      %c0_26 = arith.constant 0 : index
      %c0_27 = arith.constant 0 : index
      %38 = vector.load %arg9[%c0_26, %c0_27] : memref<16x1xf32, #tpu.memory_space<vmem>>, vector<16x1xf32>
      tpu.vector_store %arg9[%c0_26, %c0_27], %34 {strides = array<i32>} : memref<16x1xf32, #tpu.memory_space<vmem>>, vector<16x1xf32>,
      %c0_28 = arith.constant 0 : index
      %c0_29 = arith.constant 0 : index
      %39 = vector.load %arg10[%c0_28, %c0_29] : memref<16x1xf32, #tpu.memory_space<vmem>>, vector<16x1xf32>
      tpu.vector_store %arg10[%c0_28, %c0_29], %37 {strides = array<i32>} : memref<16x1xf32, #tpu.memory_space<vmem>>, vector<16x1xf32>,
      %c0_30 = arith.constant 0 : index
      %c0_31 = arith.constant 0 : index
      %c0_32 = arith.constant 0 : index
      %40 = vector.load %arg6[%c0_30, %c0_31, %c0_32] : memref<1x16x1xf32, #tpu.memory_space<vmem>>, vector<1x16x1xf32>
      %41 = vector.shape_cast %40 : vector<1x16x1xf32> to vector<16x1xf32>
      %42 = vector.shape_cast %34 : vector<16x1xf32> to vector<1x16x1xf32>
      tpu.vector_store %arg6[%c0_30, %c0_31, %c0_32], %42 {strides = array<i32>} : memref<1x16x1xf32, #tpu.memory_space<vmem>>, vector<1x16x1xf32>,
      %c0_33 = arith.constant 0 : index
      %c0_34 = arith.constant 0 : index
      %c0_35 = arith.constant 0 : index
      %43 = vector.load %arg7[%c0_33, %c0_34, %c0_35] : memref<1x16x1xf32, #tpu.memory_space<vmem>>, vector<1x16x1xf32>
      %44 = vector.shape_cast %43 : vector<1x16x1xf32> to vector<16x1xf32>
      %45 = vector.shape_cast %37 : vector<16x1xf32> to vector<1x16x1xf32>
      tpu.vector_store %arg7[%c0_33, %c0_34, %c0_35], %45 {strides = array<i32>} : memref<1x16x1xf32, #tpu.memory_space<vmem>>, vector<1x16x1xf32>,
    } else {
    }
    return
  }
  func.func @transform_0(%arg0: i32, %arg1: i32, %arg2: i32) -> (i32, i32) {
    %c0_i32 = arith.constant 0 : i32
    %c0_i32_0 = arith.constant 0 : i32
    return %c0_i32, %arg2 : i32, i32
  }
  func.func @transform_1(%arg0: i32, %arg1: i32, %arg2: i32) -> (i32, i32, i32) {
    %c0_i32 = arith.constant 0 : i32
    return %arg0, %arg2, %arg1 : i32, i32, i32
  }
  func.func @transform_2(%arg0: i32, %arg1: i32, %arg2: i32) -> (i32, i32, i32) {
    %c0_i32 = arith.constant 0 : i32
    %c0_i32_0 = arith.constant 0 : i32
    return %arg0, %c0_i32, %arg1 : i32, i32, i32
  }
  func.func @transform_3(%arg0: i32, %arg1: i32, %arg2: i32) -> (i32, i32, i32) {
    %c0_i32 = arith.constant 0 : i32
    %c0_i32_0 = arith.constant 0 : i32
    %c0_i32_1 = arith.constant 0 : i32
    return %arg0, %c0_i32, %c0_i32_0 : i32, i32, i32
  }
  func.func @transform_4(%arg0: i32, %arg1: i32, %arg2: i32) -> (i32, i32, i32) {
    %c0_i32 = arith.constant 0 : i32
    %c0_i32_0 = arith.constant 0 : i32
    %c0_i32_1 = arith.constant 0 : i32
    return %arg0, %c0_i32, %c0_i32_0 : i32, i32, i32
  }
}

module attributes {stable_mosaic.version = 11 : i64} {
  func.func @_plane_stats_kernel(%arg0: i32, %arg1: i32, %arg2: memref<1x8x256xf32, #tpu.memory_space<vmem>>, %arg3: memref<1x8x1xf32, #tpu.memory_space<vmem>>, %arg4: memref<1x1x256xf32, #tpu.memory_space<vmem>>, %arg5: memref<1x1x256xf32, #tpu.memory_space<vmem>>) attributes {dimension_semantics = [#tpu.dimension_semantics<parallel>, #tpu.dimension_semantics<parallel>], iteration_bounds = array<i64: 2, 1>, scalar_prefetch = 0 : i64, scratch_operands = 0 : i64, tpu.core_type = #tpu.core_type<tc>, window_params = [{transform_indices = @transform_0, window_bounds = array<i64: 1, 8, 256>}, {transform_indices = @transform_1, window_bounds = array<i64: 1, 8, 1>}, {transform_indices = @transform_2, window_bounds = array<i64: 1, 1, 256>}, {transform_indices = @transform_3, window_bounds = array<i64: 1, 1, 256>}]} {
    %c0 = arith.constant 0 : index
    %c0_0 = arith.constant 0 : index
    %c0_1 = arith.constant 0 : index
    %0 = vector.load %arg2[%c0, %c0_0, %c0_1] : memref<1x8x256xf32, #tpu.memory_space<vmem>>, vector<1x8x256xf32>
    %1 = vector.shape_cast %0 : vector<1x8x256xf32> to vector<8x256xf32>
    %c0_2 = arith.constant 0 : index
    %c0_3 = arith.constant 0 : index
    %c0_4 = arith.constant 0 : index
    %2 = vector.load %arg3[%c0_2, %c0_3, %c0_4] : memref<1x8x1xf32, #tpu.memory_space<vmem>>, vector<1x8x1xf32>
    %3 = vector.shape_cast %2 : vector<1x8x1xf32> to vector<8x1xf32>
    %4 = vector.broadcast %3 : vector<8x1xf32> to vector<8x256xf32>
    %5 = arith.mulf %1, %4 : vector<8x256xf32>
    %cst = arith.constant dense<0.000000e+00> : vector<256xf32>
    %6 = vector.multi_reduction <add>, %5, %cst [0] : vector<8x256xf32> to vector<256xf32>
    %7 = vector.shape_cast %6 : vector<256xf32> to vector<1x256xf32>
    %cst_5 = arith.constant 1.250000e-01 : f32
    %8 = vector.broadcast %cst_5 : f32 to vector<1x256xf32>
    %9 = arith.mulf %7, %8 : vector<1x256xf32>
    %c0_6 = arith.constant 0 : index
    %c0_7 = arith.constant 0 : index
    %c0_8 = arith.constant 0 : index
    %10 = vector.load %arg4[%c0_6, %c0_7, %c0_8] : memref<1x1x256xf32, #tpu.memory_space<vmem>>, vector<1x1x256xf32>
    %11 = vector.shape_cast %10 : vector<1x1x256xf32> to vector<1x256xf32>
    %12 = vector.shape_cast %9 : vector<1x256xf32> to vector<1x1x256xf32>
    tpu.vector_store %arg4[%c0_6, %c0_7, %c0_8], %12 {strides = array<i32>} : memref<1x1x256xf32, #tpu.memory_space<vmem>>, vector<1x1x256xf32>,
    %cst_9 = arith.constant dense<0xFF800000> : vector<256xf32>
    %13 = vector.multi_reduction <maximumf>, %5, %cst_9 [0] : vector<8x256xf32> to vector<256xf32>
    %14 = vector.shape_cast %13 : vector<256xf32> to vector<1x256xf32>
    %c0_10 = arith.constant 0 : index
    %c0_11 = arith.constant 0 : index
    %c0_12 = arith.constant 0 : index
    %15 = vector.load %arg5[%c0_10, %c0_11, %c0_12] : memref<1x1x256xf32, #tpu.memory_space<vmem>>, vector<1x1x256xf32>
    %16 = vector.shape_cast %15 : vector<1x1x256xf32> to vector<1x256xf32>
    %17 = vector.shape_cast %14 : vector<1x256xf32> to vector<1x1x256xf32>
    tpu.vector_store %arg5[%c0_10, %c0_11, %c0_12], %17 {strides = array<i32>} : memref<1x1x256xf32, #tpu.memory_space<vmem>>, vector<1x1x256xf32>,
    return
  }
  func.func @transform_0(%arg0: i32, %arg1: i32) -> (i32, i32, i32) {
    %c1_i32 = arith.constant 1 : i32
    %c0_i32 = arith.constant 0 : i32
    return %arg0, %c1_i32, %arg1 : i32, i32, i32
  }
  func.func @transform_1(%arg0: i32, %arg1: i32) -> (i32, i32, i32) {
    %c0_i32 = arith.constant 0 : i32
    %c0_i32_0 = arith.constant 0 : i32
    %c0_i32_1 = arith.constant 0 : i32
    return %arg0, %c0_i32, %c0_i32_0 : i32, i32, i32
  }
  func.func @transform_2(%arg0: i32, %arg1: i32) -> (i32, i32, i32) {
    %c0_i32 = arith.constant 0 : i32
    %c0_i32_0 = arith.constant 0 : i32
    return %arg0, %c0_i32, %arg1 : i32, i32, i32
  }
  func.func @transform_3(%arg0: i32, %arg1: i32) -> (i32, i32, i32) {
    %c0_i32 = arith.constant 0 : i32
    %c0_i32_0 = arith.constant 0 : i32
    return %arg0, %c0_i32, %arg1 : i32, i32, i32
  }
}

module attributes {stable_mosaic.version = 11 : i64} {
  func.func @kern(%arg0: i32, %arg1: i32, %arg2: i32, %arg3: memref<4x8xbf16, #tpu.memory_space<vmem>>, %arg4: memref<1x8x256xbf16, #tpu.memory_space<vmem>>, %arg5: memref<1x4x256xf32, #tpu.memory_space<vmem>>, %arg6: memref<4x256xf32, #tpu.memory_space<vmem>>) attributes {dimension_semantics = [#tpu.dimension_semantics<parallel>, #tpu.dimension_semantics<parallel>, #tpu.dimension_semantics<arbitrary>], iteration_bounds = array<i64: 2, 1, 1>, scalar_prefetch = 0 : i64, scratch_operands = 1 : i64, tpu.core_type = #tpu.core_type<tc>, window_params = [{transform_indices = @transform_0, window_bounds = array<i64: 4, 8>}, {transform_indices = @transform_1, window_bounds = array<i64: 1, 8, 256>}, {transform_indices = @transform_2, window_bounds = array<i64: 1, 4, 256>}]} {
    %c0_i32 = arith.constant 0 : i32
    %0 = arith.cmpi eq, %arg2, %c0_i32 : i32
    %1 = arith.extui %0 : i1 to i32
    %c0_i32_0 = arith.constant 0 : i32
    %2 = arith.cmpi ne, %1, %c0_i32_0 : i32
    scf.if %2 {
      %cst_11 = arith.constant 0.000000e+00 : f32
      %13 = vector.broadcast %cst_11 : f32 to vector<4x256xf32>
      %c0_12 = arith.constant 0 : index
      %c0_13 = arith.constant 0 : index
      %14 = vector.load %arg6[%c0_12, %c0_13] : memref<4x256xf32, #tpu.memory_space<vmem>>, vector<4x256xf32>
      tpu.vector_store %arg6[%c0_12, %c0_13], %13 {strides = array<i32>} : memref<4x256xf32, #tpu.memory_space<vmem>>, vector<4x256xf32>,
    } else {
    }
    %c0 = arith.constant 0 : index
    %c0_1 = arith.constant 0 : index
    %3 = vector.load %arg6[%c0, %c0_1] : memref<4x256xf32, #tpu.memory_space<vmem>>, vector<4x256xf32>
    %c0_2 = arith.constant 0 : index
    %c0_3 = arith.constant 0 : index
    %4 = vector.load %arg3[%c0_2, %c0_3] : memref<4x8xbf16, #tpu.memory_space<vmem>>, vector<4x8xbf16>
    %c0_4 = arith.constant 0 : index
    %c0_5 = arith.constant 0 : index
    %c0_6 = arith.constant 0 : index
    %5 = vector.load %arg4[%c0_4, %c0_5, %c0_6] : memref<1x8x256xbf16, #tpu.memory_space<vmem>>, vector<1x8x256xbf16>
    %6 = vector.shape_cast %5 : vector<1x8x256xbf16> to vector<8x256xbf16>
    %cst = arith.constant dense<0.000000e+00> : vector<4x256xf32>
    %7 = tpu.matmul %4, %6, %cst {dimension_numbers = #tpu.dot_dimension_numbers<[1], [0], [0], [1], [0, 0, 1, 1], [], []>} : vector<4x8xbf16>, vector<8x256xbf16>, vector<4x256xf32> -> vector<4x256xf32>
    %8 = arith.addf %3, %7 : vector<4x256xf32>
    %c0_7 = arith.constant 0 : index
    %c0_8 = arith.constant 0 : index
    %9 = vector.load %arg6[%c0_7, %c0_8] : memref<4x256xf32, #tpu.memory_space<vmem>>, vector<4x256xf32>
    tpu.vector_store %arg6[%c0_7, %c0_8], %8 {strides = array<i32>} : memref<4x256xf32, #tpu.memory_space<vmem>>, vector<4x256xf32>,
    %c0_i32_9 = arith.constant 0 : i32
    %10 = arith.cmpi eq, %arg2, %c0_i32_9 : i32
    %11 = arith.extui %10 : i1 to i32
    %c0_i32_10 = arith.constant 0 : i32
    %12 = arith.cmpi ne, %11, %c0_i32_10 : i32
    scf.if %12 {
      %c0_11 = arith.constant 0 : index
      %c0_12 = arith.constant 0 : index
      %13 = vector.load %arg6[%c0_11, %c0_12] : memref<4x256xf32, #tpu.memory_space<vmem>>, vector<4x256xf32>
      %cst_13 = arith.constant 0.000000e+00 : f32
      %14 = vector.broadcast %cst_13 : f32 to vector<4x256xf32>
      %15 = arith.maximumf %13, %14 : vector<4x256xf32>
      %c0_14 = arith.constant 0 : index
      %c0_15 = arith.constant 0 : index
      %c0_16 = arith.constant 0 : index
      %16 = vector.load %arg5[%c0_14, %c0_15, %c0_16] : memref<1x4x256xf32, #tpu.memory_space<vmem>>, vector<1x4x256xf32>
      %17 = vector.shape_cast %16 : vector<1x4x256xf32> to vector<4x256xf32>
      %18 = vector.shape_cast %15 : vector<4x256xf32> to vector<1x4x256xf32>
      tpu.vector_store %arg5[%c0_14, %c0_15, %c0_16], %18 {strides = array<i32>} : memref<1x4x256xf32, #tpu.memory_space<vmem>>, vector<1x4x256xf32>,
    } else {
    }
    return
  }
  func.func @transform_0(%arg0: i32, %arg1: i32, %arg2: i32) -> (i32, i32) {
    %c0_i32 = arith.constant 0 : i32
    %c0_i32_0 = arith.constant 0 : i32
    return %c0_i32, %arg2 : i32, i32
  }
  func.func @transform_1(%arg0: i32, %arg1: i32, %arg2: i32) -> (i32, i32, i32) {
    %c0_i32 = arith.constant 0 : i32
    return %arg0, %arg2, %arg1 : i32, i32, i32
  }
  func.func @transform_2(%arg0: i32, %arg1: i32, %arg2: i32) -> (i32, i32, i32) {
    %c0_i32 = arith.constant 0 : i32
    %c0_i32_0 = arith.constant 0 : i32
    return %arg0, %c0_i32, %arg1 : i32, i32, i32
  }
}

module attributes {stable_mosaic.version = 11 : i64} {
  func.func @kern(%arg0: i32, %arg1: memref<98xf32, #tpu.memory_space<smem>>, %arg2: memref<1x2x22x22xf32, #tpu.memory_space<vmem>>, %arg3: memref<1x1x16x16xf32, #tpu.memory_space<vmem>>) attributes {dimension_semantics = [#tpu.dimension_semantics<parallel>], iteration_bounds = array<i64: 2>, scalar_prefetch = 0 : i64, scratch_operands = 0 : i64, tpu.core_type = #tpu.core_type<tc>, window_params = [{transform_indices = @transform_0, window_bounds = array<i64: 98>}, {transform_indices = @transform_1, window_bounds = array<i64: 1, 2, 22, 22>}, {transform_indices = @transform_2, window_bounds = array<i64: 1, 1, 16, 16>}]} {
    %cst = arith.constant 0.000000e+00 : f32
    %0 = vector.broadcast %cst : f32 to vector<16x16xf32>
    %c0 = arith.constant 0 : index
    %c0_0 = arith.constant 0 : index
    %c0_1 = arith.constant 0 : index
    %c0_2 = arith.constant 0 : index
    %1 = vector.load %arg2[%c0, %c0_0, %c0_1, %c0_2] : memref<1x2x22x22xf32, #tpu.memory_space<vmem>>, vector<1x1x16x16xf32>
    %2 = vector.shape_cast %1 : vector<1x1x16x16xf32> to vector<16x16xf32>
    %c0_3 = arith.constant 0 : index
    %3 = memref.load %arg1[%c0_3] : memref<98xf32, #tpu.memory_space<smem>>
    %4 = vector.broadcast %3 : f32 to vector<16x16xf32>
    %5 = arith.mulf %4, %2 : vector<16x16xf32>
    %6 = arith.addf %0, %5 : vector<16x16xf32>
    %c0_4 = arith.constant 0 : index
    %c0_5 = arith.constant 0 : index
    %c0_6 = arith.constant 0 : index
    %c1 = arith.constant 1 : index
    %7 = vector.load %arg2[%c0_4, %c0_5, %c0_6, %c1] : memref<1x2x22x22xf32, #tpu.memory_space<vmem>>, vector<1x1x16x16xf32>
    %8 = vector.shape_cast %7 : vector<1x1x16x16xf32> to vector<16x16xf32>
    %c1_7 = arith.constant 1 : index
    %9 = memref.load %arg1[%c1_7] : memref<98xf32, #tpu.memory_space<smem>>
    %10 = vector.broadcast %9 : f32 to vector<16x16xf32>
    %11 = arith.mulf %10, %8 : vector<16x16xf32>
    %12 = arith.addf %6, %11 : vector<16x16xf32>
    %c0_8 = arith.constant 0 : index
    %c0_9 = arith.constant 0 : index
    %c0_10 = arith.constant 0 : index
    %c2 = arith.constant 2 : index
    %13 = vector.load %arg2[%c0_8, %c0_9, %c0_10, %c2] : memref<1x2x22x22xf32, #tpu.memory_space<vmem>>, vector<1x1x16x16xf32>
    %14 = vector.shape_cast %13 : vector<1x1x16x16xf32> to vector<16x16xf32>
    %c2_11 = arith.constant 2 : index
    %15 = memref.load %arg1[%c2_11] : memref<98xf32, #tpu.memory_space<smem>>
    %16 = vector.broadcast %15 : f32 to vector<16x16xf32>
    %17 = arith.mulf %16, %14 : vector<16x16xf32>
    %18 = arith.addf %12, %17 : vector<16x16xf32>
    %c0_12 = arith.constant 0 : index
    %c0_13 = arith.constant 0 : index
    %c0_14 = arith.constant 0 : index
    %c3 = arith.constant 3 : index
    %19 = vector.load %arg2[%c0_12, %c0_13, %c0_14, %c3] : memref<1x2x22x22xf32, #tpu.memory_space<vmem>>, vector<1x1x16x16xf32>
    %20 = vector.shape_cast %19 : vector<1x1x16x16xf32> to vector<16x16xf32>
    %c3_15 = arith.constant 3 : index
    %21 = memref.load %arg1[%c3_15] : memref<98xf32, #tpu.memory_space<smem>>
    %22 = vector.broadcast %21 : f32 to vector<16x16xf32>
    %23 = arith.mulf %22, %20 : vector<16x16xf32>
    %24 = arith.addf %18, %23 : vector<16x16xf32>
    %c0_16 = arith.constant 0 : index
    %c0_17 = arith.constant 0 : index
    %c0_18 = arith.constant 0 : index
    %c4 = arith.constant 4 : index
    %25 = vector.load %arg2[%c0_16, %c0_17, %c0_18, %c4] : memref<1x2x22x22xf32, #tpu.memory_space<vmem>>, vector<1x1x16x16xf32>
    %26 = vector.shape_cast %25 : vector<1x1x16x16xf32> to vector<16x16xf32>
    %c4_19 = arith.constant 4 : index
    %27 = memref.load %arg1[%c4_19] : memref<98xf32, #tpu.memory_space<smem>>
    %28 = vector.broadcast %27 : f32 to vector<16x16xf32>
    %29 = arith.mulf %28, %26 : vector<16x16xf32>
    %30 = arith.addf %24, %29 : vector<16x16xf32>
    %c0_20 = arith.constant 0 : index
    %c0_21 = arith.constant 0 : index
    %c0_22 = arith.constant 0 : index
    %c5 = arith.constant 5 : index
    %31 = vector.load %arg2[%c0_20, %c0_21, %c0_22, %c5] : memref<1x2x22x22xf32, #tpu.memory_space<vmem>>, vector<1x1x16x16xf32>
    %32 = vector.shape_cast %31 : vector<1x1x16x16xf32> to vector<16x16xf32>
    %c5_23 = arith.constant 5 : index
    %33 = memref.load %arg1[%c5_23] : memref<98xf32, #tpu.memory_space<smem>>
    %34 = vector.broadcast %33 : f32 to vector<16x16xf32>
    %35 = arith.mulf %34, %32 : vector<16x16xf32>
    %36 = arith.addf %30, %35 : vector<16x16xf32>
    %c0_24 = arith.constant 0 : index
    %c0_25 = arith.constant 0 : index
    %c0_26 = arith.constant 0 : index
    %c6 = arith.constant 6 : index
    %37 = vector.load %arg2[%c0_24, %c0_25, %c0_26, %c6] : memref<1x2x22x22xf32, #tpu.memory_space<vmem>>, vector<1x1x16x16xf32>
    %38 = vector.shape_cast %37 : vector<1x1x16x16xf32> to vector<16x16xf32>
    %c6_27 = arith.constant 6 : index
    %39 = memref.load %arg1[%c6_27] : memref<98xf32, #tpu.memory_space<smem>>
    %40 = vector.broadcast %39 : f32 to vector<16x16xf32>
    %41 = arith.mulf %40, %38 : vector<16x16xf32>
    %42 = arith.addf %36, %41 : vector<16x16xf32>
    %c0_28 = arith.constant 0 : index
    %c0_29 = arith.constant 0 : index
    %c1_30 = arith.constant 1 : index
    %c0_31 = arith.constant 0 : index
    %43 = vector.load %arg2[%c0_28, %c0_29, %c1_30, %c0_31] : memref<1x2x22x22xf32, #tpu.memory_space<vmem>>, vector<1x1x16x16xf32>
    %44 = vector.shape_cast %43 : vector<1x1x16x16xf32> to vector<16x16xf32>
    %c7 = arith.constant 7 : index
    %45 = memref.load %arg1[%c7] : memref<98xf32, #tpu.memory_space<smem>>
    %46 = vector.broadcast %45 : f32 to vector<16x16xf32>
    %47 = arith.mulf %46, %44 : vector<16x16xf32>
    %48 = arith.addf %42, %47 : vector<16x16xf32>
    %c0_32 = arith.constant 0 : index
    %c0_33 = arith.constant 0 : index
    %c1_34 = arith.constant 1 : index
    %c1_35 = arith.constant 1 : index
    %49 = vector.load %arg2[%c0_32, %c0_33, %c1_34, %c1_35] : memref<1x2x22x22xf32, #tpu.memory_space<vmem>>, vector<1x1x16x16xf32>
    %50 = vector.shape_cast %49 : vector<1x1x16x16xf32> to vector<16x16xf32>
    %c8 = arith.constant 8 : index
    %51 = memref.load %arg1[%c8] : memref<98xf32, #tpu.memory_space<smem>>
    %52 = vector.broadcast %51 : f32 to vector<16x16xf32>
    %53 = arith.mulf %52, %50 : vector<16x16xf32>
    %54 = arith.addf %48, %53 : vector<16x16xf32>
    %c0_36 = arith.constant 0 : index
    %c0_37 = arith.constant 0 : index
    %c1_38 = arith.constant 1 : index
    %c2_39 = arith.constant 2 : index
    %55 = vector.load %arg2[%c0_36, %c0_37, %c1_38, %c2_39] : memref<1x2x22x22xf32, #tpu.memory_space<vmem>>, vector<1x1x16x16xf32>
    %56 = vector.shape_cast %55 : vector<1x1x16x16xf32> to vector<16x16xf32>
    %c9 = arith.constant 9 : index
    %57 = memref.load %arg1[%c9] : memref<98xf32, #tpu.memory_space<smem>>
    %58 = vector.broadcast %57 : f32 to vector<16x16xf32>
    %59 = arith.mulf %58, %56 : vector<16x16xf32>
    %60 = arith.addf %54, %59 : vector<16x16xf32>
    %c0_40 = arith.constant 0 : index
    %c0_41 = arith.constant 0 : index
    %c1_42 = arith.constant 1 : index
    %c3_43 = arith.constant 3 : index
    %61 = vector.load %arg2[%c0_40, %c0_41, %c1_42, %c3_43] : memref<1x2x22x22xf32, #tpu.memory_space<vmem>>, vector<1x1x16x16xf32>
    %62 = vector.shape_cast %61 : vector<1x1x16x16xf32> to vector<16x16xf32>
    %c10 = arith.constant 10 : index
    %63 = memref.load %arg1[%c10] : memref<98xf32, #tpu.memory_space<smem>>
    %64 = vector.broadcast %63 : f32 to vector<16x16xf32>
    %65 = arith.mulf %64, %62 : vector<16x16xf32>
    %66 = arith.addf %60, %65 : vector<16x16xf32>
    %c0_44 = arith.constant 0 : index
    %c0_45 = arith.constant 0 : index
    %c1_46 = arith.constant 1 : index
    %c4_47 = arith.constant 4 : index
    %67 = vector.load %arg2[%c0_44, %c0_45, %c1_46, %c4_47] : memref<1x2x22x22xf32, #tpu.memory_space<vmem>>, vector<1x1x16x16xf32>
    %68 = vector.shape_cast %67 : vector<1x1x16x16xf32> to vector<16x16xf32>
    %c11 = arith.constant 11 : index
    %69 = memref.load %arg1[%c11] : memref<98xf32, #tpu.memory_space<smem>>
    %70 = vector.broadcast %69 : f32 to vector<16x16xf32>
    %71 = arith.mulf %70, %68 : vector<16x16xf32>
    %72 = arith.addf %66, %71 : vector<16x16xf32>
    %c0_48 = arith.constant 0 : index
    %c0_49 = arith.constant 0 : index
    %c1_50 = arith.constant 1 : index
    %c5_51 = arith.constant 5 : index
    %73 = vector.load %arg2[%c0_48, %c0_49, %c1_50, %c5_51] : memref<1x2x22x22xf32, #tpu.memory_space<vmem>>, vector<1x1x16x16xf32>
    %74 = vector.shape_cast %73 : vector<1x1x16x16xf32> to vector<16x16xf32>
    %c12 = arith.constant 12 : index
    %75 = memref.load %arg1[%c12] : memref<98xf32, #tpu.memory_space<smem>>
    %76 = vector.broadcast %75 : f32 to vector<16x16xf32>
    %77 = arith.mulf %76, %74 : vector<16x16xf32>
    %78 = arith.addf %72, %77 : vector<16x16xf32>
    %c0_52 = arith.constant 0 : index
    %c0_53 = arith.constant 0 : index
    %c1_54 = arith.constant 1 : index
    %c6_55 = arith.constant 6 : index
    %79 = vector.load %arg2[%c0_52, %c0_53, %c1_54, %c6_55] : memref<1x2x22x22xf32, #tpu.memory_space<vmem>>, vector<1x1x16x16xf32>
    %80 = vector.shape_cast %79 : vector<1x1x16x16xf32> to vector<16x16xf32>
    %c13 = arith.constant 13 : index
    %81 = memref.load %arg1[%c13] : memref<98xf32, #tpu.memory_space<smem>>
    %82 = vector.broadcast %81 : f32 to vector<16x16xf32>
    %83 = arith.mulf %82, %80 : vector<16x16xf32>
    %84 = arith.addf %78, %83 : vector<16x16xf32>
    %c0_56 = arith.constant 0 : index
    %c0_57 = arith.constant 0 : index
    %c2_58 = arith.constant 2 : index
    %c0_59 = arith.constant 0 : index
    %85 = vector.load %arg2[%c0_56, %c0_57, %c2_58, %c0_59] : memref<1x2x22x22xf32, #tpu.memory_space<vmem>>, vector<1x1x16x16xf32>
    %86 = vector.shape_cast %85 : vector<1x1x16x16xf32> to vector<16x16xf32>
    %c14 = arith.constant 14 : index
    %87 = memref.load %arg1[%c14] : memref<98xf32, #tpu.memory_space<smem>>
    %88 = vector.broadcast %87 : f32 to vector<16x16xf32>
    %89 = arith.mulf %88, %86 : vector<16x16xf32>
    %90 = arith.addf %84, %89 : vector<16x16xf32>
    %c0_60 = arith.constant 0 : index
    %c0_61 = arith.constant 0 : index
    %c2_62 = arith.constant 2 : index
    %c1_63 = arith.constant 1 : index
    %91 = vector.load %arg2[%c0_60, %c0_61, %c2_62, %c1_63] : memref<1x2x22x22xf32, #tpu.memory_space<vmem>>, vector<1x1x16x16xf32>
    %92 = vector.shape_cast %91 : vector<1x1x16x16xf32> to vector<16x16xf32>
    %c15 = arith.constant 15 : index
    %93 = memref.load %arg1[%c15] : memref<98xf32, #tpu.memory_space<smem>>
    %94 = vector.broadcast %93 : f32 to vector<16x16xf32>
    %95 = arith.mulf %94, %92 : vector<16x16xf32>
    %96 = arith.addf %90, %95 : vector<16x16xf32>
    %c0_64 = arith.constant 0 : index
    %c0_65 = arith.constant 0 : index
    %c2_66 = arith.constant 2 : index
    %c2_67 = arith.constant 2 : index
    %97 = vector.load %arg2[%c0_64, %c0_65, %c2_66, %c2_67] : memref<1x2x22x22xf32, #tpu.memory_space<vmem>>, vector<1x1x16x16xf32>
    %98 = vector.shape_cast %97 : vector<1x1x16x16xf32> to vector<16x16xf32>
    %c16 = arith.constant 16 : index
    %99 = memref.load %arg1[%c16] : memref<98xf32, #tpu.memory_space<smem>>
    %100 = vector.broadcast %99 : f32 to vector<16x16xf32>
    %101 = arith.mulf %100, %98 : vector<16x16xf32>
    %102 = arith.addf %96, %101 : vector<16x16xf32>
    %c0_68 = arith.constant 0 : index
    %c0_69 = arith.constant 0 : index
    %c2_70 = arith.constant 2 : index
    %c3_71 = arith.constant 3 : index
    %103 = vector.load %arg2[%c0_68, %c0_69, %c2_70, %c3_71] : memref<1x2x22x22xf32, #tpu.memory_space<vmem>>, vector<1x1x16x16xf32>
    %104 = vector.shape_cast %103 : vector<1x1x16x16xf32> to vector<16x16xf32>
    %c17 = arith.constant 17 : index
    %105 = memref.load %arg1[%c17] : memref<98xf32, #tpu.memory_space<smem>>
    %106 = vector.broadcast %105 : f32 to vector<16x16xf32>
    %107 = arith.mulf %106, %104 : vector<16x16xf32>
    %108 = arith.addf %102, %107 : vector<16x16xf32>
    %c0_72 = arith.constant 0 : index
    %c0_73 = arith.constant 0 : index
    %c2_74 = arith.constant 2 : index
    %c4_75 = arith.constant 4 : index
    %109 = vector.load %arg2[%c0_72, %c0_73, %c2_74, %c4_75] : memref<1x2x22x22xf32, #tpu.memory_space<vmem>>, vector<1x1x16x16xf32>
    %110 = vector.shape_cast %109 : vector<1x1x16x16xf32> to vector<16x16xf32>
    %c18 = arith.constant 18 : index
    %111 = memref.load %arg1[%c18] : memref<98xf32, #tpu.memory_space<smem>>
    %112 = vector.broadcast %111 : f32 to vector<16x16xf32>
    %113 = arith.mulf %112, %110 : vector<16x16xf32>
    %114 = arith.addf %108, %113 : vector<16x16xf32>
    %c0_76 = arith.constant 0 : index
    %c0_77 = arith.constant 0 : index
    %c2_78 = arith.constant 2 : index
    %c5_79 = arith.constant 5 : index
    %115 = vector.load %arg2[%c0_76, %c0_77, %c2_78, %c5_79] : memref<1x2x22x22xf32, #tpu.memory_space<vmem>>, vector<1x1x16x16xf32>
    %116 = vector.shape_cast %115 : vector<1x1x16x16xf32> to vector<16x16xf32>
    %c19 = arith.constant 19 : index
    %117 = memref.load %arg1[%c19] : memref<98xf32, #tpu.memory_space<smem>>
    %118 = vector.broadcast %117 : f32 to vector<16x16xf32>
    %119 = arith.mulf %118, %116 : vector<16x16xf32>
    %120 = arith.addf %114, %119 : vector<16x16xf32>
    %c0_80 = arith.constant 0 : index
    %c0_81 = arith.constant 0 : index
    %c2_82 = arith.constant 2 : index
    %c6_83 = arith.constant 6 : index
    %121 = vector.load %arg2[%c0_80, %c0_81, %c2_82, %c6_83] : memref<1x2x22x22xf32, #tpu.memory_space<vmem>>, vector<1x1x16x16xf32>
    %122 = vector.shape_cast %121 : vector<1x1x16x16xf32> to vector<16x16xf32>
    %c20 = arith.constant 20 : index
    %123 = memref.load %arg1[%c20] : memref<98xf32, #tpu.memory_space<smem>>
    %124 = vector.broadcast %123 : f32 to vector<16x16xf32>
    %125 = arith.mulf %124, %122 : vector<16x16xf32>
    %126 = arith.addf %120, %125 : vector<16x16xf32>
    %c0_84 = arith.constant 0 : index
    %c0_85 = arith.constant 0 : index
    %c3_86 = arith.constant 3 : index
    %c0_87 = arith.constant 0 : index
    %127 = vector.load %arg2[%c0_84, %c0_85, %c3_86, %c0_87] : memref<1x2x22x22xf32, #tpu.memory_space<vmem>>, vector<1x1x16x16xf32>
    %128 = vector.shape_cast %127 : vector<1x1x16x16xf32> to vector<16x16xf32>
    %c21 = arith.constant 21 : index
    %129 = memref.load %arg1[%c21] : memref<98xf32, #tpu.memory_space<smem>>
    %130 = vector.broadcast %129 : f32 to vector<16x16xf32>
    %131 = arith.mulf %130, %128 : vector<16x16xf32>
    %132 = arith.addf %126, %131 : vector<16x16xf32>
    %c0_88 = arith.constant 0 : index
    %c0_89 = arith.constant 0 : index
    %c3_90 = arith.constant 3 : index
    %c1_91 = arith.constant 1 : index
    %133 = vector.load %arg2[%c0_88, %c0_89, %c3_90, %c1_91] : memref<1x2x22x22xf32, #tpu.memory_space<vmem>>, vector<1x1x16x16xf32>
    %134 = vector.shape_cast %133 : vector<1x1x16x16xf32> to vector<16x16xf32>
    %c22 = arith.constant 22 : index
    %135 = memref.load %arg1[%c22] : memref<98xf32, #tpu.memory_space<smem>>
    %136 = vector.broadcast %135 : f32 to vector<16x16xf32>
    %137 = arith.mulf %136, %134 : vector<16x16xf32>
    %138 = arith.addf %132, %137 : vector<16x16xf32>
    %c0_92 = arith.constant 0 : index
    %c0_93 = arith.constant 0 : index
    %c3_94 = arith.constant 3 : index
    %c2_95 = arith.constant 2 : index
    %139 = vector.load %arg2[%c0_92, %c0_93, %c3_94, %c2_95] : memref<1x2x22x22xf32, #tpu.memory_space<vmem>>, vector<1x1x16x16xf32>
    %140 = vector.shape_cast %139 : vector<1x1x16x16xf32> to vector<16x16xf32>
    %c23 = arith.constant 23 : index
    %141 = memref.load %arg1[%c23] : memref<98xf32, #tpu.memory_space<smem>>
    %142 = vector.broadcast %141 : f32 to vector<16x16xf32>
    %143 = arith.mulf %142, %140 : vector<16x16xf32>
    %144 = arith.addf %138, %143 : vector<16x16xf32>
    %c0_96 = arith.constant 0 : index
    %c0_97 = arith.constant 0 : index
    %c3_98 = arith.constant 3 : index
    %c3_99 = arith.constant 3 : index
    %145 = vector.load %arg2[%c0_96, %c0_97, %c3_98, %c3_99] : memref<1x2x22x22xf32, #tpu.memory_space<vmem>>, vector<1x1x16x16xf32>
    %146 = vector.shape_cast %145 : vector<1x1x16x16xf32> to vector<16x16xf32>
    %c24 = arith.constant 24 : index
    %147 = memref.load %arg1[%c24] : memref<98xf32, #tpu.memory_space<smem>>
    %148 = vector.broadcast %147 : f32 to vector<16x16xf32>
    %149 = arith.mulf %148, %146 : vector<16x16xf32>
    %150 = arith.addf %144, %149 : vector<16x16xf32>
    %c0_100 = arith.constant 0 : index
    %c0_101 = arith.constant 0 : index
    %c3_102 = arith.constant 3 : index
    %c4_103 = arith.constant 4 : index
    %151 = vector.load %arg2[%c0_100, %c0_101, %c3_102, %c4_103] : memref<1x2x22x22xf32, #tpu.memory_space<vmem>>, vector<1x1x16x16xf32>
    %152 = vector.shape_cast %151 : vector<1x1x16x16xf32> to vector<16x16xf32>
    %c25 = arith.constant 25 : index
    %153 = memref.load %arg1[%c25] : memref<98xf32, #tpu.memory_space<smem>>
    %154 = vector.broadcast %153 : f32 to vector<16x16xf32>
    %155 = arith.mulf %154, %152 : vector<16x16xf32>
    %156 = arith.addf %150, %155 : vector<16x16xf32>
    %c0_104 = arith.constant 0 : index
    %c0_105 = arith.constant 0 : index
    %c3_106 = arith.constant 3 : index
    %c5_107 = arith.constant 5 : index
    %157 = vector.load %arg2[%c0_104, %c0_105, %c3_106, %c5_107] : memref<1x2x22x22xf32, #tpu.memory_space<vmem>>, vector<1x1x16x16xf32>
    %158 = vector.shape_cast %157 : vector<1x1x16x16xf32> to vector<16x16xf32>
    %c26 = arith.constant 26 : index
    %159 = memref.load %arg1[%c26] : memref<98xf32, #tpu.memory_space<smem>>
    %160 = vector.broadcast %159 : f32 to vector<16x16xf32>
    %161 = arith.mulf %160, %158 : vector<16x16xf32>
    %162 = arith.addf %156, %161 : vector<16x16xf32>
    %c0_108 = arith.constant 0 : index
    %c0_109 = arith.constant 0 : index
    %c3_110 = arith.constant 3 : index
    %c6_111 = arith.constant 6 : index
    %163 = vector.load %arg2[%c0_108, %c0_109, %c3_110, %c6_111] : memref<1x2x22x22xf32, #tpu.memory_space<vmem>>, vector<1x1x16x16xf32>
    %164 = vector.shape_cast %163 : vector<1x1x16x16xf32> to vector<16x16xf32>
    %c27 = arith.constant 27 : index
    %165 = memref.load %arg1[%c27] : memref<98xf32, #tpu.memory_space<smem>>
    %166 = vector.broadcast %165 : f32 to vector<16x16xf32>
    %167 = arith.mulf %166, %164 : vector<16x16xf32>
    %168 = arith.addf %162, %167 : vector<16x16xf32>
    %c0_112 = arith.constant 0 : index
    %c0_113 = arith.constant 0 : index
    %c4_114 = arith.constant 4 : index
    %c0_115 = arith.constant 0 : index
    %169 = vector.load %arg2[%c0_112, %c0_113, %c4_114, %c0_115] : memref<1x2x22x22xf32, #tpu.memory_space<vmem>>, vector<1x1x16x16xf32>
    %170 = vector.shape_cast %169 : vector<1x1x16x16xf32> to vector<16x16xf32>
    %c28 = arith.constant 28 : index
    %171 = memref.load %arg1[%c28] : memref<98xf32, #tpu.memory_space<smem>>
    %172 = vector.broadcast %171 : f32 to vector<16x16xf32>
    %173 = arith.mulf %172, %170 : vector<16x16xf32>
    %174 = arith.addf %168, %173 : vector<16x16xf32>
    %c0_116 = arith.constant 0 : index
    %c0_117 = arith.constant 0 : index
    %c4_118 = arith.constant 4 : index
    %c1_119 = arith.constant 1 : index
    %175 = vector.load %arg2[%c0_116, %c0_117, %c4_118, %c1_119] : memref<1x2x22x22xf32, #tpu.memory_space<vmem>>, vector<1x1x16x16xf32>
    %176 = vector.shape_cast %175 : vector<1x1x16x16xf32> to vector<16x16xf32>
    %c29 = arith.constant 29 : index
    %177 = memref.load %arg1[%c29] : memref<98xf32, #tpu.memory_space<smem>>
    %178 = vector.broadcast %177 : f32 to vector<16x16xf32>
    %179 = arith.mulf %178, %176 : vector<16x16xf32>
    %180 = arith.addf %174, %179 : vector<16x16xf32>
    %c0_120 = arith.constant 0 : index
    %c0_121 = arith.constant 0 : index
    %c4_122 = arith.constant 4 : index
    %c2_123 = arith.constant 2 : index
    %181 = vector.load %arg2[%c0_120, %c0_121, %c4_122, %c2_123] : memref<1x2x22x22xf32, #tpu.memory_space<vmem>>, vector<1x1x16x16xf32>
    %182 = vector.shape_cast %181 : vector<1x1x16x16xf32> to vector<16x16xf32>
    %c30 = arith.constant 30 : index
    %183 = memref.load %arg1[%c30] : memref<98xf32, #tpu.memory_space<smem>>
    %184 = vector.broadcast %183 : f32 to vector<16x16xf32>
    %185 = arith.mulf %184, %182 : vector<16x16xf32>
    %186 = arith.addf %180, %185 : vector<16x16xf32>
    %c0_124 = arith.constant 0 : index
    %c0_125 = arith.constant 0 : index
    %c4_126 = arith.constant 4 : index
    %c3_127 = arith.constant 3 : index
    %187 = vector.load %arg2[%c0_124, %c0_125, %c4_126, %c3_127] : memref<1x2x22x22xf32, #tpu.memory_space<vmem>>, vector<1x1x16x16xf32>
    %188 = vector.shape_cast %187 : vector<1x1x16x16xf32> to vector<16x16xf32>
    %c31 = arith.constant 31 : index
    %189 = memref.load %arg1[%c31] : memref<98xf32, #tpu.memory_space<smem>>
    %190 = vector.broadcast %189 : f32 to vector<16x16xf32>
    %191 = arith.mulf %190, %188 : vector<16x16xf32>
    %192 = arith.addf %186, %191 : vector<16x16xf32>
    %c0_128 = arith.constant 0 : index
    %c0_129 = arith.constant 0 : index
    %c4_130 = arith.constant 4 : index
    %c4_131 = arith.constant 4 : index
    %193 = vector.load %arg2[%c0_128, %c0_129, %c4_130, %c4_131] : memref<1x2x22x22xf32, #tpu.memory_space<vmem>>, vector<1x1x16x16xf32>
    %194 = vector.shape_cast %193 : vector<1x1x16x16xf32> to vector<16x16xf32>
    %c32 = arith.constant 32 : index
    %195 = memref.load %arg1[%c32] : memref<98xf32, #tpu.memory_space<smem>>
    %196 = vector.broadcast %195 : f32 to vector<16x16xf32>
    %197 = arith.mulf %196, %194 : vector<16x16xf32>
    %198 = arith.addf %192, %197 : vector<16x16xf32>
    %c0_132 = arith.constant 0 : index
    %c0_133 = arith.constant 0 : index
    %c4_134 = arith.constant 4 : index
    %c5_135 = arith.constant 5 : index
    %199 = vector.load %arg2[%c0_132, %c0_133, %c4_134, %c5_135] : memref<1x2x22x22xf32, #tpu.memory_space<vmem>>, vector<1x1x16x16xf32>
    %200 = vector.shape_cast %199 : vector<1x1x16x16xf32> to vector<16x16xf32>
    %c33 = arith.constant 33 : index
    %201 = memref.load %arg1[%c33] : memref<98xf32, #tpu.memory_space<smem>>
    %202 = vector.broadcast %201 : f32 to vector<16x16xf32>
    %203 = arith.mulf %202, %200 : vector<16x16xf32>
    %204 = arith.addf %198, %203 : vector<16x16xf32>
    %c0_136 = arith.constant 0 : index
    %c0_137 = arith.constant 0 : index
    %c4_138 = arith.constant 4 : index
    %c6_139 = arith.constant 6 : index
    %205 = vector.load %arg2[%c0_136, %c0_137, %c4_138, %c6_139] : memref<1x2x22x22xf32, #tpu.memory_space<vmem>>, vector<1x1x16x16xf32>
    %206 = vector.shape_cast %205 : vector<1x1x16x16xf32> to vector<16x16xf32>
    %c34 = arith.constant 34 : index
    %207 = memref.load %arg1[%c34] : memref<98xf32, #tpu.memory_space<smem>>
    %208 = vector.broadcast %207 : f32 to vector<16x16xf32>
    %209 = arith.mulf %208, %206 : vector<16x16xf32>
    %210 = arith.addf %204, %209 : vector<16x16xf32>
    %c0_140 = arith.constant 0 : index
    %c0_141 = arith.constant 0 : index
    %c5_142 = arith.constant 5 : index
    %c0_143 = arith.constant 0 : index
    %211 = vector.load %arg2[%c0_140, %c0_141, %c5_142, %c0_143] : memref<1x2x22x22xf32, #tpu.memory_space<vmem>>, vector<1x1x16x16xf32>
    %212 = vector.shape_cast %211 : vector<1x1x16x16xf32> to vector<16x16xf32>
    %c35 = arith.constant 35 : index
    %213 = memref.load %arg1[%c35] : memref<98xf32, #tpu.memory_space<smem>>
    %214 = vector.broadcast %213 : f32 to vector<16x16xf32>
    %215 = arith.mulf %214, %212 : vector<16x16xf32>
    %216 = arith.addf %210, %215 : vector<16x16xf32>
    %c0_144 = arith.constant 0 : index
    %c0_145 = arith.constant 0 : index
    %c5_146 = arith.constant 5 : index
    %c1_147 = arith.constant 1 : index
    %217 = vector.load %arg2[%c0_144, %c0_145, %c5_146, %c1_147] : memref<1x2x22x22xf32, #tpu.memory_space<vmem>>, vector<1x1x16x16xf32>
    %218 = vector.shape_cast %217 : vector<1x1x16x16xf32> to vector<16x16xf32>
    %c36 = arith.constant 36 : index
    %219 = memref.load %arg1[%c36] : memref<98xf32, #tpu.memory_space<smem>>
    %220 = vector.broadcast %219 : f32 to vector<16x16xf32>
    %221 = arith.mulf %220, %218 : vector<16x16xf32>
    %222 = arith.addf %216, %221 : vector<16x16xf32>
    %c0_148 = arith.constant 0 : index
    %c0_149 = arith.constant 0 : index
    %c5_150 = arith.constant 5 : index
    %c2_151 = arith.constant 2 : index
    %223 = vector.load %arg2[%c0_148, %c0_149, %c5_150, %c2_151] : memref<1x2x22x22xf32, #tpu.memory_space<vmem>>, vector<1x1x16x16xf32>
    %224 = vector.shape_cast %223 : vector<1x1x16x16xf32> to vector<16x16xf32>
    %c37 = arith.constant 37 : index
    %225 = memref.load %arg1[%c37] : memref<98xf32, #tpu.memory_space<smem>>
    %226 = vector.broadcast %225 : f32 to vector<16x16xf32>
    %227 = arith.mulf %226, %224 : vector<16x16xf32>
    %228 = arith.addf %222, %227 : vector<16x16xf32>
    %c0_152 = arith.constant 0 : index
    %c0_153 = arith.constant 0 : index
    %c5_154 = arith.constant 5 : index
    %c3_155 = arith.constant 3 : index
    %229 = vector.load %arg2[%c0_152, %c0_153, %c5_154, %c3_155] : memref<1x2x22x22xf32, #tpu.memory_space<vmem>>, vector<1x1x16x16xf32>
    %230 = vector.shape_cast %229 : vector<1x1x16x16xf32> to vector<16x16xf32>
    %c38 = arith.constant 38 : index
    %231 = memref.load %arg1[%c38] : memref<98xf32, #tpu.memory_space<smem>>
    %232 = vector.broadcast %231 : f32 to vector<16x16xf32>
    %233 = arith.mulf %232, %230 : vector<16x16xf32>
    %234 = arith.addf %228, %233 : vector<16x16xf32>
    %c0_156 = arith.constant 0 : index
    %c0_157 = arith.constant 0 : index
    %c5_158 = arith.constant 5 : index
    %c4_159 = arith.constant 4 : index
    %235 = vector.load %arg2[%c0_156, %c0_157, %c5_158, %c4_159] : memref<1x2x22x22xf32, #tpu.memory_space<vmem>>, vector<1x1x16x16xf32>
    %236 = vector.shape_cast %235 : vector<1x1x16x16xf32> to vector<16x16xf32>
    %c39 = arith.constant 39 : index
    %237 = memref.load %arg1[%c39] : memref<98xf32, #tpu.memory_space<smem>>
    %238 = vector.broadcast %237 : f32 to vector<16x16xf32>
    %239 = arith.mulf %238, %236 : vector<16x16xf32>
    %240 = arith.addf %234, %239 : vector<16x16xf32>
    %c0_160 = arith.constant 0 : index
    %c0_161 = arith.constant 0 : index
    %c5_162 = arith.constant 5 : index
    %c5_163 = arith.constant 5 : index
    %241 = vector.load %arg2[%c0_160, %c0_161, %c5_162, %c5_163] : memref<1x2x22x22xf32, #tpu.memory_space<vmem>>, vector<1x1x16x16xf32>
    %242 = vector.shape_cast %241 : vector<1x1x16x16xf32> to vector<16x16xf32>
    %c40 = arith.constant 40 : index
    %243 = memref.load %arg1[%c40] : memref<98xf32, #tpu.memory_space<smem>>
    %244 = vector.broadcast %243 : f32 to vector<16x16xf32>
    %245 = arith.mulf %244, %242 : vector<16x16xf32>
    %246 = arith.addf %240, %245 : vector<16x16xf32>
    %c0_164 = arith.constant 0 : index
    %c0_165 = arith.constant 0 : index
    %c5_166 = arith.constant 5 : index
    %c6_167 = arith.constant 6 : index
    %247 = vector.load %arg2[%c0_164, %c0_165, %c5_166, %c6_167] : memref<1x2x22x22xf32, #tpu.memory_space<vmem>>, vector<1x1x16x16xf32>
    %248 = vector.shape_cast %247 : vector<1x1x16x16xf32> to vector<16x16xf32>
    %c41 = arith.constant 41 : index
    %249 = memref.load %arg1[%c41] : memref<98xf32, #tpu.memory_space<smem>>
    %250 = vector.broadcast %249 : f32 to vector<16x16xf32>
    %251 = arith.mulf %250, %248 : vector<16x16xf32>
    %252 = arith.addf %246, %251 : vector<16x16xf32>
    %c0_168 = arith.constant 0 : index
    %c0_169 = arith.constant 0 : index
    %c6_170 = arith.constant 6 : index
    %c0_171 = arith.constant 0 : index
    %253 = vector.load %arg2[%c0_168, %c0_169, %c6_170, %c0_171] : memref<1x2x22x22xf32, #tpu.memory_space<vmem>>, vector<1x1x16x16xf32>
    %254 = vector.shape_cast %253 : vector<1x1x16x16xf32> to vector<16x16xf32>
    %c42 = arith.constant 42 : index
    %255 = memref.load %arg1[%c42] : memref<98xf32, #tpu.memory_space<smem>>
    %256 = vector.broadcast %255 : f32 to vector<16x16xf32>
    %257 = arith.mulf %256, %254 : vector<16x16xf32>
    %258 = arith.addf %252, %257 : vector<16x16xf32>
    %c0_172 = arith.constant 0 : index
    %c0_173 = arith.constant 0 : index
    %c6_174 = arith.constant 6 : index
    %c1_175 = arith.constant 1 : index
    %259 = vector.load %arg2[%c0_172, %c0_173, %c6_174, %c1_175] : memref<1x2x22x22xf32, #tpu.memory_space<vmem>>, vector<1x1x16x16xf32>
    %260 = vector.shape_cast %259 : vector<1x1x16x16xf32> to vector<16x16xf32>
    %c43 = arith.constant 43 : index
    %261 = memref.load %arg1[%c43] : memref<98xf32, #tpu.memory_space<smem>>
    %262 = vector.broadcast %261 : f32 to vector<16x16xf32>
    %263 = arith.mulf %262, %260 : vector<16x16xf32>
    %264 = arith.addf %258, %263 : vector<16x16xf32>
    %c0_176 = arith.constant 0 : index
    %c0_177 = arith.constant 0 : index
    %c6_178 = arith.constant 6 : index
    %c2_179 = arith.constant 2 : index
    %265 = vector.load %arg2[%c0_176, %c0_177, %c6_178, %c2_179] : memref<1x2x22x22xf32, #tpu.memory_space<vmem>>, vector<1x1x16x16xf32>
    %266 = vector.shape_cast %265 : vector<1x1x16x16xf32> to vector<16x16xf32>
    %c44 = arith.constant 44 : index
    %267 = memref.load %arg1[%c44] : memref<98xf32, #tpu.memory_space<smem>>
    %268 = vector.broadcast %267 : f32 to vector<16x16xf32>
    %269 = arith.mulf %268, %266 : vector<16x16xf32>
    %270 = arith.addf %264, %269 : vector<16x16xf32>
    %c0_180 = arith.constant 0 : index
    %c0_181 = arith.constant 0 : index
    %c6_182 = arith.constant 6 : index
    %c3_183 = arith.constant 3 : index
    %271 = vector.load %arg2[%c0_180, %c0_181, %c6_182, %c3_183] : memref<1x2x22x22xf32, #tpu.memory_space<vmem>>, vector<1x1x16x16xf32>
    %272 = vector.shape_cast %271 : vector<1x1x16x16xf32> to vector<16x16xf32>
    %c45 = arith.constant 45 : index
    %273 = memref.load %arg1[%c45] : memref<98xf32, #tpu.memory_space<smem>>
    %274 = vector.broadcast %273 : f32 to vector<16x16xf32>
    %275 = arith.mulf %274, %272 : vector<16x16xf32>
    %276 = arith.addf %270, %275 : vector<16x16xf32>
    %c0_184 = arith.constant 0 : index
    %c0_185 = arith.constant 0 : index
    %c6_186 = arith.constant 6 : index
    %c4_187 = arith.constant 4 : index
    %277 = vector.load %arg2[%c0_184, %c0_185, %c6_186, %c4_187] : memref<1x2x22x22xf32, #tpu.memory_space<vmem>>, vector<1x1x16x16xf32>
    %278 = vector.shape_cast %277 : vector<1x1x16x16xf32> to vector<16x16xf32>
    %c46 = arith.constant 46 : index
    %279 = memref.load %arg1[%c46] : memref<98xf32, #tpu.memory_space<smem>>
    %280 = vector.broadcast %279 : f32 to vector<16x16xf32>
    %281 = arith.mulf %280, %278 : vector<16x16xf32>
    %282 = arith.addf %276, %281 : vector<16x16xf32>
    %c0_188 = arith.constant 0 : index
    %c0_189 = arith.constant 0 : index
    %c6_190 = arith.constant 6 : index
    %c5_191 = arith.constant 5 : index
    %283 = vector.load %arg2[%c0_188, %c0_189, %c6_190, %c5_191] : memref<1x2x22x22xf32, #tpu.memory_space<vmem>>, vector<1x1x16x16xf32>
    %284 = vector.shape_cast %283 : vector<1x1x16x16xf32> to vector<16x16xf32>
    %c47 = arith.constant 47 : index
    %285 = memref.load %arg1[%c47] : memref<98xf32, #tpu.memory_space<smem>>
    %286 = vector.broadcast %285 : f32 to vector<16x16xf32>
    %287 = arith.mulf %286, %284 : vector<16x16xf32>
    %288 = arith.addf %282, %287 : vector<16x16xf32>
    %c0_192 = arith.constant 0 : index
    %c0_193 = arith.constant 0 : index
    %c6_194 = arith.constant 6 : index
    %c6_195 = arith.constant 6 : index
    %289 = vector.load %arg2[%c0_192, %c0_193, %c6_194, %c6_195] : memref<1x2x22x22xf32, #tpu.memory_space<vmem>>, vector<1x1x16x16xf32>
    %290 = vector.shape_cast %289 : vector<1x1x16x16xf32> to vector<16x16xf32>
    %c48 = arith.constant 48 : index
    %291 = memref.load %arg1[%c48] : memref<98xf32, #tpu.memory_space<smem>>
    %292 = vector.broadcast %291 : f32 to vector<16x16xf32>
    %293 = arith.mulf %292, %290 : vector<16x16xf32>
    %294 = arith.addf %288, %293 : vector<16x16xf32>
    %c0_196 = arith.constant 0 : index
    %c1_197 = arith.constant 1 : index
    %c0_198 = arith.constant 0 : index
    %c0_199 = arith.constant 0 : index
    %295 = vector.load %arg2[%c0_196, %c1_197, %c0_198, %c0_199] : memref<1x2x22x22xf32, #tpu.memory_space<vmem>>, vector<1x1x16x16xf32>
    %296 = vector.shape_cast %295 : vector<1x1x16x16xf32> to vector<16x16xf32>
    %c49 = arith.constant 49 : index
    %297 = memref.load %arg1[%c49] : memref<98xf32, #tpu.memory_space<smem>>
    %298 = vector.broadcast %297 : f32 to vector<16x16xf32>
    %299 = arith.mulf %298, %296 : vector<16x16xf32>
    %300 = arith.addf %294, %299 : vector<16x16xf32>
    %c0_200 = arith.constant 0 : index
    %c1_201 = arith.constant 1 : index
    %c0_202 = arith.constant 0 : index
    %c1_203 = arith.constant 1 : index
    %301 = vector.load %arg2[%c0_200, %c1_201, %c0_202, %c1_203] : memref<1x2x22x22xf32, #tpu.memory_space<vmem>>, vector<1x1x16x16xf32>
    %302 = vector.shape_cast %301 : vector<1x1x16x16xf32> to vector<16x16xf32>
    %c50 = arith.constant 50 : index
    %303 = memref.load %arg1[%c50] : memref<98xf32, #tpu.memory_space<smem>>
    %304 = vector.broadcast %303 : f32 to vector<16x16xf32>
    %305 = arith.mulf %304, %302 : vector<16x16xf32>
    %306 = arith.addf %300, %305 : vector<16x16xf32>
    %c0_204 = arith.constant 0 : index
    %c1_205 = arith.constant 1 : index
    %c0_206 = arith.constant 0 : index
    %c2_207 = arith.constant 2 : index
    %307 = vector.load %arg2[%c0_204, %c1_205, %c0_206, %c2_207] : memref<1x2x22x22xf32, #tpu.memory_space<vmem>>, vector<1x1x16x16xf32>
    %308 = vector.shape_cast %307 : vector<1x1x16x16xf32> to vector<16x16xf32>
    %c51 = arith.constant 51 : index
    %309 = memref.load %arg1[%c51] : memref<98xf32, #tpu.memory_space<smem>>
    %310 = vector.broadcast %309 : f32 to vector<16x16xf32>
    %311 = arith.mulf %310, %308 : vector<16x16xf32>
    %312 = arith.addf %306, %311 : vector<16x16xf32>
    %c0_208 = arith.constant 0 : index
    %c1_209 = arith.constant 1 : index
    %c0_210 = arith.constant 0 : index
    %c3_211 = arith.constant 3 : index
    %313 = vector.load %arg2[%c0_208, %c1_209, %c0_210, %c3_211] : memref<1x2x22x22xf32, #tpu.memory_space<vmem>>, vector<1x1x16x16xf32>
    %314 = vector.shape_cast %313 : vector<1x1x16x16xf32> to vector<16x16xf32>
    %c52 = arith.constant 52 : index
    %315 = memref.load %arg1[%c52] : memref<98xf32, #tpu.memory_space<smem>>
    %316 = vector.broadcast %315 : f32 to vector<16x16xf32>
    %317 = arith.mulf %316, %314 : vector<16x16xf32>
    %318 = arith.addf %312, %317 : vector<16x16xf32>
    %c0_212 = arith.constant 0 : index
    %c1_213 = arith.constant 1 : index
    %c0_214 = arith.constant 0 : index
    %c4_215 = arith.constant 4 : index
    %319 = vector.load %arg2[%c0_212, %c1_213, %c0_214, %c4_215] : memref<1x2x22x22xf32, #tpu.memory_space<vmem>>, vector<1x1x16x16xf32>
    %320 = vector.shape_cast %319 : vector<1x1x16x16xf32> to vector<16x16xf32>
    %c53 = arith.constant 53 : index
    %321 = memref.load %arg1[%c53] : memref<98xf32, #tpu.memory_space<smem>>
    %322 = vector.broadcast %321 : f32 to vector<16x16xf32>
    %323 = arith.mulf %322, %320 : vector<16x16xf32>
    %324 = arith.addf %318, %323 : vector<16x16xf32>
    %c0_216 = arith.constant 0 : index
    %c1_217 = arith.constant 1 : index
    %c0_218 = arith.constant 0 : index
    %c5_219 = arith.constant 5 : index
    %325 = vector.load %arg2[%c0_216, %c1_217, %c0_218, %c5_219] : memref<1x2x22x22xf32, #tpu.memory_space<vmem>>, vector<1x1x16x16xf32>
    %326 = vector.shape_cast %325 : vector<1x1x16x16xf32> to vector<16x16xf32>
    %c54 = arith.constant 54 : index
    %327 = memref.load %arg1[%c54] : memref<98xf32, #tpu.memory_space<smem>>
    %328 = vector.broadcast %327 : f32 to vector<16x16xf32>
    %329 = arith.mulf %328, %326 : vector<16x16xf32>
    %330 = arith.addf %324, %329 : vector<16x16xf32>
    %c0_220 = arith.constant 0 : index
    %c1_221 = arith.constant 1 : index
    %c0_222 = arith.constant 0 : index
    %c6_223 = arith.constant 6 : index
    %331 = vector.load %arg2[%c0_220, %c1_221, %c0_222, %c6_223] : memref<1x2x22x22xf32, #tpu.memory_space<vmem>>, vector<1x1x16x16xf32>
    %332 = vector.shape_cast %331 : vector<1x1x16x16xf32> to vector<16x16xf32>
    %c55 = arith.constant 55 : index
    %333 = memref.load %arg1[%c55] : memref<98xf32, #tpu.memory_space<smem>>
    %334 = vector.broadcast %333 : f32 to vector<16x16xf32>
    %335 = arith.mulf %334, %332 : vector<16x16xf32>
    %336 = arith.addf %330, %335 : vector<16x16xf32>
    %c0_224 = arith.constant 0 : index
    %c1_225 = arith.constant 1 : index
    %c1_226 = arith.constant 1 : index
    %c0_227 = arith.constant 0 : index
    %337 = vector.load %arg2[%c0_224, %c1_225, %c1_226, %c0_227] : memref<1x2x22x22xf32, #tpu.memory_space<vmem>>, vector<1x1x16x16xf32>
    %338 = vector.shape_cast %337 : vector<1x1x16x16xf32> to vector<16x16xf32>
    %c56 = arith.constant 56 : index
    %339 = memref.load %arg1[%c56] : memref<98xf32, #tpu.memory_space<smem>>
    %340 = vector.broadcast %339 : f32 to vector<16x16xf32>
    %341 = arith.mulf %340, %338 : vector<16x16xf32>
    %342 = arith.addf %336, %341 : vector<16x16xf32>
    %c0_228 = arith.constant 0 : index
    %c1_229 = arith.constant 1 : index
    %c1_230 = arith.constant 1 : index
    %c1_231 = arith.constant 1 : index
    %343 = vector.load %arg2[%c0_228, %c1_229, %c1_230, %c1_231] : memref<1x2x22x22xf32, #tpu.memory_space<vmem>>, vector<1x1x16x16xf32>
    %344 = vector.shape_cast %343 : vector<1x1x16x16xf32> to vector<16x16xf32>
    %c57 = arith.constant 57 : index
    %345 = memref.load %arg1[%c57] : memref<98xf32, #tpu.memory_space<smem>>
    %346 = vector.broadcast %345 : f32 to vector<16x16xf32>
    %347 = arith.mulf %346, %344 : vector<16x16xf32>
    %348 = arith.addf %342, %347 : vector<16x16xf32>
    %c0_232 = arith.constant 0 : index
    %c1_233 = arith.constant 1 : index
    %c1_234 = arith.constant 1 : index
    %c2_235 = arith.constant 2 : index
    %349 = vector.load %arg2[%c0_232, %c1_233, %c1_234, %c2_235] : memref<1x2x22x22xf32, #tpu.memory_space<vmem>>, vector<1x1x16x16xf32>
    %350 = vector.shape_cast %349 : vector<1x1x16x16xf32> to vector<16x16xf32>
    %c58 = arith.constant 58 : index
    %351 = memref.load %arg1[%c58] : memref<98xf32, #tpu.memory_space<smem>>
    %352 = vector.broadcast %351 : f32 to vector<16x16xf32>
    %353 = arith.mulf %352, %350 : vector<16x16xf32>
    %354 = arith.addf %348, %353 : vector<16x16xf32>
    %c0_236 = arith.constant 0 : index
    %c1_237 = arith.constant 1 : index
    %c1_238 = arith.constant 1 : index
    %c3_239 = arith.constant 3 : index
    %355 = vector.load %arg2[%c0_236, %c1_237, %c1_238, %c3_239] : memref<1x2x22x22xf32, #tpu.memory_space<vmem>>, vector<1x1x16x16xf32>
    %356 = vector.shape_cast %355 : vector<1x1x16x16xf32> to vector<16x16xf32>
    %c59 = arith.constant 59 : index
    %357 = memref.load %arg1[%c59] : memref<98xf32, #tpu.memory_space<smem>>
    %358 = vector.broadcast %357 : f32 to vector<16x16xf32>
    %359 = arith.mulf %358, %356 : vector<16x16xf32>
    %360 = arith.addf %354, %359 : vector<16x16xf32>
    %c0_240 = arith.constant 0 : index
    %c1_241 = arith.constant 1 : index
    %c1_242 = arith.constant 1 : index
    %c4_243 = arith.constant 4 : index
    %361 = vector.load %arg2[%c0_240, %c1_241, %c1_242, %c4_243] : memref<1x2x22x22xf32, #tpu.memory_space<vmem>>, vector<1x1x16x16xf32>
    %362 = vector.shape_cast %361 : vector<1x1x16x16xf32> to vector<16x16xf32>
    %c60 = arith.constant 60 : index
    %363 = memref.load %arg1[%c60] : memref<98xf32, #tpu.memory_space<smem>>
    %364 = vector.broadcast %363 : f32 to vector<16x16xf32>
    %365 = arith.mulf %364, %362 : vector<16x16xf32>
    %366 = arith.addf %360, %365 : vector<16x16xf32>
    %c0_244 = arith.constant 0 : index
    %c1_245 = arith.constant 1 : index
    %c1_246 = arith.constant 1 : index
    %c5_247 = arith.constant 5 : index
    %367 = vector.load %arg2[%c0_244, %c1_245, %c1_246, %c5_247] : memref<1x2x22x22xf32, #tpu.memory_space<vmem>>, vector<1x1x16x16xf32>
    %368 = vector.shape_cast %367 : vector<1x1x16x16xf32> to vector<16x16xf32>
    %c61 = arith.constant 61 : index
    %369 = memref.load %arg1[%c61] : memref<98xf32, #tpu.memory_space<smem>>
    %370 = vector.broadcast %369 : f32 to vector<16x16xf32>
    %371 = arith.mulf %370, %368 : vector<16x16xf32>
    %372 = arith.addf %366, %371 : vector<16x16xf32>
    %c0_248 = arith.constant 0 : index
    %c1_249 = arith.constant 1 : index
    %c1_250 = arith.constant 1 : index
    %c6_251 = arith.constant 6 : index
    %373 = vector.load %arg2[%c0_248, %c1_249, %c1_250, %c6_251] : memref<1x2x22x22xf32, #tpu.memory_space<vmem>>, vector<1x1x16x16xf32>
    %374 = vector.shape_cast %373 : vector<1x1x16x16xf32> to vector<16x16xf32>
    %c62 = arith.constant 62 : index
    %375 = memref.load %arg1[%c62] : memref<98xf32, #tpu.memory_space<smem>>
    %376 = vector.broadcast %375 : f32 to vector<16x16xf32>
    %377 = arith.mulf %376, %374 : vector<16x16xf32>
    %378 = arith.addf %372, %377 : vector<16x16xf32>
    %c0_252 = arith.constant 0 : index
    %c1_253 = arith.constant 1 : index
    %c2_254 = arith.constant 2 : index
    %c0_255 = arith.constant 0 : index
    %379 = vector.load %arg2[%c0_252, %c1_253, %c2_254, %c0_255] : memref<1x2x22x22xf32, #tpu.memory_space<vmem>>, vector<1x1x16x16xf32>
    %380 = vector.shape_cast %379 : vector<1x1x16x16xf32> to vector<16x16xf32>
    %c63 = arith.constant 63 : index
    %381 = memref.load %arg1[%c63] : memref<98xf32, #tpu.memory_space<smem>>
    %382 = vector.broadcast %381 : f32 to vector<16x16xf32>
    %383 = arith.mulf %382, %380 : vector<16x16xf32>
    %384 = arith.addf %378, %383 : vector<16x16xf32>
    %c0_256 = arith.constant 0 : index
    %c1_257 = arith.constant 1 : index
    %c2_258 = arith.constant 2 : index
    %c1_259 = arith.constant 1 : index
    %385 = vector.load %arg2[%c0_256, %c1_257, %c2_258, %c1_259] : memref<1x2x22x22xf32, #tpu.memory_space<vmem>>, vector<1x1x16x16xf32>
    %386 = vector.shape_cast %385 : vector<1x1x16x16xf32> to vector<16x16xf32>
    %c64 = arith.constant 64 : index
    %387 = memref.load %arg1[%c64] : memref<98xf32, #tpu.memory_space<smem>>
    %388 = vector.broadcast %387 : f32 to vector<16x16xf32>
    %389 = arith.mulf %388, %386 : vector<16x16xf32>
    %390 = arith.addf %384, %389 : vector<16x16xf32>
    %c0_260 = arith.constant 0 : index
    %c1_261 = arith.constant 1 : index
    %c2_262 = arith.constant 2 : index
    %c2_263 = arith.constant 2 : index
    %391 = vector.load %arg2[%c0_260, %c1_261, %c2_262, %c2_263] : memref<1x2x22x22xf32, #tpu.memory_space<vmem>>, vector<1x1x16x16xf32>
    %392 = vector.shape_cast %391 : vector<1x1x16x16xf32> to vector<16x16xf32>
    %c65 = arith.constant 65 : index
    %393 = memref.load %arg1[%c65] : memref<98xf32, #tpu.memory_space<smem>>
    %394 = vector.broadcast %393 : f32 to vector<16x16xf32>
    %395 = arith.mulf %394, %392 : vector<16x16xf32>
    %396 = arith.addf %390, %395 : vector<16x16xf32>
    %c0_264 = arith.constant 0 : index
    %c1_265 = arith.constant 1 : index
    %c2_266 = arith.constant 2 : index
    %c3_267 = arith.constant 3 : index
    %397 = vector.load %arg2[%c0_264, %c1_265, %c2_266, %c3_267] : memref<1x2x22x22xf32, #tpu.memory_space<vmem>>, vector<1x1x16x16xf32>
    %398 = vector.shape_cast %397 : vector<1x1x16x16xf32> to vector<16x16xf32>
    %c66 = arith.constant 66 : index
    %399 = memref.load %arg1[%c66] : memref<98xf32, #tpu.memory_space<smem>>
    %400 = vector.broadcast %399 : f32 to vector<16x16xf32>
    %401 = arith.mulf %400, %398 : vector<16x16xf32>
    %402 = arith.addf %396, %401 : vector<16x16xf32>
    %c0_268 = arith.constant 0 : index
    %c1_269 = arith.constant 1 : index
    %c2_270 = arith.constant 2 : index
    %c4_271 = arith.constant 4 : index
    %403 = vector.load %arg2[%c0_268, %c1_269, %c2_270, %c4_271] : memref<1x2x22x22xf32, #tpu.memory_space<vmem>>, vector<1x1x16x16xf32>
    %404 = vector.shape_cast %403 : vector<1x1x16x16xf32> to vector<16x16xf32>
    %c67 = arith.constant 67 : index
    %405 = memref.load %arg1[%c67] : memref<98xf32, #tpu.memory_space<smem>>
    %406 = vector.broadcast %405 : f32 to vector<16x16xf32>
    %407 = arith.mulf %406, %404 : vector<16x16xf32>
    %408 = arith.addf %402, %407 : vector<16x16xf32>
    %c0_272 = arith.constant 0 : index
    %c1_273 = arith.constant 1 : index
    %c2_274 = arith.constant 2 : index
    %c5_275 = arith.constant 5 : index
    %409 = vector.load %arg2[%c0_272, %c1_273, %c2_274, %c5_275] : memref<1x2x22x22xf32, #tpu.memory_space<vmem>>, vector<1x1x16x16xf32>
    %410 = vector.shape_cast %409 : vector<1x1x16x16xf32> to vector<16x16xf32>
    %c68 = arith.constant 68 : index
    %411 = memref.load %arg1[%c68] : memref<98xf32, #tpu.memory_space<smem>>
    %412 = vector.broadcast %411 : f32 to vector<16x16xf32>
    %413 = arith.mulf %412, %410 : vector<16x16xf32>
    %414 = arith.addf %408, %413 : vector<16x16xf32>
    %c0_276 = arith.constant 0 : index
    %c1_277 = arith.constant 1 : index
    %c2_278 = arith.constant 2 : index
    %c6_279 = arith.constant 6 : index
    %415 = vector.load %arg2[%c0_276, %c1_277, %c2_278, %c6_279] : memref<1x2x22x22xf32, #tpu.memory_space<vmem>>, vector<1x1x16x16xf32>
    %416 = vector.shape_cast %415 : vector<1x1x16x16xf32> to vector<16x16xf32>
    %c69 = arith.constant 69 : index
    %417 = memref.load %arg1[%c69] : memref<98xf32, #tpu.memory_space<smem>>
    %418 = vector.broadcast %417 : f32 to vector<16x16xf32>
    %419 = arith.mulf %418, %416 : vector<16x16xf32>
    %420 = arith.addf %414, %419 : vector<16x16xf32>
    %c0_280 = arith.constant 0 : index
    %c1_281 = arith.constant 1 : index
    %c3_282 = arith.constant 3 : index
    %c0_283 = arith.constant 0 : index
    %421 = vector.load %arg2[%c0_280, %c1_281, %c3_282, %c0_283] : memref<1x2x22x22xf32, #tpu.memory_space<vmem>>, vector<1x1x16x16xf32>
    %422 = vector.shape_cast %421 : vector<1x1x16x16xf32> to vector<16x16xf32>
    %c70 = arith.constant 70 : index
    %423 = memref.load %arg1[%c70] : memref<98xf32, #tpu.memory_space<smem>>
    %424 = vector.broadcast %423 : f32 to vector<16x16xf32>
    %425 = arith.mulf %424, %422 : vector<16x16xf32>
    %426 = arith.addf %420, %425 : vector<16x16xf32>
    %c0_284 = arith.constant 0 : index
    %c1_285 = arith.constant 1 : index
    %c3_286 = arith.constant 3 : index
    %c1_287 = arith.constant 1 : index
    %427 = vector.load %arg2[%c0_284, %c1_285, %c3_286, %c1_287] : memref<1x2x22x22xf32, #tpu.memory_space<vmem>>, vector<1x1x16x16xf32>
    %428 = vector.shape_cast %427 : vector<1x1x16x16xf32> to vector<16x16xf32>
    %c71 = arith.constant 71 : index
    %429 = memref.load %arg1[%c71] : memref<98xf32, #tpu.memory_space<smem>>
    %430 = vector.broadcast %429 : f32 to vector<16x16xf32>
    %431 = arith.mulf %430, %428 : vector<16x16xf32>
    %432 = arith.addf %426, %431 : vector<16x16xf32>
    %c0_288 = arith.constant 0 : index
    %c1_289 = arith.constant 1 : index
    %c3_290 = arith.constant 3 : index
    %c2_291 = arith.constant 2 : index
    %433 = vector.load %arg2[%c0_288, %c1_289, %c3_290, %c2_291] : memref<1x2x22x22xf32, #tpu.memory_space<vmem>>, vector<1x1x16x16xf32>
    %434 = vector.shape_cast %433 : vector<1x1x16x16xf32> to vector<16x16xf32>
    %c72 = arith.constant 72 : index
    %435 = memref.load %arg1[%c72] : memref<98xf32, #tpu.memory_space<smem>>
    %436 = vector.broadcast %435 : f32 to vector<16x16xf32>
    %437 = arith.mulf %436, %434 : vector<16x16xf32>
    %438 = arith.addf %432, %437 : vector<16x16xf32>
    %c0_292 = arith.constant 0 : index
    %c1_293 = arith.constant 1 : index
    %c3_294 = arith.constant 3 : index
    %c3_295 = arith.constant 3 : index
    %439 = vector.load %arg2[%c0_292, %c1_293, %c3_294, %c3_295] : memref<1x2x22x22xf32, #tpu.memory_space<vmem>>, vector<1x1x16x16xf32>
    %440 = vector.shape_cast %439 : vector<1x1x16x16xf32> to vector<16x16xf32>
    %c73 = arith.constant 73 : index
    %441 = memref.load %arg1[%c73] : memref<98xf32, #tpu.memory_space<smem>>
    %442 = vector.broadcast %441 : f32 to vector<16x16xf32>
    %443 = arith.mulf %442, %440 : vector<16x16xf32>
    %444 = arith.addf %438, %443 : vector<16x16xf32>
    %c0_296 = arith.constant 0 : index
    %c1_297 = arith.constant 1 : index
    %c3_298 = arith.constant 3 : index
    %c4_299 = arith.constant 4 : index
    %445 = vector.load %arg2[%c0_296, %c1_297, %c3_298, %c4_299] : memref<1x2x22x22xf32, #tpu.memory_space<vmem>>, vector<1x1x16x16xf32>
    %446 = vector.shape_cast %445 : vector<1x1x16x16xf32> to vector<16x16xf32>
    %c74 = arith.constant 74 : index
    %447 = memref.load %arg1[%c74] : memref<98xf32, #tpu.memory_space<smem>>
    %448 = vector.broadcast %447 : f32 to vector<16x16xf32>
    %449 = arith.mulf %448, %446 : vector<16x16xf32>
    %450 = arith.addf %444, %449 : vector<16x16xf32>
    %c0_300 = arith.constant 0 : index
    %c1_301 = arith.constant 1 : index
    %c3_302 = arith.constant 3 : index
    %c5_303 = arith.constant 5 : index
    %451 = vector.load %arg2[%c0_300, %c1_301, %c3_302, %c5_303] : memref<1x2x22x22xf32, #tpu.memory_space<vmem>>, vector<1x1x16x16xf32>
    %452 = vector.shape_cast %451 : vector<1x1x16x16xf32> to vector<16x16xf32>
    %c75 = arith.constant 75 : index
    %453 = memref.load %arg1[%c75] : memref<98xf32, #tpu.memory_space<smem>>
    %454 = vector.broadcast %453 : f32 to vector<16x16xf32>
    %455 = arith.mulf %454, %452 : vector<16x16xf32>
    %456 = arith.addf %450, %455 : vector<16x16xf32>
    %c0_304 = arith.constant 0 : index
    %c1_305 = arith.constant 1 : index
    %c3_306 = arith.constant 3 : index
    %c6_307 = arith.constant 6 : index
    %457 = vector.load %arg2[%c0_304, %c1_305, %c3_306, %c6_307] : memref<1x2x22x22xf32, #tpu.memory_space<vmem>>, vector<1x1x16x16xf32>
    %458 = vector.shape_cast %457 : vector<1x1x16x16xf32> to vector<16x16xf32>
    %c76 = arith.constant 76 : index
    %459 = memref.load %arg1[%c76] : memref<98xf32, #tpu.memory_space<smem>>
    %460 = vector.broadcast %459 : f32 to vector<16x16xf32>
    %461 = arith.mulf %460, %458 : vector<16x16xf32>
    %462 = arith.addf %456, %461 : vector<16x16xf32>
    %c0_308 = arith.constant 0 : index
    %c1_309 = arith.constant 1 : index
    %c4_310 = arith.constant 4 : index
    %c0_311 = arith.constant 0 : index
    %463 = vector.load %arg2[%c0_308, %c1_309, %c4_310, %c0_311] : memref<1x2x22x22xf32, #tpu.memory_space<vmem>>, vector<1x1x16x16xf32>
    %464 = vector.shape_cast %463 : vector<1x1x16x16xf32> to vector<16x16xf32>
    %c77 = arith.constant 77 : index
    %465 = memref.load %arg1[%c77] : memref<98xf32, #tpu.memory_space<smem>>
    %466 = vector.broadcast %465 : f32 to vector<16x16xf32>
    %467 = arith.mulf %466, %464 : vector<16x16xf32>
    %468 = arith.addf %462, %467 : vector<16x16xf32>
    %c0_312 = arith.constant 0 : index
    %c1_313 = arith.constant 1 : index
    %c4_314 = arith.constant 4 : index
    %c1_315 = arith.constant 1 : index
    %469 = vector.load %arg2[%c0_312, %c1_313, %c4_314, %c1_315] : memref<1x2x22x22xf32, #tpu.memory_space<vmem>>, vector<1x1x16x16xf32>
    %470 = vector.shape_cast %469 : vector<1x1x16x16xf32> to vector<16x16xf32>
    %c78 = arith.constant 78 : index
    %471 = memref.load %arg1[%c78] : memref<98xf32, #tpu.memory_space<smem>>
    %472 = vector.broadcast %471 : f32 to vector<16x16xf32>
    %473 = arith.mulf %472, %470 : vector<16x16xf32>
    %474 = arith.addf %468, %473 : vector<16x16xf32>
    %c0_316 = arith.constant 0 : index
    %c1_317 = arith.constant 1 : index
    %c4_318 = arith.constant 4 : index
    %c2_319 = arith.constant 2 : index
    %475 = vector.load %arg2[%c0_316, %c1_317, %c4_318, %c2_319] : memref<1x2x22x22xf32, #tpu.memory_space<vmem>>, vector<1x1x16x16xf32>
    %476 = vector.shape_cast %475 : vector<1x1x16x16xf32> to vector<16x16xf32>
    %c79 = arith.constant 79 : index
    %477 = memref.load %arg1[%c79] : memref<98xf32, #tpu.memory_space<smem>>
    %478 = vector.broadcast %477 : f32 to vector<16x16xf32>
    %479 = arith.mulf %478, %476 : vector<16x16xf32>
    %480 = arith.addf %474, %479 : vector<16x16xf32>
    %c0_320 = arith.constant 0 : index
    %c1_321 = arith.constant 1 : index
    %c4_322 = arith.constant 4 : index
    %c3_323 = arith.constant 3 : index
    %481 = vector.load %arg2[%c0_320, %c1_321, %c4_322, %c3_323] : memref<1x2x22x22xf32, #tpu.memory_space<vmem>>, vector<1x1x16x16xf32>
    %482 = vector.shape_cast %481 : vector<1x1x16x16xf32> to vector<16x16xf32>
    %c80 = arith.constant 80 : index
    %483 = memref.load %arg1[%c80] : memref<98xf32, #tpu.memory_space<smem>>
    %484 = vector.broadcast %483 : f32 to vector<16x16xf32>
    %485 = arith.mulf %484, %482 : vector<16x16xf32>
    %486 = arith.addf %480, %485 : vector<16x16xf32>
    %c0_324 = arith.constant 0 : index
    %c1_325 = arith.constant 1 : index
    %c4_326 = arith.constant 4 : index
    %c4_327 = arith.constant 4 : index
    %487 = vector.load %arg2[%c0_324, %c1_325, %c4_326, %c4_327] : memref<1x2x22x22xf32, #tpu.memory_space<vmem>>, vector<1x1x16x16xf32>
    %488 = vector.shape_cast %487 : vector<1x1x16x16xf32> to vector<16x16xf32>
    %c81 = arith.constant 81 : index
    %489 = memref.load %arg1[%c81] : memref<98xf32, #tpu.memory_space<smem>>
    %490 = vector.broadcast %489 : f32 to vector<16x16xf32>
    %491 = arith.mulf %490, %488 : vector<16x16xf32>
    %492 = arith.addf %486, %491 : vector<16x16xf32>
    %c0_328 = arith.constant 0 : index
    %c1_329 = arith.constant 1 : index
    %c4_330 = arith.constant 4 : index
    %c5_331 = arith.constant 5 : index
    %493 = vector.load %arg2[%c0_328, %c1_329, %c4_330, %c5_331] : memref<1x2x22x22xf32, #tpu.memory_space<vmem>>, vector<1x1x16x16xf32>
    %494 = vector.shape_cast %493 : vector<1x1x16x16xf32> to vector<16x16xf32>
    %c82 = arith.constant 82 : index
    %495 = memref.load %arg1[%c82] : memref<98xf32, #tpu.memory_space<smem>>
    %496 = vector.broadcast %495 : f32 to vector<16x16xf32>
    %497 = arith.mulf %496, %494 : vector<16x16xf32>
    %498 = arith.addf %492, %497 : vector<16x16xf32>
    %c0_332 = arith.constant 0 : index
    %c1_333 = arith.constant 1 : index
    %c4_334 = arith.constant 4 : index
    %c6_335 = arith.constant 6 : index
    %499 = vector.load %arg2[%c0_332, %c1_333, %c4_334, %c6_335] : memref<1x2x22x22xf32, #tpu.memory_space<vmem>>, vector<1x1x16x16xf32>
    %500 = vector.shape_cast %499 : vector<1x1x16x16xf32> to vector<16x16xf32>
    %c83 = arith.constant 83 : index
    %501 = memref.load %arg1[%c83] : memref<98xf32, #tpu.memory_space<smem>>
    %502 = vector.broadcast %501 : f32 to vector<16x16xf32>
    %503 = arith.mulf %502, %500 : vector<16x16xf32>
    %504 = arith.addf %498, %503 : vector<16x16xf32>
    %c0_336 = arith.constant 0 : index
    %c1_337 = arith.constant 1 : index
    %c5_338 = arith.constant 5 : index
    %c0_339 = arith.constant 0 : index
    %505 = vector.load %arg2[%c0_336, %c1_337, %c5_338, %c0_339] : memref<1x2x22x22xf32, #tpu.memory_space<vmem>>, vector<1x1x16x16xf32>
    %506 = vector.shape_cast %505 : vector<1x1x16x16xf32> to vector<16x16xf32>
    %c84 = arith.constant 84 : index
    %507 = memref.load %arg1[%c84] : memref<98xf32, #tpu.memory_space<smem>>
    %508 = vector.broadcast %507 : f32 to vector<16x16xf32>
    %509 = arith.mulf %508, %506 : vector<16x16xf32>
    %510 = arith.addf %504, %509 : vector<16x16xf32>
    %c0_340 = arith.constant 0 : index
    %c1_341 = arith.constant 1 : index
    %c5_342 = arith.constant 5 : index
    %c1_343 = arith.constant 1 : index
    %511 = vector.load %arg2[%c0_340, %c1_341, %c5_342, %c1_343] : memref<1x2x22x22xf32, #tpu.memory_space<vmem>>, vector<1x1x16x16xf32>
    %512 = vector.shape_cast %511 : vector<1x1x16x16xf32> to vector<16x16xf32>
    %c85 = arith.constant 85 : index
    %513 = memref.load %arg1[%c85] : memref<98xf32, #tpu.memory_space<smem>>
    %514 = vector.broadcast %513 : f32 to vector<16x16xf32>
    %515 = arith.mulf %514, %512 : vector<16x16xf32>
    %516 = arith.addf %510, %515 : vector<16x16xf32>
    %c0_344 = arith.constant 0 : index
    %c1_345 = arith.constant 1 : index
    %c5_346 = arith.constant 5 : index
    %c2_347 = arith.constant 2 : index
    %517 = vector.load %arg2[%c0_344, %c1_345, %c5_346, %c2_347] : memref<1x2x22x22xf32, #tpu.memory_space<vmem>>, vector<1x1x16x16xf32>
    %518 = vector.shape_cast %517 : vector<1x1x16x16xf32> to vector<16x16xf32>
    %c86 = arith.constant 86 : index
    %519 = memref.load %arg1[%c86] : memref<98xf32, #tpu.memory_space<smem>>
    %520 = vector.broadcast %519 : f32 to vector<16x16xf32>
    %521 = arith.mulf %520, %518 : vector<16x16xf32>
    %522 = arith.addf %516, %521 : vector<16x16xf32>
    %c0_348 = arith.constant 0 : index
    %c1_349 = arith.constant 1 : index
    %c5_350 = arith.constant 5 : index
    %c3_351 = arith.constant 3 : index
    %523 = vector.load %arg2[%c0_348, %c1_349, %c5_350, %c3_351] : memref<1x2x22x22xf32, #tpu.memory_space<vmem>>, vector<1x1x16x16xf32>
    %524 = vector.shape_cast %523 : vector<1x1x16x16xf32> to vector<16x16xf32>
    %c87 = arith.constant 87 : index
    %525 = memref.load %arg1[%c87] : memref<98xf32, #tpu.memory_space<smem>>
    %526 = vector.broadcast %525 : f32 to vector<16x16xf32>
    %527 = arith.mulf %526, %524 : vector<16x16xf32>
    %528 = arith.addf %522, %527 : vector<16x16xf32>
    %c0_352 = arith.constant 0 : index
    %c1_353 = arith.constant 1 : index
    %c5_354 = arith.constant 5 : index
    %c4_355 = arith.constant 4 : index
    %529 = vector.load %arg2[%c0_352, %c1_353, %c5_354, %c4_355] : memref<1x2x22x22xf32, #tpu.memory_space<vmem>>, vector<1x1x16x16xf32>
    %530 = vector.shape_cast %529 : vector<1x1x16x16xf32> to vector<16x16xf32>
    %c88 = arith.constant 88 : index
    %531 = memref.load %arg1[%c88] : memref<98xf32, #tpu.memory_space<smem>>
    %532 = vector.broadcast %531 : f32 to vector<16x16xf32>
    %533 = arith.mulf %532, %530 : vector<16x16xf32>
    %534 = arith.addf %528, %533 : vector<16x16xf32>
    %c0_356 = arith.constant 0 : index
    %c1_357 = arith.constant 1 : index
    %c5_358 = arith.constant 5 : index
    %c5_359 = arith.constant 5 : index
    %535 = vector.load %arg2[%c0_356, %c1_357, %c5_358, %c5_359] : memref<1x2x22x22xf32, #tpu.memory_space<vmem>>, vector<1x1x16x16xf32>
    %536 = vector.shape_cast %535 : vector<1x1x16x16xf32> to vector<16x16xf32>
    %c89 = arith.constant 89 : index
    %537 = memref.load %arg1[%c89] : memref<98xf32, #tpu.memory_space<smem>>
    %538 = vector.broadcast %537 : f32 to vector<16x16xf32>
    %539 = arith.mulf %538, %536 : vector<16x16xf32>
    %540 = arith.addf %534, %539 : vector<16x16xf32>
    %c0_360 = arith.constant 0 : index
    %c1_361 = arith.constant 1 : index
    %c5_362 = arith.constant 5 : index
    %c6_363 = arith.constant 6 : index
    %541 = vector.load %arg2[%c0_360, %c1_361, %c5_362, %c6_363] : memref<1x2x22x22xf32, #tpu.memory_space<vmem>>, vector<1x1x16x16xf32>
    %542 = vector.shape_cast %541 : vector<1x1x16x16xf32> to vector<16x16xf32>
    %c90 = arith.constant 90 : index
    %543 = memref.load %arg1[%c90] : memref<98xf32, #tpu.memory_space<smem>>
    %544 = vector.broadcast %543 : f32 to vector<16x16xf32>
    %545 = arith.mulf %544, %542 : vector<16x16xf32>
    %546 = arith.addf %540, %545 : vector<16x16xf32>
    %c0_364 = arith.constant 0 : index
    %c1_365 = arith.constant 1 : index
    %c6_366 = arith.constant 6 : index
    %c0_367 = arith.constant 0 : index
    %547 = vector.load %arg2[%c0_364, %c1_365, %c6_366, %c0_367] : memref<1x2x22x22xf32, #tpu.memory_space<vmem>>, vector<1x1x16x16xf32>
    %548 = vector.shape_cast %547 : vector<1x1x16x16xf32> to vector<16x16xf32>
    %c91 = arith.constant 91 : index
    %549 = memref.load %arg1[%c91] : memref<98xf32, #tpu.memory_space<smem>>
    %550 = vector.broadcast %549 : f32 to vector<16x16xf32>
    %551 = arith.mulf %550, %548 : vector<16x16xf32>
    %552 = arith.addf %546, %551 : vector<16x16xf32>
    %c0_368 = arith.constant 0 : index
    %c1_369 = arith.constant 1 : index
    %c6_370 = arith.constant 6 : index
    %c1_371 = arith.constant 1 : index
    %553 = vector.load %arg2[%c0_368, %c1_369, %c6_370, %c1_371] : memref<1x2x22x22xf32, #tpu.memory_space<vmem>>, vector<1x1x16x16xf32>
    %554 = vector.shape_cast %553 : vector<1x1x16x16xf32> to vector<16x16xf32>
    %c92 = arith.constant 92 : index
    %555 = memref.load %arg1[%c92] : memref<98xf32, #tpu.memory_space<smem>>
    %556 = vector.broadcast %555 : f32 to vector<16x16xf32>
    %557 = arith.mulf %556, %554 : vector<16x16xf32>
    %558 = arith.addf %552, %557 : vector<16x16xf32>
    %c0_372 = arith.constant 0 : index
    %c1_373 = arith.constant 1 : index
    %c6_374 = arith.constant 6 : index
    %c2_375 = arith.constant 2 : index
    %559 = vector.load %arg2[%c0_372, %c1_373, %c6_374, %c2_375] : memref<1x2x22x22xf32, #tpu.memory_space<vmem>>, vector<1x1x16x16xf32>
    %560 = vector.shape_cast %559 : vector<1x1x16x16xf32> to vector<16x16xf32>
    %c93 = arith.constant 93 : index
    %561 = memref.load %arg1[%c93] : memref<98xf32, #tpu.memory_space<smem>>
    %562 = vector.broadcast %561 : f32 to vector<16x16xf32>
    %563 = arith.mulf %562, %560 : vector<16x16xf32>
    %564 = arith.addf %558, %563 : vector<16x16xf32>
    %c0_376 = arith.constant 0 : index
    %c1_377 = arith.constant 1 : index
    %c6_378 = arith.constant 6 : index
    %c3_379 = arith.constant 3 : index
    %565 = vector.load %arg2[%c0_376, %c1_377, %c6_378, %c3_379] : memref<1x2x22x22xf32, #tpu.memory_space<vmem>>, vector<1x1x16x16xf32>
    %566 = vector.shape_cast %565 : vector<1x1x16x16xf32> to vector<16x16xf32>
    %c94 = arith.constant 94 : index
    %567 = memref.load %arg1[%c94] : memref<98xf32, #tpu.memory_space<smem>>
    %568 = vector.broadcast %567 : f32 to vector<16x16xf32>
    %569 = arith.mulf %568, %566 : vector<16x16xf32>
    %570 = arith.addf %564, %569 : vector<16x16xf32>
    %c0_380 = arith.constant 0 : index
    %c1_381 = arith.constant 1 : index
    %c6_382 = arith.constant 6 : index
    %c4_383 = arith.constant 4 : index
    %571 = vector.load %arg2[%c0_380, %c1_381, %c6_382, %c4_383] : memref<1x2x22x22xf32, #tpu.memory_space<vmem>>, vector<1x1x16x16xf32>
    %572 = vector.shape_cast %571 : vector<1x1x16x16xf32> to vector<16x16xf32>
    %c95 = arith.constant 95 : index
    %573 = memref.load %arg1[%c95] : memref<98xf32, #tpu.memory_space<smem>>
    %574 = vector.broadcast %573 : f32 to vector<16x16xf32>
    %575 = arith.mulf %574, %572 : vector<16x16xf32>
    %576 = arith.addf %570, %575 : vector<16x16xf32>
    %c0_384 = arith.constant 0 : index
    %c1_385 = arith.constant 1 : index
    %c6_386 = arith.constant 6 : index
    %c5_387 = arith.constant 5 : index
    %577 = vector.load %arg2[%c0_384, %c1_385, %c6_386, %c5_387] : memref<1x2x22x22xf32, #tpu.memory_space<vmem>>, vector<1x1x16x16xf32>
    %578 = vector.shape_cast %577 : vector<1x1x16x16xf32> to vector<16x16xf32>
    %c96 = arith.constant 96 : index
    %579 = memref.load %arg1[%c96] : memref<98xf32, #tpu.memory_space<smem>>
    %580 = vector.broadcast %579 : f32 to vector<16x16xf32>
    %581 = arith.mulf %580, %578 : vector<16x16xf32>
    %582 = arith.addf %576, %581 : vector<16x16xf32>
    %c0_388 = arith.constant 0 : index
    %c1_389 = arith.constant 1 : index
    %c6_390 = arith.constant 6 : index
    %c6_391 = arith.constant 6 : index
    %583 = vector.load %arg2[%c0_388, %c1_389, %c6_390, %c6_391] : memref<1x2x22x22xf32, #tpu.memory_space<vmem>>, vector<1x1x16x16xf32>
    %584 = vector.shape_cast %583 : vector<1x1x16x16xf32> to vector<16x16xf32>
    %c97 = arith.constant 97 : index
    %585 = memref.load %arg1[%c97] : memref<98xf32, #tpu.memory_space<smem>>
    %586 = vector.broadcast %585 : f32 to vector<16x16xf32>
    %587 = arith.mulf %586, %584 : vector<16x16xf32>
    %588 = arith.addf %582, %587 : vector<16x16xf32>
    %c0_392 = arith.constant 0 : index
    %c0_393 = arith.constant 0 : index
    %c0_394 = arith.constant 0 : index
    %c0_395 = arith.constant 0 : index
    %589 = vector.load %arg3[%c0_392, %c0_393, %c0_394, %c0_395] : memref<1x1x16x16xf32, #tpu.memory_space<vmem>>, vector<1x1x16x16xf32>
    %590 = vector.shape_cast %589 : vector<1x1x16x16xf32> to vector<16x16xf32>
    %591 = vector.shape_cast %588 : vector<16x16xf32> to vector<1x1x16x16xf32>
    tpu.vector_store %arg3[%c0_392, %c0_393, %c0_394, %c0_395], %591 {strides = array<i32>} : memref<1x1x16x16xf32, #tpu.memory_space<vmem>>, vector<1x1x16x16xf32>,
    return
  }
  func.func @transform_0(%arg0: i32) -> i32 {
    %c0_i32 = arith.constant 0 : i32
    %c0_i32_0 = arith.constant 0 : i32
    return %c0_i32 : i32
  }
  func.func @transform_1(%arg0: i32) -> (i32, i32, i32, i32) {
    %c0_i32 = arith.constant 0 : i32
    %c0_i32_0 = arith.constant 0 : i32
    %c0_i32_1 = arith.constant 0 : i32
    %c0_i32_2 = arith.constant 0 : i32
    return %arg0, %c0_i32, %c0_i32_0, %c0_i32_1 : i32, i32, i32, i32
  }
  func.func @transform_2(%arg0: i32) -> (i32, i32, i32, i32) {
    %c0_i32 = arith.constant 0 : i32
    %c0_i32_0 = arith.constant 0 : i32
    %c0_i32_1 = arith.constant 0 : i32
    %c0_i32_2 = arith.constant 0 : i32
    return %arg0, %c0_i32, %c0_i32_0, %c0_i32_1 : i32, i32, i32, i32
  }
}

module attributes {stable_mosaic.version = 11 : i64} {
  func.func @kern(%arg0: i32, %arg1: i32, %arg2: memref<1x8x128xf32, #tpu.memory_space<vmem>>, %arg3: memref<1x8x1xf32, #tpu.memory_space<vmem>>, %arg4: memref<1x8x1xf32, #tpu.memory_space<vmem>>, %arg5: memref<8x1xf32, #tpu.memory_space<vmem>>, %arg6: memref<8x1xf32, #tpu.memory_space<vmem>>) attributes {dimension_semantics = [#tpu.dimension_semantics<parallel>, #tpu.dimension_semantics<arbitrary>], iteration_bounds = array<i64: 2, 1>, scalar_prefetch = 0 : i64, scratch_operands = 2 : i64, tpu.core_type = #tpu.core_type<tc>, window_params = [{transform_indices = @transform_0, window_bounds = array<i64: 1, 8, 128>}, {transform_indices = @transform_1, window_bounds = array<i64: 1, 8, 1>}, {transform_indices = @transform_2, window_bounds = array<i64: 1, 8, 1>}]} {
    %c0 = arith.constant 0 : index
    %c0_0 = arith.constant 0 : index
    %c0_1 = arith.constant 0 : index
    %0 = vector.load %arg2[%c0, %c0_0, %c0_1] : memref<1x8x128xf32, #tpu.memory_space<vmem>>, vector<1x8x128xf32>
    %1 = vector.shape_cast %0 : vector<1x8x128xf32> to vector<8x128xf32>
    %2 = tpu.iota {dimensions = array<i32: 1>} : vector<8x128xi32>
    %c128_i32 = arith.constant 128 : i32
    %3 = arith.muli %arg1, %c128_i32 : i32
    %4 = vector.broadcast %3 : i32 to vector<8x128xi32>
    %5 = arith.addi %2, %4 : vector<8x128xi32>
    %c64_i32 = arith.constant 64 : i32
    %6 = vector.broadcast %c64_i32 : i32 to vector<8x128xi32>
    %7 = arith.cmpi slt, %5, %6 : vector<8x128xi32>
    %cst = arith.constant 0.000000e+00 : f32
    %8 = vector.broadcast %cst : f32 to vector<8x128xf32>
    %9 = arith.select %7, %1, %8 : vector<8x128xi1>, vector<8x128xf32>
    %cst_2 = arith.constant dense<0.000000e+00> : vector<8xf32>
    %10 = vector.multi_reduction <add>, %9, %cst_2 [1] : vector<8x128xf32> to vector<8xf32>
    %11 = vector.shape_cast %10 : vector<8xf32> to vector<8x1xf32>
    %cst_3 = arith.constant 0xFF800000 : f32
    %12 = vector.broadcast %cst_3 : f32 to vector<8x128xf32>
    %13 = arith.select %7, %1, %12 : vector<8x128xi1>, vector<8x128xf32>
    %cst_4 = arith.constant dense<0xFF800000> : vector<8xf32>
    %14 = vector.multi_reduction <maximumf>, %13, %cst_4 [1] : vector<8x128xf32> to vector<8xf32>
    %15 = vector.shape_cast %14 : vector<8xf32> to vector<8x1xf32>
    %c0_i32 = arith.constant 0 : i32
    %16 = arith.cmpi eq, %arg1, %c0_i32 : i32
    %c0_5 = arith.constant 0 : index
    %c0_6 = arith.constant 0 : index
    %17 = vector.load %arg5[%c0_5, %c0_6] : memref<8x1xf32, #tpu.memory_space<vmem>>, vector<8x1xf32>
    %18 = arith.addf %17, %11 : vector<8x1xf32>
    %19 = arith.select %16, %11, %18 : vector<8x1xf32>
    %c0_7 = arith.constant 0 : index
    %c0_8 = arith.constant 0 : index
    %20 = vector.load %arg6[%c0_7, %c0_8] : memref<8x1xf32, #tpu.memory_space<vmem>>, vector<8x1xf32>
    %21 = arith.maximumf %20, %15 : vector<8x1xf32>
    %22 = arith.select %16, %15, %21 : vector<8x1xf32>
    %c0_9 = arith.constant 0 : index
    %c0_10 = arith.constant 0 : index
    %23 = vector.load %arg5[%c0_9, %c0_10] : memref<8x1xf32, #tpu.memory_space<vmem>>, vector<8x1xf32>
    tpu.vector_store %arg5[%c0_9, %c0_10], %19 {strides = array<i32>} : memref<8x1xf32, #tpu.memory_space<vmem>>, vector<8x1xf32>,
    %c0_11 = arith.constant 0 : index
    %c0_12 = arith.constant 0 : index
    %24 = vector.load %arg6[%c0_11, %c0_12] : memref<8x1xf32, #tpu.memory_space<vmem>>, vector<8x1xf32>
    tpu.vector_store %arg6[%c0_11, %c0_12], %22 {strides = array<i32>} : memref<8x1xf32, #tpu.memory_space<vmem>>, vector<8x1xf32>,
    %c0_13 = arith.constant 0 : index
    %c0_14 = arith.constant 0 : index
    %c0_15 = arith.constant 0 : index
    %25 = vector.load %arg3[%c0_13, %c0_14, %c0_15] : memref<1x8x1xf32, #tpu.memory_space<vmem>>, vector<1x8x1xf32>
    %26 = vector.shape_cast %25 : vector<1x8x1xf32> to vector<8x1xf32>
    %27 = vector.shape_cast %19 : vector<8x1xf32> to vector<1x8x1xf32>
    tpu.vector_store %arg3[%c0_13, %c0_14, %c0_15], %27 {strides = array<i32>} : memref<1x8x1xf32, #tpu.memory_space<vmem>>, vector<1x8x1xf32>,
    %c0_16 = arith.constant 0 : index
    %c0_17 = arith.constant 0 : index
    %c0_18 = arith.constant 0 : index
    %28 = vector.load %arg4[%c0_16, %c0_17, %c0_18] : memref<1x8x1xf32, #tpu.memory_space<vmem>>, vector<1x8x1xf32>
    %29 = vector.shape_cast %28 : vector<1x8x1xf32> to vector<8x1xf32>
    %30 = vector.shape_cast %22 : vector<8x1xf32> to vector<1x8x1xf32>
    tpu.vector_store %arg4[%c0_16, %c0_17, %c0_18], %30 {strides = array<i32>} : memref<1x8x1xf32, #tpu.memory_space<vmem>>, vector<1x8x1xf32>,
    return
  }
  func.func @transform_0(%arg0: i32, %arg1: i32) -> (i32, i32, i32) {
    %c0_i32 = arith.constant 0 : i32
    %c0_i32_0 = arith.constant 0 : i32
    return %arg0, %c0_i32, %arg1 : i32, i32, i32
  }
  func.func @transform_1(%arg0: i32, %arg1: i32) -> (i32, i32, i32) {
    %c0_i32 = arith.constant 0 : i32
    %c0_i32_0 = arith.constant 0 : i32
    %c0_i32_1 = arith.constant 0 : i32
    return %arg0, %c0_i32, %c0_i32_0 : i32, i32, i32
  }
  func.func @transform_2(%arg0: i32, %arg1: i32) -> (i32, i32, i32) {
    %c0_i32 = arith.constant 0 : i32
    %c0_i32_0 = arith.constant 0 : i32
    %c0_i32_1 = arith.constant 0 : i32
    return %arg0, %c0_i32, %c0_i32_0 : i32, i32, i32
  }
}

module attributes {stable_mosaic.version = 11 : i64} {
  func.func @_plane_stats_kernel(%arg0: i32, %arg1: i32, %arg2: memref<1x8x128xf32, #tpu.memory_space<vmem>>, %arg3: memref<1x8x1xf32, #tpu.memory_space<vmem>>, %arg4: memref<1x1x128xf32, #tpu.memory_space<vmem>>, %arg5: memref<1x1x128xf32, #tpu.memory_space<vmem>>) attributes {dimension_semantics = [#tpu.dimension_semantics<parallel>, #tpu.dimension_semantics<parallel>], iteration_bounds = array<i64: 2, 1>, scalar_prefetch = 0 : i64, scratch_operands = 0 : i64, tpu.core_type = #tpu.core_type<tc>, window_params = [{transform_indices = @transform_0, window_bounds = array<i64: 1, 8, 128>}, {transform_indices = @transform_1, window_bounds = array<i64: 1, 8, 1>}, {transform_indices = @transform_2, window_bounds = array<i64: 1, 1, 128>}, {transform_indices = @transform_3, window_bounds = array<i64: 1, 1, 128>}]} {
    %c0 = arith.constant 0 : index
    %c0_0 = arith.constant 0 : index
    %c0_1 = arith.constant 0 : index
    %0 = vector.load %arg2[%c0, %c0_0, %c0_1] : memref<1x8x128xf32, #tpu.memory_space<vmem>>, vector<1x8x128xf32>
    %1 = vector.shape_cast %0 : vector<1x8x128xf32> to vector<8x128xf32>
    %c0_2 = arith.constant 0 : index
    %c0_3 = arith.constant 0 : index
    %c0_4 = arith.constant 0 : index
    %2 = vector.load %arg3[%c0_2, %c0_3, %c0_4] : memref<1x8x1xf32, #tpu.memory_space<vmem>>, vector<1x8x1xf32>
    %3 = vector.shape_cast %2 : vector<1x8x1xf32> to vector<8x1xf32>
    %4 = vector.broadcast %3 : vector<8x1xf32> to vector<8x128xf32>
    %5 = arith.mulf %1, %4 : vector<8x128xf32>
    %cst = arith.constant dense<0.000000e+00> : vector<128xf32>
    %6 = vector.multi_reduction <add>, %5, %cst [0] : vector<8x128xf32> to vector<128xf32>
    %7 = vector.shape_cast %6 : vector<128xf32> to vector<1x128xf32>
    %cst_5 = arith.constant 1.250000e-01 : f32
    %8 = vector.broadcast %cst_5 : f32 to vector<1x128xf32>
    %9 = arith.mulf %7, %8 : vector<1x128xf32>
    %c0_6 = arith.constant 0 : index
    %c0_7 = arith.constant 0 : index
    %c0_8 = arith.constant 0 : index
    %10 = vector.load %arg4[%c0_6, %c0_7, %c0_8] : memref<1x1x128xf32, #tpu.memory_space<vmem>>, vector<1x1x128xf32>
    %11 = vector.shape_cast %10 : vector<1x1x128xf32> to vector<1x128xf32>
    %12 = vector.shape_cast %9 : vector<1x128xf32> to vector<1x1x128xf32>
    tpu.vector_store %arg4[%c0_6, %c0_7, %c0_8], %12 {strides = array<i32>} : memref<1x1x128xf32, #tpu.memory_space<vmem>>, vector<1x1x128xf32>,
    %cst_9 = arith.constant dense<0xFF800000> : vector<128xf32>
    %13 = vector.multi_reduction <maximumf>, %5, %cst_9 [0] : vector<8x128xf32> to vector<128xf32>
    %14 = vector.shape_cast %13 : vector<128xf32> to vector<1x128xf32>
    %c0_10 = arith.constant 0 : index
    %c0_11 = arith.constant 0 : index
    %c0_12 = arith.constant 0 : index
    %15 = vector.load %arg5[%c0_10, %c0_11, %c0_12] : memref<1x1x128xf32, #tpu.memory_space<vmem>>, vector<1x1x128xf32>
    %16 = vector.shape_cast %15 : vector<1x1x128xf32> to vector<1x128xf32>
    %17 = vector.shape_cast %14 : vector<1x128xf32> to vector<1x1x128xf32>
    tpu.vector_store %arg5[%c0_10, %c0_11, %c0_12], %17 {strides = array<i32>} : memref<1x1x128xf32, #tpu.memory_space<vmem>>, vector<1x1x128xf32>,
    return
  }
  func.func @transform_0(%arg0: i32, %arg1: i32) -> (i32, i32, i32) {
    %c0_i32 = arith.constant 0 : i32
    %c0_i32_0 = arith.constant 0 : i32
    return %arg0, %c0_i32, %arg1 : i32, i32, i32
  }
  func.func @transform_1(%arg0: i32, %arg1: i32) -> (i32, i32, i32) {
    %c0_i32 = arith.constant 0 : i32
    %c0_i32_0 = arith.constant 0 : i32
    %c0_i32_1 = arith.constant 0 : i32
    return %arg0, %c0_i32, %c0_i32_0 : i32, i32, i32
  }
  func.func @transform_2(%arg0: i32, %arg1: i32) -> (i32, i32, i32) {
    %c0_i32 = arith.constant 0 : i32
    %c0_i32_0 = arith.constant 0 : i32
    return %arg0, %c0_i32, %arg1 : i32, i32, i32
  }
  func.func @transform_3(%arg0: i32, %arg1: i32) -> (i32, i32, i32) {
    %c0_i32 = arith.constant 0 : i32
    %c0_i32_0 = arith.constant 0 : i32
    return %arg0, %c0_i32, %arg1 : i32, i32, i32
  }
}

module attributes {stable_mosaic.version = 11 : i64} {
  func.func @kern(%arg0: i32, %arg1: i32, %arg2: memref<1x8x128xf32, #tpu.memory_space<vmem>>, %arg3: memref<1x8x1xf32, #tpu.memory_space<vmem>>, %arg4: memref<1x1x128xf32, #tpu.memory_space<vmem>>, %arg5: memref<1x8x128xbf16, #tpu.memory_space<vmem>>) attributes {dimension_semantics = [#tpu.dimension_semantics<parallel>, #tpu.dimension_semantics<parallel>], iteration_bounds = array<i64: 2, 1>, scalar_prefetch = 0 : i64, scratch_operands = 0 : i64, tpu.core_type = #tpu.core_type<tc>, window_params = [{transform_indices = @transform_0, window_bounds = array<i64: 1, 8, 128>}, {transform_indices = @transform_1, window_bounds = array<i64: 1, 8, 1>}, {transform_indices = @transform_2, window_bounds = array<i64: 1, 1, 128>}, {transform_indices = @transform_3, window_bounds = array<i64: 1, 8, 128>}]} {
    %c0 = arith.constant 0 : index
    %c0_0 = arith.constant 0 : index
    %c0_1 = arith.constant 0 : index
    %0 = vector.load %arg2[%c0, %c0_0, %c0_1] : memref<1x8x128xf32, #tpu.memory_space<vmem>>, vector<1x8x128xf32>
    %1 = vector.shape_cast %0 : vector<1x8x128xf32> to vector<8x128xf32>
    %c0_2 = arith.constant 0 : index
    %c0_3 = arith.constant 0 : index
    %c0_4 = arith.constant 0 : index
    %2 = vector.load %arg3[%c0_2, %c0_3, %c0_4] : memref<1x8x1xf32, #tpu.memory_space<vmem>>, vector<1x8x1xf32>
    %3 = vector.shape_cast %2 : vector<1x8x1xf32> to vector<8x1xf32>
    %4 = vector.broadcast %3 : vector<8x1xf32> to vector<8x128xf32>
    %5 = arith.mulf %1, %4 : vector<8x128xf32>
    %c0_5 = arith.constant 0 : index
    %c0_6 = arith.constant 0 : index
    %c0_7 = arith.constant 0 : index
    %6 = vector.load %arg4[%c0_5, %c0_6, %c0_7] : memref<1x1x128xf32, #tpu.memory_space<vmem>>, vector<1x1x128xf32>
    %7 = vector.shape_cast %6 : vector<1x1x128xf32> to vector<1x128xf32>
    %8 = arith.negf %7 : vector<1x128xf32>
    %9 = math.exp %8 : vector<1x128xf32>
    %cst = arith.constant 1.000000e+00 : f32
    %10 = vector.broadcast %cst : f32 to vector<1x128xf32>
    %11 = arith.addf %10, %9 : vector<1x128xf32>
    %12 = arith.divf %10, %11 : vector<1x128xf32>
    %13 = vector.broadcast %12 : vector<1x128xf32> to vector<8x128xf32>
    %14 = arith.mulf %5, %13 : vector<8x128xf32>
    %15 = arith.truncf %14 : vector<8x128xf32> to vector<8x128xbf16>
    %c0_8 = arith.constant 0 : index
    %c0_9 = arith.constant 0 : index
    %c0_10 = arith.constant 0 : index
    %16 = vector.load %arg5[%c0_8, %c0_9, %c0_10] : memref<1x8x128xbf16, #tpu.memory_space<vmem>>, vector<1x8x128xbf16>
    %17 = vector.shape_cast %16 : vector<1x8x128xbf16> to vector<8x128xbf16>
    %18 = vector.shape_cast %15 : vector<8x128xbf16> to vector<1x8x128xbf16>
    tpu.vector_store %arg5[%c0_8, %c0_9, %c0_10], %18 {strides = array<i32>} : memref<1x8x128xbf16, #tpu.memory_space<vmem>>, vector<1x8x128xbf16>,
    return
  }
  func.func @transform_0(%arg0: i32, %arg1: i32) -> (i32, i32, i32) {
    %c0_i32 = arith.constant 0 : i32
    %c0_i32_0 = arith.constant 0 : i32
    return %arg0, %c0_i32, %arg1 : i32, i32, i32
  }
  func.func @transform_1(%arg0: i32, %arg1: i32) -> (i32, i32, i32) {
    %c0_i32 = arith.constant 0 : i32
    %c0_i32_0 = arith.constant 0 : i32
    %c0_i32_1 = arith.constant 0 : i32
    return %arg0, %c0_i32, %c0_i32_0 : i32, i32, i32
  }
  func.func @transform_2(%arg0: i32, %arg1: i32) -> (i32, i32, i32) {
    %c0_i32 = arith.constant 0 : i32
    %c0_i32_0 = arith.constant 0 : i32
    return %arg0, %c0_i32, %arg1 : i32, i32, i32
  }
  func.func @transform_3(%arg0: i32, %arg1: i32) -> (i32, i32, i32) {
    %c0_i32 = arith.constant 0 : i32
    %c0_i32_0 = arith.constant 0 : i32
    return %arg0, %c0_i32, %arg1 : i32, i32, i32
  }
}

module attributes {stable_mosaic.version = 11 : i64} {
  func.func @kern(%arg0: i32, %arg1: memref<98xf32, #tpu.memory_space<smem>>, %arg2: memref<1x2x14x14xf32, #tpu.memory_space<vmem>>, %arg3: memref<1x1x8x8xf32, #tpu.memory_space<vmem>>) attributes {dimension_semantics = [#tpu.dimension_semantics<parallel>], iteration_bounds = array<i64: 2>, scalar_prefetch = 0 : i64, scratch_operands = 0 : i64, tpu.core_type = #tpu.core_type<tc>, window_params = [{transform_indices = @transform_0, window_bounds = array<i64: 98>}, {transform_indices = @transform_1, window_bounds = array<i64: 1, 2, 14, 14>}, {transform_indices = @transform_2, window_bounds = array<i64: 1, 1, 8, 8>}]} {
    %cst = arith.constant 0.000000e+00 : f32
    %0 = vector.broadcast %cst : f32 to vector<8x8xf32>
    %c0 = arith.constant 0 : index
    %c0_0 = arith.constant 0 : index
    %c0_1 = arith.constant 0 : index
    %c0_2 = arith.constant 0 : index
    %1 = vector.load %arg2[%c0, %c0_0, %c0_1, %c0_2] : memref<1x2x14x14xf32, #tpu.memory_space<vmem>>, vector<1x1x8x8xf32>
    %2 = vector.shape_cast %1 : vector<1x1x8x8xf32> to vector<8x8xf32>
    %c0_3 = arith.constant 0 : index
    %3 = memref.load %arg1[%c0_3] : memref<98xf32, #tpu.memory_space<smem>>
    %4 = vector.broadcast %3 : f32 to vector<8x8xf32>
    %5 = arith.mulf %4, %2 : vector<8x8xf32>
    %6 = arith.addf %0, %5 : vector<8x8xf32>
    %c0_4 = arith.constant 0 : index
    %c0_5 = arith.constant 0 : index
    %c0_6 = arith.constant 0 : index
    %c1 = arith.constant 1 : index
    %7 = vector.load %arg2[%c0_4, %c0_5, %c0_6, %c1] : memref<1x2x14x14xf32, #tpu.memory_space<vmem>>, vector<1x1x8x8xf32>
    %8 = vector.shape_cast %7 : vector<1x1x8x8xf32> to vector<8x8xf32>
    %c1_7 = arith.constant 1 : index
    %9 = memref.load %arg1[%c1_7] : memref<98xf32, #tpu.memory_space<smem>>
    %10 = vector.broadcast %9 : f32 to vector<8x8xf32>
    %11 = arith.mulf %10, %8 : vector<8x8xf32>
    %12 = arith.addf %6, %11 : vector<8x8xf32>
    %c0_8 = arith.constant 0 : index
    %c0_9 = arith.constant 0 : index
    %c0_10 = arith.constant 0 : index
    %c2 = arith.constant 2 : index
    %13 = vector.load %arg2[%c0_8, %c0_9, %c0_10, %c2] : memref<1x2x14x14xf32, #tpu.memory_space<vmem>>, vector<1x1x8x8xf32>
    %14 = vector.shape_cast %13 : vector<1x1x8x8xf32> to vector<8x8xf32>
    %c2_11 = arith.constant 2 : index
    %15 = memref.load %arg1[%c2_11] : memref<98xf32, #tpu.memory_space<smem>>
    %16 = vector.broadcast %15 : f32 to vector<8x8xf32>
    %17 = arith.mulf %16, %14 : vector<8x8xf32>
    %18 = arith.addf %12, %17 : vector<8x8xf32>
    %c0_12 = arith.constant 0 : index
    %c0_13 = arith.constant 0 : index
    %c0_14 = arith.constant 0 : index
    %c3 = arith.constant 3 : index
    %19 = vector.load %arg2[%c0_12, %c0_13, %c0_14, %c3] : memref<1x2x14x14xf32, #tpu.memory_space<vmem>>, vector<1x1x8x8xf32>
    %20 = vector.shape_cast %19 : vector<1x1x8x8xf32> to vector<8x8xf32>
    %c3_15 = arith.constant 3 : index
    %21 = memref.load %arg1[%c3_15] : memref<98xf32, #tpu.memory_space<smem>>
    %22 = vector.broadcast %21 : f32 to vector<8x8xf32>
    %23 = arith.mulf %22, %20 : vector<8x8xf32>
    %24 = arith.addf %18, %23 : vector<8x8xf32>
    %c0_16 = arith.constant 0 : index
    %c0_17 = arith.constant 0 : index
    %c0_18 = arith.constant 0 : index
    %c4 = arith.constant 4 : index
    %25 = vector.load %arg2[%c0_16, %c0_17, %c0_18, %c4] : memref<1x2x14x14xf32, #tpu.memory_space<vmem>>, vector<1x1x8x8xf32>
    %26 = vector.shape_cast %25 : vector<1x1x8x8xf32> to vector<8x8xf32>
    %c4_19 = arith.constant 4 : index
    %27 = memref.load %arg1[%c4_19] : memref<98xf32, #tpu.memory_space<smem>>
    %28 = vector.broadcast %27 : f32 to vector<8x8xf32>
    %29 = arith.mulf %28, %26 : vector<8x8xf32>
    %30 = arith.addf %24, %29 : vector<8x8xf32>
    %c0_20 = arith.constant 0 : index
    %c0_21 = arith.constant 0 : index
    %c0_22 = arith.constant 0 : index
    %c5 = arith.constant 5 : index
    %31 = vector.load %arg2[%c0_20, %c0_21, %c0_22, %c5] : memref<1x2x14x14xf32, #tpu.memory_space<vmem>>, vector<1x1x8x8xf32>
    %32 = vector.shape_cast %31 : vector<1x1x8x8xf32> to vector<8x8xf32>
    %c5_23 = arith.constant 5 : index
    %33 = memref.load %arg1[%c5_23] : memref<98xf32, #tpu.memory_space<smem>>
    %34 = vector.broadcast %33 : f32 to vector<8x8xf32>
    %35 = arith.mulf %34, %32 : vector<8x8xf32>
    %36 = arith.addf %30, %35 : vector<8x8xf32>
    %c0_24 = arith.constant 0 : index
    %c0_25 = arith.constant 0 : index
    %c0_26 = arith.constant 0 : index
    %c6 = arith.constant 6 : index
    %37 = vector.load %arg2[%c0_24, %c0_25, %c0_26, %c6] : memref<1x2x14x14xf32, #tpu.memory_space<vmem>>, vector<1x1x8x8xf32>
    %38 = vector.shape_cast %37 : vector<1x1x8x8xf32> to vector<8x8xf32>
    %c6_27 = arith.constant 6 : index
    %39 = memref.load %arg1[%c6_27] : memref<98xf32, #tpu.memory_space<smem>>
    %40 = vector.broadcast %39 : f32 to vector<8x8xf32>
    %41 = arith.mulf %40, %38 : vector<8x8xf32>
    %42 = arith.addf %36, %41 : vector<8x8xf32>
    %c0_28 = arith.constant 0 : index
    %c0_29 = arith.constant 0 : index
    %c1_30 = arith.constant 1 : index
    %c0_31 = arith.constant 0 : index
    %43 = vector.load %arg2[%c0_28, %c0_29, %c1_30, %c0_31] : memref<1x2x14x14xf32, #tpu.memory_space<vmem>>, vector<1x1x8x8xf32>
    %44 = vector.shape_cast %43 : vector<1x1x8x8xf32> to vector<8x8xf32>
    %c7 = arith.constant 7 : index
    %45 = memref.load %arg1[%c7] : memref<98xf32, #tpu.memory_space<smem>>
    %46 = vector.broadcast %45 : f32 to vector<8x8xf32>
    %47 = arith.mulf %46, %44 : vector<8x8xf32>
    %48 = arith.addf %42, %47 : vector<8x8xf32>
    %c0_32 = arith.constant 0 : index
    %c0_33 = arith.constant 0 : index
    %c1_34 = arith.constant 1 : index
    %c1_35 = arith.constant 1 : index
    %49 = vector.load %arg2[%c0_32, %c0_33, %c1_34, %c1_35] : memref<1x2x14x14xf32, #tpu.memory_space<vmem>>, vector<1x1x8x8xf32>
    %50 = vector.shape_cast %49 : vector<1x1x8x8xf32> to vector<8x8xf32>
    %c8 = arith.constant 8 : index
    %51 = memref.load %arg1[%c8] : memref<98xf32, #tpu.memory_space<smem>>
    %52 = vector.broadcast %51 : f32 to vector<8x8xf32>
    %53 = arith.mulf %52, %50 : vector<8x8xf32>
    %54 = arith.addf %48, %53 : vector<8x8xf32>
    %c0_36 = arith.constant 0 : index
    %c0_37 = arith.constant 0 : index
    %c1_38 = arith.constant 1 : index
    %c2_39 = arith.constant 2 : index
    %55 = vector.load %arg2[%c0_36, %c0_37, %c1_38, %c2_39] : memref<1x2x14x14xf32, #tpu.memory_space<vmem>>, vector<1x1x8x8xf32>
    %56 = vector.shape_cast %55 : vector<1x1x8x8xf32> to vector<8x8xf32>
    %c9 = arith.constant 9 : index
    %57 = memref.load %arg1[%c9] : memref<98xf32, #tpu.memory_space<smem>>
    %58 = vector.broadcast %57 : f32 to vector<8x8xf32>
    %59 = arith.mulf %58, %56 : vector<8x8xf32>
    %60 = arith.addf %54, %59 : vector<8x8xf32>
    %c0_40 = arith.constant 0 : index
    %c0_41 = arith.constant 0 : index
    %c1_42 = arith.constant 1 : index
    %c3_43 = arith.constant 3 : index
    %61 = vector.load %arg2[%c0_40, %c0_41, %c1_42, %c3_43] : memref<1x2x14x14xf32, #tpu.memory_space<vmem>>, vector<1x1x8x8xf32>
    %62 = vector.shape_cast %61 : vector<1x1x8x8xf32> to vector<8x8xf32>
    %c10 = arith.constant 10 : index
    %63 = memref.load %arg1[%c10] : memref<98xf32, #tpu.memory_space<smem>>
    %64 = vector.broadcast %63 : f32 to vector<8x8xf32>
    %65 = arith.mulf %64, %62 : vector<8x8xf32>
    %66 = arith.addf %60, %65 : vector<8x8xf32>
    %c0_44 = arith.constant 0 : index
    %c0_45 = arith.constant 0 : index
    %c1_46 = arith.constant 1 : index
    %c4_47 = arith.constant 4 : index
    %67 = vector.load %arg2[%c0_44, %c0_45, %c1_46, %c4_47] : memref<1x2x14x14xf32, #tpu.memory_space<vmem>>, vector<1x1x8x8xf32>
    %68 = vector.shape_cast %67 : vector<1x1x8x8xf32> to vector<8x8xf32>
    %c11 = arith.constant 11 : index
    %69 = memref.load %arg1[%c11] : memref<98xf32, #tpu.memory_space<smem>>
    %70 = vector.broadcast %69 : f32 to vector<8x8xf32>
    %71 = arith.mulf %70, %68 : vector<8x8xf32>
    %72 = arith.addf %66, %71 : vector<8x8xf32>
    %c0_48 = arith.constant 0 : index
    %c0_49 = arith.constant 0 : index
    %c1_50 = arith.constant 1 : index
    %c5_51 = arith.constant 5 : index
    %73 = vector.load %arg2[%c0_48, %c0_49, %c1_50, %c5_51] : memref<1x2x14x14xf32, #tpu.memory_space<vmem>>, vector<1x1x8x8xf32>
    %74 = vector.shape_cast %73 : vector<1x1x8x8xf32> to vector<8x8xf32>
    %c12 = arith.constant 12 : index
    %75 = memref.load %arg1[%c12] : memref<98xf32, #tpu.memory_space<smem>>
    %76 = vector.broadcast %75 : f32 to vector<8x8xf32>
    %77 = arith.mulf %76, %74 : vector<8x8xf32>
    %78 = arith.addf %72, %77 : vector<8x8xf32>
    %c0_52 = arith.constant 0 : index
    %c0_53 = arith.constant 0 : index
    %c1_54 = arith.constant 1 : index
    %c6_55 = arith.constant 6 : index
    %79 = vector.load %arg2[%c0_52, %c0_53, %c1_54, %c6_55] : memref<1x2x14x14xf32, #tpu.memory_space<vmem>>, vector<1x1x8x8xf32>
    %80 = vector.shape_cast %79 : vector<1x1x8x8xf32> to vector<8x8xf32>
    %c13 = arith.constant 13 : index
    %81 = memref.load %arg1[%c13] : memref<98xf32, #tpu.memory_space<smem>>
    %82 = vector.broadcast %81 : f32 to vector<8x8xf32>
    %83 = arith.mulf %82, %80 : vector<8x8xf32>
    %84 = arith.addf %78, %83 : vector<8x8xf32>
    %c0_56 = arith.constant 0 : index
    %c0_57 = arith.constant 0 : index
    %c2_58 = arith.constant 2 : index
    %c0_59 = arith.constant 0 : index
    %85 = vector.load %arg2[%c0_56, %c0_57, %c2_58, %c0_59] : memref<1x2x14x14xf32, #tpu.memory_space<vmem>>, vector<1x1x8x8xf32>
    %86 = vector.shape_cast %85 : vector<1x1x8x8xf32> to vector<8x8xf32>
    %c14 = arith.constant 14 : index
    %87 = memref.load %arg1[%c14] : memref<98xf32, #tpu.memory_space<smem>>
    %88 = vector.broadcast %87 : f32 to vector<8x8xf32>
    %89 = arith.mulf %88, %86 : vector<8x8xf32>
    %90 = arith.addf %84, %89 : vector<8x8xf32>
    %c0_60 = arith.constant 0 : index
    %c0_61 = arith.constant 0 : index
    %c2_62 = arith.constant 2 : index
    %c1_63 = arith.constant 1 : index
    %91 = vector.load %arg2[%c0_60, %c0_61, %c2_62, %c1_63] : memref<1x2x14x14xf32, #tpu.memory_space<vmem>>, vector<1x1x8x8xf32>
    %92 = vector.shape_cast %91 : vector<1x1x8x8xf32> to vector<8x8xf32>
    %c15 = arith.constant 15 : index
    %93 = memref.load %arg1[%c15] : memref<98xf32, #tpu.memory_space<smem>>
    %94 = vector.broadcast %93 : f32 to vector<8x8xf32>
    %95 = arith.mulf %94, %92 : vector<8x8xf32>
    %96 = arith.addf %90, %95 : vector<8x8xf32>
    %c0_64 = arith.constant 0 : index
    %c0_65 = arith.constant 0 : index
    %c2_66 = arith.constant 2 : index
    %c2_67 = arith.constant 2 : index
    %97 = vector.load %arg2[%c0_64, %c0_65, %c2_66, %c2_67] : memref<1x2x14x14xf32, #tpu.memory_space<vmem>>, vector<1x1x8x8xf32>
    %98 = vector.shape_cast %97 : vector<1x1x8x8xf32> to vector<8x8xf32>
    %c16 = arith.constant 16 : index
    %99 = memref.load %arg1[%c16] : memref<98xf32, #tpu.memory_space<smem>>
    %100 = vector.broadcast %99 : f32 to vector<8x8xf32>
    %101 = arith.mulf %100, %98 : vector<8x8xf32>
    %102 = arith.addf %96, %101 : vector<8x8xf32>
    %c0_68 = arith.constant 0 : index
    %c0_69 = arith.constant 0 : index
    %c2_70 = arith.constant 2 : index
    %c3_71 = arith.constant 3 : index
    %103 = vector.load %arg2[%c0_68, %c0_69, %c2_70, %c3_71] : memref<1x2x14x14xf32, #tpu.memory_space<vmem>>, vector<1x1x8x8xf32>
    %104 = vector.shape_cast %103 : vector<1x1x8x8xf32> to vector<8x8xf32>
    %c17 = arith.constant 17 : index
    %105 = memref.load %arg1[%c17] : memref<98xf32, #tpu.memory_space<smem>>
    %106 = vector.broadcast %105 : f32 to vector<8x8xf32>
    %107 = arith.mulf %106, %104 : vector<8x8xf32>
    %108 = arith.addf %102, %107 : vector<8x8xf32>
    %c0_72 = arith.constant 0 : index
    %c0_73 = arith.constant 0 : index
    %c2_74 = arith.constant 2 : index
    %c4_75 = arith.constant 4 : index
    %109 = vector.load %arg2[%c0_72, %c0_73, %c2_74, %c4_75] : memref<1x2x14x14xf32, #tpu.memory_space<vmem>>, vector<1x1x8x8xf32>
    %110 = vector.shape_cast %109 : vector<1x1x8x8xf32> to vector<8x8xf32>
    %c18 = arith.constant 18 : index
    %111 = memref.load %arg1[%c18] : memref<98xf32, #tpu.memory_space<smem>>
    %112 = vector.broadcast %111 : f32 to vector<8x8xf32>
    %113 = arith.mulf %112, %110 : vector<8x8xf32>
    %114 = arith.addf %108, %113 : vector<8x8xf32>
    %c0_76 = arith.constant 0 : index
    %c0_77 = arith.constant 0 : index
    %c2_78 = arith.constant 2 : index
    %c5_79 = arith.constant 5 : index
    %115 = vector.load %arg2[%c0_76, %c0_77, %c2_78, %c5_79] : memref<1x2x14x14xf32, #tpu.memory_space<vmem>>, vector<1x1x8x8xf32>
    %116 = vector.shape_cast %115 : vector<1x1x8x8xf32> to vector<8x8xf32>
    %c19 = arith.constant 19 : index
    %117 = memref.load %arg1[%c19] : memref<98xf32, #tpu.memory_space<smem>>
    %118 = vector.broadcast %117 : f32 to vector<8x8xf32>
    %119 = arith.mulf %118, %116 : vector<8x8xf32>
    %120 = arith.addf %114, %119 : vector<8x8xf32>
    %c0_80 = arith.constant 0 : index
    %c0_81 = arith.constant 0 : index
    %c2_82 = arith.constant 2 : index
    %c6_83 = arith.constant 6 : index
    %121 = vector.load %arg2[%c0_80, %c0_81, %c2_82, %c6_83] : memref<1x2x14x14xf32, #tpu.memory_space<vmem>>, vector<1x1x8x8xf32>
    %122 = vector.shape_cast %121 : vector<1x1x8x8xf32> to vector<8x8xf32>
    %c20 = arith.constant 20 : index
    %123 = memref.load %arg1[%c20] : memref<98xf32, #tpu.memory_space<smem>>
    %124 = vector.broadcast %123 : f32 to vector<8x8xf32>
    %125 = arith.mulf %124, %122 : vector<8x8xf32>
    %126 = arith.addf %120, %125 : vector<8x8xf32>
    %c0_84 = arith.constant 0 : index
    %c0_85 = arith.constant 0 : index
    %c3_86 = arith.constant 3 : index
    %c0_87 = arith.constant 0 : index
    %127 = vector.load %arg2[%c0_84, %c0_85, %c3_86, %c0_87] : memref<1x2x14x14xf32, #tpu.memory_space<vmem>>, vector<1x1x8x8xf32>
    %128 = vector.shape_cast %127 : vector<1x1x8x8xf32> to vector<8x8xf32>
    %c21 = arith.constant 21 : index
    %129 = memref.load %arg1[%c21] : memref<98xf32, #tpu.memory_space<smem>>
    %130 = vector.broadcast %129 : f32 to vector<8x8xf32>
    %131 = arith.mulf %130, %128 : vector<8x8xf32>
    %132 = arith.addf %126, %131 : vector<8x8xf32>
    %c0_88 = arith.constant 0 : index
    %c0_89 = arith.constant 0 : index
    %c3_90 = arith.constant 3 : index
    %c1_91 = arith.constant 1 : index
    %133 = vector.load %arg2[%c0_88, %c0_89, %c3_90, %c1_91] : memref<1x2x14x14xf32, #tpu.memory_space<vmem>>, vector<1x1x8x8xf32>
    %134 = vector.shape_cast %133 : vector<1x1x8x8xf32> to vector<8x8xf32>
    %c22 = arith.constant 22 : index
    %135 = memref.load %arg1[%c22] : memref<98xf32, #tpu.memory_space<smem>>
    %136 = vector.broadcast %135 : f32 to vector<8x8xf32>
    %137 = arith.mulf %136, %134 : vector<8x8xf32>
    %138 = arith.addf %132, %137 : vector<8x8xf32>
    %c0_92 = arith.constant 0 : index
    %c0_93 = arith.constant 0 : index
    %c3_94 = arith.constant 3 : index
    %c2_95 = arith.constant 2 : index
    %139 = vector.load %arg2[%c0_92, %c0_93, %c3_94, %c2_95] : memref<1x2x14x14xf32, #tpu.memory_space<vmem>>, vector<1x1x8x8xf32>
    %140 = vector.shape_cast %139 : vector<1x1x8x8xf32> to vector<8x8xf32>
    %c23 = arith.constant 23 : index
    %141 = memref.load %arg1[%c23] : memref<98xf32, #tpu.memory_space<smem>>
    %142 = vector.broadcast %141 : f32 to vector<8x8xf32>
    %143 = arith.mulf %142, %140 : vector<8x8xf32>
    %144 = arith.addf %138, %143 : vector<8x8xf32>
    %c0_96 = arith.constant 0 : index
    %c0_97 = arith.constant 0 : index
    %c3_98 = arith.constant 3 : index
    %c3_99 = arith.constant 3 : index
    %145 = vector.load %arg2[%c0_96, %c0_97, %c3_98, %c3_99] : memref<1x2x14x14xf32, #tpu.memory_space<vmem>>, vector<1x1x8x8xf32>
    %146 = vector.shape_cast %145 : vector<1x1x8x8xf32> to vector<8x8xf32>
    %c24 = arith.constant 24 : index
    %147 = memref.load %arg1[%c24] : memref<98xf32, #tpu.memory_space<smem>>
    %148 = vector.broadcast %147 : f32 to vector<8x8xf32>
    %149 = arith.mulf %148, %146 : vector<8x8xf32>
    %150 = arith.addf %144, %149 : vector<8x8xf32>
    %c0_100 = arith.constant 0 : index
    %c0_101 = arith.constant 0 : index
    %c3_102 = arith.constant 3 : index
    %c4_103 = arith.constant 4 : index
    %151 = vector.load %arg2[%c0_100, %c0_101, %c3_102, %c4_103] : memref<1x2x14x14xf32, #tpu.memory_space<vmem>>, vector<1x1x8x8xf32>
    %152 = vector.shape_cast %151 : vector<1x1x8x8xf32> to vector<8x8xf32>
    %c25 = arith.constant 25 : index
    %153 = memref.load %arg1[%c25] : memref<98xf32, #tpu.memory_space<smem>>
    %154 = vector.broadcast %153 : f32 to vector<8x8xf32>
    %155 = arith.mulf %154, %152 : vector<8x8xf32>
    %156 = arith.addf %150, %155 : vector<8x8xf32>
    %c0_104 = arith.constant 0 : index
    %c0_105 = arith.constant 0 : index
    %c3_106 = arith.constant 3 : index
    %c5_107 = arith.constant 5 : index
    %157 = vector.load %arg2[%c0_104, %c0_105, %c3_106, %c5_107] : memref<1x2x14x14xf32, #tpu.memory_space<vmem>>, vector<1x1x8x8xf32>
    %158 = vector.shape_cast %157 : vector<1x1x8x8xf32> to vector<8x8xf32>
    %c26 = arith.constant 26 : index
    %159 = memref.load %arg1[%c26] : memref<98xf32, #tpu.memory_space<smem>>
    %160 = vector.broadcast %159 : f32 to vector<8x8xf32>
    %161 = arith.mulf %160, %158 : vector<8x8xf32>
    %162 = arith.addf %156, %161 : vector<8x8xf32>
    %c0_108 = arith.constant 0 : index
    %c0_109 = arith.constant 0 : index
    %c3_110 = arith.constant 3 : index
    %c6_111 = arith.constant 6 : index
    %163 = vector.load %arg2[%c0_108, %c0_109, %c3_110, %c6_111] : memref<1x2x14x14xf32, #tpu.memory_space<vmem>>, vector<1x1x8x8xf32>
    %164 = vector.shape_cast %163 : vector<1x1x8x8xf32> to vector<8x8xf32>
    %c27 = arith.constant 27 : index
    %165 = memref.load %arg1[%c27] : memref<98xf32, #tpu.memory_space<smem>>
    %166 = vector.broadcast %165 : f32 to vector<8x8xf32>
    %167 = arith.mulf %166, %164 : vector<8x8xf32>
    %168 = arith.addf %162, %167 : vector<8x8xf32>
    %c0_112 = arith.constant 0 : index
    %c0_113 = arith.constant 0 : index
    %c4_114 = arith.constant 4 : index
    %c0_115 = arith.constant 0 : index
    %169 = vector.load %arg2[%c0_112, %c0_113, %c4_114, %c0_115] : memref<1x2x14x14xf32, #tpu.memory_space<vmem>>, vector<1x1x8x8xf32>
    %170 = vector.shape_cast %169 : vector<1x1x8x8xf32> to vector<8x8xf32>
    %c28 = arith.constant 28 : index
    %171 = memref.load %arg1[%c28] : memref<98xf32, #tpu.memory_space<smem>>
    %172 = vector.broadcast %171 : f32 to vector<8x8xf32>
    %173 = arith.mulf %172, %170 : vector<8x8xf32>
    %174 = arith.addf %168, %173 : vector<8x8xf32>
    %c0_116 = arith.constant 0 : index
    %c0_117 = arith.constant 0 : index
    %c4_118 = arith.constant 4 : index
    %c1_119 = arith.constant 1 : index
    %175 = vector.load %arg2[%c0_116, %c0_117, %c4_118, %c1_119] : memref<1x2x14x14xf32, #tpu.memory_space<vmem>>, vector<1x1x8x8xf32>
    %176 = vector.shape_cast %175 : vector<1x1x8x8xf32> to vector<8x8xf32>
    %c29 = arith.constant 29 : index
    %177 = memref.load %arg1[%c29] : memref<98xf32, #tpu.memory_space<smem>>
    %178 = vector.broadcast %177 : f32 to vector<8x8xf32>
    %179 = arith.mulf %178, %176 : vector<8x8xf32>
    %180 = arith.addf %174, %179 : vector<8x8xf32>
    %c0_120 = arith.constant 0 : index
    %c0_121 = arith.constant 0 : index
    %c4_122 = arith.constant 4 : index
    %c2_123 = arith.constant 2 : index
    %181 = vector.load %arg2[%c0_120, %c0_121, %c4_122, %c2_123] : memref<1x2x14x14xf32, #tpu.memory_space<vmem>>, vector<1x1x8x8xf32>
    %182 = vector.shape_cast %181 : vector<1x1x8x8xf32> to vector<8x8xf32>
    %c30 = arith.constant 30 : index
    %183 = memref.load %arg1[%c30] : memref<98xf32, #tpu.memory_space<smem>>
    %184 = vector.broadcast %183 : f32 to vector<8x8xf32>
    %185 = arith.mulf %184, %182 : vector<8x8xf32>
    %186 = arith.addf %180, %185 : vector<8x8xf32>
    %c0_124 = arith.constant 0 : index
    %c0_125 = arith.constant 0 : index
    %c4_126 = arith.constant 4 : index
    %c3_127 = arith.constant 3 : index
    %187 = vector.load %arg2[%c0_124, %c0_125, %c4_126, %c3_127] : memref<1x2x14x14xf32, #tpu.memory_space<vmem>>, vector<1x1x8x8xf32>
    %188 = vector.shape_cast %187 : vector<1x1x8x8xf32> to vector<8x8xf32>
    %c31 = arith.constant 31 : index
    %189 = memref.load %arg1[%c31] : memref<98xf32, #tpu.memory_space<smem>>
    %190 = vector.broadcast %189 : f32 to vector<8x8xf32>
    %191 = arith.mulf %190, %188 : vector<8x8xf32>
    %192 = arith.addf %186, %191 : vector<8x8xf32>
    %c0_128 = arith.constant 0 : index
    %c0_129 = arith.constant 0 : index
    %c4_130 = arith.constant 4 : index
    %c4_131 = arith.constant 4 : index
    %193 = vector.load %arg2[%c0_128, %c0_129, %c4_130, %c4_131] : memref<1x2x14x14xf32, #tpu.memory_space<vmem>>, vector<1x1x8x8xf32>
    %194 = vector.shape_cast %193 : vector<1x1x8x8xf32> to vector<8x8xf32>
    %c32 = arith.constant 32 : index
    %195 = memref.load %arg1[%c32] : memref<98xf32, #tpu.memory_space<smem>>
    %196 = vector.broadcast %195 : f32 to vector<8x8xf32>
    %197 = arith.mulf %196, %194 : vector<8x8xf32>
    %198 = arith.addf %192, %197 : vector<8x8xf32>
    %c0_132 = arith.constant 0 : index
    %c0_133 = arith.constant 0 : index
    %c4_134 = arith.constant 4 : index
    %c5_135 = arith.constant 5 : index
    %199 = vector.load %arg2[%c0_132, %c0_133, %c4_134, %c5_135] : memref<1x2x14x14xf32, #tpu.memory_space<vmem>>, vector<1x1x8x8xf32>
    %200 = vector.shape_cast %199 : vector<1x1x8x8xf32> to vector<8x8xf32>
    %c33 = arith.constant 33 : index
    %201 = memref.load %arg1[%c33] : memref<98xf32, #tpu.memory_space<smem>>
    %202 = vector.broadcast %201 : f32 to vector<8x8xf32>
    %203 = arith.mulf %202, %200 : vector<8x8xf32>
    %204 = arith.addf %198, %203 : vector<8x8xf32>
    %c0_136 = arith.constant 0 : index
    %c0_137 = arith.constant 0 : index
    %c4_138 = arith.constant 4 : index
    %c6_139 = arith.constant 6 : index
    %205 = vector.load %arg2[%c0_136, %c0_137, %c4_138, %c6_139] : memref<1x2x14x14xf32, #tpu.memory_space<vmem>>, vector<1x1x8x8xf32>
    %206 = vector.shape_cast %205 : vector<1x1x8x8xf32> to vector<8x8xf32>
    %c34 = arith.constant 34 : index
    %207 = memref.load %arg1[%c34] : memref<98xf32, #tpu.memory_space<smem>>
    %208 = vector.broadcast %207 : f32 to vector<8x8xf32>
    %209 = arith.mulf %208, %206 : vector<8x8xf32>
    %210 = arith.addf %204, %209 : vector<8x8xf32>
    %c0_140 = arith.constant 0 : index
    %c0_141 = arith.constant 0 : index
    %c5_142 = arith.constant 5 : index
    %c0_143 = arith.constant 0 : index
    %211 = vector.load %arg2[%c0_140, %c0_141, %c5_142, %c0_143] : memref<1x2x14x14xf32, #tpu.memory_space<vmem>>, vector<1x1x8x8xf32>
    %212 = vector.shape_cast %211 : vector<1x1x8x8xf32> to vector<8x8xf32>
    %c35 = arith.constant 35 : index
    %213 = memref.load %arg1[%c35] : memref<98xf32, #tpu.memory_space<smem>>
    %214 = vector.broadcast %213 : f32 to vector<8x8xf32>
    %215 = arith.mulf %214, %212 : vector<8x8xf32>
    %216 = arith.addf %210, %215 : vector<8x8xf32>
    %c0_144 = arith.constant 0 : index
    %c0_145 = arith.constant 0 : index
    %c5_146 = arith.constant 5 : index
    %c1_147 = arith.constant 1 : index
    %217 = vector.load %arg2[%c0_144, %c0_145, %c5_146, %c1_147] : memref<1x2x14x14xf32, #tpu.memory_space<vmem>>, vector<1x1x8x8xf32>
    %218 = vector.shape_cast %217 : vector<1x1x8x8xf32> to vector<8x8xf32>
    %c36 = arith.constant 36 : index
    %219 = memref.load %arg1[%c36] : memref<98xf32, #tpu.memory_space<smem>>
    %220 = vector.broadcast %219 : f32 to vector<8x8xf32>
    %221 = arith.mulf %220, %218 : vector<8x8xf32>
    %222 = arith.addf %216, %221 : vector<8x8xf32>
    %c0_148 = arith.constant 0 : index
    %c0_149 = arith.constant 0 : index
    %c5_150 = arith.constant 5 : index
    %c2_151 = arith.constant 2 : index
    %223 = vector.load %arg2[%c0_148, %c0_149, %c5_150, %c2_151] : memref<1x2x14x14xf32, #tpu.memory_space<vmem>>, vector<1x1x8x8xf32>
    %224 = vector.shape_cast %223 : vector<1x1x8x8xf32> to vector<8x8xf32>
    %c37 = arith.constant 37 : index
    %225 = memref.load %arg1[%c37] : memref<98xf32, #tpu.memory_space<smem>>
    %226 = vector.broadcast %225 : f32 to vector<8x8xf32>
    %227 = arith.mulf %226, %224 : vector<8x8xf32>
    %228 = arith.addf %222, %227 : vector<8x8xf32>
    %c0_152 = arith.constant 0 : index
    %c0_153 = arith.constant 0 : index
    %c5_154 = arith.constant 5 : index
    %c3_155 = arith.constant 3 : index
    %229 = vector.load %arg2[%c0_152, %c0_153, %c5_154, %c3_155] : memref<1x2x14x14xf32, #tpu.memory_space<vmem>>, vector<1x1x8x8xf32>
    %230 = vector.shape_cast %229 : vector<1x1x8x8xf32> to vector<8x8xf32>
    %c38 = arith.constant 38 : index
    %231 = memref.load %arg1[%c38] : memref<98xf32, #tpu.memory_space<smem>>
    %232 = vector.broadcast %231 : f32 to vector<8x8xf32>
    %233 = arith.mulf %232, %230 : vector<8x8xf32>
    %234 = arith.addf %228, %233 : vector<8x8xf32>
    %c0_156 = arith.constant 0 : index
    %c0_157 = arith.constant 0 : index
    %c5_158 = arith.constant 5 : index
    %c4_159 = arith.constant 4 : index
    %235 = vector.load %arg2[%c0_156, %c0_157, %c5_158, %c4_159] : memref<1x2x14x14xf32, #tpu.memory_space<vmem>>, vector<1x1x8x8xf32>
    %236 = vector.shape_cast %235 : vector<1x1x8x8xf32> to vector<8x8xf32>
    %c39 = arith.constant 39 : index
    %237 = memref.load %arg1[%c39] : memref<98xf32, #tpu.memory_space<smem>>
    %238 = vector.broadcast %237 : f32 to vector<8x8xf32>
    %239 = arith.mulf %238, %236 : vector<8x8xf32>
    %240 = arith.addf %234, %239 : vector<8x8xf32>
    %c0_160 = arith.constant 0 : index
    %c0_161 = arith.constant 0 : index
    %c5_162 = arith.constant 5 : index
    %c5_163 = arith.constant 5 : index
    %241 = vector.load %arg2[%c0_160, %c0_161, %c5_162, %c5_163] : memref<1x2x14x14xf32, #tpu.memory_space<vmem>>, vector<1x1x8x8xf32>
    %242 = vector.shape_cast %241 : vector<1x1x8x8xf32> to vector<8x8xf32>
    %c40 = arith.constant 40 : index
    %243 = memref.load %arg1[%c40] : memref<98xf32, #tpu.memory_space<smem>>
    %244 = vector.broadcast %243 : f32 to vector<8x8xf32>
    %245 = arith.mulf %244, %242 : vector<8x8xf32>
    %246 = arith.addf %240, %245 : vector<8x8xf32>
    %c0_164 = arith.constant 0 : index
    %c0_165 = arith.constant 0 : index
    %c5_166 = arith.constant 5 : index
    %c6_167 = arith.constant 6 : index
    %247 = vector.load %arg2[%c0_164, %c0_165, %c5_166, %c6_167] : memref<1x2x14x14xf32, #tpu.memory_space<vmem>>, vector<1x1x8x8xf32>
    %248 = vector.shape_cast %247 : vector<1x1x8x8xf32> to vector<8x8xf32>
    %c41 = arith.constant 41 : index
    %249 = memref.load %arg1[%c41] : memref<98xf32, #tpu.memory_space<smem>>
    %250 = vector.broadcast %249 : f32 to vector<8x8xf32>
    %251 = arith.mulf %250, %248 : vector<8x8xf32>
    %252 = arith.addf %246, %251 : vector<8x8xf32>
    %c0_168 = arith.constant 0 : index
    %c0_169 = arith.constant 0 : index
    %c6_170 = arith.constant 6 : index
    %c0_171 = arith.constant 0 : index
    %253 = vector.load %arg2[%c0_168, %c0_169, %c6_170, %c0_171] : memref<1x2x14x14xf32, #tpu.memory_space<vmem>>, vector<1x1x8x8xf32>
    %254 = vector.shape_cast %253 : vector<1x1x8x8xf32> to vector<8x8xf32>
    %c42 = arith.constant 42 : index
    %255 = memref.load %arg1[%c42] : memref<98xf32, #tpu.memory_space<smem>>
    %256 = vector.broadcast %255 : f32 to vector<8x8xf32>
    %257 = arith.mulf %256, %254 : vector<8x8xf32>
    %258 = arith.addf %252, %257 : vector<8x8xf32>
    %c0_172 = arith.constant 0 : index
    %c0_173 = arith.constant 0 : index
    %c6_174 = arith.constant 6 : index
    %c1_175 = arith.constant 1 : index
    %259 = vector.load %arg2[%c0_172, %c0_173, %c6_174, %c1_175] : memref<1x2x14x14xf32, #tpu.memory_space<vmem>>, vector<1x1x8x8xf32>
    %260 = vector.shape_cast %259 : vector<1x1x8x8xf32> to vector<8x8xf32>
    %c43 = arith.constant 43 : index
    %261 = memref.load %arg1[%c43] : memref<98xf32, #tpu.memory_space<smem>>
    %262 = vector.broadcast %261 : f32 to vector<8x8xf32>
    %263 = arith.mulf %262, %260 : vector<8x8xf32>
    %264 = arith.addf %258, %263 : vector<8x8xf32>
    %c0_176 = arith.constant 0 : index
    %c0_177 = arith.constant 0 : index
    %c6_178 = arith.constant 6 : index
    %c2_179 = arith.constant 2 : index
    %265 = vector.load %arg2[%c0_176, %c0_177, %c6_178, %c2_179] : memref<1x2x14x14xf32, #tpu.memory_space<vmem>>, vector<1x1x8x8xf32>
    %266 = vector.shape_cast %265 : vector<1x1x8x8xf32> to vector<8x8xf32>
    %c44 = arith.constant 44 : index
    %267 = memref.load %arg1[%c44] : memref<98xf32, #tpu.memory_space<smem>>
    %268 = vector.broadcast %267 : f32 to vector<8x8xf32>
    %269 = arith.mulf %268, %266 : vector<8x8xf32>
    %270 = arith.addf %264, %269 : vector<8x8xf32>
    %c0_180 = arith.constant 0 : index
    %c0_181 = arith.constant 0 : index
    %c6_182 = arith.constant 6 : index
    %c3_183 = arith.constant 3 : index
    %271 = vector.load %arg2[%c0_180, %c0_181, %c6_182, %c3_183] : memref<1x2x14x14xf32, #tpu.memory_space<vmem>>, vector<1x1x8x8xf32>
    %272 = vector.shape_cast %271 : vector<1x1x8x8xf32> to vector<8x8xf32>
    %c45 = arith.constant 45 : index
    %273 = memref.load %arg1[%c45] : memref<98xf32, #tpu.memory_space<smem>>
    %274 = vector.broadcast %273 : f32 to vector<8x8xf32>
    %275 = arith.mulf %274, %272 : vector<8x8xf32>
    %276 = arith.addf %270, %275 : vector<8x8xf32>
    %c0_184 = arith.constant 0 : index
    %c0_185 = arith.constant 0 : index
    %c6_186 = arith.constant 6 : index
    %c4_187 = arith.constant 4 : index
    %277 = vector.load %arg2[%c0_184, %c0_185, %c6_186, %c4_187] : memref<1x2x14x14xf32, #tpu.memory_space<vmem>>, vector<1x1x8x8xf32>
    %278 = vector.shape_cast %277 : vector<1x1x8x8xf32> to vector<8x8xf32>
    %c46 = arith.constant 46 : index
    %279 = memref.load %arg1[%c46] : memref<98xf32, #tpu.memory_space<smem>>
    %280 = vector.broadcast %279 : f32 to vector<8x8xf32>
    %281 = arith.mulf %280, %278 : vector<8x8xf32>
    %282 = arith.addf %276, %281 : vector<8x8xf32>
    %c0_188 = arith.constant 0 : index
    %c0_189 = arith.constant 0 : index
    %c6_190 = arith.constant 6 : index
    %c5_191 = arith.constant 5 : index
    %283 = vector.load %arg2[%c0_188, %c0_189, %c6_190, %c5_191] : memref<1x2x14x14xf32, #tpu.memory_space<vmem>>, vector<1x1x8x8xf32>
    %284 = vector.shape_cast %283 : vector<1x1x8x8xf32> to vector<8x8xf32>
    %c47 = arith.constant 47 : index
    %285 = memref.load %arg1[%c47] : memref<98xf32, #tpu.memory_space<smem>>
    %286 = vector.broadcast %285 : f32 to vector<8x8xf32>
    %287 = arith.mulf %286, %284 : vector<8x8xf32>
    %288 = arith.addf %282, %287 : vector<8x8xf32>
    %c0_192 = arith.constant 0 : index
    %c0_193 = arith.constant 0 : index
    %c6_194 = arith.constant 6 : index
    %c6_195 = arith.constant 6 : index
    %289 = vector.load %arg2[%c0_192, %c0_193, %c6_194, %c6_195] : memref<1x2x14x14xf32, #tpu.memory_space<vmem>>, vector<1x1x8x8xf32>
    %290 = vector.shape_cast %289 : vector<1x1x8x8xf32> to vector<8x8xf32>
    %c48 = arith.constant 48 : index
    %291 = memref.load %arg1[%c48] : memref<98xf32, #tpu.memory_space<smem>>
    %292 = vector.broadcast %291 : f32 to vector<8x8xf32>
    %293 = arith.mulf %292, %290 : vector<8x8xf32>
    %294 = arith.addf %288, %293 : vector<8x8xf32>
    %c0_196 = arith.constant 0 : index
    %c1_197 = arith.constant 1 : index
    %c0_198 = arith.constant 0 : index
    %c0_199 = arith.constant 0 : index
    %295 = vector.load %arg2[%c0_196, %c1_197, %c0_198, %c0_199] : memref<1x2x14x14xf32, #tpu.memory_space<vmem>>, vector<1x1x8x8xf32>
    %296 = vector.shape_cast %295 : vector<1x1x8x8xf32> to vector<8x8xf32>
    %c49 = arith.constant 49 : index
    %297 = memref.load %arg1[%c49] : memref<98xf32, #tpu.memory_space<smem>>
    %298 = vector.broadcast %297 : f32 to vector<8x8xf32>
    %299 = arith.mulf %298, %296 : vector<8x8xf32>
    %300 = arith.addf %294, %299 : vector<8x8xf32>
    %c0_200 = arith.constant 0 : index
    %c1_201 = arith.constant 1 : index
    %c0_202 = arith.constant 0 : index
    %c1_203 = arith.constant 1 : index
    %301 = vector.load %arg2[%c0_200, %c1_201, %c0_202, %c1_203] : memref<1x2x14x14xf32, #tpu.memory_space<vmem>>, vector<1x1x8x8xf32>
    %302 = vector.shape_cast %301 : vector<1x1x8x8xf32> to vector<8x8xf32>
    %c50 = arith.constant 50 : index
    %303 = memref.load %arg1[%c50] : memref<98xf32, #tpu.memory_space<smem>>
    %304 = vector.broadcast %303 : f32 to vector<8x8xf32>
    %305 = arith.mulf %304, %302 : vector<8x8xf32>
    %306 = arith.addf %300, %305 : vector<8x8xf32>
    %c0_204 = arith.constant 0 : index
    %c1_205 = arith.constant 1 : index
    %c0_206 = arith.constant 0 : index
    %c2_207 = arith.constant 2 : index
    %307 = vector.load %arg2[%c0_204, %c1_205, %c0_206, %c2_207] : memref<1x2x14x14xf32, #tpu.memory_space<vmem>>, vector<1x1x8x8xf32>
    %308 = vector.shape_cast %307 : vector<1x1x8x8xf32> to vector<8x8xf32>
    %c51 = arith.constant 51 : index
    %309 = memref.load %arg1[%c51] : memref<98xf32, #tpu.memory_space<smem>>
    %310 = vector.broadcast %309 : f32 to vector<8x8xf32>
    %311 = arith.mulf %310, %308 : vector<8x8xf32>
    %312 = arith.addf %306, %311 : vector<8x8xf32>
    %c0_208 = arith.constant 0 : index
    %c1_209 = arith.constant 1 : index
    %c0_210 = arith.constant 0 : index
    %c3_211 = arith.constant 3 : index
    %313 = vector.load %arg2[%c0_208, %c1_209, %c0_210, %c3_211] : memref<1x2x14x14xf32, #tpu.memory_space<vmem>>, vector<1x1x8x8xf32>
    %314 = vector.shape_cast %313 : vector<1x1x8x8xf32> to vector<8x8xf32>
    %c52 = arith.constant 52 : index
    %315 = memref.load %arg1[%c52] : memref<98xf32, #tpu.memory_space<smem>>
    %316 = vector.broadcast %315 : f32 to vector<8x8xf32>
    %317 = arith.mulf %316, %314 : vector<8x8xf32>
    %318 = arith.addf %312, %317 : vector<8x8xf32>
    %c0_212 = arith.constant 0 : index
    %c1_213 = arith.constant 1 : index
    %c0_214 = arith.constant 0 : index
    %c4_215 = arith.constant 4 : index
    %319 = vector.load %arg2[%c0_212, %c1_213, %c0_214, %c4_215] : memref<1x2x14x14xf32, #tpu.memory_space<vmem>>, vector<1x1x8x8xf32>
    %320 = vector.shape_cast %319 : vector<1x1x8x8xf32> to vector<8x8xf32>
    %c53 = arith.constant 53 : index
    %321 = memref.load %arg1[%c53] : memref<98xf32, #tpu.memory_space<smem>>
    %322 = vector.broadcast %321 : f32 to vector<8x8xf32>
    %323 = arith.mulf %322, %320 : vector<8x8xf32>
    %324 = arith.addf %318, %323 : vector<8x8xf32>
    %c0_216 = arith.constant 0 : index
    %c1_217 = arith.constant 1 : index
    %c0_218 = arith.constant 0 : index
    %c5_219 = arith.constant 5 : index
    %325 = vector.load %arg2[%c0_216, %c1_217, %c0_218, %c5_219] : memref<1x2x14x14xf32, #tpu.memory_space<vmem>>, vector<1x1x8x8xf32>
    %326 = vector.shape_cast %325 : vector<1x1x8x8xf32> to vector<8x8xf32>
    %c54 = arith.constant 54 : index
    %327 = memref.load %arg1[%c54] : memref<98xf32, #tpu.memory_space<smem>>
    %328 = vector.broadcast %327 : f32 to vector<8x8xf32>
    %329 = arith.mulf %328, %326 : vector<8x8xf32>
    %330 = arith.addf %324, %329 : vector<8x8xf32>
    %c0_220 = arith.constant 0 : index
    %c1_221 = arith.constant 1 : index
    %c0_222 = arith.constant 0 : index
    %c6_223 = arith.constant 6 : index
    %331 = vector.load %arg2[%c0_220, %c1_221, %c0_222, %c6_223] : memref<1x2x14x14xf32, #tpu.memory_space<vmem>>, vector<1x1x8x8xf32>
    %332 = vector.shape_cast %331 : vector<1x1x8x8xf32> to vector<8x8xf32>
    %c55 = arith.constant 55 : index
    %333 = memref.load %arg1[%c55] : memref<98xf32, #tpu.memory_space<smem>>
    %334 = vector.broadcast %333 : f32 to vector<8x8xf32>
    %335 = arith.mulf %334, %332 : vector<8x8xf32>
    %336 = arith.addf %330, %335 : vector<8x8xf32>
    %c0_224 = arith.constant 0 : index
    %c1_225 = arith.constant 1 : index
    %c1_226 = arith.constant 1 : index
    %c0_227 = arith.constant 0 : index
    %337 = vector.load %arg2[%c0_224, %c1_225, %c1_226, %c0_227] : memref<1x2x14x14xf32, #tpu.memory_space<vmem>>, vector<1x1x8x8xf32>
    %338 = vector.shape_cast %337 : vector<1x1x8x8xf32> to vector<8x8xf32>
    %c56 = arith.constant 56 : index
    %339 = memref.load %arg1[%c56] : memref<98xf32, #tpu.memory_space<smem>>
    %340 = vector.broadcast %339 : f32 to vector<8x8xf32>
    %341 = arith.mulf %340, %338 : vector<8x8xf32>
    %342 = arith.addf %336, %341 : vector<8x8xf32>
    %c0_228 = arith.constant 0 : index
    %c1_229 = arith.constant 1 : index
    %c1_230 = arith.constant 1 : index
    %c1_231 = arith.constant 1 : index
    %343 = vector.load %arg2[%c0_228, %c1_229, %c1_230, %c1_231] : memref<1x2x14x14xf32, #tpu.memory_space<vmem>>, vector<1x1x8x8xf32>
    %344 = vector.shape_cast %343 : vector<1x1x8x8xf32> to vector<8x8xf32>
    %c57 = arith.constant 57 : index
    %345 = memref.load %arg1[%c57] : memref<98xf32, #tpu.memory_space<smem>>
    %346 = vector.broadcast %345 : f32 to vector<8x8xf32>
    %347 = arith.mulf %346, %344 : vector<8x8xf32>
    %348 = arith.addf %342, %347 : vector<8x8xf32>
    %c0_232 = arith.constant 0 : index
    %c1_233 = arith.constant 1 : index
    %c1_234 = arith.constant 1 : index
    %c2_235 = arith.constant 2 : index
    %349 = vector.load %arg2[%c0_232, %c1_233, %c1_234, %c2_235] : memref<1x2x14x14xf32, #tpu.memory_space<vmem>>, vector<1x1x8x8xf32>
    %350 = vector.shape_cast %349 : vector<1x1x8x8xf32> to vector<8x8xf32>
    %c58 = arith.constant 58 : index
    %351 = memref.load %arg1[%c58] : memref<98xf32, #tpu.memory_space<smem>>
    %352 = vector.broadcast %351 : f32 to vector<8x8xf32>
    %353 = arith.mulf %352, %350 : vector<8x8xf32>
    %354 = arith.addf %348, %353 : vector<8x8xf32>
    %c0_236 = arith.constant 0 : index
    %c1_237 = arith.constant 1 : index
    %c1_238 = arith.constant 1 : index
    %c3_239 = arith.constant 3 : index
    %355 = vector.load %arg2[%c0_236, %c1_237, %c1_238, %c3_239] : memref<1x2x14x14xf32, #tpu.memory_space<vmem>>, vector<1x1x8x8xf32>
    %356 = vector.shape_cast %355 : vector<1x1x8x8xf32> to vector<8x8xf32>
    %c59 = arith.constant 59 : index
    %357 = memref.load %arg1[%c59] : memref<98xf32, #tpu.memory_space<smem>>
    %358 = vector.broadcast %357 : f32 to vector<8x8xf32>
    %359 = arith.mulf %358, %356 : vector<8x8xf32>
    %360 = arith.addf %354, %359 : vector<8x8xf32>
    %c0_240 = arith.constant 0 : index
    %c1_241 = arith.constant 1 : index
    %c1_242 = arith.constant 1 : index
    %c4_243 = arith.constant 4 : index
    %361 = vector.load %arg2[%c0_240, %c1_241, %c1_242, %c4_243] : memref<1x2x14x14xf32, #tpu.memory_space<vmem>>, vector<1x1x8x8xf32>
    %362 = vector.shape_cast %361 : vector<1x1x8x8xf32> to vector<8x8xf32>
    %c60 = arith.constant 60 : index
    %363 = memref.load %arg1[%c60] : memref<98xf32, #tpu.memory_space<smem>>
    %364 = vector.broadcast %363 : f32 to vector<8x8xf32>
    %365 = arith.mulf %364, %362 : vector<8x8xf32>
    %366 = arith.addf %360, %365 : vector<8x8xf32>
    %c0_244 = arith.constant 0 : index
    %c1_245 = arith.constant 1 : index
    %c1_246 = arith.constant 1 : index
    %c5_247 = arith.constant 5 : index
    %367 = vector.load %arg2[%c0_244, %c1_245, %c1_246, %c5_247] : memref<1x2x14x14xf32, #tpu.memory_space<vmem>>, vector<1x1x8x8xf32>
    %368 = vector.shape_cast %367 : vector<1x1x8x8xf32> to vector<8x8xf32>
    %c61 = arith.constant 61 : index
    %369 = memref.load %arg1[%c61] : memref<98xf32, #tpu.memory_space<smem>>
    %370 = vector.broadcast %369 : f32 to vector<8x8xf32>
    %371 = arith.mulf %370, %368 : vector<8x8xf32>
    %372 = arith.addf %366, %371 : vector<8x8xf32>
    %c0_248 = arith.constant 0 : index
    %c1_249 = arith.constant 1 : index
    %c1_250 = arith.constant 1 : index
    %c6_251 = arith.constant 6 : index
    %373 = vector.load %arg2[%c0_248, %c1_249, %c1_250, %c6_251] : memref<1x2x14x14xf32, #tpu.memory_space<vmem>>, vector<1x1x8x8xf32>
    %374 = vector.shape_cast %373 : vector<1x1x8x8xf32> to vector<8x8xf32>
    %c62 = arith.constant 62 : index
    %375 = memref.load %arg1[%c62] : memref<98xf32, #tpu.memory_space<smem>>
    %376 = vector.broadcast %375 : f32 to vector<8x8xf32>
    %377 = arith.mulf %376, %374 : vector<8x8xf32>
    %378 = arith.addf %372, %377 : vector<8x8xf32>
    %c0_252 = arith.constant 0 : index
    %c1_253 = arith.constant 1 : index
    %c2_254 = arith.constant 2 : index
    %c0_255 = arith.constant 0 : index
    %379 = vector.load %arg2[%c0_252, %c1_253, %c2_254, %c0_255] : memref<1x2x14x14xf32, #tpu.memory_space<vmem>>, vector<1x1x8x8xf32>
    %380 = vector.shape_cast %379 : vector<1x1x8x8xf32> to vector<8x8xf32>
    %c63 = arith.constant 63 : index
    %381 = memref.load %arg1[%c63] : memref<98xf32, #tpu.memory_space<smem>>
    %382 = vector.broadcast %381 : f32 to vector<8x8xf32>
    %383 = arith.mulf %382, %380 : vector<8x8xf32>
    %384 = arith.addf %378, %383 : vector<8x8xf32>
    %c0_256 = arith.constant 0 : index
    %c1_257 = arith.constant 1 : index
    %c2_258 = arith.constant 2 : index
    %c1_259 = arith.constant 1 : index
    %385 = vector.load %arg2[%c0_256, %c1_257, %c2_258, %c1_259] : memref<1x2x14x14xf32, #tpu.memory_space<vmem>>, vector<1x1x8x8xf32>
    %386 = vector.shape_cast %385 : vector<1x1x8x8xf32> to vector<8x8xf32>
    %c64 = arith.constant 64 : index
    %387 = memref.load %arg1[%c64] : memref<98xf32, #tpu.memory_space<smem>>
    %388 = vector.broadcast %387 : f32 to vector<8x8xf32>
    %389 = arith.mulf %388, %386 : vector<8x8xf32>
    %390 = arith.addf %384, %389 : vector<8x8xf32>
    %c0_260 = arith.constant 0 : index
    %c1_261 = arith.constant 1 : index
    %c2_262 = arith.constant 2 : index
    %c2_263 = arith.constant 2 : index
    %391 = vector.load %arg2[%c0_260, %c1_261, %c2_262, %c2_263] : memref<1x2x14x14xf32, #tpu.memory_space<vmem>>, vector<1x1x8x8xf32>
    %392 = vector.shape_cast %391 : vector<1x1x8x8xf32> to vector<8x8xf32>
    %c65 = arith.constant 65 : index
    %393 = memref.load %arg1[%c65] : memref<98xf32, #tpu.memory_space<smem>>
    %394 = vector.broadcast %393 : f32 to vector<8x8xf32>
    %395 = arith.mulf %394, %392 : vector<8x8xf32>
    %396 = arith.addf %390, %395 : vector<8x8xf32>
    %c0_264 = arith.constant 0 : index
    %c1_265 = arith.constant 1 : index
    %c2_266 = arith.constant 2 : index
    %c3_267 = arith.constant 3 : index
    %397 = vector.load %arg2[%c0_264, %c1_265, %c2_266, %c3_267] : memref<1x2x14x14xf32, #tpu.memory_space<vmem>>, vector<1x1x8x8xf32>
    %398 = vector.shape_cast %397 : vector<1x1x8x8xf32> to vector<8x8xf32>
    %c66 = arith.constant 66 : index
    %399 = memref.load %arg1[%c66] : memref<98xf32, #tpu.memory_space<smem>>
    %400 = vector.broadcast %399 : f32 to vector<8x8xf32>
    %401 = arith.mulf %400, %398 : vector<8x8xf32>
    %402 = arith.addf %396, %401 : vector<8x8xf32>
    %c0_268 = arith.constant 0 : index
    %c1_269 = arith.constant 1 : index
    %c2_270 = arith.constant 2 : index
    %c4_271 = arith.constant 4 : index
    %403 = vector.load %arg2[%c0_268, %c1_269, %c2_270, %c4_271] : memref<1x2x14x14xf32, #tpu.memory_space<vmem>>, vector<1x1x8x8xf32>
    %404 = vector.shape_cast %403 : vector<1x1x8x8xf32> to vector<8x8xf32>
    %c67 = arith.constant 67 : index
    %405 = memref.load %arg1[%c67] : memref<98xf32, #tpu.memory_space<smem>>
    %406 = vector.broadcast %405 : f32 to vector<8x8xf32>
    %407 = arith.mulf %406, %404 : vector<8x8xf32>
    %408 = arith.addf %402, %407 : vector<8x8xf32>
    %c0_272 = arith.constant 0 : index
    %c1_273 = arith.constant 1 : index
    %c2_274 = arith.constant 2 : index
    %c5_275 = arith.constant 5 : index
    %409 = vector.load %arg2[%c0_272, %c1_273, %c2_274, %c5_275] : memref<1x2x14x14xf32, #tpu.memory_space<vmem>>, vector<1x1x8x8xf32>
    %410 = vector.shape_cast %409 : vector<1x1x8x8xf32> to vector<8x8xf32>
    %c68 = arith.constant 68 : index
    %411 = memref.load %arg1[%c68] : memref<98xf32, #tpu.memory_space<smem>>
    %412 = vector.broadcast %411 : f32 to vector<8x8xf32>
    %413 = arith.mulf %412, %410 : vector<8x8xf32>
    %414 = arith.addf %408, %413 : vector<8x8xf32>
    %c0_276 = arith.constant 0 : index
    %c1_277 = arith.constant 1 : index
    %c2_278 = arith.constant 2 : index
    %c6_279 = arith.constant 6 : index
    %415 = vector.load %arg2[%c0_276, %c1_277, %c2_278, %c6_279] : memref<1x2x14x14xf32, #tpu.memory_space<vmem>>, vector<1x1x8x8xf32>
    %416 = vector.shape_cast %415 : vector<1x1x8x8xf32> to vector<8x8xf32>
    %c69 = arith.constant 69 : index
    %417 = memref.load %arg1[%c69] : memref<98xf32, #tpu.memory_space<smem>>
    %418 = vector.broadcast %417 : f32 to vector<8x8xf32>
    %419 = arith.mulf %418, %416 : vector<8x8xf32>
    %420 = arith.addf %414, %419 : vector<8x8xf32>
    %c0_280 = arith.constant 0 : index
    %c1_281 = arith.constant 1 : index
    %c3_282 = arith.constant 3 : index
    %c0_283 = arith.constant 0 : index
    %421 = vector.load %arg2[%c0_280, %c1_281, %c3_282, %c0_283] : memref<1x2x14x14xf32, #tpu.memory_space<vmem>>, vector<1x1x8x8xf32>
    %422 = vector.shape_cast %421 : vector<1x1x8x8xf32> to vector<8x8xf32>
    %c70 = arith.constant 70 : index
    %423 = memref.load %arg1[%c70] : memref<98xf32, #tpu.memory_space<smem>>
    %424 = vector.broadcast %423 : f32 to vector<8x8xf32>
    %425 = arith.mulf %424, %422 : vector<8x8xf32>
    %426 = arith.addf %420, %425 : vector<8x8xf32>
    %c0_284 = arith.constant 0 : index
    %c1_285 = arith.constant 1 : index
    %c3_286 = arith.constant 3 : index
    %c1_287 = arith.constant 1 : index
    %427 = vector.load %arg2[%c0_284, %c1_285, %c3_286, %c1_287] : memref<1x2x14x14xf32, #tpu.memory_space<vmem>>, vector<1x1x8x8xf32>
    %428 = vector.shape_cast %427 : vector<1x1x8x8xf32> to vector<8x8xf32>
    %c71 = arith.constant 71 : index
    %429 = memref.load %arg1[%c71] : memref<98xf32, #tpu.memory_space<smem>>
    %430 = vector.broadcast %429 : f32 to vector<8x8xf32>
    %431 = arith.mulf %430, %428 : vector<8x8xf32>
    %432 = arith.addf %426, %431 : vector<8x8xf32>
    %c0_288 = arith.constant 0 : index
    %c1_289 = arith.constant 1 : index
    %c3_290 = arith.constant 3 : index
    %c2_291 = arith.constant 2 : index
    %433 = vector.load %arg2[%c0_288, %c1_289, %c3_290, %c2_291] : memref<1x2x14x14xf32, #tpu.memory_space<vmem>>, vector<1x1x8x8xf32>
    %434 = vector.shape_cast %433 : vector<1x1x8x8xf32> to vector<8x8xf32>
    %c72 = arith.constant 72 : index
    %435 = memref.load %arg1[%c72] : memref<98xf32, #tpu.memory_space<smem>>
    %436 = vector.broadcast %435 : f32 to vector<8x8xf32>
    %437 = arith.mulf %436, %434 : vector<8x8xf32>
    %438 = arith.addf %432, %437 : vector<8x8xf32>
    %c0_292 = arith.constant 0 : index
    %c1_293 = arith.constant 1 : index
    %c3_294 = arith.constant 3 : index
    %c3_295 = arith.constant 3 : index
    %439 = vector.load %arg2[%c0_292, %c1_293, %c3_294, %c3_295] : memref<1x2x14x14xf32, #tpu.memory_space<vmem>>, vector<1x1x8x8xf32>
    %440 = vector.shape_cast %439 : vector<1x1x8x8xf32> to vector<8x8xf32>
    %c73 = arith.constant 73 : index
    %441 = memref.load %arg1[%c73] : memref<98xf32, #tpu.memory_space<smem>>
    %442 = vector.broadcast %441 : f32 to vector<8x8xf32>
    %443 = arith.mulf %442, %440 : vector<8x8xf32>
    %444 = arith.addf %438, %443 : vector<8x8xf32>
    %c0_296 = arith.constant 0 : index
    %c1_297 = arith.constant 1 : index
    %c3_298 = arith.constant 3 : index
    %c4_299 = arith.constant 4 : index
    %445 = vector.load %arg2[%c0_296, %c1_297, %c3_298, %c4_299] : memref<1x2x14x14xf32, #tpu.memory_space<vmem>>, vector<1x1x8x8xf32>
    %446 = vector.shape_cast %445 : vector<1x1x8x8xf32> to vector<8x8xf32>
    %c74 = arith.constant 74 : index
    %447 = memref.load %arg1[%c74] : memref<98xf32, #tpu.memory_space<smem>>
    %448 = vector.broadcast %447 : f32 to vector<8x8xf32>
    %449 = arith.mulf %448, %446 : vector<8x8xf32>
    %450 = arith.addf %444, %449 : vector<8x8xf32>
    %c0_300 = arith.constant 0 : index
    %c1_301 = arith.constant 1 : index
    %c3_302 = arith.constant 3 : index
    %c5_303 = arith.constant 5 : index
    %451 = vector.load %arg2[%c0_300, %c1_301, %c3_302, %c5_303] : memref<1x2x14x14xf32, #tpu.memory_space<vmem>>, vector<1x1x8x8xf32>
    %452 = vector.shape_cast %451 : vector<1x1x8x8xf32> to vector<8x8xf32>
    %c75 = arith.constant 75 : index
    %453 = memref.load %arg1[%c75] : memref<98xf32, #tpu.memory_space<smem>>
    %454 = vector.broadcast %453 : f32 to vector<8x8xf32>
    %455 = arith.mulf %454, %452 : vector<8x8xf32>
    %456 = arith.addf %450, %455 : vector<8x8xf32>
    %c0_304 = arith.constant 0 : index
    %c1_305 = arith.constant 1 : index
    %c3_306 = arith.constant 3 : index
    %c6_307 = arith.constant 6 : index
    %457 = vector.load %arg2[%c0_304, %c1_305, %c3_306, %c6_307] : memref<1x2x14x14xf32, #tpu.memory_space<vmem>>, vector<1x1x8x8xf32>
    %458 = vector.shape_cast %457 : vector<1x1x8x8xf32> to vector<8x8xf32>
    %c76 = arith.constant 76 : index
    %459 = memref.load %arg1[%c76] : memref<98xf32, #tpu.memory_space<smem>>
    %460 = vector.broadcast %459 : f32 to vector<8x8xf32>
    %461 = arith.mulf %460, %458 : vector<8x8xf32>
    %462 = arith.addf %456, %461 : vector<8x8xf32>
    %c0_308 = arith.constant 0 : index
    %c1_309 = arith.constant 1 : index
    %c4_310 = arith.constant 4 : index
    %c0_311 = arith.constant 0 : index
    %463 = vector.load %arg2[%c0_308, %c1_309, %c4_310, %c0_311] : memref<1x2x14x14xf32, #tpu.memory_space<vmem>>, vector<1x1x8x8xf32>
    %464 = vector.shape_cast %463 : vector<1x1x8x8xf32> to vector<8x8xf32>
    %c77 = arith.constant 77 : index
    %465 = memref.load %arg1[%c77] : memref<98xf32, #tpu.memory_space<smem>>
    %466 = vector.broadcast %465 : f32 to vector<8x8xf32>
    %467 = arith.mulf %466, %464 : vector<8x8xf32>
    %468 = arith.addf %462, %467 : vector<8x8xf32>
    %c0_312 = arith.constant 0 : index
    %c1_313 = arith.constant 1 : index
    %c4_314 = arith.constant 4 : index
    %c1_315 = arith.constant 1 : index
    %469 = vector.load %arg2[%c0_312, %c1_313, %c4_314, %c1_315] : memref<1x2x14x14xf32, #tpu.memory_space<vmem>>, vector<1x1x8x8xf32>
    %470 = vector.shape_cast %469 : vector<1x1x8x8xf32> to vector<8x8xf32>
    %c78 = arith.constant 78 : index
    %471 = memref.load %arg1[%c78] : memref<98xf32, #tpu.memory_space<smem>>
    %472 = vector.broadcast %471 : f32 to vector<8x8xf32>
    %473 = arith.mulf %472, %470 : vector<8x8xf32>
    %474 = arith.addf %468, %473 : vector<8x8xf32>
    %c0_316 = arith.constant 0 : index
    %c1_317 = arith.constant 1 : index
    %c4_318 = arith.constant 4 : index
    %c2_319 = arith.constant 2 : index
    %475 = vector.load %arg2[%c0_316, %c1_317, %c4_318, %c2_319] : memref<1x2x14x14xf32, #tpu.memory_space<vmem>>, vector<1x1x8x8xf32>
    %476 = vector.shape_cast %475 : vector<1x1x8x8xf32> to vector<8x8xf32>
    %c79 = arith.constant 79 : index
    %477 = memref.load %arg1[%c79] : memref<98xf32, #tpu.memory_space<smem>>
    %478 = vector.broadcast %477 : f32 to vector<8x8xf32>
    %479 = arith.mulf %478, %476 : vector<8x8xf32>
    %480 = arith.addf %474, %479 : vector<8x8xf32>
    %c0_320 = arith.constant 0 : index
    %c1_321 = arith.constant 1 : index
    %c4_322 = arith.constant 4 : index
    %c3_323 = arith.constant 3 : index
    %481 = vector.load %arg2[%c0_320, %c1_321, %c4_322, %c3_323] : memref<1x2x14x14xf32, #tpu.memory_space<vmem>>, vector<1x1x8x8xf32>
    %482 = vector.shape_cast %481 : vector<1x1x8x8xf32> to vector<8x8xf32>
    %c80 = arith.constant 80 : index
    %483 = memref.load %arg1[%c80] : memref<98xf32, #tpu.memory_space<smem>>
    %484 = vector.broadcast %483 : f32 to vector<8x8xf32>
    %485 = arith.mulf %484, %482 : vector<8x8xf32>
    %486 = arith.addf %480, %485 : vector<8x8xf32>
    %c0_324 = arith.constant 0 : index
    %c1_325 = arith.constant 1 : index
    %c4_326 = arith.constant 4 : index
    %c4_327 = arith.constant 4 : index
    %487 = vector.load %arg2[%c0_324, %c1_325, %c4_326, %c4_327] : memref<1x2x14x14xf32, #tpu.memory_space<vmem>>, vector<1x1x8x8xf32>
    %488 = vector.shape_cast %487 : vector<1x1x8x8xf32> to vector<8x8xf32>
    %c81 = arith.constant 81 : index
    %489 = memref.load %arg1[%c81] : memref<98xf32, #tpu.memory_space<smem>>
    %490 = vector.broadcast %489 : f32 to vector<8x8xf32>
    %491 = arith.mulf %490, %488 : vector<8x8xf32>
    %492 = arith.addf %486, %491 : vector<8x8xf32>
    %c0_328 = arith.constant 0 : index
    %c1_329 = arith.constant 1 : index
    %c4_330 = arith.constant 4 : index
    %c5_331 = arith.constant 5 : index
    %493 = vector.load %arg2[%c0_328, %c1_329, %c4_330, %c5_331] : memref<1x2x14x14xf32, #tpu.memory_space<vmem>>, vector<1x1x8x8xf32>
    %494 = vector.shape_cast %493 : vector<1x1x8x8xf32> to vector<8x8xf32>
    %c82 = arith.constant 82 : index
    %495 = memref.load %arg1[%c82] : memref<98xf32, #tpu.memory_space<smem>>
    %496 = vector.broadcast %495 : f32 to vector<8x8xf32>
    %497 = arith.mulf %496, %494 : vector<8x8xf32>
    %498 = arith.addf %492, %497 : vector<8x8xf32>
    %c0_332 = arith.constant 0 : index
    %c1_333 = arith.constant 1 : index
    %c4_334 = arith.constant 4 : index
    %c6_335 = arith.constant 6 : index
    %499 = vector.load %arg2[%c0_332, %c1_333, %c4_334, %c6_335] : memref<1x2x14x14xf32, #tpu.memory_space<vmem>>, vector<1x1x8x8xf32>
    %500 = vector.shape_cast %499 : vector<1x1x8x8xf32> to vector<8x8xf32>
    %c83 = arith.constant 83 : index
    %501 = memref.load %arg1[%c83] : memref<98xf32, #tpu.memory_space<smem>>
    %502 = vector.broadcast %501 : f32 to vector<8x8xf32>
    %503 = arith.mulf %502, %500 : vector<8x8xf32>
    %504 = arith.addf %498, %503 : vector<8x8xf32>
    %c0_336 = arith.constant 0 : index
    %c1_337 = arith.constant 1 : index
    %c5_338 = arith.constant 5 : index
    %c0_339 = arith.constant 0 : index
    %505 = vector.load %arg2[%c0_336, %c1_337, %c5_338, %c0_339] : memref<1x2x14x14xf32, #tpu.memory_space<vmem>>, vector<1x1x8x8xf32>
    %506 = vector.shape_cast %505 : vector<1x1x8x8xf32> to vector<8x8xf32>
    %c84 = arith.constant 84 : index
    %507 = memref.load %arg1[%c84] : memref<98xf32, #tpu.memory_space<smem>>
    %508 = vector.broadcast %507 : f32 to vector<8x8xf32>
    %509 = arith.mulf %508, %506 : vector<8x8xf32>
    %510 = arith.addf %504, %509 : vector<8x8xf32>
    %c0_340 = arith.constant 0 : index
    %c1_341 = arith.constant 1 : index
    %c5_342 = arith.constant 5 : index
    %c1_343 = arith.constant 1 : index
    %511 = vector.load %arg2[%c0_340, %c1_341, %c5_342, %c1_343] : memref<1x2x14x14xf32, #tpu.memory_space<vmem>>, vector<1x1x8x8xf32>
    %512 = vector.shape_cast %511 : vector<1x1x8x8xf32> to vector<8x8xf32>
    %c85 = arith.constant 85 : index
    %513 = memref.load %arg1[%c85] : memref<98xf32, #tpu.memory_space<smem>>
    %514 = vector.broadcast %513 : f32 to vector<8x8xf32>
    %515 = arith.mulf %514, %512 : vector<8x8xf32>
    %516 = arith.addf %510, %515 : vector<8x8xf32>
    %c0_344 = arith.constant 0 : index
    %c1_345 = arith.constant 1 : index
    %c5_346 = arith.constant 5 : index
    %c2_347 = arith.constant 2 : index
    %517 = vector.load %arg2[%c0_344, %c1_345, %c5_346, %c2_347] : memref<1x2x14x14xf32, #tpu.memory_space<vmem>>, vector<1x1x8x8xf32>
    %518 = vector.shape_cast %517 : vector<1x1x8x8xf32> to vector<8x8xf32>
    %c86 = arith.constant 86 : index
    %519 = memref.load %arg1[%c86] : memref<98xf32, #tpu.memory_space<smem>>
    %520 = vector.broadcast %519 : f32 to vector<8x8xf32>
    %521 = arith.mulf %520, %518 : vector<8x8xf32>
    %522 = arith.addf %516, %521 : vector<8x8xf32>
    %c0_348 = arith.constant 0 : index
    %c1_349 = arith.constant 1 : index
    %c5_350 = arith.constant 5 : index
    %c3_351 = arith.constant 3 : index
    %523 = vector.load %arg2[%c0_348, %c1_349, %c5_350, %c3_351] : memref<1x2x14x14xf32, #tpu.memory_space<vmem>>, vector<1x1x8x8xf32>
    %524 = vector.shape_cast %523 : vector<1x1x8x8xf32> to vector<8x8xf32>
    %c87 = arith.constant 87 : index
    %525 = memref.load %arg1[%c87] : memref<98xf32, #tpu.memory_space<smem>>
    %526 = vector.broadcast %525 : f32 to vector<8x8xf32>
    %527 = arith.mulf %526, %524 : vector<8x8xf32>
    %528 = arith.addf %522, %527 : vector<8x8xf32>
    %c0_352 = arith.constant 0 : index
    %c1_353 = arith.constant 1 : index
    %c5_354 = arith.constant 5 : index
    %c4_355 = arith.constant 4 : index
    %529 = vector.load %arg2[%c0_352, %c1_353, %c5_354, %c4_355] : memref<1x2x14x14xf32, #tpu.memory_space<vmem>>, vector<1x1x8x8xf32>
    %530 = vector.shape_cast %529 : vector<1x1x8x8xf32> to vector<8x8xf32>
    %c88 = arith.constant 88 : index
    %531 = memref.load %arg1[%c88] : memref<98xf32, #tpu.memory_space<smem>>
    %532 = vector.broadcast %531 : f32 to vector<8x8xf32>
    %533 = arith.mulf %532, %530 : vector<8x8xf32>
    %534 = arith.addf %528, %533 : vector<8x8xf32>
    %c0_356 = arith.constant 0 : index
    %c1_357 = arith.constant 1 : index
    %c5_358 = arith.constant 5 : index
    %c5_359 = arith.constant 5 : index
    %535 = vector.load %arg2[%c0_356, %c1_357, %c5_358, %c5_359] : memref<1x2x14x14xf32, #tpu.memory_space<vmem>>, vector<1x1x8x8xf32>
    %536 = vector.shape_cast %535 : vector<1x1x8x8xf32> to vector<8x8xf32>
    %c89 = arith.constant 89 : index
    %537 = memref.load %arg1[%c89] : memref<98xf32, #tpu.memory_space<smem>>
    %538 = vector.broadcast %537 : f32 to vector<8x8xf32>
    %539 = arith.mulf %538, %536 : vector<8x8xf32>
    %540 = arith.addf %534, %539 : vector<8x8xf32>
    %c0_360 = arith.constant 0 : index
    %c1_361 = arith.constant 1 : index
    %c5_362 = arith.constant 5 : index
    %c6_363 = arith.constant 6 : index
    %541 = vector.load %arg2[%c0_360, %c1_361, %c5_362, %c6_363] : memref<1x2x14x14xf32, #tpu.memory_space<vmem>>, vector<1x1x8x8xf32>
    %542 = vector.shape_cast %541 : vector<1x1x8x8xf32> to vector<8x8xf32>
    %c90 = arith.constant 90 : index
    %543 = memref.load %arg1[%c90] : memref<98xf32, #tpu.memory_space<smem>>
    %544 = vector.broadcast %543 : f32 to vector<8x8xf32>
    %545 = arith.mulf %544, %542 : vector<8x8xf32>
    %546 = arith.addf %540, %545 : vector<8x8xf32>
    %c0_364 = arith.constant 0 : index
    %c1_365 = arith.constant 1 : index
    %c6_366 = arith.constant 6 : index
    %c0_367 = arith.constant 0 : index
    %547 = vector.load %arg2[%c0_364, %c1_365, %c6_366, %c0_367] : memref<1x2x14x14xf32, #tpu.memory_space<vmem>>, vector<1x1x8x8xf32>
    %548 = vector.shape_cast %547 : vector<1x1x8x8xf32> to vector<8x8xf32>
    %c91 = arith.constant 91 : index
    %549 = memref.load %arg1[%c91] : memref<98xf32, #tpu.memory_space<smem>>
    %550 = vector.broadcast %549 : f32 to vector<8x8xf32>
    %551 = arith.mulf %550, %548 : vector<8x8xf32>
    %552 = arith.addf %546, %551 : vector<8x8xf32>
    %c0_368 = arith.constant 0 : index
    %c1_369 = arith.constant 1 : index
    %c6_370 = arith.constant 6 : index
    %c1_371 = arith.constant 1 : index
    %553 = vector.load %arg2[%c0_368, %c1_369, %c6_370, %c1_371] : memref<1x2x14x14xf32, #tpu.memory_space<vmem>>, vector<1x1x8x8xf32>
    %554 = vector.shape_cast %553 : vector<1x1x8x8xf32> to vector<8x8xf32>
    %c92 = arith.constant 92 : index
    %555 = memref.load %arg1[%c92] : memref<98xf32, #tpu.memory_space<smem>>
    %556 = vector.broadcast %555 : f32 to vector<8x8xf32>
    %557 = arith.mulf %556, %554 : vector<8x8xf32>
    %558 = arith.addf %552, %557 : vector<8x8xf32>
    %c0_372 = arith.constant 0 : index
    %c1_373 = arith.constant 1 : index
    %c6_374 = arith.constant 6 : index
    %c2_375 = arith.constant 2 : index
    %559 = vector.load %arg2[%c0_372, %c1_373, %c6_374, %c2_375] : memref<1x2x14x14xf32, #tpu.memory_space<vmem>>, vector<1x1x8x8xf32>
    %560 = vector.shape_cast %559 : vector<1x1x8x8xf32> to vector<8x8xf32>
    %c93 = arith.constant 93 : index
    %561 = memref.load %arg1[%c93] : memref<98xf32, #tpu.memory_space<smem>>
    %562 = vector.broadcast %561 : f32 to vector<8x8xf32>
    %563 = arith.mulf %562, %560 : vector<8x8xf32>
    %564 = arith.addf %558, %563 : vector<8x8xf32>
    %c0_376 = arith.constant 0 : index
    %c1_377 = arith.constant 1 : index
    %c6_378 = arith.constant 6 : index
    %c3_379 = arith.constant 3 : index
    %565 = vector.load %arg2[%c0_376, %c1_377, %c6_378, %c3_379] : memref<1x2x14x14xf32, #tpu.memory_space<vmem>>, vector<1x1x8x8xf32>
    %566 = vector.shape_cast %565 : vector<1x1x8x8xf32> to vector<8x8xf32>
    %c94 = arith.constant 94 : index
    %567 = memref.load %arg1[%c94] : memref<98xf32, #tpu.memory_space<smem>>
    %568 = vector.broadcast %567 : f32 to vector<8x8xf32>
    %569 = arith.mulf %568, %566 : vector<8x8xf32>
    %570 = arith.addf %564, %569 : vector<8x8xf32>
    %c0_380 = arith.constant 0 : index
    %c1_381 = arith.constant 1 : index
    %c6_382 = arith.constant 6 : index
    %c4_383 = arith.constant 4 : index
    %571 = vector.load %arg2[%c0_380, %c1_381, %c6_382, %c4_383] : memref<1x2x14x14xf32, #tpu.memory_space<vmem>>, vector<1x1x8x8xf32>
    %572 = vector.shape_cast %571 : vector<1x1x8x8xf32> to vector<8x8xf32>
    %c95 = arith.constant 95 : index
    %573 = memref.load %arg1[%c95] : memref<98xf32, #tpu.memory_space<smem>>
    %574 = vector.broadcast %573 : f32 to vector<8x8xf32>
    %575 = arith.mulf %574, %572 : vector<8x8xf32>
    %576 = arith.addf %570, %575 : vector<8x8xf32>
    %c0_384 = arith.constant 0 : index
    %c1_385 = arith.constant 1 : index
    %c6_386 = arith.constant 6 : index
    %c5_387 = arith.constant 5 : index
    %577 = vector.load %arg2[%c0_384, %c1_385, %c6_386, %c5_387] : memref<1x2x14x14xf32, #tpu.memory_space<vmem>>, vector<1x1x8x8xf32>
    %578 = vector.shape_cast %577 : vector<1x1x8x8xf32> to vector<8x8xf32>
    %c96 = arith.constant 96 : index
    %579 = memref.load %arg1[%c96] : memref<98xf32, #tpu.memory_space<smem>>
    %580 = vector.broadcast %579 : f32 to vector<8x8xf32>
    %581 = arith.mulf %580, %578 : vector<8x8xf32>
    %582 = arith.addf %576, %581 : vector<8x8xf32>
    %c0_388 = arith.constant 0 : index
    %c1_389 = arith.constant 1 : index
    %c6_390 = arith.constant 6 : index
    %c6_391 = arith.constant 6 : index
    %583 = vector.load %arg2[%c0_388, %c1_389, %c6_390, %c6_391] : memref<1x2x14x14xf32, #tpu.memory_space<vmem>>, vector<1x1x8x8xf32>
    %584 = vector.shape_cast %583 : vector<1x1x8x8xf32> to vector<8x8xf32>
    %c97 = arith.constant 97 : index
    %585 = memref.load %arg1[%c97] : memref<98xf32, #tpu.memory_space<smem>>
    %586 = vector.broadcast %585 : f32 to vector<8x8xf32>
    %587 = arith.mulf %586, %584 : vector<8x8xf32>
    %588 = arith.addf %582, %587 : vector<8x8xf32>
    %c0_392 = arith.constant 0 : index
    %c0_393 = arith.constant 0 : index
    %c0_394 = arith.constant 0 : index
    %c0_395 = arith.constant 0 : index
    %589 = vector.load %arg3[%c0_392, %c0_393, %c0_394, %c0_395] : memref<1x1x8x8xf32, #tpu.memory_space<vmem>>, vector<1x1x8x8xf32>
    %590 = vector.shape_cast %589 : vector<1x1x8x8xf32> to vector<8x8xf32>
    %591 = vector.shape_cast %588 : vector<8x8xf32> to vector<1x1x8x8xf32>
    tpu.vector_store %arg3[%c0_392, %c0_393, %c0_394, %c0_395], %591 {strides = array<i32>} : memref<1x1x8x8xf32, #tpu.memory_space<vmem>>, vector<1x1x8x8xf32>,
    return
  }
  func.func @transform_0(%arg0: i32) -> i32 {
    %c0_i32 = arith.constant 0 : i32
    %c0_i32_0 = arith.constant 0 : i32
    return %c0_i32 : i32
  }
  func.func @transform_1(%arg0: i32) -> (i32, i32, i32, i32) {
    %c0_i32 = arith.constant 0 : i32
    %c0_i32_0 = arith.constant 0 : i32
    %c0_i32_1 = arith.constant 0 : i32
    %c0_i32_2 = arith.constant 0 : i32
    return %arg0, %c0_i32, %c0_i32_0, %c0_i32_1 : i32, i32, i32, i32
  }
  func.func @transform_2(%arg0: i32) -> (i32, i32, i32, i32) {
    %c0_i32 = arith.constant 0 : i32
    %c0_i32_0 = arith.constant 0 : i32
    %c0_i32_1 = arith.constant 0 : i32
    %c0_i32_2 = arith.constant 0 : i32
    return %arg0, %c0_i32, %c0_i32_0, %c0_i32_1 : i32, i32, i32, i32
  }
}

module attributes {stable_mosaic.version = 11 : i64} {
  func.func @kern(%arg0: i32, %arg1: i32, %arg2: i32, %arg3: memref<8x8xbf16, #tpu.memory_space<vmem>>, %arg4: memref<1x8x128xbf16, #tpu.memory_space<vmem>>, %arg5: memref<1x8x128xf32, #tpu.memory_space<vmem>>, %arg6: memref<8x128xf32, #tpu.memory_space<vmem>>) attributes {dimension_semantics = [#tpu.dimension_semantics<parallel>, #tpu.dimension_semantics<parallel>, #tpu.dimension_semantics<arbitrary>], iteration_bounds = array<i64: 2, 1, 1>, scalar_prefetch = 0 : i64, scratch_operands = 1 : i64, tpu.core_type = #tpu.core_type<tc>, window_params = [{transform_indices = @transform_0, window_bounds = array<i64: 8, 8>}, {transform_indices = @transform_1, window_bounds = array<i64: 1, 8, 128>}, {transform_indices = @transform_2, window_bounds = array<i64: 1, 8, 128>}]} {
    %c0_i32 = arith.constant 0 : i32
    %0 = arith.cmpi eq, %arg2, %c0_i32 : i32
    %1 = arith.extui %0 : i1 to i32
    %c0_i32_0 = arith.constant 0 : i32
    %2 = arith.cmpi ne, %1, %c0_i32_0 : i32
    scf.if %2 {
      %cst_11 = arith.constant 0.000000e+00 : f32
      %13 = vector.broadcast %cst_11 : f32 to vector<8x128xf32>
      %c0_12 = arith.constant 0 : index
      %c0_13 = arith.constant 0 : index
      %14 = vector.load %arg6[%c0_12, %c0_13] : memref<8x128xf32, #tpu.memory_space<vmem>>, vector<8x128xf32>
      tpu.vector_store %arg6[%c0_12, %c0_13], %13 {strides = array<i32>} : memref<8x128xf32, #tpu.memory_space<vmem>>, vector<8x128xf32>,
    } else {
    }
    %c0 = arith.constant 0 : index
    %c0_1 = arith.constant 0 : index
    %3 = vector.load %arg6[%c0, %c0_1] : memref<8x128xf32, #tpu.memory_space<vmem>>, vector<8x128xf32>
    %c0_2 = arith.constant 0 : index
    %c0_3 = arith.constant 0 : index
    %4 = vector.load %arg3[%c0_2, %c0_3] : memref<8x8xbf16, #tpu.memory_space<vmem>>, vector<8x8xbf16>
    %c0_4 = arith.constant 0 : index
    %c0_5 = arith.constant 0 : index
    %c0_6 = arith.constant 0 : index
    %5 = vector.load %arg4[%c0_4, %c0_5, %c0_6] : memref<1x8x128xbf16, #tpu.memory_space<vmem>>, vector<1x8x128xbf16>
    %6 = vector.shape_cast %5 : vector<1x8x128xbf16> to vector<8x128xbf16>
    %cst = arith.constant dense<0.000000e+00> : vector<8x128xf32>
    %7 = tpu.matmul %4, %6, %cst {dimension_numbers = #tpu.dot_dimension_numbers<[1], [0], [0], [1], [0, 0, 1, 1], [], []>} : vector<8x8xbf16>, vector<8x128xbf16>, vector<8x128xf32> -> vector<8x128xf32>
    %8 = arith.addf %3, %7 : vector<8x128xf32>
    %c0_7 = arith.constant 0 : index
    %c0_8 = arith.constant 0 : index
    %9 = vector.load %arg6[%c0_7, %c0_8] : memref<8x128xf32, #tpu.memory_space<vmem>>, vector<8x128xf32>
    tpu.vector_store %arg6[%c0_7, %c0_8], %8 {strides = array<i32>} : memref<8x128xf32, #tpu.memory_space<vmem>>, vector<8x128xf32>,
    %c0_i32_9 = arith.constant 0 : i32
    %10 = arith.cmpi eq, %arg2, %c0_i32_9 : i32
    %11 = arith.extui %10 : i1 to i32
    %c0_i32_10 = arith.constant 0 : i32
    %12 = arith.cmpi ne, %11, %c0_i32_10 : i32
    scf.if %12 {
      %c0_11 = arith.constant 0 : index
      %c0_12 = arith.constant 0 : index
      %13 = vector.load %arg6[%c0_11, %c0_12] : memref<8x128xf32, #tpu.memory_space<vmem>>, vector<8x128xf32>
      %cst_13 = arith.constant 0.000000e+00 : f32
      %14 = vector.broadcast %cst_13 : f32 to vector<8x128xf32>
      %15 = arith.maximumf %13, %14 : vector<8x128xf32>
      %c0_14 = arith.constant 0 : index
      %c0_15 = arith.constant 0 : index
      %c0_16 = arith.constant 0 : index
      %16 = vector.load %arg5[%c0_14, %c0_15, %c0_16] : memref<1x8x128xf32, #tpu.memory_space<vmem>>, vector<1x8x128xf32>
      %17 = vector.shape_cast %16 : vector<1x8x128xf32> to vector<8x128xf32>
      %18 = vector.shape_cast %15 : vector<8x128xf32> to vector<1x8x128xf32>
      tpu.vector_store %arg5[%c0_14, %c0_15, %c0_16], %18 {strides = array<i32>} : memref<1x8x128xf32, #tpu.memory_space<vmem>>, vector<1x8x128xf32>,
    } else {
    }
    return
  }
  func.func @transform_0(%arg0: i32, %arg1: i32, %arg2: i32) -> (i32, i32) {
    %c0_i32 = arith.constant 0 : i32
    %c0_i32_0 = arith.constant 0 : i32
    return %c0_i32, %arg2 : i32, i32
  }
  func.func @transform_1(%arg0: i32, %arg1: i32, %arg2: i32) -> (i32, i32, i32) {
    %c0_i32 = arith.constant 0 : i32
    return %arg0, %arg2, %arg1 : i32, i32, i32
  }
  func.func @transform_2(%arg0: i32, %arg1: i32, %arg2: i32) -> (i32, i32, i32) {
    %c0_i32 = arith.constant 0 : i32
    %c0_i32_0 = arith.constant 0 : i32
    return %arg0, %c0_i32, %arg1 : i32, i32, i32
  }
}

module attributes {stable_mosaic.version = 11 : i64} {
  func.func @kern(%arg0: i32, %arg1: i32, %arg2: memref<1x8x256xf32, #tpu.memory_space<vmem>>, %arg3: memref<1x8x1xf32, #tpu.memory_space<vmem>>, %arg4: memref<1x8x1xf32, #tpu.memory_space<vmem>>, %arg5: memref<8x1xf32, #tpu.memory_space<vmem>>, %arg6: memref<8x1xf32, #tpu.memory_space<vmem>>) attributes {dimension_semantics = [#tpu.dimension_semantics<parallel>, #tpu.dimension_semantics<arbitrary>], iteration_bounds = array<i64: 2, 1>, scalar_prefetch = 0 : i64, scratch_operands = 2 : i64, tpu.core_type = #tpu.core_type<tc>, window_params = [{transform_indices = @transform_0, window_bounds = array<i64: 1, 8, 256>}, {transform_indices = @transform_1, window_bounds = array<i64: 1, 8, 1>}, {transform_indices = @transform_2, window_bounds = array<i64: 1, 8, 1>}]} {
    %c0 = arith.constant 0 : index
    %c0_0 = arith.constant 0 : index
    %c0_1 = arith.constant 0 : index
    %0 = vector.load %arg2[%c0, %c0_0, %c0_1] : memref<1x8x256xf32, #tpu.memory_space<vmem>>, vector<1x8x256xf32>
    %1 = vector.shape_cast %0 : vector<1x8x256xf32> to vector<8x256xf32>
    %2 = tpu.iota {dimensions = array<i32: 1>} : vector<8x256xi32>
    %c256_i32 = arith.constant 256 : i32
    %3 = arith.muli %arg1, %c256_i32 : i32
    %4 = vector.broadcast %3 : i32 to vector<8x256xi32>
    %5 = arith.addi %2, %4 : vector<8x256xi32>
    %c256_i32_2 = arith.constant 256 : i32
    %6 = vector.broadcast %c256_i32_2 : i32 to vector<8x256xi32>
    %7 = arith.cmpi slt, %5, %6 : vector<8x256xi32>
    %cst = arith.constant 0.000000e+00 : f32
    %8 = vector.broadcast %cst : f32 to vector<8x256xf32>
    %9 = arith.select %7, %1, %8 : vector<8x256xi1>, vector<8x256xf32>
    %cst_3 = arith.constant dense<0.000000e+00> : vector<8xf32>
    %10 = vector.multi_reduction <add>, %9, %cst_3 [1] : vector<8x256xf32> to vector<8xf32>
    %11 = vector.shape_cast %10 : vector<8xf32> to vector<8x1xf32>
    %cst_4 = arith.constant 0xFF800000 : f32
    %12 = vector.broadcast %cst_4 : f32 to vector<8x256xf32>
    %13 = arith.select %7, %1, %12 : vector<8x256xi1>, vector<8x256xf32>
    %cst_5 = arith.constant dense<0xFF800000> : vector<8xf32>
    %14 = vector.multi_reduction <maximumf>, %13, %cst_5 [1] : vector<8x256xf32> to vector<8xf32>
    %15 = vector.shape_cast %14 : vector<8xf32> to vector<8x1xf32>
    %c0_i32 = arith.constant 0 : i32
    %16 = arith.cmpi eq, %arg1, %c0_i32 : i32
    %c0_6 = arith.constant 0 : index
    %c0_7 = arith.constant 0 : index
    %17 = vector.load %arg5[%c0_6, %c0_7] : memref<8x1xf32, #tpu.memory_space<vmem>>, vector<8x1xf32>
    %18 = arith.addf %17, %11 : vector<8x1xf32>
    %19 = arith.select %16, %11, %18 : vector<8x1xf32>
    %c0_8 = arith.constant 0 : index
    %c0_9 = arith.constant 0 : index
    %20 = vector.load %arg6[%c0_8, %c0_9] : memref<8x1xf32, #tpu.memory_space<vmem>>, vector<8x1xf32>
    %21 = arith.maximumf %20, %15 : vector<8x1xf32>
    %22 = arith.select %16, %15, %21 : vector<8x1xf32>
    %c0_10 = arith.constant 0 : index
    %c0_11 = arith.constant 0 : index
    %23 = vector.load %arg5[%c0_10, %c0_11] : memref<8x1xf32, #tpu.memory_space<vmem>>, vector<8x1xf32>
    tpu.vector_store %arg5[%c0_10, %c0_11], %19 {strides = array<i32>} : memref<8x1xf32, #tpu.memory_space<vmem>>, vector<8x1xf32>,
    %c0_12 = arith.constant 0 : index
    %c0_13 = arith.constant 0 : index
    %24 = vector.load %arg6[%c0_12, %c0_13] : memref<8x1xf32, #tpu.memory_space<vmem>>, vector<8x1xf32>
    tpu.vector_store %arg6[%c0_12, %c0_13], %22 {strides = array<i32>} : memref<8x1xf32, #tpu.memory_space<vmem>>, vector<8x1xf32>,
    %c0_14 = arith.constant 0 : index
    %c0_15 = arith.constant 0 : index
    %c0_16 = arith.constant 0 : index
    %25 = vector.load %arg3[%c0_14, %c0_15, %c0_16] : memref<1x8x1xf32, #tpu.memory_space<vmem>>, vector<1x8x1xf32>
    %26 = vector.shape_cast %25 : vector<1x8x1xf32> to vector<8x1xf32>
    %27 = vector.shape_cast %19 : vector<8x1xf32> to vector<1x8x1xf32>
    tpu.vector_store %arg3[%c0_14, %c0_15, %c0_16], %27 {strides = array<i32>} : memref<1x8x1xf32, #tpu.memory_space<vmem>>, vector<1x8x1xf32>,
    %c0_17 = arith.constant 0 : index
    %c0_18 = arith.constant 0 : index
    %c0_19 = arith.constant 0 : index
    %28 = vector.load %arg4[%c0_17, %c0_18, %c0_19] : memref<1x8x1xf32, #tpu.memory_space<vmem>>, vector<1x8x1xf32>
    %29 = vector.shape_cast %28 : vector<1x8x1xf32> to vector<8x1xf32>
    %30 = vector.shape_cast %22 : vector<8x1xf32> to vector<1x8x1xf32>
    tpu.vector_store %arg4[%c0_17, %c0_18, %c0_19], %30 {strides = array<i32>} : memref<1x8x1xf32, #tpu.memory_space<vmem>>, vector<1x8x1xf32>,
    return
  }
  func.func @transform_0(%arg0: i32, %arg1: i32) -> (i32, i32, i32) {
    %c0_i32 = arith.constant 0 : i32
    %c0_i32_0 = arith.constant 0 : i32
    return %arg0, %c0_i32, %arg1 : i32, i32, i32
  }
  func.func @transform_1(%arg0: i32, %arg1: i32) -> (i32, i32, i32) {
    %c0_i32 = arith.constant 0 : i32
    %c0_i32_0 = arith.constant 0 : i32
    %c0_i32_1 = arith.constant 0 : i32
    return %arg0, %c0_i32, %c0_i32_0 : i32, i32, i32
  }
  func.func @transform_2(%arg0: i32, %arg1: i32) -> (i32, i32, i32) {
    %c0_i32 = arith.constant 0 : i32
    %c0_i32_0 = arith.constant 0 : i32
    %c0_i32_1 = arith.constant 0 : i32
    return %arg0, %c0_i32, %c0_i32_0 : i32, i32, i32
  }
}

module attributes {stable_mosaic.version = 11 : i64} {
  func.func @_plane_stats_kernel(%arg0: i32, %arg1: i32, %arg2: memref<1x8x256xf32, #tpu.memory_space<vmem>>, %arg3: memref<1x8x1xf32, #tpu.memory_space<vmem>>, %arg4: memref<1x1x256xf32, #tpu.memory_space<vmem>>, %arg5: memref<1x1x256xf32, #tpu.memory_space<vmem>>) attributes {dimension_semantics = [#tpu.dimension_semantics<parallel>, #tpu.dimension_semantics<parallel>], iteration_bounds = array<i64: 2, 1>, scalar_prefetch = 0 : i64, scratch_operands = 0 : i64, tpu.core_type = #tpu.core_type<tc>, window_params = [{transform_indices = @transform_0, window_bounds = array<i64: 1, 8, 256>}, {transform_indices = @transform_1, window_bounds = array<i64: 1, 8, 1>}, {transform_indices = @transform_2, window_bounds = array<i64: 1, 1, 256>}, {transform_indices = @transform_3, window_bounds = array<i64: 1, 1, 256>}]} {
    %c0 = arith.constant 0 : index
    %c0_0 = arith.constant 0 : index
    %c0_1 = arith.constant 0 : index
    %0 = vector.load %arg2[%c0, %c0_0, %c0_1] : memref<1x8x256xf32, #tpu.memory_space<vmem>>, vector<1x8x256xf32>
    %1 = vector.shape_cast %0 : vector<1x8x256xf32> to vector<8x256xf32>
    %c0_2 = arith.constant 0 : index
    %c0_3 = arith.constant 0 : index
    %c0_4 = arith.constant 0 : index
    %2 = vector.load %arg3[%c0_2, %c0_3, %c0_4] : memref<1x8x1xf32, #tpu.memory_space<vmem>>, vector<1x8x1xf32>
    %3 = vector.shape_cast %2 : vector<1x8x1xf32> to vector<8x1xf32>
    %4 = vector.broadcast %3 : vector<8x1xf32> to vector<8x256xf32>
    %5 = arith.mulf %1, %4 : vector<8x256xf32>
    %cst = arith.constant dense<0.000000e+00> : vector<256xf32>
    %6 = vector.multi_reduction <add>, %5, %cst [0] : vector<8x256xf32> to vector<256xf32>
    %7 = vector.shape_cast %6 : vector<256xf32> to vector<1x256xf32>
    %cst_5 = arith.constant 1.250000e-01 : f32
    %8 = vector.broadcast %cst_5 : f32 to vector<1x256xf32>
    %9 = arith.mulf %7, %8 : vector<1x256xf32>
    %c0_6 = arith.constant 0 : index
    %c0_7 = arith.constant 0 : index
    %c0_8 = arith.constant 0 : index
    %10 = vector.load %arg4[%c0_6, %c0_7, %c0_8] : memref<1x1x256xf32, #tpu.memory_space<vmem>>, vector<1x1x256xf32>
    %11 = vector.shape_cast %10 : vector<1x1x256xf32> to vector<1x256xf32>
    %12 = vector.shape_cast %9 : vector<1x256xf32> to vector<1x1x256xf32>
    tpu.vector_store %arg4[%c0_6, %c0_7, %c0_8], %12 {strides = array<i32>} : memref<1x1x256xf32, #tpu.memory_space<vmem>>, vector<1x1x256xf32>,
    %cst_9 = arith.constant dense<0xFF800000> : vector<256xf32>
    %13 = vector.multi_reduction <maximumf>, %5, %cst_9 [0] : vector<8x256xf32> to vector<256xf32>
    %14 = vector.shape_cast %13 : vector<256xf32> to vector<1x256xf32>
    %c0_10 = arith.constant 0 : index
    %c0_11 = arith.constant 0 : index
    %c0_12 = arith.constant 0 : index
    %15 = vector.load %arg5[%c0_10, %c0_11, %c0_12] : memref<1x1x256xf32, #tpu.memory_space<vmem>>, vector<1x1x256xf32>
    %16 = vector.shape_cast %15 : vector<1x1x256xf32> to vector<1x256xf32>
    %17 = vector.shape_cast %14 : vector<1x256xf32> to vector<1x1x256xf32>
    tpu.vector_store %arg5[%c0_10, %c0_11, %c0_12], %17 {strides = array<i32>} : memref<1x1x256xf32, #tpu.memory_space<vmem>>, vector<1x1x256xf32>,
    return
  }
  func.func @transform_0(%arg0: i32, %arg1: i32) -> (i32, i32, i32) {
    %c0_i32 = arith.constant 0 : i32
    %c0_i32_0 = arith.constant 0 : i32
    return %arg0, %c0_i32, %arg1 : i32, i32, i32
  }
  func.func @transform_1(%arg0: i32, %arg1: i32) -> (i32, i32, i32) {
    %c0_i32 = arith.constant 0 : i32
    %c0_i32_0 = arith.constant 0 : i32
    %c0_i32_1 = arith.constant 0 : i32
    return %arg0, %c0_i32, %c0_i32_0 : i32, i32, i32
  }
  func.func @transform_2(%arg0: i32, %arg1: i32) -> (i32, i32, i32) {
    %c0_i32 = arith.constant 0 : i32
    %c0_i32_0 = arith.constant 0 : i32
    return %arg0, %c0_i32, %arg1 : i32, i32, i32
  }
  func.func @transform_3(%arg0: i32, %arg1: i32) -> (i32, i32, i32) {
    %c0_i32 = arith.constant 0 : i32
    %c0_i32_0 = arith.constant 0 : i32
    return %arg0, %c0_i32, %arg1 : i32, i32, i32
  }
}

module attributes {stable_mosaic.version = 11 : i64} {
  func.func @kern(%arg0: i32, %arg1: i32, %arg2: memref<1x8x256xf32, #tpu.memory_space<vmem>>, %arg3: memref<1x8x1xf32, #tpu.memory_space<vmem>>, %arg4: memref<1x1x256xf32, #tpu.memory_space<vmem>>, %arg5: memref<1x8x256xbf16, #tpu.memory_space<vmem>>) attributes {dimension_semantics = [#tpu.dimension_semantics<parallel>, #tpu.dimension_semantics<parallel>], iteration_bounds = array<i64: 2, 1>, scalar_prefetch = 0 : i64, scratch_operands = 0 : i64, tpu.core_type = #tpu.core_type<tc>, window_params = [{transform_indices = @transform_0, window_bounds = array<i64: 1, 8, 256>}, {transform_indices = @transform_1, window_bounds = array<i64: 1, 8, 1>}, {transform_indices = @transform_2, window_bounds = array<i64: 1, 1, 256>}, {transform_indices = @transform_3, window_bounds = array<i64: 1, 8, 256>}]} {
    %c0 = arith.constant 0 : index
    %c0_0 = arith.constant 0 : index
    %c0_1 = arith.constant 0 : index
    %0 = vector.load %arg2[%c0, %c0_0, %c0_1] : memref<1x8x256xf32, #tpu.memory_space<vmem>>, vector<1x8x256xf32>
    %1 = vector.shape_cast %0 : vector<1x8x256xf32> to vector<8x256xf32>
    %c0_2 = arith.constant 0 : index
    %c0_3 = arith.constant 0 : index
    %c0_4 = arith.constant 0 : index
    %2 = vector.load %arg3[%c0_2, %c0_3, %c0_4] : memref<1x8x1xf32, #tpu.memory_space<vmem>>, vector<1x8x1xf32>
    %3 = vector.shape_cast %2 : vector<1x8x1xf32> to vector<8x1xf32>
    %4 = vector.broadcast %3 : vector<8x1xf32> to vector<8x256xf32>
    %5 = arith.mulf %1, %4 : vector<8x256xf32>
    %c0_5 = arith.constant 0 : index
    %c0_6 = arith.constant 0 : index
    %c0_7 = arith.constant 0 : index
    %6 = vector.load %arg4[%c0_5, %c0_6, %c0_7] : memref<1x1x256xf32, #tpu.memory_space<vmem>>, vector<1x1x256xf32>
    %7 = vector.shape_cast %6 : vector<1x1x256xf32> to vector<1x256xf32>
    %8 = arith.negf %7 : vector<1x256xf32>
    %9 = math.exp %8 : vector<1x256xf32>
    %cst = arith.constant 1.000000e+00 : f32
    %10 = vector.broadcast %cst : f32 to vector<1x256xf32>
    %11 = arith.addf %10, %9 : vector<1x256xf32>
    %12 = arith.divf %10, %11 : vector<1x256xf32>
    %13 = vector.broadcast %12 : vector<1x256xf32> to vector<8x256xf32>
    %14 = arith.mulf %5, %13 : vector<8x256xf32>
    %15 = arith.truncf %14 : vector<8x256xf32> to vector<8x256xbf16>
    %c0_8 = arith.constant 0 : index
    %c0_9 = arith.constant 0 : index
    %c0_10 = arith.constant 0 : index
    %16 = vector.load %arg5[%c0_8, %c0_9, %c0_10] : memref<1x8x256xbf16, #tpu.memory_space<vmem>>, vector<1x8x256xbf16>
    %17 = vector.shape_cast %16 : vector<1x8x256xbf16> to vector<8x256xbf16>
    %18 = vector.shape_cast %15 : vector<8x256xbf16> to vector<1x8x256xbf16>
    tpu.vector_store %arg5[%c0_8, %c0_9, %c0_10], %18 {strides = array<i32>} : memref<1x8x256xbf16, #tpu.memory_space<vmem>>, vector<1x8x256xbf16>,
    return
  }
  func.func @transform_0(%arg0: i32, %arg1: i32) -> (i32, i32, i32) {
    %c0_i32 = arith.constant 0 : i32
    %c0_i32_0 = arith.constant 0 : i32
    return %arg0, %c0_i32, %arg1 : i32, i32, i32
  }
  func.func @transform_1(%arg0: i32, %arg1: i32) -> (i32, i32, i32) {
    %c0_i32 = arith.constant 0 : i32
    %c0_i32_0 = arith.constant 0 : i32
    %c0_i32_1 = arith.constant 0 : i32
    return %arg0, %c0_i32, %c0_i32_0 : i32, i32, i32
  }
  func.func @transform_2(%arg0: i32, %arg1: i32) -> (i32, i32, i32) {
    %c0_i32 = arith.constant 0 : i32
    %c0_i32_0 = arith.constant 0 : i32
    return %arg0, %c0_i32, %arg1 : i32, i32, i32
  }
  func.func @transform_3(%arg0: i32, %arg1: i32) -> (i32, i32, i32) {
    %c0_i32 = arith.constant 0 : i32
    %c0_i32_0 = arith.constant 0 : i32
    return %arg0, %c0_i32, %arg1 : i32, i32, i32
  }
}

module attributes {stable_mosaic.version = 11 : i64} {
  func.func @kern(%arg0: i32, %arg1: i32, %arg2: i32, %arg3: memref<8x8xbf16, #tpu.memory_space<vmem>>, %arg4: memref<1x8x256xbf16, #tpu.memory_space<vmem>>, %arg5: memref<1x8x256xf32, #tpu.memory_space<vmem>>, %arg6: memref<8x256xf32, #tpu.memory_space<vmem>>) attributes {dimension_semantics = [#tpu.dimension_semantics<parallel>, #tpu.dimension_semantics<parallel>, #tpu.dimension_semantics<arbitrary>], iteration_bounds = array<i64: 2, 1, 1>, scalar_prefetch = 0 : i64, scratch_operands = 1 : i64, tpu.core_type = #tpu.core_type<tc>, window_params = [{transform_indices = @transform_0, window_bounds = array<i64: 8, 8>}, {transform_indices = @transform_1, window_bounds = array<i64: 1, 8, 256>}, {transform_indices = @transform_2, window_bounds = array<i64: 1, 8, 256>}]} {
    %c0_i32 = arith.constant 0 : i32
    %0 = arith.cmpi eq, %arg2, %c0_i32 : i32
    %1 = arith.extui %0 : i1 to i32
    %c0_i32_0 = arith.constant 0 : i32
    %2 = arith.cmpi ne, %1, %c0_i32_0 : i32
    scf.if %2 {
      %cst_11 = arith.constant 0.000000e+00 : f32
      %13 = vector.broadcast %cst_11 : f32 to vector<8x256xf32>
      %c0_12 = arith.constant 0 : index
      %c0_13 = arith.constant 0 : index
      %14 = vector.load %arg6[%c0_12, %c0_13] : memref<8x256xf32, #tpu.memory_space<vmem>>, vector<8x256xf32>
      tpu.vector_store %arg6[%c0_12, %c0_13], %13 {strides = array<i32>} : memref<8x256xf32, #tpu.memory_space<vmem>>, vector<8x256xf32>,
    } else {
    }
    %c0 = arith.constant 0 : index
    %c0_1 = arith.constant 0 : index
    %3 = vector.load %arg6[%c0, %c0_1] : memref<8x256xf32, #tpu.memory_space<vmem>>, vector<8x256xf32>
    %c0_2 = arith.constant 0 : index
    %c0_3 = arith.constant 0 : index
    %4 = vector.load %arg3[%c0_2, %c0_3] : memref<8x8xbf16, #tpu.memory_space<vmem>>, vector<8x8xbf16>
    %c0_4 = arith.constant 0 : index
    %c0_5 = arith.constant 0 : index
    %c0_6 = arith.constant 0 : index
    %5 = vector.load %arg4[%c0_4, %c0_5, %c0_6] : memref<1x8x256xbf16, #tpu.memory_space<vmem>>, vector<1x8x256xbf16>
    %6 = vector.shape_cast %5 : vector<1x8x256xbf16> to vector<8x256xbf16>
    %cst = arith.constant dense<0.000000e+00> : vector<8x256xf32>
    %7 = tpu.matmul %4, %6, %cst {dimension_numbers = #tpu.dot_dimension_numbers<[1], [0], [0], [1], [0, 0, 1, 1], [], []>} : vector<8x8xbf16>, vector<8x256xbf16>, vector<8x256xf32> -> vector<8x256xf32>
    %8 = arith.addf %3, %7 : vector<8x256xf32>
    %c0_7 = arith.constant 0 : index
    %c0_8 = arith.constant 0 : index
    %9 = vector.load %arg6[%c0_7, %c0_8] : memref<8x256xf32, #tpu.memory_space<vmem>>, vector<8x256xf32>
    tpu.vector_store %arg6[%c0_7, %c0_8], %8 {strides = array<i32>} : memref<8x256xf32, #tpu.memory_space<vmem>>, vector<8x256xf32>,
    %c0_i32_9 = arith.constant 0 : i32
    %10 = arith.cmpi eq, %arg2, %c0_i32_9 : i32
    %11 = arith.extui %10 : i1 to i32
    %c0_i32_10 = arith.constant 0 : i32
    %12 = arith.cmpi ne, %11, %c0_i32_10 : i32
    scf.if %12 {
      %c0_11 = arith.constant 0 : index
      %c0_12 = arith.constant 0 : index
      %13 = vector.load %arg6[%c0_11, %c0_12] : memref<8x256xf32, #tpu.memory_space<vmem>>, vector<8x256xf32>
      %cst_13 = arith.constant 0.000000e+00 : f32
      %14 = vector.broadcast %cst_13 : f32 to vector<8x256xf32>
      %15 = arith.maximumf %13, %14 : vector<8x256xf32>
      %c0_14 = arith.constant 0 : index
      %c0_15 = arith.constant 0 : index
      %c0_16 = arith.constant 0 : index
      %16 = vector.load %arg5[%c0_14, %c0_15, %c0_16] : memref<1x8x256xf32, #tpu.memory_space<vmem>>, vector<1x8x256xf32>
      %17 = vector.shape_cast %16 : vector<1x8x256xf32> to vector<8x256xf32>
      %18 = vector.shape_cast %15 : vector<8x256xf32> to vector<1x8x256xf32>
      tpu.vector_store %arg5[%c0_14, %c0_15, %c0_16], %18 {strides = array<i32>} : memref<1x8x256xf32, #tpu.memory_space<vmem>>, vector<1x8x256xf32>,
    } else {
    }
    return
  }
  func.func @transform_0(%arg0: i32, %arg1: i32, %arg2: i32) -> (i32, i32) {
    %c0_i32 = arith.constant 0 : i32
    %c0_i32_0 = arith.constant 0 : i32
    return %c0_i32, %arg2 : i32, i32
  }
  func.func @transform_1(%arg0: i32, %arg1: i32, %arg2: i32) -> (i32, i32, i32) {
    %c0_i32 = arith.constant 0 : i32
    return %arg0, %arg2, %arg1 : i32, i32, i32
  }
  func.func @transform_2(%arg0: i32, %arg1: i32, %arg2: i32) -> (i32, i32, i32) {
    %c0_i32 = arith.constant 0 : i32
    %c0_i32_0 = arith.constant 0 : i32
    return %arg0, %c0_i32, %arg1 : i32, i32, i32
  }
}

module attributes {stable_mosaic.version = 11 : i64} {
  func.func @kern(%arg0: i32, %arg1: i32, %arg2: i32, %arg3: memref<8x4xbf16, #tpu.memory_space<vmem>>, %arg4: memref<1x4x256xbf16, #tpu.memory_space<vmem>>, %arg5: memref<1x8x256xf32, #tpu.memory_space<vmem>>, %arg6: memref<8x256xf32, #tpu.memory_space<vmem>>) attributes {dimension_semantics = [#tpu.dimension_semantics<parallel>, #tpu.dimension_semantics<parallel>, #tpu.dimension_semantics<arbitrary>], iteration_bounds = array<i64: 2, 1, 1>, scalar_prefetch = 0 : i64, scratch_operands = 1 : i64, tpu.core_type = #tpu.core_type<tc>, window_params = [{transform_indices = @transform_0, window_bounds = array<i64: 8, 4>}, {transform_indices = @transform_1, window_bounds = array<i64: 1, 4, 256>}, {transform_indices = @transform_2, window_bounds = array<i64: 1, 8, 256>}]} {
    %c0_i32 = arith.constant 0 : i32
    %0 = arith.cmpi eq, %arg2, %c0_i32 : i32
    %1 = arith.extui %0 : i1 to i32
    %c0_i32_0 = arith.constant 0 : i32
    %2 = arith.cmpi ne, %1, %c0_i32_0 : i32
    scf.if %2 {
      %cst_11 = arith.constant 0.000000e+00 : f32
      %13 = vector.broadcast %cst_11 : f32 to vector<8x256xf32>
      %c0_12 = arith.constant 0 : index
      %c0_13 = arith.constant 0 : index
      %14 = vector.load %arg6[%c0_12, %c0_13] : memref<8x256xf32, #tpu.memory_space<vmem>>, vector<8x256xf32>
      tpu.vector_store %arg6[%c0_12, %c0_13], %13 {strides = array<i32>} : memref<8x256xf32, #tpu.memory_space<vmem>>, vector<8x256xf32>,
    } else {
    }
    %c0 = arith.constant 0 : index
    %c0_1 = arith.constant 0 : index
    %3 = vector.load %arg6[%c0, %c0_1] : memref<8x256xf32, #tpu.memory_space<vmem>>, vector<8x256xf32>
    %c0_2 = arith.constant 0 : index
    %c0_3 = arith.constant 0 : index
    %4 = vector.load %arg3[%c0_2, %c0_3] : memref<8x4xbf16, #tpu.memory_space<vmem>>, vector<8x4xbf16>
    %c0_4 = arith.constant 0 : index
    %c0_5 = arith.constant 0 : index
    %c0_6 = arith.constant 0 : index
    %5 = vector.load %arg4[%c0_4, %c0_5, %c0_6] : memref<1x4x256xbf16, #tpu.memory_space<vmem>>, vector<1x4x256xbf16>
    %6 = vector.shape_cast %5 : vector<1x4x256xbf16> to vector<4x256xbf16>
    %cst = arith.constant dense<0.000000e+00> : vector<8x256xf32>
    %7 = tpu.matmul %4, %6, %cst {dimension_numbers = #tpu.dot_dimension_numbers<[1], [0], [0], [1], [0, 0, 1, 1], [], []>} : vector<8x4xbf16>, vector<4x256xbf16>, vector<8x256xf32> -> vector<8x256xf32>
    %8 = arith.addf %3, %7 : vector<8x256xf32>
    %c0_7 = arith.constant 0 : index
    %c0_8 = arith.constant 0 : index
    %9 = vector.load %arg6[%c0_7, %c0_8] : memref<8x256xf32, #tpu.memory_space<vmem>>, vector<8x256xf32>
    tpu.vector_store %arg6[%c0_7, %c0_8], %8 {strides = array<i32>} : memref<8x256xf32, #tpu.memory_space<vmem>>, vector<8x256xf32>,
    %c0_i32_9 = arith.constant 0 : i32
    %10 = arith.cmpi eq, %arg2, %c0_i32_9 : i32
    %11 = arith.extui %10 : i1 to i32
    %c0_i32_10 = arith.constant 0 : i32
    %12 = arith.cmpi ne, %11, %c0_i32_10 : i32
    scf.if %12 {
      %c0_11 = arith.constant 0 : index
      %c0_12 = arith.constant 0 : index
      %13 = vector.load %arg6[%c0_11, %c0_12] : memref<8x256xf32, #tpu.memory_space<vmem>>, vector<8x256xf32>
      %c0_13 = arith.constant 0 : index
      %c0_14 = arith.constant 0 : index
      %c0_15 = arith.constant 0 : index
      %14 = vector.load %arg5[%c0_13, %c0_14, %c0_15] : memref<1x8x256xf32, #tpu.memory_space<vmem>>, vector<1x8x256xf32>
      %15 = vector.shape_cast %14 : vector<1x8x256xf32> to vector<8x256xf32>
      %16 = vector.shape_cast %13 : vector<8x256xf32> to vector<1x8x256xf32>
      tpu.vector_store %arg5[%c0_13, %c0_14, %c0_15], %16 {strides = array<i32>} : memref<1x8x256xf32, #tpu.memory_space<vmem>>, vector<1x8x256xf32>,
    } else {
    }
    return
  }
  func.func @transform_0(%arg0: i32, %arg1: i32, %arg2: i32) -> (i32, i32) {
    %c0_i32 = arith.constant 0 : i32
    %c0_i32_0 = arith.constant 0 : i32
    return %c0_i32, %arg2 : i32, i32
  }
  func.func @transform_1(%arg0: i32, %arg1: i32, %arg2: i32) -> (i32, i32, i32) {
    %c0_i32 = arith.constant 0 : i32
    return %arg0, %arg2, %arg1 : i32, i32, i32
  }
  func.func @transform_2(%arg0: i32, %arg1: i32, %arg2: i32) -> (i32, i32, i32) {
    %c0_i32 = arith.constant 0 : i32
    %c0_i32_0 = arith.constant 0 : i32
    return %arg0, %c0_i32, %arg1 : i32, i32, i32
  }
}

module attributes {stable_mosaic.version = 11 : i64} {
  func.func @kern(%arg0: i32, %arg1: i32, %arg2: memref<1x8x256xf32, #tpu.memory_space<vmem>>, %arg3: memref<1x8x1xf32, #tpu.memory_space<vmem>>, %arg4: memref<1x1x256xf32, #tpu.memory_space<vmem>>, %arg5: memref<1x8x256xf32, #tpu.memory_space<vmem>>, %arg6: memref<1x8x256xf32, #tpu.memory_space<vmem>>, %arg7: memref<1x8x1xf32, #tpu.memory_space<vmem>>, %arg8: memref<1x8x1xf32, #tpu.memory_space<vmem>>, %arg9: memref<8x1xf32, #tpu.memory_space<vmem>>, %arg10: memref<8x1xf32, #tpu.memory_space<vmem>>) attributes {dimension_semantics = [#tpu.dimension_semantics<parallel>, #tpu.dimension_semantics<arbitrary>], iteration_bounds = array<i64: 2, 1>, scalar_prefetch = 0 : i64, scratch_operands = 2 : i64, tpu.core_type = #tpu.core_type<tc>, window_params = [{transform_indices = @transform_0, window_bounds = array<i64: 1, 8, 256>}, {transform_indices = @transform_1, window_bounds = array<i64: 1, 8, 1>}, {transform_indices = @transform_2, window_bounds = array<i64: 1, 1, 256>}, {transform_indices = @transform_3, window_bounds = array<i64: 1, 8, 256>}, {transform_indices = @transform_4, window_bounds = array<i64: 1, 8, 256>}, {transform_indices = @transform_5, window_bounds = array<i64: 1, 8, 1>}, {transform_indices = @transform_6, window_bounds = array<i64: 1, 8, 1>}]} {
    %c0 = arith.constant 0 : index
    %c0_0 = arith.constant 0 : index
    %c0_1 = arith.constant 0 : index
    %0 = vector.load %arg2[%c0, %c0_0, %c0_1] : memref<1x8x256xf32, #tpu.memory_space<vmem>>, vector<1x8x256xf32>
    %1 = vector.shape_cast %0 : vector<1x8x256xf32> to vector<8x256xf32>
    %c0_2 = arith.constant 0 : index
    %c0_3 = arith.constant 0 : index
    %c0_4 = arith.constant 0 : index
    %2 = vector.load %arg3[%c0_2, %c0_3, %c0_4] : memref<1x8x1xf32, #tpu.memory_space<vmem>>, vector<1x8x1xf32>
    %3 = vector.shape_cast %2 : vector<1x8x1xf32> to vector<8x1xf32>
    %4 = vector.broadcast %3 : vector<8x1xf32> to vector<8x256xf32>
    %5 = arith.mulf %1, %4 : vector<8x256xf32>
    %c0_5 = arith.constant 0 : index
    %c0_6 = arith.constant 0 : index
    %c0_7 = arith.constant 0 : index
    %6 = vector.load %arg4[%c0_5, %c0_6, %c0_7] : memref<1x1x256xf32, #tpu.memory_space<vmem>>, vector<1x1x256xf32>
    %7 = vector.shape_cast %6 : vector<1x1x256xf32> to vector<1x256xf32>
    %8 = arith.negf %7 : vector<1x256xf32>
    %9 = math.exp %8 : vector<1x256xf32>
    %cst = arith.constant 1.000000e+00 : f32
    %10 = vector.broadcast %cst : f32 to vector<1x256xf32>
    %11 = arith.addf %10, %9 : vector<1x256xf32>
    %12 = arith.divf %10, %11 : vector<1x256xf32>
    %13 = vector.broadcast %12 : vector<1x256xf32> to vector<8x256xf32>
    %14 = arith.mulf %5, %13 : vector<8x256xf32>
    %c0_8 = arith.constant 0 : index
    %c0_9 = arith.constant 0 : index
    %c0_10 = arith.constant 0 : index
    %15 = vector.load %arg5[%c0_8, %c0_9, %c0_10] : memref<1x8x256xf32, #tpu.memory_space<vmem>>, vector<1x8x256xf32>
    %16 = vector.shape_cast %15 : vector<1x8x256xf32> to vector<8x256xf32>
    %17 = arith.addf %14, %16 : vector<8x256xf32>
    %c0_11 = arith.constant 0 : index
    %c0_12 = arith.constant 0 : index
    %c0_13 = arith.constant 0 : index
    %18 = vector.load %arg6[%c0_11, %c0_12, %c0_13] : memref<1x8x256xf32, #tpu.memory_space<vmem>>, vector<1x8x256xf32>
    %19 = vector.shape_cast %18 : vector<1x8x256xf32> to vector<8x256xf32>
    %20 = vector.shape_cast %17 : vector<8x256xf32> to vector<1x8x256xf32>
    tpu.vector_store %arg6[%c0_11, %c0_12, %c0_13], %20 {strides = array<i32>} : memref<1x8x256xf32, #tpu.memory_space<vmem>>, vector<1x8x256xf32>,
    %cst_14 = arith.constant dense<0.000000e+00> : vector<8xf32>
    %21 = vector.multi_reduction <add>, %17, %cst_14 [1] : vector<8x256xf32> to vector<8xf32>
    %22 = vector.shape_cast %21 : vector<8xf32> to vector<8x1xf32>
    %23 = arith.mulf %17, %17 : vector<8x256xf32>
    %cst_15 = arith.constant dense<0.000000e+00> : vector<8xf32>
    %24 = vector.multi_reduction <add>, %23, %cst_15 [1] : vector<8x256xf32> to vector<8xf32>
    %25 = vector.shape_cast %24 : vector<8xf32> to vector<8x1xf32>
    %c0_i32 = arith.constant 0 : i32
    %26 = arith.cmpi eq, %arg1, %c0_i32 : i32
    %c0_16 = arith.constant 0 : index
    %c0_17 = arith.constant 0 : index
    %27 = vector.load %arg9[%c0_16, %c0_17] : memref<8x1xf32, #tpu.memory_space<vmem>>, vector<8x1xf32>
    %28 = arith.addf %27, %22 : vector<8x1xf32>
    %29 = arith.select %26, %22, %28 : vector<8x1xf32>
    %c0_18 = arith.constant 0 : index
    %c0_19 = arith.constant 0 : index
    %30 = vector.load %arg10[%c0_18, %c0_19] : memref<8x1xf32, #tpu.memory_space<vmem>>, vector<8x1xf32>
    %31 = arith.addf %30, %25 : vector<8x1xf32>
    %32 = arith.select %26, %25, %31 : vector<8x1xf32>
    %c0_20 = arith.constant 0 : index
    %c0_21 = arith.constant 0 : index
    %33 = vector.load %arg9[%c0_20, %c0_21] : memref<8x1xf32, #tpu.memory_space<vmem>>, vector<8x1xf32>
    tpu.vector_store %arg9[%c0_20, %c0_21], %29 {strides = array<i32>} : memref<8x1xf32, #tpu.memory_space<vmem>>, vector<8x1xf32>,
    %c0_22 = arith.constant 0 : index
    %c0_23 = arith.constant 0 : index
    %34 = vector.load %arg10[%c0_22, %c0_23] : memref<8x1xf32, #tpu.memory_space<vmem>>, vector<8x1xf32>
    tpu.vector_store %arg10[%c0_22, %c0_23], %32 {strides = array<i32>} : memref<8x1xf32, #tpu.memory_space<vmem>>, vector<8x1xf32>,
    %c0_24 = arith.constant 0 : index
    %c0_25 = arith.constant 0 : index
    %c0_26 = arith.constant 0 : index
    %35 = vector.load %arg7[%c0_24, %c0_25, %c0_26] : memref<1x8x1xf32, #tpu.memory_space<vmem>>, vector<1x8x1xf32>
    %36 = vector.shape_cast %35 : vector<1x8x1xf32> to vector<8x1xf32>
    %37 = vector.shape_cast %29 : vector<8x1xf32> to vector<1x8x1xf32>
    tpu.vector_store %arg7[%c0_24, %c0_25, %c0_26], %37 {strides = array<i32>} : memref<1x8x1xf32, #tpu.memory_space<vmem>>, vector<1x8x1xf32>,
    %c0_27 = arith.constant 0 : index
    %c0_28 = arith.constant 0 : index
    %c0_29 = arith.constant 0 : index
    %38 = vector.load %arg8[%c0_27, %c0_28, %c0_29] : memref<1x8x1xf32, #tpu.memory_space<vmem>>, vector<1x8x1xf32>
    %39 = vector.shape_cast %38 : vector<1x8x1xf32> to vector<8x1xf32>
    %40 = vector.shape_cast %32 : vector<8x1xf32> to vector<1x8x1xf32>
    tpu.vector_store %arg8[%c0_27, %c0_28, %c0_29], %40 {strides = array<i32>} : memref<1x8x1xf32, #tpu.memory_space<vmem>>, vector<1x8x1xf32>,
    return
  }
  func.func @transform_0(%arg0: i32, %arg1: i32) -> (i32, i32, i32) {
    %c1_i32 = arith.constant 1 : i32
    %c0_i32 = arith.constant 0 : i32
    return %arg0, %c1_i32, %arg1 : i32, i32, i32
  }
  func.func @transform_1(%arg0: i32, %arg1: i32) -> (i32, i32, i32) {
    %c0_i32 = arith.constant 0 : i32
    %c0_i32_0 = arith.constant 0 : i32
    %c0_i32_1 = arith.constant 0 : i32
    return %arg0, %c0_i32, %c0_i32_0 : i32, i32, i32
  }
  func.func @transform_2(%arg0: i32, %arg1: i32) -> (i32, i32, i32) {
    %c0_i32 = arith.constant 0 : i32
    %c0_i32_0 = arith.constant 0 : i32
    return %arg0, %c0_i32, %arg1 : i32, i32, i32
  }
  func.func @transform_3(%arg0: i32, %arg1: i32) -> (i32, i32, i32) {
    %c0_i32 = arith.constant 0 : i32
    %c0_i32_0 = arith.constant 0 : i32
    return %arg0, %c0_i32, %arg1 : i32, i32, i32
  }
  func.func @transform_4(%arg0: i32, %arg1: i32) -> (i32, i32, i32) {
    %c0_i32 = arith.constant 0 : i32
    %c0_i32_0 = arith.constant 0 : i32
    return %arg0, %c0_i32, %arg1 : i32, i32, i32
  }
  func.func @transform_5(%arg0: i32, %arg1: i32) -> (i32, i32, i32) {
    %c0_i32 = arith.constant 0 : i32
    %c0_i32_0 = arith.constant 0 : i32
    %c0_i32_1 = arith.constant 0 : i32
    return %arg0, %c0_i32, %c0_i32_0 : i32, i32, i32
  }
  func.func @transform_6(%arg0: i32, %arg1: i32) -> (i32, i32, i32) {
    %c0_i32 = arith.constant 0 : i32
    %c0_i32_0 = arith.constant 0 : i32
    %c0_i32_1 = arith.constant 0 : i32
    return %arg0, %c0_i32, %c0_i32_0 : i32, i32, i32
  }
}

module attributes {stable_mosaic.version = 11 : i64} {
  func.func @_bn_residual_kernel(%arg0: i32, %arg1: i32, %arg2: memref<1x8x256xf32, #tpu.memory_space<vmem>>, %arg3: memref<1x8x256xf32, #tpu.memory_space<vmem>>, %arg4: memref<8x1xf32, #tpu.memory_space<vmem>>, %arg5: memref<8x1xf32, #tpu.memory_space<vmem>>, %arg6: memref<1x8x256xf32, #tpu.memory_space<vmem>>) attributes {dimension_semantics = [#tpu.dimension_semantics<parallel>, #tpu.dimension_semantics<parallel>], iteration_bounds = array<i64: 2, 1>, scalar_prefetch = 0 : i64, scratch_operands = 0 : i64, tpu.core_type = #tpu.core_type<tc>, window_params = [{transform_indices = @transform_0, window_bounds = array<i64: 1, 8, 256>}, {transform_indices = @transform_1, window_bounds = array<i64: 1, 8, 256>}, {pipeline_mode = #tpu.pipeline_mode<synchronous>, transform_indices = @transform_2, window_bounds = array<i64: 8, 1>}, {pipeline_mode = #tpu.pipeline_mode<synchronous>, transform_indices = @transform_3, window_bounds = array<i64: 8, 1>}, {transform_indices = @transform_4, window_bounds = array<i64: 1, 8, 256>}]} {
    %c0 = arith.constant 0 : index
    %c0_0 = arith.constant 0 : index
    %c0_1 = arith.constant 0 : index
    %0 = vector.load %arg2[%c0, %c0_0, %c0_1] : memref<1x8x256xf32, #tpu.memory_space<vmem>>, vector<1x8x256xf32>
    %1 = vector.shape_cast %0 : vector<1x8x256xf32> to vector<8x256xf32>
    %cst = arith.constant 3.000000e+00 : f32
    %2 = vector.broadcast %cst : f32 to vector<8x256xf32>
    %3 = arith.mulf %2, %1 : vector<8x256xf32>
    %c0_2 = arith.constant 0 : index
    %c0_3 = arith.constant 0 : index
    %c0_4 = arith.constant 0 : index
    %4 = vector.load %arg3[%c0_2, %c0_3, %c0_4] : memref<1x8x256xf32, #tpu.memory_space<vmem>>, vector<1x8x256xf32>
    %5 = vector.shape_cast %4 : vector<1x8x256xf32> to vector<8x256xf32>
    %c0_5 = arith.constant 0 : index
    %c0_6 = arith.constant 0 : index
    %6 = vector.load %arg4[%c0_5, %c0_6] : memref<8x1xf32, #tpu.memory_space<vmem>>, vector<8x1xf32>
    %7 = vector.broadcast %6 : vector<8x1xf32> to vector<8x256xf32>
    %8 = arith.subf %5, %7 : vector<8x256xf32>
    %c0_7 = arith.constant 0 : index
    %c0_8 = arith.constant 0 : index
    %9 = vector.load %arg5[%c0_7, %c0_8] : memref<8x1xf32, #tpu.memory_space<vmem>>, vector<8x1xf32>
    %10 = vector.broadcast %9 : vector<8x1xf32> to vector<8x256xf32>
    %11 = arith.mulf %8, %10 : vector<8x256xf32>
    %12 = arith.addf %3, %11 : vector<8x256xf32>
    %c0_9 = arith.constant 0 : index
    %c0_10 = arith.constant 0 : index
    %c0_11 = arith.constant 0 : index
    %13 = vector.load %arg6[%c0_9, %c0_10, %c0_11] : memref<1x8x256xf32, #tpu.memory_space<vmem>>, vector<1x8x256xf32>
    %14 = vector.shape_cast %13 : vector<1x8x256xf32> to vector<8x256xf32>
    %15 = vector.shape_cast %12 : vector<8x256xf32> to vector<1x8x256xf32>
    tpu.vector_store %arg6[%c0_9, %c0_10, %c0_11], %15 {strides = array<i32>} : memref<1x8x256xf32, #tpu.memory_space<vmem>>, vector<1x8x256xf32>,
    return
  }
  func.func @transform_0(%arg0: i32, %arg1: i32) -> (i32, i32, i32) {
    %c0_i32 = arith.constant 0 : i32
    %c0_i32_0 = arith.constant 0 : i32
    return %arg0, %c0_i32, %arg1 : i32, i32, i32
  }
  func.func @transform_1(%arg0: i32, %arg1: i32) -> (i32, i32, i32) {
    %c0_i32 = arith.constant 0 : i32
    %c0_i32_0 = arith.constant 0 : i32
    return %arg0, %c0_i32, %arg1 : i32, i32, i32
  }
  func.func @transform_2(%arg0: i32, %arg1: i32) -> (i32, i32) {
    %c0_i32 = arith.constant 0 : i32
    %c0_i32_0 = arith.constant 0 : i32
    %c0_i32_1 = arith.constant 0 : i32
    return %c0_i32, %c0_i32_0 : i32, i32
  }
  func.func @transform_3(%arg0: i32, %arg1: i32) -> (i32, i32) {
    %c0_i32 = arith.constant 0 : i32
    %c0_i32_0 = arith.constant 0 : i32
    %c0_i32_1 = arith.constant 0 : i32
    return %c0_i32, %c0_i32_0 : i32, i32
  }
  func.func @transform_4(%arg0: i32, %arg1: i32) -> (i32, i32, i32) {
    %c0_i32 = arith.constant 0 : i32
    %c0_i32_0 = arith.constant 0 : i32
    return %arg0, %c0_i32, %arg1 : i32, i32, i32
  }
}

module attributes {stable_mosaic.version = 11 : i64} {
  func.func @kern(%arg0: i32, %arg1: i32, %arg2: i32, %arg3: memref<8x72xbf16, #tpu.memory_space<vmem>>, %arg4: memref<1x72x256xbf16, #tpu.memory_space<vmem>>, %arg5: memref<1x8x256xf32, #tpu.memory_space<vmem>>, %arg6: memref<1x8x1xf32, #tpu.memory_space<vmem>>, %arg7: memref<1x8x1xf32, #tpu.memory_space<vmem>>, %arg8: memref<8x256xf32, #tpu.memory_space<vmem>>, %arg9: memref<8x1xf32, #tpu.memory_space<vmem>>, %arg10: memref<8x1xf32, #tpu.memory_space<vmem>>) attributes {dimension_semantics = [#tpu.dimension_semantics<parallel>, #tpu.dimension_semantics<arbitrary>, #tpu.dimension_semantics<arbitrary>], iteration_bounds = array<i64: 2, 1, 1>, scalar_prefetch = 0 : i64, scratch_operands = 3 : i64, tpu.core_type = #tpu.core_type<tc>, window_params = [{transform_indices = @transform_0, window_bounds = array<i64: 8, 72>}, {transform_indices = @transform_1, window_bounds = array<i64: 1, 72, 256>}, {transform_indices = @transform_2, window_bounds = array<i64: 1, 8, 256>}, {transform_indices = @transform_3, window_bounds = array<i64: 1, 8, 1>}, {transform_indices = @transform_4, window_bounds = array<i64: 1, 8, 1>}]} {
    %c0_i32 = arith.constant 0 : i32
    %0 = arith.cmpi eq, %arg2, %c0_i32 : i32
    %1 = arith.extui %0 : i1 to i32
    %c0_i32_0 = arith.constant 0 : i32
    %2 = arith.cmpi ne, %1, %c0_i32_0 : i32
    scf.if %2 {
      %cst_11 = arith.constant 0.000000e+00 : f32
      %13 = vector.broadcast %cst_11 : f32 to vector<8x256xf32>
      %c0_12 = arith.constant 0 : index
      %c0_13 = arith.constant 0 : index
      %14 = vector.load %arg8[%c0_12, %c0_13] : memref<8x256xf32, #tpu.memory_space<vmem>>, vector<8x256xf32>
      tpu.vector_store %arg8[%c0_12, %c0_13], %13 {strides = array<i32>} : memref<8x256xf32, #tpu.memory_space<vmem>>, vector<8x256xf32>,
    } else {
    }
    %c0 = arith.constant 0 : index
    %c0_1 = arith.constant 0 : index
    %3 = vector.load %arg8[%c0, %c0_1] : memref<8x256xf32, #tpu.memory_space<vmem>>, vector<8x256xf32>
    %c0_2 = arith.constant 0 : index
    %c0_3 = arith.constant 0 : index
    %4 = vector.load %arg3[%c0_2, %c0_3] : memref<8x72xbf16, #tpu.memory_space<vmem>>, vector<8x72xbf16>
    %c0_4 = arith.constant 0 : index
    %c0_5 = arith.constant 0 : index
    %c0_6 = arith.constant 0 : index
    %5 = vector.load %arg4[%c0_4, %c0_5, %c0_6] : memref<1x72x256xbf16, #tpu.memory_space<vmem>>, vector<1x72x256xbf16>
    %6 = vector.shape_cast %5 : vector<1x72x256xbf16> to vector<72x256xbf16>
    %cst = arith.constant dense<0.000000e+00> : vector<8x256xf32>
    %7 = tpu.matmul %4, %6, %cst {dimension_numbers = #tpu.dot_dimension_numbers<[1], [0], [0], [1], [0, 0, 1, 1], [], []>} : vector<8x72xbf16>, vector<72x256xbf16>, vector<8x256xf32> -> vector<8x256xf32>
    %8 = arith.addf %3, %7 : vector<8x256xf32>
    %c0_7 = arith.constant 0 : index
    %c0_8 = arith.constant 0 : index
    %9 = vector.load %arg8[%c0_7, %c0_8] : memref<8x256xf32, #tpu.memory_space<vmem>>, vector<8x256xf32>
    tpu.vector_store %arg8[%c0_7, %c0_8], %8 {strides = array<i32>} : memref<8x256xf32, #tpu.memory_space<vmem>>, vector<8x256xf32>,
    %c0_i32_9 = arith.constant 0 : i32
    %10 = arith.cmpi eq, %arg2, %c0_i32_9 : i32
    %11 = arith.extui %10 : i1 to i32
    %c0_i32_10 = arith.constant 0 : i32
    %12 = arith.cmpi ne, %11, %c0_i32_10 : i32
    scf.if %12 {
      %c0_11 = arith.constant 0 : index
      %c0_12 = arith.constant 0 : index
      %13 = vector.load %arg8[%c0_11, %c0_12] : memref<8x256xf32, #tpu.memory_space<vmem>>, vector<8x256xf32>
      %c0_13 = arith.constant 0 : index
      %c0_14 = arith.constant 0 : index
      %c0_15 = arith.constant 0 : index
      %14 = vector.load %arg5[%c0_13, %c0_14, %c0_15] : memref<1x8x256xf32, #tpu.memory_space<vmem>>, vector<1x8x256xf32>
      %15 = vector.shape_cast %14 : vector<1x8x256xf32> to vector<8x256xf32>
      %16 = vector.shape_cast %13 : vector<8x256xf32> to vector<1x8x256xf32>
      tpu.vector_store %arg5[%c0_13, %c0_14, %c0_15], %16 {strides = array<i32>} : memref<1x8x256xf32, #tpu.memory_space<vmem>>, vector<1x8x256xf32>,
      %17 = tpu.iota {dimensions = array<i32: 1>} : vector<8x256xi32>
      %c256_i32 = arith.constant 256 : i32
      %18 = arith.muli %arg1, %c256_i32 : i32
      %19 = vector.broadcast %18 : i32 to vector<8x256xi32>
      %20 = arith.addi %17, %19 : vector<8x256xi32>
      %c256_i32_16 = arith.constant 256 : i32
      %21 = vector.broadcast %c256_i32_16 : i32 to vector<8x256xi32>
      %22 = arith.cmpi slt, %20, %21 : vector<8x256xi32>
      %cst_17 = arith.constant 0.000000e+00 : f32
      %23 = vector.broadcast %cst_17 : f32 to vector<8x256xf32>
      %24 = arith.select %22, %13, %23 : vector<8x256xi1>, vector<8x256xf32>
      %cst_18 = arith.constant dense<0.000000e+00> : vector<8xf32>
      %25 = vector.multi_reduction <add>, %24, %cst_18 [1] : vector<8x256xf32> to vector<8xf32>
      %26 = vector.shape_cast %25 : vector<8xf32> to vector<8x1xf32>
      %cst_19 = arith.constant 0xFF800000 : f32
      %27 = vector.broadcast %cst_19 : f32 to vector<8x256xf32>
      %28 = arith.select %22, %13, %27 : vector<8x256xi1>, vector<8x256xf32>
      %cst_20 = arith.constant dense<0xFF800000> : vector<8xf32>
      %29 = vector.multi_reduction <maximumf>, %28, %cst_20 [1] : vector<8x256xf32> to vector<8xf32>
      %30 = vector.shape_cast %29 : vector<8xf32> to vector<8x1xf32>
      %c0_i32_21 = arith.constant 0 : i32
      %31 = arith.cmpi eq, %arg1, %c0_i32_21 : i32
      %c0_22 = arith.constant 0 : index
      %c0_23 = arith.constant 0 : index
      %32 = vector.load %arg9[%c0_22, %c0_23] : memref<8x1xf32, #tpu.memory_space<vmem>>, vector<8x1xf32>
      %33 = arith.addf %32, %26 : vector<8x1xf32>
      %34 = arith.select %31, %26, %33 : vector<8x1xf32>
      %c0_24 = arith.constant 0 : index
      %c0_25 = arith.constant 0 : index
      %35 = vector.load %arg10[%c0_24, %c0_25] : memref<8x1xf32, #tpu.memory_space<vmem>>, vector<8x1xf32>
      %36 = arith.maximumf %35, %30 : vector<8x1xf32>
      %37 = arith.select %31, %30, %36 : vector<8x1xf32>
      %c0_26 = arith.constant 0 : index
      %c0_27 = arith.constant 0 : index
      %38 = vector.load %arg9[%c0_26, %c0_27] : memref<8x1xf32, #tpu.memory_space<vmem>>, vector<8x1xf32>
      tpu.vector_store %arg9[%c0_26, %c0_27], %34 {strides = array<i32>} : memref<8x1xf32, #tpu.memory_space<vmem>>, vector<8x1xf32>,
      %c0_28 = arith.constant 0 : index
      %c0_29 = arith.constant 0 : index
      %39 = vector.load %arg10[%c0_28, %c0_29] : memref<8x1xf32, #tpu.memory_space<vmem>>, vector<8x1xf32>
      tpu.vector_store %arg10[%c0_28, %c0_29], %37 {strides = array<i32>} : memref<8x1xf32, #tpu.memory_space<vmem>>, vector<8x1xf32>,
      %c0_30 = arith.constant 0 : index
      %c0_31 = arith.constant 0 : index
      %c0_32 = arith.constant 0 : index
      %40 = vector.load %arg6[%c0_30, %c0_31, %c0_32] : memref<1x8x1xf32, #tpu.memory_space<vmem>>, vector<1x8x1xf32>
      %41 = vector.shape_cast %40 : vector<1x8x1xf32> to vector<8x1xf32>
      %42 = vector.shape_cast %34 : vector<8x1xf32> to vector<1x8x1xf32>
      tpu.vector_store %arg6[%c0_30, %c0_31, %c0_32], %42 {strides = array<i32>} : memref<1x8x1xf32, #tpu.memory_space<vmem>>, vector<1x8x1xf32>,
      %c0_33 = arith.constant 0 : index
      %c0_34 = arith.constant 0 : index
      %c0_35 = arith.constant 0 : index
      %43 = vector.load %arg7[%c0_33, %c0_34, %c0_35] : memref<1x8x1xf32, #tpu.memory_space<vmem>>, vector<1x8x1xf32>
      %44 = vector.shape_cast %43 : vector<1x8x1xf32> to vector<8x1xf32>
      %45 = vector.shape_cast %37 : vector<8x1xf32> to vector<1x8x1xf32>
      tpu.vector_store %arg7[%c0_33, %c0_34, %c0_35], %45 {strides = array<i32>} : memref<1x8x1xf32, #tpu.memory_space<vmem>>, vector<1x8x1xf32>,
    } else {
    }
    return
  }
  func.func @transform_0(%arg0: i32, %arg1: i32, %arg2: i32) -> (i32, i32) {
    %c0_i32 = arith.constant 0 : i32
    %c0_i32_0 = arith.constant 0 : i32
    return %c0_i32, %arg2 : i32, i32
  }
  func.func @transform_1(%arg0: i32, %arg1: i32, %arg2: i32) -> (i32, i32, i32) {
    %c0_i32 = arith.constant 0 : i32
    return %arg0, %arg2, %arg1 : i32, i32, i32
  }
  func.func @transform_2(%arg0: i32, %arg1: i32, %arg2: i32) -> (i32, i32, i32) {
    %c0_i32 = arith.constant 0 : i32
    %c0_i32_0 = arith.constant 0 : i32
    return %arg0, %c0_i32, %arg1 : i32, i32, i32
  }
  func.func @transform_3(%arg0: i32, %arg1: i32, %arg2: i32) -> (i32, i32, i32) {
    %c0_i32 = arith.constant 0 : i32
    %c0_i32_0 = arith.constant 0 : i32
    %c0_i32_1 = arith.constant 0 : i32
    return %arg0, %c0_i32, %c0_i32_0 : i32, i32, i32
  }
  func.func @transform_4(%arg0: i32, %arg1: i32, %arg2: i32) -> (i32, i32, i32) {
    %c0_i32 = arith.constant 0 : i32
    %c0_i32_0 = arith.constant 0 : i32
    %c0_i32_1 = arith.constant 0 : i32
    return %arg0, %c0_i32, %c0_i32_0 : i32, i32, i32
  }
}

module attributes {stable_mosaic.version = 11 : i64} {
  func.func @_plane_stats_kernel(%arg0: i32, %arg1: i32, %arg2: memref<1x8x256xf32, #tpu.memory_space<vmem>>, %arg3: memref<1x8x1xf32, #tpu.memory_space<vmem>>, %arg4: memref<1x1x256xf32, #tpu.memory_space<vmem>>, %arg5: memref<1x1x256xf32, #tpu.memory_space<vmem>>) attributes {dimension_semantics = [#tpu.dimension_semantics<parallel>, #tpu.dimension_semantics<parallel>], iteration_bounds = array<i64: 2, 1>, scalar_prefetch = 0 : i64, scratch_operands = 0 : i64, tpu.core_type = #tpu.core_type<tc>, window_params = [{transform_indices = @transform_0, window_bounds = array<i64: 1, 8, 256>}, {transform_indices = @transform_1, window_bounds = array<i64: 1, 8, 1>}, {transform_indices = @transform_2, window_bounds = array<i64: 1, 1, 256>}, {transform_indices = @transform_3, window_bounds = array<i64: 1, 1, 256>}]} {
    %c0 = arith.constant 0 : index
    %c0_0 = arith.constant 0 : index
    %c0_1 = arith.constant 0 : index
    %0 = vector.load %arg2[%c0, %c0_0, %c0_1] : memref<1x8x256xf32, #tpu.memory_space<vmem>>, vector<1x8x256xf32>
    %1 = vector.shape_cast %0 : vector<1x8x256xf32> to vector<8x256xf32>
    %c0_2 = arith.constant 0 : index
    %c0_3 = arith.constant 0 : index
    %c0_4 = arith.constant 0 : index
    %2 = vector.load %arg3[%c0_2, %c0_3, %c0_4] : memref<1x8x1xf32, #tpu.memory_space<vmem>>, vector<1x8x1xf32>
    %3 = vector.shape_cast %2 : vector<1x8x1xf32> to vector<8x1xf32>
    %4 = vector.broadcast %3 : vector<8x1xf32> to vector<8x256xf32>
    %5 = arith.mulf %1, %4 : vector<8x256xf32>
    %cst = arith.constant dense<0.000000e+00> : vector<256xf32>
    %6 = vector.multi_reduction <add>, %5, %cst [0] : vector<8x256xf32> to vector<256xf32>
    %7 = vector.shape_cast %6 : vector<256xf32> to vector<1x256xf32>
    %cst_5 = arith.constant 1.250000e-01 : f32
    %8 = vector.broadcast %cst_5 : f32 to vector<1x256xf32>
    %9 = arith.mulf %7, %8 : vector<1x256xf32>
    %c0_6 = arith.constant 0 : index
    %c0_7 = arith.constant 0 : index
    %c0_8 = arith.constant 0 : index
    %10 = vector.load %arg4[%c0_6, %c0_7, %c0_8] : memref<1x1x256xf32, #tpu.memory_space<vmem>>, vector<1x1x256xf32>
    %11 = vector.shape_cast %10 : vector<1x1x256xf32> to vector<1x256xf32>
    %12 = vector.shape_cast %9 : vector<1x256xf32> to vector<1x1x256xf32>
    tpu.vector_store %arg4[%c0_6, %c0_7, %c0_8], %12 {strides = array<i32>} : memref<1x1x256xf32, #tpu.memory_space<vmem>>, vector<1x1x256xf32>,
    %cst_9 = arith.constant dense<0xFF800000> : vector<256xf32>
    %13 = vector.multi_reduction <maximumf>, %5, %cst_9 [0] : vector<8x256xf32> to vector<256xf32>
    %14 = vector.shape_cast %13 : vector<256xf32> to vector<1x256xf32>
    %c0_10 = arith.constant 0 : index
    %c0_11 = arith.constant 0 : index
    %c0_12 = arith.constant 0 : index
    %15 = vector.load %arg5[%c0_10, %c0_11, %c0_12] : memref<1x1x256xf32, #tpu.memory_space<vmem>>, vector<1x1x256xf32>
    %16 = vector.shape_cast %15 : vector<1x1x256xf32> to vector<1x256xf32>
    %17 = vector.shape_cast %14 : vector<1x256xf32> to vector<1x1x256xf32>
    tpu.vector_store %arg5[%c0_10, %c0_11, %c0_12], %17 {strides = array<i32>} : memref<1x1x256xf32, #tpu.memory_space<vmem>>, vector<1x1x256xf32>,
    return
  }
  func.func @transform_0(%arg0: i32, %arg1: i32) -> (i32, i32, i32) {
    %c0_i32 = arith.constant 0 : i32
    %c0_i32_0 = arith.constant 0 : i32
    return %arg0, %c0_i32, %arg1 : i32, i32, i32
  }
  func.func @transform_1(%arg0: i32, %arg1: i32) -> (i32, i32, i32) {
    %c0_i32 = arith.constant 0 : i32
    %c0_i32_0 = arith.constant 0 : i32
    %c0_i32_1 = arith.constant 0 : i32
    return %arg0, %c0_i32, %c0_i32_0 : i32, i32, i32
  }
  func.func @transform_2(%arg0: i32, %arg1: i32) -> (i32, i32, i32) {
    %c0_i32 = arith.constant 0 : i32
    %c0_i32_0 = arith.constant 0 : i32
    return %arg0, %c0_i32, %arg1 : i32, i32, i32
  }
  func.func @transform_3(%arg0: i32, %arg1: i32) -> (i32, i32, i32) {
    %c0_i32 = arith.constant 0 : i32
    %c0_i32_0 = arith.constant 0 : i32
    return %arg0, %c0_i32, %arg1 : i32, i32, i32
  }
}

module attributes {stable_mosaic.version = 11 : i64} {
  func.func @kern(%arg0: i32, %arg1: i32, %arg2: memref<1x8x256xf32, #tpu.memory_space<vmem>>, %arg3: memref<1x8x1xf32, #tpu.memory_space<vmem>>, %arg4: memref<1x1x256xf32, #tpu.memory_space<vmem>>, %arg5: memref<1x8x256xf32, #tpu.memory_space<vmem>>) attributes {dimension_semantics = [#tpu.dimension_semantics<parallel>, #tpu.dimension_semantics<parallel>], iteration_bounds = array<i64: 2, 1>, scalar_prefetch = 0 : i64, scratch_operands = 0 : i64, tpu.core_type = #tpu.core_type<tc>, window_params = [{transform_indices = @transform_0, window_bounds = array<i64: 1, 8, 256>}, {transform_indices = @transform_1, window_bounds = array<i64: 1, 8, 1>}, {transform_indices = @transform_2, window_bounds = array<i64: 1, 1, 256>}, {transform_indices = @transform_3, window_bounds = array<i64: 1, 8, 256>}]} {
    %c0 = arith.constant 0 : index
    %c0_0 = arith.constant 0 : index
    %c0_1 = arith.constant 0 : index
    %0 = vector.load %arg2[%c0, %c0_0, %c0_1] : memref<1x8x256xf32, #tpu.memory_space<vmem>>, vector<1x8x256xf32>
    %1 = vector.shape_cast %0 : vector<1x8x256xf32> to vector<8x256xf32>
    %c0_2 = arith.constant 0 : index
    %c0_3 = arith.constant 0 : index
    %c0_4 = arith.constant 0 : index
    %2 = vector.load %arg3[%c0_2, %c0_3, %c0_4] : memref<1x8x1xf32, #tpu.memory_space<vmem>>, vector<1x8x1xf32>
    %3 = vector.shape_cast %2 : vector<1x8x1xf32> to vector<8x1xf32>
    %4 = vector.broadcast %3 : vector<8x1xf32> to vector<8x256xf32>
    %5 = arith.mulf %1, %4 : vector<8x256xf32>
    %c0_5 = arith.constant 0 : index
    %c0_6 = arith.constant 0 : index
    %c0_7 = arith.constant 0 : index
    %6 = vector.load %arg4[%c0_5, %c0_6, %c0_7] : memref<1x1x256xf32, #tpu.memory_space<vmem>>, vector<1x1x256xf32>
    %7 = vector.shape_cast %6 : vector<1x1x256xf32> to vector<1x256xf32>
    %8 = arith.negf %7 : vector<1x256xf32>
    %9 = math.exp %8 : vector<1x256xf32>
    %cst = arith.constant 1.000000e+00 : f32
    %10 = vector.broadcast %cst : f32 to vector<1x256xf32>
    %11 = arith.addf %10, %9 : vector<1x256xf32>
    %12 = arith.divf %10, %11 : vector<1x256xf32>
    %13 = vector.broadcast %12 : vector<1x256xf32> to vector<8x256xf32>
    %14 = arith.mulf %5, %13 : vector<8x256xf32>
    %c0_8 = arith.constant 0 : index
    %c0_9 = arith.constant 0 : index
    %c0_10 = arith.constant 0 : index
    %15 = vector.load %arg5[%c0_8, %c0_9, %c0_10] : memref<1x8x256xf32, #tpu.memory_space<vmem>>, vector<1x8x256xf32>
    %16 = vector.shape_cast %15 : vector<1x8x256xf32> to vector<8x256xf32>
    %17 = vector.shape_cast %14 : vector<8x256xf32> to vector<1x8x256xf32>
    tpu.vector_store %arg5[%c0_8, %c0_9, %c0_10], %17 {strides = array<i32>} : memref<1x8x256xf32, #tpu.memory_space<vmem>>, vector<1x8x256xf32>,
    return
  }
  func.func @transform_0(%arg0: i32, %arg1: i32) -> (i32, i32, i32) {
    %c0_i32 = arith.constant 0 : i32
    %c0_i32_0 = arith.constant 0 : i32
    return %arg0, %c0_i32, %arg1 : i32, i32, i32
  }
  func.func @transform_1(%arg0: i32, %arg1: i32) -> (i32, i32, i32) {
    %c0_i32 = arith.constant 0 : i32
    %c0_i32_0 = arith.constant 0 : i32
    %c0_i32_1 = arith.constant 0 : i32
    return %arg0, %c0_i32, %c0_i32_0 : i32, i32, i32
  }
  func.func @transform_2(%arg0: i32, %arg1: i32) -> (i32, i32, i32) {
    %c0_i32 = arith.constant 0 : i32
    %c0_i32_0 = arith.constant 0 : i32
    return %arg0, %c0_i32, %arg1 : i32, i32, i32
  }
  func.func @transform_3(%arg0: i32, %arg1: i32) -> (i32, i32, i32) {
    %c0_i32 = arith.constant 0 : i32
    %c0_i32_0 = arith.constant 0 : i32
    return %arg0, %c0_i32, %arg1 : i32, i32, i32
  }
}

module attributes {stable_mosaic.version = 11 : i64} {
  func.func @kern(%arg0: i32, %arg1: i32, %arg2: memref<1x8x256xf32, #tpu.memory_space<vmem>>, %arg3: memref<1x8x1xf32, #tpu.memory_space<vmem>>, %arg4: memref<1x1x256xf32, #tpu.memory_space<vmem>>, %arg5: memref<1x8x256xf32, #tpu.memory_space<vmem>>, %arg6: memref<1x8x256xf32, #tpu.memory_space<vmem>>, %arg7: memref<1x8x1xf32, #tpu.memory_space<vmem>>, %arg8: memref<1x8x1xf32, #tpu.memory_space<vmem>>, %arg9: memref<8x1xf32, #tpu.memory_space<vmem>>, %arg10: memref<8x1xf32, #tpu.memory_space<vmem>>) attributes {dimension_semantics = [#tpu.dimension_semantics<parallel>, #tpu.dimension_semantics<arbitrary>], iteration_bounds = array<i64: 2, 1>, scalar_prefetch = 0 : i64, scratch_operands = 2 : i64, tpu.core_type = #tpu.core_type<tc>, window_params = [{transform_indices = @transform_0, window_bounds = array<i64: 1, 8, 256>}, {transform_indices = @transform_1, window_bounds = array<i64: 1, 8, 1>}, {transform_indices = @transform_2, window_bounds = array<i64: 1, 1, 256>}, {transform_indices = @transform_3, window_bounds = array<i64: 1, 8, 256>}, {transform_indices = @transform_4, window_bounds = array<i64: 1, 8, 256>}, {transform_indices = @transform_5, window_bounds = array<i64: 1, 8, 1>}, {transform_indices = @transform_6, window_bounds = array<i64: 1, 8, 1>}]} {
    %c0 = arith.constant 0 : index
    %c0_0 = arith.constant 0 : index
    %c0_1 = arith.constant 0 : index
    %0 = vector.load %arg2[%c0, %c0_0, %c0_1] : memref<1x8x256xf32, #tpu.memory_space<vmem>>, vector<1x8x256xf32>
    %1 = vector.shape_cast %0 : vector<1x8x256xf32> to vector<8x256xf32>
    %c0_2 = arith.constant 0 : index
    %c0_3 = arith.constant 0 : index
    %c0_4 = arith.constant 0 : index
    %2 = vector.load %arg3[%c0_2, %c0_3, %c0_4] : memref<1x8x1xf32, #tpu.memory_space<vmem>>, vector<1x8x1xf32>
    %3 = vector.shape_cast %2 : vector<1x8x1xf32> to vector<8x1xf32>
    %4 = vector.broadcast %3 : vector<8x1xf32> to vector<8x256xf32>
    %5 = arith.mulf %1, %4 : vector<8x256xf32>
    %c0_5 = arith.constant 0 : index
    %c0_6 = arith.constant 0 : index
    %c0_7 = arith.constant 0 : index
    %6 = vector.load %arg4[%c0_5, %c0_6, %c0_7] : memref<1x1x256xf32, #tpu.memory_space<vmem>>, vector<1x1x256xf32>
    %7 = vector.shape_cast %6 : vector<1x1x256xf32> to vector<1x256xf32>
    %8 = arith.negf %7 : vector<1x256xf32>
    %9 = math.exp %8 : vector<1x256xf32>
    %cst = arith.constant 1.000000e+00 : f32
    %10 = vector.broadcast %cst : f32 to vector<1x256xf32>
    %11 = arith.addf %10, %9 : vector<1x256xf32>
    %12 = arith.divf %10, %11 : vector<1x256xf32>
    %13 = vector.broadcast %12 : vector<1x256xf32> to vector<8x256xf32>
    %14 = arith.mulf %5, %13 : vector<8x256xf32>
    %c0_8 = arith.constant 0 : index
    %c0_9 = arith.constant 0 : index
    %c0_10 = arith.constant 0 : index
    %15 = vector.load %arg5[%c0_8, %c0_9, %c0_10] : memref<1x8x256xf32, #tpu.memory_space<vmem>>, vector<1x8x256xf32>
    %16 = vector.shape_cast %15 : vector<1x8x256xf32> to vector<8x256xf32>
    %17 = arith.addf %14, %16 : vector<8x256xf32>
    %c0_11 = arith.constant 0 : index
    %c0_12 = arith.constant 0 : index
    %c0_13 = arith.constant 0 : index
    %18 = vector.load %arg6[%c0_11, %c0_12, %c0_13] : memref<1x8x256xf32, #tpu.memory_space<vmem>>, vector<1x8x256xf32>
    %19 = vector.shape_cast %18 : vector<1x8x256xf32> to vector<8x256xf32>
    %20 = vector.shape_cast %17 : vector<8x256xf32> to vector<1x8x256xf32>
    tpu.vector_store %arg6[%c0_11, %c0_12, %c0_13], %20 {strides = array<i32>} : memref<1x8x256xf32, #tpu.memory_space<vmem>>, vector<1x8x256xf32>,
    %cst_14 = arith.constant dense<0.000000e+00> : vector<8xf32>
    %21 = vector.multi_reduction <add>, %17, %cst_14 [1] : vector<8x256xf32> to vector<8xf32>
    %22 = vector.shape_cast %21 : vector<8xf32> to vector<8x1xf32>
    %23 = arith.mulf %17, %17 : vector<8x256xf32>
    %cst_15 = arith.constant dense<0.000000e+00> : vector<8xf32>
    %24 = vector.multi_reduction <add>, %23, %cst_15 [1] : vector<8x256xf32> to vector<8xf32>
    %25 = vector.shape_cast %24 : vector<8xf32> to vector<8x1xf32>
    %c0_i32 = arith.constant 0 : i32
    %26 = arith.cmpi eq, %arg1, %c0_i32 : i32
    %c0_16 = arith.constant 0 : index
    %c0_17 = arith.constant 0 : index
    %27 = vector.load %arg9[%c0_16, %c0_17] : memref<8x1xf32, #tpu.memory_space<vmem>>, vector<8x1xf32>
    %28 = arith.addf %27, %22 : vector<8x1xf32>
    %29 = arith.select %26, %22, %28 : vector<8x1xf32>
    %c0_18 = arith.constant 0 : index
    %c0_19 = arith.constant 0 : index
    %30 = vector.load %arg10[%c0_18, %c0_19] : memref<8x1xf32, #tpu.memory_space<vmem>>, vector<8x1xf32>
    %31 = arith.addf %30, %25 : vector<8x1xf32>
    %32 = arith.select %26, %25, %31 : vector<8x1xf32>
    %c0_20 = arith.constant 0 : index
    %c0_21 = arith.constant 0 : index
    %33 = vector.load %arg9[%c0_20, %c0_21] : memref<8x1xf32, #tpu.memory_space<vmem>>, vector<8x1xf32>
    tpu.vector_store %arg9[%c0_20, %c0_21], %29 {strides = array<i32>} : memref<8x1xf32, #tpu.memory_space<vmem>>, vector<8x1xf32>,
    %c0_22 = arith.constant 0 : index
    %c0_23 = arith.constant 0 : index
    %34 = vector.load %arg10[%c0_22, %c0_23] : memref<8x1xf32, #tpu.memory_space<vmem>>, vector<8x1xf32>
    tpu.vector_store %arg10[%c0_22, %c0_23], %32 {strides = array<i32>} : memref<8x1xf32, #tpu.memory_space<vmem>>, vector<8x1xf32>,
    %c0_24 = arith.constant 0 : index
    %c0_25 = arith.constant 0 : index
    %c0_26 = arith.constant 0 : index
    %35 = vector.load %arg7[%c0_24, %c0_25, %c0_26] : memref<1x8x1xf32, #tpu.memory_space<vmem>>, vector<1x8x1xf32>
    %36 = vector.shape_cast %35 : vector<1x8x1xf32> to vector<8x1xf32>
    %37 = vector.shape_cast %29 : vector<8x1xf32> to vector<1x8x1xf32>
    tpu.vector_store %arg7[%c0_24, %c0_25, %c0_26], %37 {strides = array<i32>} : memref<1x8x1xf32, #tpu.memory_space<vmem>>, vector<1x8x1xf32>,
    %c0_27 = arith.constant 0 : index
    %c0_28 = arith.constant 0 : index
    %c0_29 = arith.constant 0 : index
    %38 = vector.load %arg8[%c0_27, %c0_28, %c0_29] : memref<1x8x1xf32, #tpu.memory_space<vmem>>, vector<1x8x1xf32>
    %39 = vector.shape_cast %38 : vector<1x8x1xf32> to vector<8x1xf32>
    %40 = vector.shape_cast %32 : vector<8x1xf32> to vector<1x8x1xf32>
    tpu.vector_store %arg8[%c0_27, %c0_28, %c0_29], %40 {strides = array<i32>} : memref<1x8x1xf32, #tpu.memory_space<vmem>>, vector<1x8x1xf32>,
    return
  }
  func.func @transform_0(%arg0: i32, %arg1: i32) -> (i32, i32, i32) {
    %c0_i32 = arith.constant 0 : i32
    %c0_i32_0 = arith.constant 0 : i32
    return %arg0, %c0_i32, %arg1 : i32, i32, i32
  }
  func.func @transform_1(%arg0: i32, %arg1: i32) -> (i32, i32, i32) {
    %c0_i32 = arith.constant 0 : i32
    %c0_i32_0 = arith.constant 0 : i32
    %c0_i32_1 = arith.constant 0 : i32
    return %arg0, %c0_i32, %c0_i32_0 : i32, i32, i32
  }
  func.func @transform_2(%arg0: i32, %arg1: i32) -> (i32, i32, i32) {
    %c0_i32 = arith.constant 0 : i32
    %c0_i32_0 = arith.constant 0 : i32
    return %arg0, %c0_i32, %arg1 : i32, i32, i32
  }
  func.func @transform_3(%arg0: i32, %arg1: i32) -> (i32, i32, i32) {
    %c0_i32 = arith.constant 0 : i32
    %c0_i32_0 = arith.constant 0 : i32
    return %arg0, %c0_i32, %arg1 : i32, i32, i32
  }
  func.func @transform_4(%arg0: i32, %arg1: i32) -> (i32, i32, i32) {
    %c0_i32 = arith.constant 0 : i32
    %c0_i32_0 = arith.constant 0 : i32
    return %arg0, %c0_i32, %arg1 : i32, i32, i32
  }
  func.func @transform_5(%arg0: i32, %arg1: i32) -> (i32, i32, i32) {
    %c0_i32 = arith.constant 0 : i32
    %c0_i32_0 = arith.constant 0 : i32
    %c0_i32_1 = arith.constant 0 : i32
    return %arg0, %c0_i32, %c0_i32_0 : i32, i32, i32
  }
  func.func @transform_6(%arg0: i32, %arg1: i32) -> (i32, i32, i32) {
    %c0_i32 = arith.constant 0 : i32
    %c0_i32_0 = arith.constant 0 : i32
    %c0_i32_1 = arith.constant 0 : i32
    return %arg0, %c0_i32, %c0_i32_0 : i32, i32, i32
  }
}

</mosaic_0001>

<bundles_post_ra>
// kernel: mam_ffc_block_forward.34
= control target key start
LH: loop header
LB: loop body
LE: loop exit
PB: predicated region body
PF: predicated region fallthrough
CT: control target
= control target key end

     0   :  { %s556_s12 = smov 0   ;;  %s558_s13 = smov 0   ;;  %s600_s0 = inlined_call_operand.vmem [shape: f32[2,16,256], index: 0, kind: input, shape index: {}]   ;;  %s601_s1 = inlined_call_operand.vmem [shape: f32[2,8,1], index: 1, kind: input, shape index: {}]   ;;  %s602_s2 = inlined_call_operand.vmem [shape: f32[2,1,256], index: 2, kind: output, shape index: {0}]   ;;  %s603_s3 = inlined_call_operand.vmem [shape: f32[2,1,256], index: 3, kind: output, shape index: {1}]  }
   0x1   :  { %s560_s14 = smov 0  }
   0x2 LB: > { %s26_s15 = sadd.s32 1, %s528_s13  ;;  %p472_p0 = scmp.ge.s32.totalorder %s532_s14, 1  ;;  %s532_s14 = sphi %s560_s14, %s14_s14   ;;  %s528_s13 = sphi %s558_s13, %s605_s13   ;;  %s524_s12 = sphi %s556_s12, %s604_s12  }
   0x3   : > { %p28_p1 = scmp.ge.s32.totalorder %s26_s15, 2  ;;  %p173_p2 = scmp.lt.s32.totalorder %s532_s14, 3 }
   0x5   : > { %s607_s15 = smov (%p28_p1, %s26_s15), 0  ;;  %p174_p3 = pnand %p472_p0, %p173_p2 }
   0x6   : > { %p218_p4 = scmp.lt.s32.totalorder (!%p174_p3), %s524_s12, 1  ;;  %v534_v0 = vmov (!%p174_p3), 0   ;;  %v535_v9 = vmov (!%p174_p3), 1966171168   ;;  %v280_v11 = vlaneseq (!%p174_p3) }
   0x7   : > { %177 = sbr.rel (%p174_p3) target bundleno = 169 (0xa9), region = 28  ;;  %509 = vset.pattern.permute.xlu0 (!%p174_p3), %v534_v0  ;;  %v278_v10 = vunpack.c.l.s4 (!%p174_p3), %v535_v9 }
   0x8   : > { %v281_v21 = vshrl.u32 (!%p174_p3), %v280_v11, 7  ;;  %vm294_vm0 = vcmp.lt.s32.totalorder (!%p174_p3), %v280_v11, 256 }
   0x9   : > { %v279_v20 = vunpack.c.0.s8 (!%p174_p3), %v278_v10 }
   0xb   : > { %v282_v30 = vsub.s32 (!%p174_p3), %v279_v20, %v281_v21 }
   0xe   : > { %s609_s12 = smov (!%p218_p4, %s524_s12), 1 }
   0xf   : > { %s475_s16 = sshll.u32 %s609_s12, 3  ;;  %s482_s20 = sshll.u32 %s609_s12, 5 }
  0x10   : > { %s231_s19 = scalar_lea.vmem %s601_s1, %s475_s16  ;;  %s402_s23 = scalar_lea.vmem %s600_s0, %s482_s20 }
  0x11   : > { %v252_v1 = vld [vmem:[%s231_s19] sm:$0xff]  ;;  %v478_v2 = vld [vmem:[%s402_s23 + $0x10] sm:$0xff]  ;;  %v479_v3 = vld [vmem:[%s402_s23 + $0x18] sm:$0xff]  ;;  %s476_s24 = sshll.u32 %s609_s12, 1 }
  0x12   : > { %255 = vperm.xlu0 %509, %v252_v1   ;;  %s248_s27 = scalar_lea.vmem %s603_s3, %s476_s24  ;;  %s239_s30 = scalar_lea.vmem %s602_s2, %s476_s24 }
  0x91   : > { %v256_v4 = vpop.permute.xlu0 %255 }
  0x92   : > { %v258_v5 = vmul.f32 %v478_v2, %v256_v4  ;;  %v259_v6 = vmul.f32 %v479_v3, %v256_v4 }
  0x94   : > { %v260_v7 = vrot.slane %v258_v5, 4  ;;  %v266_v8 = vrot.slane %v259_v6, 4 }
  0x96   : > { %v261_v12 = vadd.f32 %v260_v7, %v258_v5  ;;  %v267_v13 = vadd.f32 %v266_v8, %v259_v6  ;;  %v298_v14 = vmax.f32 %v258_v5, %v260_v7  ;;  %v304_v15 = vmax.f32 %v259_v6, %v266_v8 }
  0x98   : > { %v262_v16 = vrot.slane %v261_v12, 2  ;;  %v268_v17 = vrot.slane %v267_v13, 2  ;;  %v299_v18 = vrot.slane %v298_v14, 2  ;;  %v305_v19 = vrot.slane %v304_v15, 2 }
  0x9a   : > { %v263_v22 = vadd.f32 %v262_v16, %v261_v12  ;;  %v269_v23 = vadd.f32 %v268_v17, %v267_v13  ;;  %v300_v24 = vmax.f32 %v298_v14, %v299_v18  ;;  %v306_v25 = vmax.f32 %v304_v15, %v305_v19 }
  0x9c   : > { %v264_v26 = vrot.slane %v263_v22, 1  ;;  %v270_v27 = vrot.slane %v269_v23, 1  ;;  %v301_v28 = vrot.slane %v300_v24, 1  ;;  %v307_v29 = vrot.slane %v306_v25, 1 }
  0x9e   : > { %v265_v31 = vadd.f32 %v264_v26, %v263_v22  ;;  %v271_v32 = vadd.f32 %v270_v27, %v269_v23  ;;  %v302_v33 = vmax.f32 %v300_v24, %v301_v28  ;;  %v308_v34 = vmax.f32 %v306_v25, %v307_v29 }
  0xa0   : > { %v272_v35 = vmul.f32 0.125, %v265_v31  ;;  %v273_v36 = vmul.f32 0.125, %v271_v32  ;;  %v311_v37 = vcombine.low %v302_v33, %v308_v34 }
  0xa2   : > { %v276_v38 = vcombine.low %v272_v35, %v273_v36  ;;  %v318_v39 = vrot.slane %v311_v37, %v282_v30 }
  0xa4   : > { %v283_v40 = vrot.slane %v276_v38, %v282_v30  ;;  %v325_v41 = vrot.slane %v318_v39, %v282_v30 }
  0xa6   : > { %v290_v42 = vrot.slane %v283_v40, %v282_v30  ;;  %327 = vst.msk [vmem:[%s248_s27] sm:$0x3] %vm294_vm0, %v325_v41 }
  0xa8   : > { %296 = vst.msk [vmem:[%s239_s30] sm:$0x3] %vm294_vm0, %v290_v42 }
  0xa9 PF: > { %s14_s14 = sadd.s32 1, %s532_s14   ;;  %s604_s12 = smov %s528_s13 }
  0xaa   : > { %p11_p5 = scmp.ge.s32.totalorder %s14_s14, 4   ;;  %s605_s13 = smov %s607_s15 }
  0xac   :  { %13 = sbr.rel (!%p11_p5) target bundleno = 2 (0x2), region = 73 }

// kernel: mam_ffc_block_forward.28
= control target key start
LH: loop header
LB: loop body
LE: loop exit
PB: predicated region body
PF: predicated region fallthrough
CT: control target
= control target key end

     0   :  { %s805_s15 = smov 0   ;;  %s807_s16 = smov 0   ;;  %s852_s0 = inlined_call_operand.vmem [shape: bf16[16,72], index: 0, kind: input, shape index: {}]   ;;  %s853_s1 = inlined_call_operand.vmem [shape: bf16[2,72,256], index: 1, kind: input, shape index: {}]   ;;  %s854_s2 = inlined_call_operand.vmem [shape: f32[2,16,256], index: 2, kind: output, shape index: {0}]   ;;  %s855_s3 = inlined_call_operand.vmem [shape: f32[2,16,1], index: 3, kind: output, shape index: {1}]   ;;  %s856_s4 = inlined_call_operand.vmem [shape: f32[2,16,1], index: 4, kind: output, shape index: {2}]  }
   0x1   :  { %s809_s17 = smov 0  }
   0x2 LB: > { %s34_s18 = sadd.s32 1, %s773_s16  ;;  %p688_p0 = scmp.ge.s32.totalorder %s777_s17, 1  ;;  %s777_s17 = sphi %s809_s17, %s15_s17   ;;  %s773_s16 = sphi %s807_s16, %s858_s16   ;;  %s769_s15 = sphi %s805_s15, %s857_s15  }
   0x3   : > { %p36_p1 = scmp.ge.s32.totalorder %s34_s18, 2  ;;  %p212_p2 = scmp.lt.s32.totalorder %s777_s17, 3 }
   0x5   : > { %s860_s18 = smov (%p36_p1, %s34_s18), 0  ;;  %p213_p3 = pnand %p688_p0, %p212_p2 }
   0x6   : > { %p271_p4 = scmp.lt.s32.totalorder (!%p213_p3), %s769_s15, 1  ;;  %v779_v0 = vmov (!%p213_p3), 0   ;;  %vm383_vm0 = vcmask (!%p213_p3), 1043456   ;;  %v754_v13 = vld [vmem:[%s852_s0] sm:$0xff] (!%p213_p3)   ;;  %vm379_vm1 = vcmask (!%p213_p3), 588800   ;;  %vm497_vm2 = vcmask (!%p213_p3), 7168  }
   0x7   : > { %216 = sbr.rel (%p213_p3) target bundleno = 401 (0x191), region = 28  ;;  %422 = vmatprep.mubr.bf16.mxu0 (!%p213_p3), %v779_v0 }
   0xe   : > { %s862_s15 = smov (!%p271_p4, %s769_s15), 1 }
   0xf   : > { %s714_s19 = smul.u32 72, %s862_s15  ;;  %s711_s25 = sshll.u32 %s862_s15, 5 }
  0x10   : > { %s293_s28 = scalar_lea.vmem %s854_s2, %s711_s25  ;;  %s712_s29 = sshll.u32 %s862_s15, 4 }
  0x11   : > { %s282_s22 = scalar_lea.vmem %s853_s1, %s714_s19  ;;  %s304_s6 = scalar_lea.vmem %s856_s4, %s712_s29 }
  0x12   : > { %v740_v1 = vld [vmem:[%s282_s22 + $0x4] ss:$8 sps:$4 sm:$0xff]   ;;  %v742_v2 = vld [vmem:[%s282_s22] ss:$8 sps:$4 sm:$0xff]   ;;  %v743_v3 = vld [vmem:[%s282_s22 + $0x14] ss:$8 sps:$4 sm:$0xff]   ;;  %s299_s9 = scalar_lea.vmem %s855_s3, %s712_s29 }
  0x13   : > { %390 = vmatprep.subr.bf16.mxu0 %v740_v1  ;;  %v745_v4 = vld [vmem:[%s282_s22 + $0x10] ss:$8 sps:$4 sm:$0xff]   ;;  %v746_v5 = vld [vmem:[%s282_s22 + $0x24] ss:$8 sps:$4 sm:$0xff]   ;;  %v748_v6 = vld [vmem:[%s282_s22 + $0x20] ss:$8 sps:$4 sm:$0xff]  }
  0x14   : > { %391 = vmatpush1.bf16.msra.mxu0 %v742_v2  ;;  %v749_v7 = vld [vmem:[%s282_s22 + $0x34] ss:$8 sps:$4 sm:$0xff]   ;;  %v328_v8 = vld [vmem:[%s282_s22 + $0x40] sm:$0xff]  ;;  %v751_v9 = vld [vmem:[%s282_s22 + $0x30] ss:$8 sps:$4 sm:$0xff]  }
  0x15   : > { %392 = vmatprep.subr.bf16.mxu0 %v743_v3  ;;  %v706_v10 = vcombine.high %v328_v8, %v328_v8  ;;  %v705_v11 = vcombine.low %v328_v8, %v328_v8 }
  0x17   : > { %v385_v12 = vsel %vm383_vm0, %v705_v11, 0 }
  0x18   : > { %393 = vmatpush1.bf16.msra.mxu0 %v745_v4 }
  0x19   : > { %394 = vmatprep.subr.bf16.mxu0 %v746_v5 }
  0x1c   : > { %395 = vmatpush1.bf16.msra.mxu0 %v748_v6 }
  0x1d   : > { %396 = vmatprep.subr.bf16.mxu0 %v749_v7 }
  0x20   : > { %397 = vmatpush1.bf16.msra.mxu0 %v751_v9 }
  0x21   : > { %707 = vmatprep.subr.msk.bf16.mxu0 %vm383_vm0, %v706_v10 }
  0x24   : > { %399 = vmatpush1.bf16.msra.mxu0 %v385_v12 }
  0x27   : > { %708 = vmatmul.mubr.msk.bf16.vlgmr.msra.gmra.mrb[0].mxu0 %vm379_vm1, %v754_v13 }
  0xfa   : > { %v424_v14 = vpop.f32.mrb[0].mxu0 }
  0xfb   : > { %448 = vst [vmem:[%s293_s28] sm:$0xff] %v424_v14  ;;  %v426_v15 = vpop.f32.mrb[1].mxu0 }
  0xfc   : > { %449 = vst [vmem:[%s293_s28 + $0x8] sm:$0xff] %v426_v15  ;;  %v428_v16 = vpop.f32.mrb[2].mxu0  ;;  %v475_v17 = vmax.f32 %v424_v14, %v426_v15  ;;  %v465_v18 = vadd.f32 %v426_v15, %v424_v14 }
  0xfd   : > { %450 = vst [vmem:[%s293_s28 + $0x10] sm:$0xff] %v428_v16  ;;  %v430_v19 = vpop.f32.mrb[3].mxu0 }
  0xfe   : > { %451 = vst [vmem:[%s293_s28 + $0x18] sm:$0xff] %v430_v19  ;;  %476 = vmax.xlane.f32.xlu1 %v475_v17  ;;  %466 = vadd.xlane.f32.xlu0 %v465_v18  ;;  %v478_v20 = vmax.f32 %v428_v16, %v430_v19  ;;  %v468_v21 = vadd.f32 %v430_v19, %v428_v16 }
 0x102   : > { %479 = vmax.xlane.f32.xlu1 %v478_v20  ;;  %469 = vadd.xlane.f32.xlu0 %v468_v21 }
 0x18b   : > { %v477_v22 = vpop.xlane.xlu1 %476  ;;  %v467_v23 = vpop.xlane.xlu0 %466 }
 0x18c   : > { %504 = vst.msk [vmem:[%s304_s6] sm:$0xff] %vm497_vm2, %v477_v22  ;;  %502 = vst.msk [vmem:[%s299_s9] sm:$0xff] %vm497_vm2, %v467_v23 }
 0x18f   : > { %v480_v24 = vpop.xlane.xlu1 %479  ;;  %v470_v25 = vpop.xlane.xlu0 %469 }
 0x190   : > { %505 = vst.msk [vmem:[%s304_s6 + $0x8] sm:$0xff] %vm497_vm2, %v480_v24  ;;  %503 = vst.msk [vmem:[%s299_s9 + $0x8] sm:$0xff] %vm497_vm2, %v470_v25 }
 0x191 PF: > { %s15_s17 = sadd.s32 1, %s777_s17   ;;  %s857_s15 = smov %s773_s16 }
 0x192   : > { %p12_p5 = scmp.ge.s32.totalorder %s15_s17, 4   ;;  %s858_s16 = smov %s860_s18 }
 0x194   :  { %14 = sbr.rel (!%p12_p5) target bundleno = 2 (0x2), region = 93 }

// kernel: mam_ffc_block_forward.36
= control target key start
LH: loop header
LB: loop body
LE: loop exit
PB: predicated region body
PF: predicated region fallthrough
CT: control target
= control target key end

     0   :  { %s495_s9 = smov 0   ;;  %s497_s10 = smov 0   ;;  %s531_s0 = inlined_call_operand.vmem [shape: bf16[4,8], index: 0, kind: input, shape index: {}]   ;;  %s532_s1 = inlined_call_operand.vmem [shape: bf16[2,8,256], index: 1, kind: input, shape index: {}]   ;;  %s533_s2 = inlined_call_operand.vmem [shape: f32[2,4,256], index: 2, kind: output, shape index: {}]  }
   0x1   :  { %s499_s11 = smov 0  }
   0x2 LB: > { %s31_s12 = sadd.s32 1, %s473_s10  ;;  %p415_p0 = scmp.ge.s32.totalorder %s477_s11, 1  ;;  %s477_s11 = sphi %s499_s11, %s12_s11   ;;  %s473_s10 = sphi %s497_s10, %s535_s10   ;;  %s469_s9 = sphi %s495_s9, %s534_s9  }
   0x3   : > { %p33_p1 = scmp.ge.s32.totalorder %s31_s12, 2  ;;  %p155_p2 = scmp.lt.s32.totalorder %s477_s11, 3 }
   0x5   : > { %s537_s12 = smov (%p33_p1, %s31_s12), 0  ;;  %p156_p3 = pnand %p415_p0, %p155_p2 }
   0x6   : > { %p198_p4 = scmp.lt.s32.totalorder (!%p156_p3), %s469_s9, 1  ;;  %v479_v0 = vmov (!%p156_p3), 0   ;;  %vm239_vm0 = vcmask (!%p156_p3), 1043456   ;;  %v228_v5 = vld [vmem:[%s531_s0] sm:$0x3] (!%p156_p3)  ;;  %vm235_vm1 = vcmask (!%p156_p3), 64512  }
   0x7   : > { %159 = sbr.rel (%p156_p3) target bundleno = 242 (0xf2), region = 28  ;;  %278 = vmatprep.mubr.bf16.mxu0 (!%p156_p3), %v479_v0 }
   0xe   : > { %s539_s9 = smov (!%p198_p4, %s469_s9), 1 }
   0xf   : > { %s426_s13 = sshll.u32 %s539_s9, 3 }
  0x10   : > { %s209_s16 = scalar_lea.vmem %s532_s1, %s426_s13  ;;  %s219_s21 = scalar_lea.vmem %s533_s2, %s426_s13 }
  0x11   : > { %v229_v1 = vld [vmem:[%s209_s16] sm:$0xff] }
  0x12   : > { %v421_v2 = vcombine.high %v229_v1, %v229_v1  ;;  %v420_v3 = vcombine.low %v229_v1, %v229_v1 }
  0x14   : > { %422 = vmatprep.subr.msk.bf16.mxu0 %vm239_vm0, %v421_v2  ;;  %v241_v4 = vsel %vm239_vm0, %v420_v3, 0 }
  0x15   : > { %247 = vmatpush1.bf16.msra.mxu0 %v241_v4 }
  0x18   : > { %423 = vmatmul.mubr.msk.bf16.vlgmr.msra.gmra.mrb[0].mxu0 %vm235_vm1, %v228_v5 }
  0xeb   : > { %v280_v6 = vpop.f32.mrb[0].mxu0 }
  0xec   : > { %v282_v7 = vpop.f32.mrb[1].mxu0 }
  0xed   : > { %v289_v8 = vcombine.low %v280_v6, %v282_v7  ;;  %v284_v9 = vpop.f32.mrb[2].mxu0 }
  0xee   : > { %v285_v10 = vpop.f32.mrb[3].mxu0 }
  0xef   : > { %v297_v11 = vmax.f32 %v289_v8, 0.0 }
  0xf1   : > { %298 = vst [vmem:[%s219_s21] sm:$0xff] %v297_v11 }
  0xf2 PF: > { %s12_s11 = sadd.s32 1, %s477_s11   ;;  %s534_s9 = smov %s473_s10 }
  0xf3   : > { %p9_p5 = scmp.ge.s32.totalorder %s12_s11, 4   ;;  %s535_s10 = smov %s537_s12 }
  0xf5   :  { %11 = sbr.rel (!%p9_p5) target bundleno = 2 (0x2), region = 69 }

// kernel: mam_ffc_block_forward.35
= control target key start
LH: loop header
LB: loop body
LE: loop exit
PB: predicated region body
PF: predicated region fallthrough
CT: control target
= control target key end

     0   :  { %7 = vsyncpa [#allocation3], 0  ;;  %s1716_s9 = smov 0   ;;  %s2309_s0 = inlined_call_operand.vmem [shape: f32[98], index: 0, kind: input, shape index: {}]   ;;  %s2310_s1 = inlined_call_operand.vmem [shape: f32[2,2,22,22], index: 1, kind: input, shape index: {}]   ;;  %s2311_s2 = inlined_call_operand.vmem [shape: f32[2,1,16,16], index: 2, kind: output, shape index: {}]  }
   0x1 LB: > { %s1517_s10 = sadd.s32 4294967295, %s1692_s9   ;;  %p1519_p0 = scmp.ge.s32.totalorder %s1692_s9, 1  ;;  %s1692_s9 = sphi %s1716_s9, %s13_s9  }
   0x2   : > { %p91_p1 = scmp.lt.s32.totalorder %s1692_s9, 3  ;;  %s104_s13 = sshll.u32 %s2309_s0, 4  ;;  %s105_s13 = int_to_ptr.vmem [resolvable:$true] %s104_s13 }
   0x3   : > { %p1650_p3 = scmp.eq.s32.totalorder %s1517_s10, 0  ;;  %s1667_s15 = scalar_lea.vmem %s105_s13, 16 }
   0x4   : > { %p1727_p2 = pnand %p1519_p0, %p91_p1  ;;  %p1668_p6 = scmp.ne.s32.totalorder %s105_s13, %s1667_s15 }
   0x5   : > { %p1675_p10 = scmp.lt.s32.totalorder %s105_s13, %s105_s13  ;;  %p1676_p11 = scmp.lt.s32.totalorder %s1667_s15, %s1667_s15 }
   0x6   : > { %p1646_p4 = pneg %p1727_p2 }
   0x7   : > { %p1677_p12 = por %p1676_p11, %p1675_p10 }
   0x8   : > { %p1647_p5 = pnand %p1650_p3, %p1646_p4 }
   0xa   : > { %p1669_p7 = pneg %p1647_p5 }
   0xc   : > { %p1670_p8 = pnand %p1669_p7, %p1668_p6 }
   0xe   : > { %p1671_p9 = pneg %p1670_p8 }
  0x10   : > { %p1678_p13 = pnand %p1677_p12, %p1671_p9 }
  0x12   : > { %1681 = shalt.err (!%p1678_p13)
}
  0x13   : > { %s1694_s16 = smov [#allocation2]   ;;  %125 = sbr.rel (%p1727_p2) target bundleno = 489 (0x1e9), region = 28 }
  0x14   : > { %1649 = dma.vmem_to_smem (!%p1647_p5), %s105_s13, 16, %s1694_s16, [#allocation3]  }
  0x1a   : > { %1687 = dma.done.wait (%p1650_p3), [#allocation3], 16  }
  0x1b   : > { %1689 = vsyncadd (%p1650_p3), [#allocation3], 4294967280 }
  0x1c   : > { %131 = sfence }
  0x1d   : > { %p148_p0 = scmp.lt.s32.totalorder %s1517_s10, 1  ;;  %s1528_s17 = sld [smem:[#allocation2 + $0x2]]  ;;  %vm1447_vm0 = vcmask 130048  }
  0x1e   : > { %s1527_s18 = sld [smem:[#allocation2 + $0x1]]  ;;  %s1529_s19 = sld [smem:[#allocation2 + $0x3]] }
  0x1f   : > { %s2314_s10 = smov (!%p148_p0, %s1517_s10), 1  ;;  %s1530_s24 = sld [smem:[#allocation2 + $0x4]] }
  0x20   : > { %s1641_s20 = smul.u32 48, %s2314_s10  ;;  %s1695_s25 = smov 126  }
  0x21   : > { %s1696_s26 = smov 127   ;;  %s1531_s27 = sld [smem:[#allocation2 + $0x5]] }
  0x22   : > { %s1744_s23 = scalar_lea.vmem %s2310_s1, %s1641_s20  ;;  %s1532_s28 = sld [smem:[#allocation2 + $0x6]] }
  0x23   : > { %v181_v0 = vstv %s1528_s17  ;;  %v1747_v1 = vld [vmem:[%s1744_s23] sm:$0xff]  ;;  %v1750_v2 = vld [vmem:[%s1744_s23 + $0x8] sm:$0xff]  ;;  %s1697_s29 = smov 125   ;;  %s1534_s30 = sld [smem:[#allocation2 + $0x8]] }
  0x24   : > { %v167_v3 = vstv %s1527_s18  ;;  %v182_v4 = vmul.f32 %v181_v0, %v1747_v1  ;;  %v183_v6 = vmul.f32 %v181_v0, %v1750_v2  ;;  %v195_v8 = vstv %s1529_s19  ;;  %s1698_s3 = smov 124   ;;  %s1535_s4 = sld [smem:[#allocation2 + $0x9]]  ;;  %v1775_v20 = vld [vmem:[%s1744_s23 + $0x9] sm:$0xff]  ;;  %v1778_v22 = vld [vmem:[%s1744_s23 + $0x1] sm:$0xff] }
  0x25   : > { %v168_v5 = vmul.f32 %v167_v3, %v1747_v1  ;;  %v169_v7 = vmul.f32 %v167_v3, %v1750_v2  ;;  %v197_v9 = vmul.f32 %v195_v8, %v1750_v2  ;;  %v196_v10 = vmul.f32 %v195_v8, %v1747_v1  ;;  %s1699_s5 = smov 123   ;;  %s1536_s6 = sld [smem:[#allocation2 + $0xa]]  ;;  %v1805_v40 = vld [vmem:[%s1744_s23 + $0xa] sm:$0xff]  ;;  %v1808_v42 = vld [vmem:[%s1744_s23 + $0x2] sm:$0xff] }
  0x26   : > { %186 = vrot.lane.b32.xlu1 %v182_v4, %s1695_s25  ;;  %v209_v11 = vstv %s1530_s24  ;;  %s1700_s7 = smov 122   ;;  %s1537_s8 = sld [smem:[#allocation2 + $0xb]]  ;;  %v1835_v60 = vld [vmem:[%s1744_s23 + $0xb] sm:$0xff]  ;;  %v1838_v62 = vld [vmem:[%s1744_s23 + $0x3] sm:$0xff] }
  0x27   : > { %172 = vrot.lane.b32.xlu0 %v168_v5, %s1696_s26  ;;  %v211_v12 = vmul.f32 %v209_v11, %v1750_v2  ;;  %v210_v13 = vmul.f32 %v209_v11, %v1747_v1  ;;  %v223_v14 = vstv %s1531_s27  ;;  %s1538_s11 = sld [smem:[#allocation2 + $0xc]]  ;;  %s1539_s12 = sld [smem:[#allocation2 + $0xd]] }
  0x28   : > { %v225_v15 = vmul.f32 %v223_v14, %v1750_v2  ;;  %v224_v16 = vmul.f32 %v223_v14, %v1747_v1  ;;  %v237_v17 = vstv %s1532_s28  ;;  %s1541_s13 = sld [smem:[#allocation2 + $0xf]]  ;;  %s1542_s14 = sld [smem:[#allocation2 + $0x10]] }
  0x29   : > { %v239_v18 = vmul.f32 %v237_v17, %v1750_v2  ;;  %v238_v19 = vmul.f32 %v237_v17, %v1747_v1  ;;  %v259_v21 = vstv %s1534_s30  ;;  %s1543_s15 = sld [smem:[#allocation2 + $0x11]]  ;;  %s1544_s16 = sld [smem:[#allocation2 + $0x12]] }
  0x2a   : > { %188 = vrot.lane.b32.xlu1 %v183_v6, %s1695_s25  ;;  %v261_v23 = vmul.f32 %v259_v21, %v1775_v20  ;;  %v260_v24 = vmul.f32 %v259_v21, %v1778_v22  ;;  %v273_v25 = vstv %s1535_s4  ;;  %s1545_s17 = sld [smem:[#allocation2 + $0x13]]  ;;  %s1546_s18 = sld [smem:[#allocation2 + $0x14]]  ;;  %v1868_v21 = vld [vmem:[%s1744_s23 + $0x4] sm:$0xff] }
  0x2b   : > { %174 = vrot.lane.b32.xlu0 %v169_v7, %s1696_s26  ;;  %v275_v26 = vmul.f32 %v273_v25, %v1775_v20  ;;  %v274_v27 = vmul.f32 %v273_v25, %v1778_v22  ;;  %v287_v28 = vstv %s1536_s6  ;;  %s1548_s19 = sld [smem:[#allocation2 + $0x16]]  ;;  %s1549_s20 = sld [smem:[#allocation2 + $0x17]] }
  0x2c   : > { %v289_v29 = vmul.f32 %v287_v28, %v1775_v20  ;;  %v288_v30 = vmul.f32 %v287_v28, %v1778_v22  ;;  %v301_v31 = vstv %s1537_s8  ;;  %s1550_s21 = sld [smem:[#allocation2 + $0x18]]  ;;  %s1551_s22 = sld [smem:[#allocation2 + $0x19]] }
  0x2d   : > { %v303_v32 = vmul.f32 %v301_v31, %v1775_v20  ;;  %v302_v33 = vmul.f32 %v301_v31, %v1778_v22  ;;  %v315_v34 = vstv %s1538_s11  ;;  %v329_v37 = vstv %s1539_s12  ;;  %s1552_s24 = sld [smem:[#allocation2 + $0x1a]]  ;;  %s1553_s27 = sld [smem:[#allocation2 + $0x1b]] }
  0x2e   : > { %202 = vrot.lane.b32.xlu1 %v197_v9, %s1697_s29  ;;  %v317_v35 = vmul.f32 %v315_v34, %v1775_v20  ;;  %v316_v36 = vmul.f32 %v315_v34, %v1778_v22  ;;  %v331_v38 = vmul.f32 %v329_v37, %v1775_v20  ;;  %v330_v39 = vmul.f32 %v329_v37, %v1778_v22  ;;  %s1555_s28 = sld [smem:[#allocation2 + $0x1d]]  ;;  %s1556_s30 = sld [smem:[#allocation2 + $0x1e]] }
  0x2f   : > { %200 = vrot.lane.b32.xlu0 %v196_v10, %s1697_s29  ;;  %v351_v41 = vstv %s1541_s13  ;;  %v365_v45 = vstv %s1542_s14  ;;  %v379_v48 = vstv %s1543_s15  ;;  %s1557_s4 = sld [smem:[#allocation2 + $0x1f]]  ;;  %s1558_s6 = sld [smem:[#allocation2 + $0x20]] }
  0x30   : > { %v353_v43 = vmul.f32 %v351_v41, %v1805_v40  ;;  %v352_v44 = vmul.f32 %v351_v41, %v1808_v42  ;;  %v367_v46 = vmul.f32 %v365_v45, %v1805_v40  ;;  %v366_v47 = vmul.f32 %v365_v45, %v1808_v42  ;;  %s1559_s8 = sld [smem:[#allocation2 + $0x21]]  ;;  %s1560_s11 = sld [smem:[#allocation2 + $0x22]]  ;;  %v1895_v41 = vld [vmem:[%s1744_s23 + $0xd] sm:$0xff] }
  0x31   : > { %v381_v49 = vmul.f32 %v379_v48, %v1805_v40  ;;  %v380_v50 = vmul.f32 %v379_v48, %v1808_v42  ;;  %v393_v51 = vstv %s1544_s16  ;;  %v407_v54 = vstv %s1545_s17  ;;  %s1562_s12 = sld [smem:[#allocation2 + $0x24]]  ;;  %s160_s13 = sld [smem:[#allocation2]] }
  0x32   : > { %216 = vrot.lane.b32.xlu1 %v211_v12, %s1698_s3  ;;  %v395_v52 = vmul.f32 %v393_v51, %v1805_v40  ;;  %v394_v53 = vmul.f32 %v393_v51, %v1808_v42  ;;  %v409_v55 = vmul.f32 %v407_v54, %v1805_v40  ;;  %v408_v56 = vmul.f32 %v407_v54, %v1808_v42  ;;  %s1563_s14 = sld [smem:[#allocation2 + $0x25]]  ;;  %s1564_s15 = sld [smem:[#allocation2 + $0x26]] }
  0x33   : > { %214 = vrot.lane.b32.xlu0 %v210_v13, %s1698_s3  ;;  %v421_v57 = vstv %s1546_s18  ;;  %v443_v61 = vstv %s1548_s19  ;;  %v457_v3 = vstv %s1549_s20  ;;  %s1565_s16 = sld [smem:[#allocation2 + $0x27]]  ;;  %s1912_s18 = sld [smem:[#allocation2 + $0x28]] }
  0x34   : > { %v423_v58 = vmul.f32 %v421_v57, %v1805_v40  ;;  %v422_v59 = vmul.f32 %v421_v57, %v1808_v42  ;;  %v445_v63 = vmul.f32 %v443_v61, %v1835_v60  ;;  %v444_v0 = vmul.f32 %v443_v61, %v1838_v62  ;;  %s1910_s17 = sld [smem:[#allocation2 + $0x7]]  ;;  %s1918_s19 = sld [smem:[#allocation2 + $0x29]] }
  0x35   : > { %v459_v4 = vmul.f32 %v457_v3, %v1835_v60  ;;  %v458_v5 = vmul.f32 %v457_v3, %v1838_v62  ;;  %v471_v6 = vstv %s1550_s21  ;;  %v485_v9 = vstv %s1551_s22  ;;  %s1926_s20 = sld [smem:[#allocation2 + $0x2b]]  ;;  %s1570_s21 = sld [smem:[#allocation2 + $0x2c]] }
  0x36   : > { %230 = vrot.lane.b32.xlu1 %v225_v15, %s1699_s5  ;;  %v473_v7 = vmul.f32 %v471_v6, %v1835_v60  ;;  %v472_v8 = vmul.f32 %v471_v6, %v1838_v62  ;;  %v487_v10 = vmul.f32 %v485_v9, %v1835_v60  ;;  %v486_v11 = vmul.f32 %v485_v9, %v1838_v62  ;;  %s1571_s22 = sld [smem:[#allocation2 + $0x2d]] }
  0x37   : > { %228 = vrot.lane.b32.xlu0 %v224_v16, %s1699_s5  ;;  %v499_v12 = vstv %s1552_s24  ;;  %v513_v15 = vstv %s1553_s27  ;;  %v549_v25 = vstv %s1556_s30  ;;  %s1572_s24 = sld [smem:[#allocation2 + $0x2e]]  ;;  %s1962_s30 = sld [smem:[#allocation2 + $0x30]] }
  0x38   : > { %v501_v13 = vmul.f32 %v499_v12, %v1835_v60  ;;  %v500_v14 = vmul.f32 %v499_v12, %v1838_v62  ;;  %v515_v16 = vmul.f32 %v513_v15, %v1835_v60  ;;  %v514_v17 = vmul.f32 %v513_v15, %v1838_v62  ;;  %s1954_s27 = sld [smem:[#allocation2 + $0xe]] }
  0x39   : > { %v563_v28 = vstv %s1557_s4  ;;  %v577_v31 = vstv %s1558_s6  ;;  %v591_v34 = vstv %s1559_s8  ;;  %v605_v37 = vstv %s1560_s11  ;;  %s1970_s4 = sld [smem:[#allocation2 + $0x32]]  ;;  %s1579_s6 = sld [smem:[#allocation2 + $0x33]] }
  0x3a   : > { %244 = vrot.lane.b32.xlu1 %v239_v18, %s1700_s7  ;;  %v1865_v18 = vld [vmem:[%s1744_s23 + $0xc] sm:$0xff]  ;;  %v641_v51 = vstv %s1563_s14  ;;  %v669_v3 = vstv %s1565_s16  ;;  %s1580_s8 = sld [smem:[#allocation2 + $0x34]]  ;;  %s1581_s11 = sld [smem:[#allocation2 + $0x35]] }
  0x3b   : > { %242 = vrot.lane.b32.xlu0 %v238_v19, %s1700_s7  ;;  %v535_v19 = vstv %s1555_s28  ;;  %v683_v12 = vstv %s1912_s18  ;;  %s1956_s28 = sld [smem:[#allocation2 + $0x2f]]  ;;  %s1588_s16 = sld [smem:[#allocation2 + $0x3a]] }
  0x3c   : > { %s2006_s14 = sld [smem:[#allocation2 + $0x37]]  ;;  %s1590_s18 = sld [smem:[#allocation2 + $0x3c]] }
  0x3e   : > { %266 = vrot.lane.b32.xlu1 %v261_v23, %s1696_s26  ;;  %v537_v23 = vmul.f32 %v535_v19, %v1865_v18 }
  0x3f   : > { %264 = vrot.lane.b32.xlu0 %v260_v24, %s1696_s26  ;;  %v536_v24 = vmul.f32 %v535_v19, %v1868_v21  ;;  %v685_v19 = vmul.f32 %v683_v12, %v1895_v41 }
  0x42   : > { %280 = vrot.lane.b32.xlu1 %v275_v26, %s1695_s25  ;;  %v551_v26 = vmul.f32 %v549_v25, %v1865_v18 }
  0x43   : > { %278 = vrot.lane.b32.xlu0 %v274_v27, %s1695_s25  ;;  %v550_v27 = vmul.f32 %v549_v25, %v1868_v21 }
  0x46   : > { %294 = vrot.lane.b32.xlu1 %v289_v29, %s1697_s29  ;;  %v565_v29 = vmul.f32 %v563_v28, %v1865_v18 }
  0x47   : > { %292 = vrot.lane.b32.xlu0 %v288_v30, %s1697_s29  ;;  %v564_v30 = vmul.f32 %v563_v28, %v1868_v21 }
  0x4a   : > { %308 = vrot.lane.b32.xlu1 %v303_v32, %s1698_s3  ;;  %v579_v32 = vmul.f32 %v577_v31, %v1865_v18 }
  0x4b   : > { %306 = vrot.lane.b32.xlu0 %v302_v33, %s1698_s3  ;;  %v578_v33 = vmul.f32 %v577_v31, %v1868_v21 }
  0x4e   : > { %322 = vrot.lane.b32.xlu1 %v317_v35, %s1699_s5  ;;  %v593_v35 = vmul.f32 %v591_v34, %v1865_v18 }
  0x4f   : > { %320 = vrot.lane.b32.xlu0 %v316_v36, %s1699_s5  ;;  %v592_v36 = vmul.f32 %v591_v34, %v1868_v21 }
  0x52   : > { %336 = vrot.lane.b32.xlu1 %v331_v38, %s1700_s7  ;;  %v607_v38 = vmul.f32 %v605_v37, %v1865_v18 }
  0x53   : > { %334 = vrot.lane.b32.xlu0 %v330_v39, %s1700_s7  ;;  %v606_v39 = vmul.f32 %v605_v37, %v1868_v21 }
  0x56   : > { %358 = vrot.lane.b32.xlu1 %v353_v43, %s1696_s26  ;;  %v627_v43 = vstv %s1562_s12  ;;  %s1998_s12 = sld [smem:[#allocation2 + $0x15]] }
  0x57   : > { %356 = vrot.lane.b32.xlu0 %v352_v44, %s1696_s26  ;;  %v1898_v44 = vld [vmem:[%s1744_s23 + $0x5] sm:$0xff]  ;;  %v629_v48 = vmul.f32 %v627_v43, %v1895_v41 }
  0x5a   : > { %372 = vrot.lane.b32.xlu1 %v367_v46, %s1695_s25 }
  0x5b   : > { %370 = vrot.lane.b32.xlu0 %v366_v47, %s1695_s25  ;;  %v161_v47 = vstv %s160_s13  ;;  %s2000_s13 = sld [smem:[#allocation2 + $0x36]] }
  0x5c   : > { %v162_v54 = vmul.f32 %v161_v47, %v1747_v1 }
  0x5e   : > { %386 = vrot.lane.b32.xlu1 %v381_v49, %s1697_s29  ;;  %v628_v49 = vmul.f32 %v627_v43, %v1898_v44 }
  0x5f   : > { %384 = vrot.lane.b32.xlu0 %v380_v50, %s1697_s29  ;;  %v163_v50 = vmul.f32 %v161_v47, %v1750_v2 }
  0x62   : > { %400 = vrot.lane.b32.xlu1 %v395_v52, %s1698_s3 }
  0x63   : > { %398 = vrot.lane.b32.xlu0 %v394_v53, %s1698_s3 }
  0x66   : > { %414 = vrot.lane.b32.xlu1 %v409_v55, %s1699_s5  ;;  %v643_v55 = vmul.f32 %v641_v51, %v1895_v41 }
  0x67   : > { %412 = vrot.lane.b32.xlu0 %v408_v56, %s1699_s5  ;;  %v642_v56 = vmul.f32 %v641_v51, %v1898_v44 }
  0x6a   : > { %428 = vrot.lane.b32.xlu1 %v423_v58, %s1700_s7  ;;  %v655_v58 = vstv %s1564_s15  ;;  %s2014_s15 = sld [smem:[#allocation2 + $0x39]] }
  0x6b   : > { %426 = vrot.lane.b32.xlu0 %v422_v59, %s1700_s7  ;;  %v657_v1 = vmul.f32 %v655_v58, %v1895_v41 }
  0x6e   : > { %450 = vrot.lane.b32.xlu1 %v445_v63, %s1696_s26  ;;  %v656_v63 = vmul.f32 %v655_v58, %v1898_v44 }
  0x6f   : > { %448 = vrot.lane.b32.xlu0 %v444_v0, %s1696_s26 }
  0x72   : > { %464 = vrot.lane.b32.xlu1 %v459_v4, %s1695_s25 }
  0x73   : > { %462 = vrot.lane.b32.xlu0 %v458_v5, %s1695_s25 }
  0x76   : > { %478 = vrot.lane.b32.xlu1 %v473_v7, %s1697_s29  ;;  %v671_v7 = vmul.f32 %v669_v3, %v1895_v41 }
  0x77   : > { %476 = vrot.lane.b32.xlu0 %v472_v8, %s1697_s29  ;;  %v670_v8 = vmul.f32 %v669_v3, %v1898_v44 }
  0x7a   : > { %492 = vrot.lane.b32.xlu1 %v487_v10, %s1698_s3 }
  0x7b   : > { %490 = vrot.lane.b32.xlu0 %v486_v11, %s1698_s3  ;;  %v253_v11 = vstv %s1910_s17  ;;  %s1589_s17 = sld [smem:[#allocation2 + $0x3b]] }
  0x7e   : > { %506 = vrot.lane.b32.xlu1 %v501_v13, %s1699_s5 }
  0x7f   : > { %504 = vrot.lane.b32.xlu0 %v500_v14, %s1699_s5 }
  0x82   : > { %520 = vrot.lane.b32.xlu1 %v515_v16, %s1700_s7 }
  0x83   : > { %518 = vrot.lane.b32.xlu0 %v514_v17, %s1700_s7  ;;  %v255_v17 = vmul.f32 %v253_v11, %v1775_v20 }
  0x86   : > { %542 = vrot.lane.b32.xlu1 %v537_v23, %s1696_s26  ;;  %v684_v23 = vmul.f32 %v683_v12, %v1898_v44 }
  0x87   : > { %540 = vrot.lane.b32.xlu0 %v536_v24, %s1696_s26 }
  0x8a   : > { %556 = vrot.lane.b32.xlu1 %v551_v26, %s1695_s25  ;;  %v254_v26 = vmul.f32 %v253_v11, %v1778_v22  ;;  %v1944_v22 = vld [vmem:[%s1744_s23 + $0x6] sm:$0xff] }
  0x8b   : > { %554 = vrot.lane.b32.xlu0 %v550_v27, %s1695_s25  ;;  %v697_v27 = vstv %s1918_s19  ;;  %s2042_s19 = sld [smem:[#allocation2 + $0x1c]] }
  0x8c   : > { %v699_v20 = vmul.f32 %v697_v27, %v1895_v41 }
  0x8e   : > { %570 = vrot.lane.b32.xlu1 %v565_v29, %s1697_s29 }
  0x8f   : > { %568 = vrot.lane.b32.xlu0 %v564_v30, %s1697_s29 }
  0x92   : > { %584 = vrot.lane.b32.xlu1 %v579_v32, %s1698_s3  ;;  %v698_v32 = vmul.f32 %v697_v27, %v1898_v44 }
  0x93   : > { %582 = vrot.lane.b32.xlu0 %v578_v33, %s1698_s3 }
  0x96   : > { %598 = vrot.lane.b32.xlu1 %v593_v35, %s1699_s5  ;;  %v1940_v35 = vld [vmem:[%s1744_s23 + $0xe] sm:$0xff] }
  0x97   : > { %596 = vrot.lane.b32.xlu0 %v592_v36, %s1699_s5  ;;  %v719_v36 = vstv %s1926_s20  ;;  %s2044_s20 = sld [smem:[#allocation2 + $0x3d]] }
  0x98   : > { %v187_v45 = vpop.permute.xlu1 %186  ;;  %v720_v43 = vmul.f32 %v719_v36, %v1944_v22 }
  0x99   : > { %v173_v46 = vpop.permute.xlu0 %172 }
  0x9a   : > { %612 = vrot.lane.b32.xlu1 %v607_v38, %s1700_s7  ;;  %v178_v61 = vadd.f32 %v173_v46, %v162_v54 }
  0x9b   : > { %610 = vrot.lane.b32.xlu0 %v606_v39, %s1700_s7  ;;  %v721_v39 = vmul.f32 %v719_v36, %v1940_v35 }
  0x9c   : > { %v189_v52 = vpop.permute.xlu1 %188  ;;  %v192_v6 = vadd.f32 %v187_v45, %v178_v61  ;;  %v733_v45 = vstv %s1570_s21  ;;  %s2050_s21 = sld [smem:[#allocation2 + $0x3e]] }
  0x9d   : > { %v175_v53 = vpop.permute.xlu0 %174 }
  0x9e   : > { %634 = vrot.lane.b32.xlu1 %v629_v48, %s1696_s26  ;;  %v179_v57 = vadd.f32 %v175_v53, %v163_v50  ;;  %v735_v48 = vmul.f32 %v733_v45, %v1940_v35  ;;  %v747_v50 = vstv %s1571_s22  ;;  %s2058_s22 = sld [smem:[#allocation2 + $0x40]] }
  0x9f   : > { %632 = vrot.lane.b32.xlu0 %v628_v49, %s1696_s26  ;;  %v734_v49 = vmul.f32 %v733_v45, %v1944_v22  ;;  %v749_v53 = vmul.f32 %v747_v50, %v1940_v35  ;;  %v748_v54 = vmul.f32 %v747_v50, %v1944_v22  ;;  %v854_v50 = vstv %s1581_s11  ;;  %s2102_s11 = sld [smem:[#allocation2 + $0x48]] }
  0xa0   : > { %v203_v2 = vpop.permute.xlu1 %202  ;;  %v193_v0 = vadd.f32 %v189_v52, %v179_v57  ;;  %v761_v57 = vstv %s1572_s24  ;;  %s1597_s24 = sld [smem:[#allocation2 + $0x41]] }
  0xa1   : > { %v201_v59 = vpop.permute.xlu0 %200 }
  0xa2   : > { %648 = vrot.lane.b32.xlu1 %v643_v55, %s1695_s25  ;;  %v207_v9 = vadd.f32 %v203_v2, %v193_v0  ;;  %v206_v10 = vadd.f32 %v201_v59, %v192_v6 }
  0xa3   : > { %646 = vrot.lane.b32.xlu0 %v642_v56, %s1695_s25 }
  0xa4   : > { %v217_v4 = vpop.permute.xlu1 %216 }
  0xa5   : > { %v215_v5 = vpop.permute.xlu0 %214  ;;  %v221_v15 = vadd.f32 %v217_v4, %v207_v9  ;;  %v345_v4 = vstv %s1954_s27  ;;  %s1598_s27 = sld [smem:[#allocation2 + $0x42]] }
  0xa6   : > { %662 = vrot.lane.b32.xlu1 %v657_v1, %s1697_s29  ;;  %v220_v16 = vadd.f32 %v215_v5, %v206_v10  ;;  %v763_v1 = vmul.f32 %v761_v57, %v1940_v35  ;;  %v775_v5 = vstv %s1956_s28  ;;  %v347_v10 = vmul.f32 %v345_v4, %v1805_v40  ;;  %s1599_s28 = sld [smem:[#allocation2 + $0x43]] }
  0xa7   : > { %660 = vrot.lane.b32.xlu0 %v656_v63, %s1697_s29  ;;  %v762_v63 = vmul.f32 %v761_v57, %v1944_v22  ;;  %v777_v11 = vmul.f32 %v775_v5, %v1940_v35  ;;  %v776_v12 = vmul.f32 %v775_v5, %v1944_v22 }
  0xa8   : > { %v231_v13 = vpop.permute.xlu1 %230 }
  0xa9   : > { %v229_v14 = vpop.permute.xlu0 %228  ;;  %v235_v24 = vadd.f32 %v231_v13, %v221_v15  ;;  %v346_v15 = vmul.f32 %v345_v4, %v1808_v42  ;;  %v1988_v42 = vld [vmem:[%s1744_s23 + $0x18] sm:$0xff] }
  0xaa   : > { %676 = vrot.lane.b32.xlu1 %v671_v7, %s1698_s3  ;;  %v234_v25 = vadd.f32 %v229_v14, %v220_v16  ;;  %v789_v16 = vstv %s1962_s30  ;;  %s1600_s30 = sld [smem:[#allocation2 + $0x44]] }
  0xab   : > { %674 = vrot.lane.b32.xlu0 %v670_v8, %s1698_s3  ;;  %v791_v40 = vmul.f32 %v789_v16, %v1940_v35 }
  0xac   : > { %v245_v28 = vpop.permute.xlu1 %244 }
  0xad   : > { %v243_v29 = vpop.permute.xlu0 %242  ;;  %v249_v30 = vadd.f32 %v245_v28, %v235_v24  ;;  %v1984_v28 = vld [vmem:[%s1744_s23 + $0x20] sm:$0xff] }
  0xae   : > { %v248_v31 = vadd.f32 %v243_v29, %v234_v25  ;;  %690 = vrot.lane.b32.xlu1 %v685_v19, %s1699_s5  ;;  %v790_v25 = vmul.f32 %v789_v16, %v1944_v22  ;;  %v812_v29 = vstv %s1970_s4  ;;  %s1601_s4 = sld [smem:[#allocation2 + $0x45]] }
  0xaf   : > { %688 = vrot.lane.b32.xlu0 %v684_v23, %s1699_s5  ;;  %v257_v33 = vadd.f32 %v255_v17, %v249_v30 }
  0xb0   : > { %v256_v34 = vadd.f32 %v254_v26, %v248_v31  ;;  %v267_v37 = vpop.permute.xlu1 %266 }
  0xb1   : > { %v265_v38 = vpop.permute.xlu0 %264  ;;  %v271_v55 = vadd.f32 %v267_v37, %v257_v33  ;;  %v826_v33 = vstv %s1579_s6  ;;  %s2094_s6 = sld [smem:[#allocation2 + $0x23]] }
  0xb2   : > { %704 = vrot.lane.b32.xlu1 %v699_v20, %s1700_s7  ;;  %v270_v56 = vadd.f32 %v265_v38, %v256_v34  ;;  %v814_v20 = vmul.f32 %v1984_v28, %v812_v29  ;;  %v828_v37 = vmul.f32 %v1984_v28, %v826_v33  ;;  %v827_v38 = vmul.f32 %v1988_v42, %v826_v33 }
  0xb3   : > { %702 = vrot.lane.b32.xlu0 %v698_v32, %s1700_s7  ;;  %v813_v32 = vmul.f32 %v1988_v42, %v812_v29 }
  0xb4   : > { %v281_v46 = vpop.permute.xlu1 %280 }
  0xb5   : > { %v279_v47 = vpop.permute.xlu0 %278  ;;  %v285_v59 = vadd.f32 %v281_v46, %v271_v55  ;;  %v856_v55 = vmul.f32 %v1984_v28, %v854_v50 }
  0xb6   : > { %726 = vrot.lane.b32.xlu1 %v721_v39, %s1696_s26  ;;  %v284_v61 = vadd.f32 %v279_v47, %v270_v56  ;;  %v840_v39 = vstv %s1580_s8  ;;  %v855_v56 = vmul.f32 %v1988_v42, %v854_v50  ;;  %s2096_s8 = sld [smem:[#allocation2 + $0x47]] }
  0xb7   : > { %724 = vrot.lane.b32.xlu0 %v720_v43, %s1696_s26  ;;  %v842_v46 = vmul.f32 %v1984_v28, %v840_v39  ;;  %v841_v47 = vmul.f32 %v1988_v42, %v840_v39  ;;  %v946_v39 = vstv %s1590_s18  ;;  %s2155_s18 = sld [smem:[#allocation2 + $0x4f]] }
  0xb8   : > { %v295_v51 = vpop.permute.xlu1 %294 }
  0xb9   : > { %v293_v52 = vpop.permute.xlu0 %292  ;;  %v299_v0 = vadd.f32 %v295_v51, %v285_v59  ;;  %v868_v59 = vstv %s2000_s13  ;;  %s1608_s13 = sld [smem:[#allocation2 + $0x4a]] }
  0xba   : > { %740 = vrot.lane.b32.xlu1 %v735_v48, %s1695_s25  ;;  %v298_v3 = vadd.f32 %v293_v52, %v284_v61  ;;  %v870_v4 = vmul.f32 %v1984_v28, %v868_v59  ;;  %v869_v5 = vmul.f32 %v1988_v42, %v868_v59 }
  0xbb   : > { %738 = vrot.lane.b32.xlu0 %v734_v49, %s1695_s25 }
  0xbc   : > { %v309_v58 = vpop.permute.xlu1 %308 }
  0xbd   : > { %v307_v2 = vpop.permute.xlu0 %306  ;;  %v313_v8 = vadd.f32 %v309_v58, %v299_v0 }
  0xbe   : > { %754 = vrot.lane.b32.xlu1 %v749_v53, %s1697_s29  ;;  %v312_v9 = vadd.f32 %v307_v2, %v298_v3  ;;  %v437_v2 = vstv %s1998_s12  ;;  %s2116_s12 = sld [smem:[#allocation2 + $0x49]] }
  0xbf   : > { %752 = vrot.lane.b32.xlu0 %v748_v54, %s1697_s29  ;;  %v439_v3 = vmul.f32 %v437_v2, %v1835_v60 }
  0xc0   : > { %v323_v6 = vpop.permute.xlu1 %322 }
  0xc1   : > { %v321_v7 = vpop.permute.xlu0 %320  ;;  %v327_v13 = vadd.f32 %v323_v6, %v313_v8  ;;  %v438_v8 = vmul.f32 %v437_v2, %v1838_v62  ;;  %v2032_v62 = vld [vmem:[%s1744_s23 + $0x19] sm:$0xff] }
  0xc2   : > { %768 = vrot.lane.b32.xlu1 %v763_v1, %s1698_s3  ;;  %v326_v14 = vadd.f32 %v321_v7, %v312_v9  ;;  %v882_v9 = vstv %s2006_s14  ;;  %s2130_s14 = sld [smem:[#allocation2 + $0x2a]] }
  0xc3   : > { %766 = vrot.lane.b32.xlu0 %v762_v63, %s1698_s3  ;;  %v884_v60 = vmul.f32 %v1984_v28, %v882_v9 }
  0xc4   : > { %v337_v17 = vpop.permute.xlu1 %336 }
  0xc5   : > { %v335_v19 = vpop.permute.xlu0 %334  ;;  %v341_v23 = vadd.f32 %v337_v17, %v327_v13  ;;  %v2028_v17 = vld [vmem:[%s1744_s23 + $0x21] sm:$0xff] }
  0xc6   : > { %v340_v24 = vadd.f32 %v335_v19, %v326_v14  ;;  %782 = vrot.lane.b32.xlu1 %v777_v11, %s1699_s5  ;;  %v883_v14 = vmul.f32 %v1988_v42, %v882_v9  ;;  %v904_v19 = vstv %s2014_s15  ;;  %s2132_s15 = sld [smem:[#allocation2 + $0x4b]] }
  0xc7   : > { %780 = vrot.lane.b32.xlu0 %v776_v12, %s1699_s5  ;;  %v349_v26 = vadd.f32 %v347_v10, %v341_v23 }
  0xc8   : > { %v348_v27 = vadd.f32 %v346_v15, %v340_v24  ;;  %v359_v30 = vpop.permute.xlu1 %358 }
  0xc9   : > { %v357_v31 = vpop.permute.xlu0 %356  ;;  %v363_v48 = vadd.f32 %v359_v30, %v349_v26  ;;  %v918_v26 = vstv %s1588_s16  ;;  %s2138_s16 = sld [smem:[#allocation2 + $0x4c]] }
  0xca   : > { %796 = vrot.lane.b32.xlu1 %v791_v40, %s1700_s7  ;;  %v362_v49 = vadd.f32 %v357_v31, %v348_v27  ;;  %v906_v40 = vmul.f32 %v2028_v17, %v904_v19  ;;  %v920_v30 = vmul.f32 %v2028_v17, %v918_v26  ;;  %v919_v31 = vmul.f32 %v2032_v62, %v918_v26 }
  0xcb   : > { %794 = vrot.lane.b32.xlu0 %v790_v25, %s1700_s7  ;;  %v905_v25 = vmul.f32 %v2032_v62, %v904_v19 }
  0xcc   : > { %v373_v34 = vpop.permute.xlu1 %372 }
  0xcd   : > { %v371_v36 = vpop.permute.xlu0 %370  ;;  %v377_v53 = vadd.f32 %v373_v34, %v363_v48  ;;  %v948_v48 = vmul.f32 %v2028_v17, %v946_v39 }
  0xce   : > { %819 = vrot.lane.b32.xlu1 %v814_v20, %s1696_s26  ;;  %v376_v54 = vadd.f32 %v371_v36, %v362_v49  ;;  %v932_v20 = vstv %s1589_s17  ;;  %v947_v49 = vmul.f32 %v2032_v62, %v946_v39  ;;  %s2146_s17 = sld [smem:[#allocation2 + $0x4e]] }
  0xcf   : > { %817 = vrot.lane.b32.xlu0 %v813_v32, %s1696_s26  ;;  %v934_v34 = vmul.f32 %v2028_v17, %v932_v20  ;;  %v933_v36 = vmul.f32 %v2032_v62, %v932_v20 }
  0xd0   : > { %v387_v43 = vpop.permute.xlu1 %386 }
  0xd1   : > { %v385_v45 = vpop.permute.xlu0 %384  ;;  %v391_v57 = vadd.f32 %v387_v43, %v377_v53  ;;  %v960_v53 = vstv %s2044_s20  ;;  %s1617_s20 = sld [smem:[#allocation2 + $0x51]] }
  0xd2   : > { %833 = vrot.lane.b32.xlu1 %v828_v37, %s1695_s25  ;;  %v390_v58 = vadd.f32 %v385_v45, %v376_v54  ;;  %v962_v2 = vmul.f32 %v2028_v17, %v960_v53  ;;  %v961_v59 = vmul.f32 %v2032_v62, %v960_v53 }
  0xd3   : > { %831 = vrot.lane.b32.xlu0 %v827_v38, %s1695_s25 }
  0xd4   : > { %v401_v51 = vpop.permute.xlu1 %400 }
  0xd5   : > { %v399_v52 = vpop.permute.xlu0 %398  ;;  %v405_v63 = vadd.f32 %v401_v51, %v391_v57 }
  0xd6   : > { %847 = vrot.lane.b32.xlu1 %v842_v46, %s1697_s29  ;;  %v404_v0 = vadd.f32 %v399_v52, %v390_v58  ;;  %v529_v52 = vstv %s2042_s19  ;;  %s1616_s19 = sld [smem:[#allocation2 + $0x50]] }
  0xd7   : > { %845 = vrot.lane.b32.xlu0 %v841_v47, %s1697_s29  ;;  %v531_v58 = vmul.f32 %v529_v52, %v1865_v18 }
  0xd8   : > { %v415_v61 = vpop.permute.xlu1 %414 }
  0xd9   : > { %v413_v1 = vpop.permute.xlu0 %412  ;;  %v419_v6 = vadd.f32 %v415_v61, %v405_v63  ;;  %v530_v63 = vmul.f32 %v529_v52, %v1868_v21  ;;  %v2076_v21 = vld [vmem:[%s1744_s23 + $0x1a] sm:$0xff] }
  0xda   : > { %861 = vrot.lane.b32.xlu1 %v856_v55, %s1698_s3  ;;  %v418_v7 = vadd.f32 %v413_v1, %v404_v0  ;;  %v974_v0 = vstv %s2050_s21  ;;  %s1618_s21 = sld [smem:[#allocation2 + $0x52]] }
  0xdb   : > { %859 = vrot.lane.b32.xlu0 %v855_v56, %s1698_s3  ;;  %v976_v18 = vmul.f32 %v2028_v17, %v974_v0 }
  0xdc   : > { %v429_v10 = vpop.permute.xlu1 %428 }
  0xdd   : > { %v427_v11 = vpop.permute.xlu0 %426  ;;  %v433_v12 = vadd.f32 %v429_v10, %v419_v6  ;;  %v2072_v10 = vld [vmem:[%s1744_s23 + $0x22] sm:$0xff] }
  0xde   : > { %v432_v13 = vadd.f32 %v427_v11, %v418_v7  ;;  %875 = vrot.lane.b32.xlu1 %v870_v4, %s1699_s5  ;;  %v975_v7 = vmul.f32 %v2032_v62, %v974_v0  ;;  %v996_v11 = vstv %s2058_s22  ;;  %s1577_s22 = sld [smem:[#allocation2 + $0x31]] }
  0xdf   : > { %873 = vrot.lane.b32.xlu0 %v869_v5, %s1699_s5  ;;  %v441_v15 = vadd.f32 %v439_v3, %v433_v12 }
  0xe0   : > { %v440_v16 = vadd.f32 %v438_v8, %v432_v13  ;;  %v451_v23 = vpop.permute.xlu1 %450 }
  0xe1   : > { %v449_v24 = vpop.permute.xlu0 %448  ;;  %v455_v37 = vadd.f32 %v451_v23, %v441_v15  ;;  %v1010_v15 = vstv %s1597_s24  ;;  %s2181_s24 = sld [smem:[#allocation2 + $0x53]] }
  0xe2   : > { %889 = vrot.lane.b32.xlu1 %v884_v60, %s1700_s7  ;;  %v454_v38 = vadd.f32 %v449_v24, %v440_v16  ;;  %v998_v60 = vmul.f32 %v2072_v10, %v996_v11  ;;  %v1012_v23 = vmul.f32 %v2072_v10, %v1010_v15  ;;  %v1011_v24 = vmul.f32 %v2076_v21, %v1010_v15 }
  0xe3   : > { %887 = vrot.lane.b32.xlu0 %v883_v14, %s1700_s7  ;;  %v997_v14 = vmul.f32 %v2076_v21, %v996_v11 }
  0xe4   : > { %v465_v27 = vpop.permute.xlu1 %464 }
  0xe5   : > { %v463_v29 = vpop.permute.xlu0 %462  ;;  %v469_v46 = vadd.f32 %v465_v27, %v455_v37 }
  0xe6   : > { %911 = vrot.lane.b32.xlu1 %v906_v40, %s1696_s26  ;;  %v468_v47 = vadd.f32 %v463_v29, %v454_v38  ;;  %v1024_v40 = vstv %s1598_s27  ;;  %s2187_s27 = sld [smem:[#allocation2 + $0x55]] }
  0xe7   : > { %909 = vrot.lane.b32.xlu0 %v905_v25, %s1696_s26  ;;  %v1026_v27 = vmul.f32 %v2072_v10, %v1024_v40  ;;  %v1025_v29 = vmul.f32 %v2076_v21, %v1024_v40  ;;  %v1130_v40 = vstv %s1608_s13  ;;  %s1634_s13 = sld [smem:[#allocation2 + $0x5e]] }
  0xe8   : > { %v479_v32 = vpop.permute.xlu1 %478 }
  0xe9   : > { %v477_v33 = vpop.permute.xlu0 %476  ;;  %v483_v50 = vadd.f32 %v479_v32, %v469_v46 }
  0xea   : > { %925 = vrot.lane.b32.xlu1 %v920_v30, %s1695_s25  ;;  %v482_v51 = vadd.f32 %v477_v33, %v468_v47  ;;  %v1038_v30 = vstv %s1599_s28  ;;  %s2196_s28 = sld [smem:[#allocation2 + $0x56]] }
  0xeb   : > { %923 = vrot.lane.b32.xlu0 %v919_v31, %s1695_s25  ;;  %v1040_v32 = vmul.f32 %v2072_v10, %v1038_v30  ;;  %v1039_v33 = vmul.f32 %v2076_v21, %v1038_v30 }
  0xec   : > { %v493_v43 = vpop.permute.xlu1 %492 }
  0xed   : > { %v491_v45 = vpop.permute.xlu0 %490  ;;  %v497_v56 = vadd.f32 %v493_v43, %v483_v50 }
  0xee   : > { %939 = vrot.lane.b32.xlu1 %v934_v34, %s1697_s29  ;;  %v496_v57 = vadd.f32 %v491_v45, %v482_v51  ;;  %v1052_v34 = vstv %s1600_s30  ;;  %s1625_s30 = sld [smem:[#allocation2 + $0x57]] }
  0xef   : > { %937 = vrot.lane.b32.xlu0 %v933_v36, %s1697_s29  ;;  %v1054_v43 = vmul.f32 %v2072_v10, %v1052_v34  ;;  %v1053_v45 = vmul.f32 %v2076_v21, %v1052_v34  ;;  %v1144_v34 = vstv %s2132_s15  ;;  %s1637_s15 = sld [smem:[#allocation2 + $0x61]] }
  0xf0   : > { %v507_v54 = vpop.permute.xlu1 %506 }
  0xf1   : > { %v505_v55 = vpop.permute.xlu0 %504  ;;  %v511_v61 = vadd.f32 %v507_v54, %v497_v56 }
  0xf2   : > { %953 = vrot.lane.b32.xlu1 %v948_v48, %s1698_s3  ;;  %v510_v1 = vadd.f32 %v505_v55, %v496_v57  ;;  %v1066_v48 = vstv %s1601_s4  ;;  %v621_v57 = vstv %s2094_s6  ;;  %s1626_s4 = sld [smem:[#allocation2 + $0x58]]  ;;  %s1627_s6 = sld [smem:[#allocation2 + $0x59]] }
  0xf3   : > { %951 = vrot.lane.b32.xlu0 %v947_v49, %s1698_s3  ;;  %v1068_v53 = vmul.f32 %v2072_v10, %v1066_v48  ;;  %v1067_v54 = vmul.f32 %v2076_v21, %v1066_v48 }
  0xf4   : > { %v521_v3 = vpop.permute.xlu1 %520 }
  0xf5   : > { %v519_v4 = vpop.permute.xlu0 %518  ;;  %v525_v5 = vadd.f32 %v521_v3, %v511_v61  ;;  %v623_v3 = vmul.f32 %v621_v57, %v1895_v41 }
  0xf6   : > { %v524_v6 = vadd.f32 %v519_v4, %v510_v1  ;;  %967 = vrot.lane.b32.xlu1 %v962_v2, %s1699_s5  ;;  %v1088_v2 = vstv %s2096_s8  ;;  %s1628_s8 = sld [smem:[#allocation2 + $0x5a]] }
  0xf7   : > { %965 = vrot.lane.b32.xlu0 %v961_v59, %s1699_s5  ;;  %v533_v8 = vadd.f32 %v531_v58, %v525_v5  ;;  %v2110_v58 = vld [vmem:[%s1744_s23 + $0x23] sm:$0xff]  ;;  %v2114_v59 = vld [vmem:[%s1744_s23 + $0x1b] sm:$0xff] }
  0xf8   : > { %v532_v9 = vadd.f32 %v530_v63, %v524_v6  ;;  %v543_v12 = vpop.permute.xlu1 %542  ;;  %v1090_v4 = vmul.f32 %v2110_v58, %v1088_v2  ;;  %v1089_v5 = vmul.f32 %v2114_v59, %v1088_v2  ;;  %v1132_v30 = vmul.f32 %v2110_v58, %v1130_v40  ;;  %v2162_v2 = vld [vmem:[%s1744_s23 + $0x24] sm:$0xff] }
  0xf9   : > { %v541_v13 = vpop.permute.xlu0 %540  ;;  %v547_v38 = vadd.f32 %v543_v12, %v533_v8  ;;  %v1102_v8 = vstv %s2102_s11  ;;  %s1632_s11 = sld [smem:[#allocation2 + $0x5c]] }
  0xfa   : > { %981 = vrot.lane.b32.xlu1 %v976_v18, %s1700_s7  ;;  %v546_v39 = vadd.f32 %v541_v13, %v532_v9  ;;  %v622_v18 = vmul.f32 %v621_v57, %v1898_v44  ;;  %v1104_v41 = vmul.f32 %v2110_v58, %v1102_v8  ;;  %v1103_v12 = vmul.f32 %v2114_v59, %v1102_v8 }
  0xfb   : > { %979 = vrot.lane.b32.xlu0 %v975_v7, %s1700_s7 }
  0xfc   : > { %v557_v16 = vpop.permute.xlu1 %556 }
  0xfd   : > { %v555_v19 = vpop.permute.xlu0 %554  ;;  %v561_v46 = vadd.f32 %v557_v16, %v547_v38 }
  0xfe   : > { %1003 = vrot.lane.b32.xlu1 %v998_v60, %s1696_s26  ;;  %v560_v47 = vadd.f32 %v555_v19, %v546_v39 }
  0xff   : > { %1001 = vrot.lane.b32.xlu0 %v997_v14, %s1696_s26  ;;  %v1116_v14 = vstv %s2116_s12  ;;  %s1633_s12 = sld [smem:[#allocation2 + $0x5d]] }
 0x100   : > { %v571_v25 = vpop.permute.xlu1 %570  ;;  %v1118_v16 = vmul.f32 %v2110_v58, %v1116_v14  ;;  %v1117_v19 = vmul.f32 %v2114_v59, %v1116_v14 }
 0x101   : > { %v569_v26 = vpop.permute.xlu0 %568  ;;  %v575_v51 = vadd.f32 %v571_v25, %v561_v46  ;;  %v1145_v46 = vmul.f32 %v2114_v59, %v1144_v34 }
 0x102   : > { %1017 = vrot.lane.b32.xlu1 %v1012_v23, %s1695_s25  ;;  %v574_v52 = vadd.f32 %v569_v26, %v560_v47 }
 0x103   : > { %1015 = vrot.lane.b32.xlu0 %v1011_v24, %s1695_s25 }
 0x104   : > { %v585_v31 = vpop.permute.xlu1 %584 }
 0x105   : > { %v583_v20 = vpop.permute.xlu0 %582  ;;  %v589_v55 = vadd.f32 %v585_v31, %v575_v51  ;;  %v1131_v31 = vmul.f32 %v2114_v59, %v1130_v40 }
 0x106   : > { %1031 = vrot.lane.b32.xlu1 %v1026_v27, %s1697_s29  ;;  %v588_v56 = vadd.f32 %v583_v20, %v574_v52 }
 0x107   : > { %1029 = vrot.lane.b32.xlu0 %v1025_v29, %s1697_s29 }
 0x108   : > { %v599_v36 = vpop.permute.xlu1 %598 }
 0x109   : > { %v597_v37 = vpop.permute.xlu0 %596  ;;  %v603_v63 = vadd.f32 %v599_v36, %v589_v55 }
 0x10a   : > { %1045 = vrot.lane.b32.xlu1 %v1040_v32, %s1698_s3  ;;  %v602_v0 = vadd.f32 %v597_v37, %v588_v56 }
 0x10b   : > { %1043 = vrot.lane.b32.xlu0 %v1039_v33, %s1698_s3  ;;  %v713_v33 = vstv %s2130_s14  ;;  %s1635_s14 = sld [smem:[#allocation2 + $0x5f]] }
 0x10c   : > { %v613_v49 = vpop.permute.xlu1 %612 }
 0x10d   : > { %v611_v50 = vpop.permute.xlu0 %610  ;;  %v617_v6 = vadd.f32 %v613_v49, %v603_v63  ;;  %v714_v49 = vmul.f32 %v713_v33, %v1944_v22  ;;  %v1180_v22 = vstv %s2146_s17 }
 0x10e   : > { %1059 = vrot.lane.b32.xlu1 %v1054_v43, %s1699_s5  ;;  %v616_v7 = vadd.f32 %v611_v50, %v602_v0  ;;  %v715_v43 = vmul.f32 %v713_v33, %v1940_v35  ;;  %v1158_v50 = vstv %s2138_s16  ;;  %s1640_s16 = sshll.u32 %s2314_s10, 4 }
 0x10f   : > { %1057 = vrot.lane.b32.xlu0 %v1053_v45, %s1699_s5  ;;  %v625_v13 = vadd.f32 %v623_v3, %v617_v6  ;;  %v1146_v45 = vmul.f32 %v2110_v58, %v1144_v34  ;;  %v1160_v35 = vmul.f32 %v2110_v58, %v1158_v50  ;;  %v1159_v55 = vmul.f32 %v2114_v59, %v1158_v50 }
 0x110   : > { %v635_v61 = vpop.permute.xlu1 %634  ;;  %v624_v60 = vadd.f32 %v622_v18, %v616_v7  ;;  %v1194_v6 = vstv %s2155_s18 }
 0x111   : > { %v633_v1 = vpop.permute.xlu0 %632  ;;  %v639_v23 = vadd.f32 %v635_v61, %v625_v13  ;;  %v2166_v61 = vld [vmem:[%s1744_s23 + $0x1c] sm:$0xff] }
 0x112   : > { %1073 = vrot.lane.b32.xlu1 %v1068_v53, %s1700_s7  ;;  %v638_v24 = vadd.f32 %v633_v1, %v624_v60 }
 0x113   : > { %1071 = vrot.lane.b32.xlu0 %v1067_v54, %s1700_s7 }
 0x114   : > { %v649_v9 = vpop.permute.xlu1 %648 }
 0x115   : > { %v647_v11 = vpop.permute.xlu0 %646  ;;  %v653_v27 = vadd.f32 %v649_v9, %v639_v23 }
 0x116   : > { %1095 = vrot.lane.b32.xlu1 %v1090_v4, %s1696_s26  ;;  %v652_v29 = vadd.f32 %v647_v11, %v638_v24  ;;  %v1182_v4 = vmul.f32 %v2162_v2, %v1180_v22  ;;  %v1196_v11 = vmul.f32 %v2162_v2, %v1194_v6 }
 0x117   : > { %1093 = vrot.lane.b32.xlu0 %v1089_v5, %s1696_s26  ;;  %v1181_v5 = vmul.f32 %v2166_v61, %v1180_v22  ;;  %v1286_v22 = vstv %s2196_s28 }
 0x118   : > { %v663_v44 = vpop.permute.xlu1 %662 }
 0x119   : > { %v661_v15 = vpop.permute.xlu0 %660  ;;  %v667_v20 = vadd.f32 %v663_v44, %v653_v27 }
 0x11a   : > { %1109 = vrot.lane.b32.xlu1 %v1104_v41, %s1695_s25  ;;  %v666_v32 = vadd.f32 %v661_v15, %v652_v29  ;;  %v1195_v41 = vmul.f32 %v2166_v61, %v1194_v6  ;;  %v1236_v29 = vstv %s1618_s21  ;;  %v1300_v6 = vstv %s1625_s30 }
 0x11b   : > { %1107 = vrot.lane.b32.xlu0 %v1103_v12, %s1695_s25  ;;  %v1208_v12 = vstv %s1616_s19  ;;  %v1238_v34 = vmul.f32 %v2162_v2, %v1236_v29  ;;  %s157_s19 = scalar_lea.vmem %s2311_s2, %s1640_s16 }
 0x11c   : > { %v677_v25 = vpop.permute.xlu1 %676  ;;  %v1210_v15 = vmul.f32 %v2162_v2, %v1208_v12 }
 0x11d   : > { %v675_v26 = vpop.permute.xlu0 %674  ;;  %v681_v38 = vadd.f32 %v677_v25, %v667_v20  ;;  %v806_v20 = vstv %s1577_s22 }
 0x11e   : > { %1123 = vrot.lane.b32.xlu1 %v1118_v16, %s1697_s29  ;;  %v680_v39 = vadd.f32 %v675_v26, %v666_v32  ;;  %v1209_v16 = vmul.f32 %v2166_v61, %v1208_v12  ;;  %v1314_v12 = vstv %s1626_s4 }
 0x11f   : > { %1121 = vrot.lane.b32.xlu0 %v1117_v19, %s1697_s29  ;;  %v1222_v19 = vstv %s1617_s20 }
 0x120   : > { %v691_v36 = vpop.permute.xlu1 %690  ;;  %v1224_v26 = vmul.f32 %v2162_v2, %v1222_v19  ;;  %v1223_v27 = vmul.f32 %v2166_v61, %v1222_v19  ;;  %v1328_v19 = vstv %s1627_s6 }
 0x121   : > { %v689_v37 = vpop.permute.xlu0 %688  ;;  %v695_v47 = vadd.f32 %v691_v36, %v681_v38  ;;  %v1237_v36 = vmul.f32 %v2166_v61, %v1236_v29  ;;  %v807_v38 = vmul.f32 %v1988_v42, %v806_v20  ;;  %v1272_v42 = vstv %s2187_s27 }
 0x122   : > { %1137 = vrot.lane.b32.xlu1 %v1132_v30, %s1698_s3  ;;  %v694_v48 = vadd.f32 %v689_v37, %v680_v39  ;;  %v808_v37 = vmul.f32 %v1984_v28, %v806_v20  ;;  %v1250_v39 = vstv %s2181_s24  ;;  %v2247_v20 = vld [vmem:[%s1744_s23 + $0x26] sm:$0xff] }
 0x123   : > { %1135 = vrot.lane.b32.xlu0 %v1131_v31, %s1698_s3 }
 0x124   : > { %v705_v51 = vpop.permute.xlu1 %704 }
 0x125   : > { %v703_v52 = vpop.permute.xlu0 %702  ;;  %v709_v53 = vadd.f32 %v705_v51, %v695_v47  ;;  %v2203_v51 = vld [vmem:[%s1744_s23 + $0x25] sm:$0xff] }
 0x126   : > { %v708_v54 = vadd.f32 %v703_v52, %v694_v48  ;;  %1151 = vrot.lane.b32.xlu1 %v1146_v45, %s1699_s5  ;;  %v1252_v48 = vmul.f32 %v2162_v2, %v1250_v39  ;;  %v2207_v52 = vld [vmem:[%s1744_s23 + $0x1d] sm:$0xff] }
 0x127   : > { %1149 = vrot.lane.b32.xlu0 %v1145_v46, %s1699_s5  ;;  %v717_v56 = vadd.f32 %v715_v43, %v709_v53 }
 0x128   : > { %v716_v57 = vadd.f32 %v714_v49, %v708_v54  ;;  %v727_v1 = vpop.permute.xlu1 %726  ;;  %v1251_v49 = vmul.f32 %v2166_v61, %v1250_v39  ;;  %v1378_v39 = vstv %s1633_s12 }
 0x129   : > { %v725_v63 = vpop.permute.xlu0 %724  ;;  %v731_v0 = vadd.f32 %v727_v1, %v717_v56  ;;  %v1274_v56 = vmul.f32 %v2203_v51, %v1272_v42 }
 0x12a   : > { %v730_v3 = vadd.f32 %v725_v63, %v716_v57  ;;  %1165 = vrot.lane.b32.xlu1 %v1160_v35, %s1700_s7  ;;  %v1273_v57 = vmul.f32 %v2207_v52, %v1272_v42 }
 0x12b   : > { %1163 = vrot.lane.b32.xlu0 %v1159_v55, %s1700_s7 }
 0x12c   : > { %v741_v18 = vpop.permute.xlu1 %740 }
 0x12d   : > { %v739_v7 = vpop.permute.xlu0 %738  ;;  %v745_v8 = vadd.f32 %v741_v18, %v731_v0 }
 0x12e   : > { %v744_v9 = vadd.f32 %v739_v7, %v730_v3  ;;  %1187 = vrot.lane.b32.xlu1 %v1182_v4, %s1696_s26  ;;  %v1288_v4 = vmul.f32 %v2203_v51, %v1286_v22 }
 0x12f   : > { %1185 = vrot.lane.b32.xlu0 %v1181_v5, %s1696_s26  ;;  %v1287_v5 = vmul.f32 %v2207_v52, %v1286_v22 }
 0x130   : > { %v755_v13 = vpop.permute.xlu1 %754 }
 0x131   : > { %v753_v60 = vpop.permute.xlu0 %752  ;;  %v759_v14 = vadd.f32 %v755_v13, %v745_v8 }
 0x132   : > { %v758_v44 = vadd.f32 %v753_v60, %v744_v9  ;;  %1201 = vrot.lane.b32.xlu1 %v1196_v11, %s1695_s25  ;;  %v1302_v11 = vmul.f32 %v2203_v51, %v1300_v6 }
 0x133   : > { %1199 = vrot.lane.b32.xlu0 %v1195_v41, %s1695_s25  ;;  %v1301_v41 = vmul.f32 %v2207_v52, %v1300_v6 }
 0x134   : > { %v769_v23 = vpop.permute.xlu1 %768 }
 0x135   : > { %v767_v24 = vpop.permute.xlu0 %766  ;;  %v773_v40 = vadd.f32 %v769_v23, %v759_v14 }
 0x136   : > { %v772_v25 = vadd.f32 %v767_v24, %v758_v44  ;;  %1215 = vrot.lane.b32.xlu1 %v1210_v15, %s1697_s29  ;;  %v1316_v15 = vmul.f32 %v2203_v51, %v1314_v12 }
 0x137   : > { %1213 = vrot.lane.b32.xlu0 %v1209_v16, %s1697_s29  ;;  %v1315_v16 = vmul.f32 %v2207_v52, %v1314_v12 }
 0x138   : > { %v783_v30 = vpop.permute.xlu1 %782 }
 0x139   : > { %v781_v31 = vpop.permute.xlu0 %780  ;;  %v787_v32 = vadd.f32 %v783_v30, %v773_v40  ;;  %v1330_v40 = vmul.f32 %v2203_v51, %v1328_v19 }
 0x13a   : > { %v786_v33 = vadd.f32 %v781_v31, %v772_v25  ;;  %1229 = vrot.lane.b32.xlu1 %v1224_v26, %s1698_s3  ;;  %v1329_v25 = vmul.f32 %v2207_v52, %v1328_v19  ;;  %v1342_v26 = vstv %s1628_s8 }
 0x13b   : > { %1227 = vrot.lane.b32.xlu0 %v1223_v27, %s1698_s3  ;;  %v1344_v30 = vmul.f32 %v2203_v51, %v1342_v26  ;;  %v1343_v31 = vmul.f32 %v2207_v52, %v1342_v26 }
 0x13c   : > { %v797_v43 = vpop.permute.xlu1 %796 }
 0x13d   : > { %v795_v45 = vpop.permute.xlu0 %794  ;;  %v801_v46 = vadd.f32 %v797_v43, %v787_v32  ;;  %v1364_v32 = vstv %s1632_s11 }
 0x13e   : > { %v800_v47 = vadd.f32 %v795_v45, %v786_v33  ;;  %1243 = vrot.lane.b32.xlu1 %v1238_v34, %s1699_s5  ;;  %v2250_v33 = vld [vmem:[%s1744_s23 + $0x1e] sm:$0xff]  ;;  %s1636_s23 = sld [smem:[#allocation2 + $0x60]] }
 0x13f   : > { %1241 = vrot.lane.b32.xlu0 %v1237_v36, %s1699_s5  ;;  %v810_v28 = vadd.f32 %v808_v37, %v801_v46  ;;  %v1366_v37 = vmul.f32 %v2247_v20, %v1364_v32  ;;  %v1380_v46 = vmul.f32 %v2247_v20, %v1378_v39 }
 0x140   : > { %v809_v50 = vadd.f32 %v807_v38, %v800_v47  ;;  %v820_v53 = vpop.permute.xlu1 %819  ;;  %v1365_v38 = vmul.f32 %v2250_v33, %v1364_v32  ;;  %v1379_v47 = vmul.f32 %v2250_v33, %v1378_v39 }
 0x141   : > { %v818_v54 = vpop.permute.xlu0 %817  ;;  %v824_v35 = vadd.f32 %v820_v53, %v810_v28  ;;  %v1406_v53 = vstv %s1635_s14 }
 0x142   : > { %v823_v55 = vadd.f32 %v818_v54, %v809_v50  ;;  %1257 = vrot.lane.b32.xlu1 %v1252_v48, %s1700_s7  ;;  %v1392_v48 = vstv %s1634_s13 }
 0x143   : > { %1255 = vrot.lane.b32.xlu0 %v1251_v49, %s1700_s7  ;;  %v1394_v50 = vmul.f32 %v2247_v20, %v1392_v48  ;;  %v1393_v42 = vmul.f32 %v2250_v33, %v1392_v48 }
 0x144   : > { %v834_v1 = vpop.permute.xlu1 %833 }
 0x145   : > { %v832_v63 = vpop.permute.xlu0 %831  ;;  %v838_v0 = vadd.f32 %v834_v1, %v824_v35 }
 0x146   : > { %v837_v3 = vadd.f32 %v832_v63, %v823_v55  ;;  %1279 = vrot.lane.b32.xlu1 %v1274_v56, %s1696_s26  ;;  %v1408_v55 = vmul.f32 %v2247_v20, %v1406_v53  ;;  %v1407_v56 = vmul.f32 %v2250_v33, %v1406_v53 }
 0x147   : > { %1277 = vrot.lane.b32.xlu0 %v1273_v57, %s1696_s26  ;;  %v1420_v57 = vstv %s1636_s23 }
 0x148   : > { %v848_v18 = vpop.permute.xlu1 %847  ;;  %v1422_v63 = vmul.f32 %v2247_v20, %v1420_v57 }
 0x149   : > { %v846_v7 = vpop.permute.xlu0 %845  ;;  %v852_v8 = vadd.f32 %v848_v18, %v838_v0  ;;  %v1421_v0 = vmul.f32 %v2250_v33, %v1420_v57 }
 0x14a   : > { %v851_v9 = vadd.f32 %v846_v7, %v837_v3  ;;  %1293 = vrot.lane.b32.xlu1 %v1288_v4, %s1695_s25  ;;  %v1434_v3 = vstv %s1637_s15 }
 0x14b   : > { %1291 = vrot.lane.b32.xlu0 %v1287_v5, %s1695_s25  ;;  %v1436_v6 = vmul.f32 %v2247_v20, %v1434_v3  ;;  %v1435_v18 = vmul.f32 %v2250_v33, %v1434_v3 }
 0x14c   : > { %v862_v13 = vpop.permute.xlu1 %861 }
 0x14d   : > { %v860_v60 = vpop.permute.xlu0 %859  ;;  %v2222_v14 = vadd.f32 %v862_v13, %v852_v8 }
 0x14e   : > { %v2224_v44 = vadd.f32 %v860_v60, %v851_v9  ;;  %1307 = vrot.lane.b32.xlu1 %v1302_v11, %s1697_s29 }
 0x14f   : > { %1305 = vrot.lane.b32.xlu0 %v1301_v41, %s1697_s29 }
 0x150   : > { %v2230_v23 = vpop.permute.xlu1 %875 }
 0x151   : > { %v2232_v24 = vpop.permute.xlu0 %873  ;;  %v880_v12 = vadd.f32 %v2230_v23, %v2222_v14 }
 0x152   : > { %1321 = vrot.lane.b32.xlu1 %v1316_v15, %s1698_s3  ;;  %v879_v13 = vadd.f32 %v2232_v24, %v2224_v44 }
 0x153   : > { %1319 = vrot.lane.b32.xlu0 %v1315_v16, %s1698_s3 }
 0x154   : > { %v2238_v27 = vpop.permute.xlu1 %889 }
 0x155   : > { %v2240_v29 = vpop.permute.xlu0 %887  ;;  %v894_v19 = vadd.f32 %v2238_v27, %v880_v12 }
 0x156   : > { %1335 = vrot.lane.b32.xlu1 %v1330_v40, %s1699_s5 }
 0x157   : > { %1333 = vrot.lane.b32.xlu0 %v1329_v25, %s1699_s5  ;;  %v893_v25 = vadd.f32 %v2240_v29, %v879_v13 }
 0x158   : > { %v2252_v34 = vpop.permute.xlu1 %911 }
 0x159   : > { %v2254_v36 = vpop.permute.xlu0 %909 }
 0x15a   : > { %1349 = vrot.lane.b32.xlu1 %v1344_v30, %s1700_s7 }
 0x15b   : > { %1347 = vrot.lane.b32.xlu0 %v1343_v31, %s1700_s7 }
 0x15c   : > { %v926_v43 = vpop.permute.xlu1 %925 }
 0x15d   : > { %v924_v45 = vpop.permute.xlu0 %923 }
 0x15e   : > { %1371 = vrot.lane.b32.xlu1 %v1366_v37, %s1696_s26 }
 0x15f   : > { %1369 = vrot.lane.b32.xlu0 %v1365_v38, %s1696_s26  ;;  %s1595_s26 = sld [smem:[#allocation2 + $0x3f]] }
 0x160   : > { %v940_v49 = vpop.permute.xlu1 %939 }
 0x161   : > { %v938_v28 = vpop.permute.xlu0 %937 }
 0x162   : > { %1385 = vrot.lane.b32.xlu1 %v1380_v46, %s1695_s25 }
 0x163   : > { %1383 = vrot.lane.b32.xlu0 %v1379_v47, %s1695_s25  ;;  %s1586_s25 = sld [smem:[#allocation2 + $0x38]] }
 0x164   : > { %v954_v54 = vpop.permute.xlu1 %953 }
 0x165   : > { %v952_v35 = vpop.permute.xlu0 %951  ;;  %v990_v29 = vstv %s1595_s26 }
 0x166   : > { %1399 = vrot.lane.b32.xlu1 %v1394_v50, %s1697_s29  ;;  %v992_v57 = vmul.f32 %v2072_v10, %v990_v29 }
 0x167   : > { %1397 = vrot.lane.b32.xlu0 %v1393_v42, %s1697_s29  ;;  %s1604_s29 = sld [smem:[#allocation2 + $0x46]] }
 0x168   : > { %v968_v22 = vpop.permute.xlu1 %967 }
 0x169   : > { %v966_v1 = vpop.permute.xlu0 %965  ;;  %v898_v41 = vstv %s1586_s25 }
 0x16a   : > { %1413 = vrot.lane.b32.xlu1 %v1408_v55, %s1698_s3  ;;  %v900_v16 = vmul.f32 %v2028_v17, %v898_v41  ;;  %v899_v40 = vmul.f32 %v2032_v62, %v898_v41 }
 0x16b   : > { %1411 = vrot.lane.b32.xlu0 %v1407_v56, %s1698_s3  ;;  %s1613_s3 = sld [smem:[#allocation2 + $0x4d]] }
 0x16c   : > { %v982_v4 = vpop.permute.xlu1 %981  ;;  %v902_v31 = vadd.f32 %v900_v16, %v894_v19  ;;  %v901_v32 = vadd.f32 %v899_v40, %v893_v25 }
 0x16d   : > { %v980_v5 = vpop.permute.xlu0 %979 }
 0x16e   : > { %1427 = vrot.lane.b32.xlu1 %v1422_v63, %s1699_s5  ;;  %v916_v23 = vadd.f32 %v2252_v34, %v902_v31  ;;  %v915_v44 = vadd.f32 %v2254_v36, %v901_v32  ;;  %v991_v34 = vmul.f32 %v2076_v21, %v990_v29  ;;  %v1082_v21 = vstv %s1604_s29 }
 0x16f   : > { %1425 = vrot.lane.b32.xlu0 %v1421_v0, %s1699_s5  ;;  %s1622_s5 = sld [smem:[#allocation2 + $0x54]] }
 0x170   : > { %v1004_v7 = vpop.permute.xlu1 %1003  ;;  %v930_v24 = vadd.f32 %v926_v43, %v916_v23  ;;  %v929_v38 = vadd.f32 %v924_v45, %v915_v44 }
 0x171   : > { %v1002_v8 = vpop.permute.xlu0 %1001 }
 0x172   : > { %1441 = vrot.lane.b32.xlu1 %v1436_v6, %s1700_s7  ;;  %v944_v27 = vadd.f32 %v940_v49, %v930_v24  ;;  %v943_v46 = vadd.f32 %v938_v28, %v929_v38 }
 0x173   : > { %1439 = vrot.lane.b32.xlu0 %v1435_v18, %s1700_s7  ;;  %s1631_s7 = sld [smem:[#allocation2 + $0x5b]] }
 0x174   : > { %v1018_v9 = vpop.permute.xlu1 %1017  ;;  %v958_v62 = vadd.f32 %v954_v54, %v944_v27  ;;  %v957_v47 = vadd.f32 %v952_v35, %v943_v46 }
 0x175   : > { %v1016_v11 = vpop.permute.xlu0 %1015 }
 0x176   : > { %v972_v42 = vadd.f32 %v968_v22, %v958_v62  ;;  %v971_v53 = vadd.f32 %v966_v1, %v957_v47 }
 0x178   : > { %v1032_v60 = vpop.permute.xlu1 %1031  ;;  %v986_v55 = vadd.f32 %v982_v4, %v972_v42  ;;  %v985_v56 = vadd.f32 %v980_v5, %v971_v53 }
 0x179   : > { %v1030_v15 = vpop.permute.xlu0 %1029 }
 0x17a   : > { %v994_v45 = vadd.f32 %v992_v57, %v986_v55  ;;  %v993_v63 = vadd.f32 %v991_v34, %v985_v56 }
 0x17c   : > { %v1046_v26 = vpop.permute.xlu1 %1045  ;;  %v1008_v28 = vadd.f32 %v1004_v7, %v994_v45  ;;  %v1007_v54 = vadd.f32 %v1002_v8, %v993_v63  ;;  %v1084_v7 = vmul.f32 %v2110_v58, %v1082_v21  ;;  %v1083_v8 = vmul.f32 %v2114_v59, %v1082_v21 }
 0x17d   : > { %v1044_v30 = vpop.permute.xlu0 %1043  ;;  %v1174_v58 = vstv %s1613_s3 }
 0x17e   : > { %v1022_v6 = vadd.f32 %v1018_v9, %v1008_v28  ;;  %v1021_v22 = vadd.f32 %v1016_v11, %v1007_v54  ;;  %v1176_v42 = vmul.f32 %v2162_v2, %v1174_v58 }
 0x180   : > { %v1060_v37 = vpop.permute.xlu1 %1059  ;;  %v1036_v1 = vadd.f32 %v1032_v60, %v1022_v6  ;;  %v1035_v4 = vadd.f32 %v1030_v15, %v1021_v22 }
 0x181   : > { %v1058_v14 = vpop.permute.xlu0 %1057 }
 0x182   : > { %v1050_v10 = vadd.f32 %v1046_v26, %v1036_v1  ;;  %v1049_v41 = vadd.f32 %v1044_v30, %v1035_v4 }
 0x184   : > { %v1074_v17 = vpop.permute.xlu1 %1073  ;;  %v1064_v12 = vadd.f32 %v1060_v37, %v1050_v10  ;;  %v1063_v13 = vadd.f32 %v1058_v14, %v1049_v41 }
 0x185   : > { %v1072_v39 = vpop.permute.xlu0 %1071 }
 0x186   : > { %v1078_v40 = vadd.f32 %v1074_v17, %v1064_v12  ;;  %v1077_v25 = vadd.f32 %v1072_v39, %v1063_v13 }
 0x188   : > { %v1096_v48 = vpop.permute.xlu1 %1095  ;;  %v1086_v11 = vadd.f32 %v1084_v7, %v1078_v40  ;;  %v1085_v60 = vadd.f32 %v1083_v8, %v1077_v25 }
 0x189   : > { %v1094_v50 = vpop.permute.xlu0 %1093 }
 0x18a   : > { %v1100_v26 = vadd.f32 %v1096_v48, %v1086_v11  ;;  %v1099_v30 = vadd.f32 %v1094_v50, %v1085_v60  ;;  %v1175_v48 = vmul.f32 %v2166_v61, %v1174_v58  ;;  %v1266_v61 = vstv %s1622_s5 }
 0x18b   : > { %v1268_v41 = vmul.f32 %v2203_v51, %v1266_v61  ;;  %v1267_v21 = vmul.f32 %v2207_v52, %v1266_v61  ;;  %v1358_v51 = vstv %s1631_s7 }
 0x18c   : > { %v1110_v36 = vpop.permute.xlu1 %1109 }
 0x18d   : > { %v1108_v43 = vpop.permute.xlu0 %1107  ;;  %v1114_v23 = vadd.f32 %v1110_v36, %v1100_v26 }
 0x18e   : > { %v1113_v37 = vadd.f32 %v1108_v43, %v1099_v30 }
 0x190   : > { %v1124_v0 = vpop.permute.xlu1 %1123 }
 0x191   : > { %v1122_v49 = vpop.permute.xlu0 %1121  ;;  %v1128_v24 = vadd.f32 %v1124_v0, %v1114_v23 }
 0x192   : > { %v1127_v38 = vadd.f32 %v1122_v49, %v1113_v37 }
 0x194   : > { %v1138_v35 = vpop.permute.xlu1 %1137 }
 0x195   : > { %v1136_v3 = vpop.permute.xlu0 %1135  ;;  %v1142_v17 = vadd.f32 %v1138_v35, %v1128_v24 }
 0x196   : > { %v1141_v39 = vadd.f32 %v1136_v3, %v1127_v38  ;;  %v1360_v38 = vmul.f32 %v2247_v20, %v1358_v51 }
 0x198   : > { %v1152_v5 = vpop.permute.xlu1 %1151 }
 0x199   : > { %v1150_v18 = vpop.permute.xlu0 %1149  ;;  %v1156_v46 = vadd.f32 %v1152_v5, %v1142_v17  ;;  %v1359_v17 = vmul.f32 %v2250_v33, %v1358_v51 }
 0x19a   : > { %v1155_v62 = vadd.f32 %v1150_v18, %v1141_v39 }
 0x19c   : > { %v1166_v16 = vpop.permute.xlu1 %1165 }
 0x19d   : > { %v1164_v19 = vpop.permute.xlu0 %1163  ;;  %v1170_v47 = vadd.f32 %v1166_v16, %v1156_v46 }
 0x19e   : > { %v1169_v29 = vadd.f32 %v1164_v19, %v1155_v62 }
 0x19f   : > { %v1178_v55 = vadd.f32 %v1176_v42, %v1170_v47 }
 0x1a0   : > { %v1188_v31 = vpop.permute.xlu1 %1187  ;;  %v1177_v56 = vadd.f32 %v1175_v48, %v1169_v29 }
 0x1a1   : > { %v1186_v9 = vpop.permute.xlu0 %1185  ;;  %v1192_v36 = vadd.f32 %v1188_v31, %v1178_v55 }
 0x1a2   : > { %v1191_v43 = vadd.f32 %v1186_v9, %v1177_v56 }
 0x1a4   : > { %v1202_v15 = vpop.permute.xlu1 %1201 }
 0x1a5   : > { %v1200_v32 = vpop.permute.xlu0 %1199  ;;  %v1206_v0 = vadd.f32 %v1202_v15, %v1192_v36 }
 0x1a6   : > { %v1205_v49 = vadd.f32 %v1200_v32, %v1191_v43 }
 0x1a8   : > { %v1216_v14 = vpop.permute.xlu1 %1215 }
 0x1a9   : > { %v1214_v44 = vpop.permute.xlu0 %1213  ;;  %v1220_v28 = vadd.f32 %v1216_v14, %v1206_v0 }
 0x1aa   : > { %v1219_v54 = vadd.f32 %v1214_v44, %v1205_v49 }
 0x1ac   : > { %v1230_v27 = vpop.permute.xlu1 %1229 }
 0x1ad   : > { %v1228_v59 = vpop.permute.xlu0 %1227  ;;  %v1234_v2 = vadd.f32 %v1230_v27, %v1220_v28 }
 0x1ae   : > { %v1233_v6 = vadd.f32 %v1228_v59, %v1219_v54 }
 0x1b0   : > { %v1244_v50 = vpop.permute.xlu1 %1243 }
 0x1b1   : > { %v1242_v53 = vpop.permute.xlu0 %1241  ;;  %v1248_v22 = vadd.f32 %v1244_v50, %v1234_v2 }
 0x1b2   : > { %v1247_v1 = vadd.f32 %v1242_v53, %v1233_v6 }
 0x1b4   : > { %v1258_v57 = vpop.permute.xlu1 %1257 }
 0x1b5   : > { %v1256_v34 = vpop.permute.xlu0 %1255  ;;  %v1262_v18 = vadd.f32 %v1258_v57, %v1248_v22 }
 0x1b6   : > { %v1261_v10 = vadd.f32 %v1256_v34, %v1247_v1 }
 0x1b7   : > { %v1270_v16 = vadd.f32 %v1268_v41, %v1262_v18 }
 0x1b8   : > { %v1280_v45 = vpop.permute.xlu1 %1279  ;;  %v1269_v19 = vadd.f32 %v1267_v21, %v1261_v10 }
 0x1b9   : > { %v1278_v63 = vpop.permute.xlu0 %1277  ;;  %v1284_v7 = vadd.f32 %v1280_v45, %v1270_v16 }
 0x1ba   : > { %v1283_v8 = vadd.f32 %v1278_v63, %v1269_v19 }
 0x1bc   : > { %v1294_v35 = vpop.permute.xlu1 %1293 }
 0x1bd   : > { %v1292_v3 = vpop.permute.xlu0 %1291  ;;  %v1298_v31 = vadd.f32 %v1294_v35, %v1284_v7 }
 0x1be   : > { %v1297_v9 = vadd.f32 %v1292_v3, %v1283_v8 }
 0x1c0   : > { %v1308_v4 = vpop.permute.xlu1 %1307 }
 0x1c1   : > { %v1306_v5 = vpop.permute.xlu0 %1305  ;;  %v1312_v15 = vadd.f32 %v1308_v4, %v1298_v31 }
 0x1c2   : > { %v1311_v32 = vadd.f32 %v1306_v5, %v1297_v9 }
 0x1c4   : > { %v1322_v12 = vpop.permute.xlu1 %1321 }
 0x1c5   : > { %v1320_v13 = vpop.permute.xlu0 %1319  ;;  %v1326_v26 = vadd.f32 %v1322_v12, %v1312_v15 }
 0x1c6   : > { %v1325_v30 = vadd.f32 %v1320_v13, %v1311_v32 }
 0x1c8   : > { %v1336_v40 = vpop.permute.xlu1 %1335 }
 0x1c9   : > { %v1334_v25 = vpop.permute.xlu0 %1333  ;;  %v1340_v37 = vadd.f32 %v1336_v40, %v1326_v26 }
 0x1ca   : > { %v1339_v14 = vadd.f32 %v1334_v25, %v1325_v30 }
 0x1cc   : > { %v1350_v11 = vpop.permute.xlu1 %1349 }
 0x1cd   : > { %v1348_v60 = vpop.permute.xlu0 %1347  ;;  %v1354_v44 = vadd.f32 %v1350_v11, %v1340_v37 }
 0x1ce   : > { %v1353_v24 = vadd.f32 %v1348_v60, %v1339_v14 }
 0x1cf   : > { %v1362_v27 = vadd.f32 %v1360_v38, %v1354_v44 }
 0x1d0   : > { %v1372_v23 = vpop.permute.xlu1 %1371  ;;  %v1361_v59 = vadd.f32 %v1359_v17, %v1353_v24 }
 0x1d1   : > { %v1370_v52 = vpop.permute.xlu0 %1369  ;;  %v1376_v47 = vadd.f32 %v1372_v23, %v1362_v27 }
 0x1d2   : > { %v1375_v29 = vadd.f32 %v1370_v52, %v1361_v59 }
 0x1d4   : > { %v1386_v39 = vpop.permute.xlu1 %1385 }
 0x1d5   : > { %v1384_v58 = vpop.permute.xlu0 %1383  ;;  %v1390_v50 = vadd.f32 %v1386_v39, %v1376_v47 }
 0x1d6   : > { %v1389_v53 = vadd.f32 %v1384_v58, %v1375_v29 }
 0x1d8   : > { %v1400_v46 = vpop.permute.xlu1 %1399 }
 0x1d9   : > { %v1398_v62 = vpop.permute.xlu0 %1397  ;;  %v1404_v55 = vadd.f32 %v1400_v46, %v1390_v50 }
 0x1da   : > { %v1403_v56 = vadd.f32 %v1398_v62, %v1389_v53 }
 0x1dc   : > { %v1414_v42 = vpop.permute.xlu1 %1413 }
 0x1dd   : > { %v1412_v48 = vpop.permute.xlu0 %1411  ;;  %v1418_v20 = vadd.f32 %v1414_v42, %v1404_v55 }
 0x1de   : > { %v1417_v36 = vadd.f32 %v1412_v48, %v1403_v56 }
 0x1e0   : > { %v1428_v57 = vpop.permute.xlu1 %1427 }
 0x1e1   : > { %v1426_v34 = vpop.permute.xlu0 %1425  ;;  %v1432_v33 = vadd.f32 %v1428_v57, %v1418_v20 }
 0x1e2   : > { %v1431_v43 = vadd.f32 %v1426_v34, %v1417_v36 }
 0x1e4   : > { %v1442_v45 = vpop.permute.xlu1 %1441 }
 0x1e5   : > { %v1440_v63 = vpop.permute.xlu0 %1439  ;;  %v1446_v0 = vadd.f32 %v1442_v45, %v1432_v33 }
 0x1e6   : > { %v1445_v49 = vadd.f32 %v1440_v63, %v1431_v43 }
 0x1e7   : > { %1449 = vst.msk [vmem:[%s157_s19 + $0x8] sm:$0xff] %vm1447_vm0, %v1446_v0 }
 0x1e8   : > { %1448 = vst.msk [vmem:[%s157_s19] sm:$0xff] %vm1447_vm0, %v1445_v49 }
 0x1e9 PF: > { %s13_s9 = sadd.s32 1, %s1692_s9  }
 0x1ea   : > { %p10_p1 = scmp.ge.s32.totalorder %s13_s9, 4  }
 0x1ec   :  { %12 = sbr.rel (!%p10_p1) target bundleno = 1 (0x1), region = 64 }
 0x1f3   :  { %1471 = vsyncpa [#allocation3], 1 }
 0x1f4   :  { %1473 = vsyncpa [#allocation3 + $0x1], 1 }

// kernel: mam_ffc_block_forward.42
= control target key start
LH: loop header
LB: loop body
LE: loop exit
PB: predicated region body
PF: predicated region fallthrough
CT: control target
= control target key end

     0   :  { %s369_s9 = smov 0   ;;  %s371_s10 = smov 0   ;;  %s402_s0 = inlined_call_operand.vmem [shape: f32[2,8,128], index: 0, kind: input, shape index: {}]   ;;  %s403_s1 = inlined_call_operand.vmem [shape: f32[2,8,1], index: 1, kind: output, shape index: {0}]   ;;  %s404_s2 = inlined_call_operand.vmem [shape: f32[2,8,1], index: 2, kind: output, shape index: {1}]  }
   0x1   :  { %s373_s11 = smov 0  }
   0x2 LB: > { %s25_s12 = sadd.s32 1, %s348_s10  ;;  %p300_p0 = scmp.ge.s32.totalorder %s352_s11, 1  ;;  %s352_s11 = sphi %s373_s11, %s13_s11   ;;  %s348_s10 = sphi %s371_s10, %s406_s10   ;;  %s344_s9 = sphi %s369_s9, %s405_s9  }
   0x3   : > { %p27_p1 = scmp.ge.s32.totalorder %s25_s12, 2  ;;  %p131_p2 = scmp.lt.s32.totalorder %s352_s11, 3 }
   0x5   : > { %s408_s12 = smov (%p27_p1, %s25_s12), 0  ;;  %p132_p3 = pnand %p300_p0, %p131_p2 }
   0x6   : > { %p158_p4 = scmp.lt.s32.totalorder (!%p132_p3), %s344_s9, 1  ;;  %v174_v0 = vlaneseq (!%p132_p3)  ;;  %vm196_vm1 = vcmask (!%p132_p3), 7168  }
   0x7   : > { %135 = sbr.rel (%p132_p3) target bundleno = 166 (0xa6), region = 24 }
   0x8   : > { %v175_v1 = vand.u32 (!%p132_p3), 127, %v174_v0 }
   0xa   : > { %vm179_vm0 = vcmp.lt.s32.totalorder (!%p132_p3), %v175_v1, 64 }
   0xe   : > { %s410_s9 = smov (!%p158_p4, %s344_s9), 1 }
   0xf   : > { %s301_s13 = sshll.u32 %s410_s9, 3 }
  0x10   : > { %s164_s16 = scalar_lea.vmem %s402_s0, %s301_s13  ;;  %s168_s19 = scalar_lea.vmem %s403_s1, %s301_s13 }
  0x11   : > { %v173_v2 = vld [vmem:[%s164_s16] sm:$0xff]  ;;  %s172_s22 = scalar_lea.vmem %s404_s2, %s301_s13 }
  0x12   : > { %v180_v3 = vsel %vm179_vm0, %v173_v2, 0.0  ;;  %v183_v4 = vsel %vm179_vm0, %v173_v2, -inf }
  0x13   : > { %181 = vadd.xlane.f32.xlu0 %v180_v3 }
  0x17   : > { %184 = vmax.xlane.f32.xlu0 %v183_v4 }
  0xa0   : > { %v182_v5 = vpop.xlane.xlu0 %181 }
  0xa1   : > { %199 = vst.msk [vmem:[%s168_s19] sm:$0xff] %vm196_vm1, %v182_v5 }
  0xa4   : > { %v185_v6 = vpop.xlane.xlu0 %184 }
  0xa5   : > { %200 = vst.msk [vmem:[%s172_s22] sm:$0xff] %vm196_vm1, %v185_v6 }
  0xa6 PF: > { %s13_s11 = sadd.s32 1, %s352_s11   ;;  %s405_s9 = smov %s348_s10 }
  0xa7   : > { %p10_p5 = scmp.ge.s32.totalorder %s13_s11, 4   ;;  %s406_s10 = smov %s408_s12 }
  0xa9   :  { %12 = sbr.rel (!%p10_p5) target bundleno = 2 (0x2), region = 66 }

// kernel: mam_ffc_block_forward.43
= control target key start
LH: loop header
LB: loop body
LE: loop exit
PB: predicated region body
PF: predicated region fallthrough
CT: control target
= control target key end

     0   :  { %s447_s12 = smov 0   ;;  %s449_s13 = smov 0   ;;  %s486_s0 = inlined_call_operand.vmem [shape: f32[2,8,128], index: 0, kind: input, shape index: {}]   ;;  %s487_s1 = inlined_call_operand.vmem [shape: f32[2,8,1], index: 1, kind: input, shape index: {}]   ;;  %s488_s2 = inlined_call_operand.vmem [shape: f32[2,1,128], index: 2, kind: output, shape index: {0}]   ;;  %s489_s3 = inlined_call_operand.vmem [shape: f32[2,1,128], index: 3, kind: output, shape index: {1}]  }
   0x1   :  { %s451_s14 = smov 0  }
   0x2 LB: > { %s26_s15 = sadd.s32 1, %s420_s13  ;;  %p371_p0 = scmp.ge.s32.totalorder %s424_s14, 1  ;;  %s424_s14 = sphi %s451_s14, %s14_s14   ;;  %s420_s13 = sphi %s449_s13, %s491_s13   ;;  %s416_s12 = sphi %s447_s12, %s490_s12  }
   0x3   : > { %p28_p1 = scmp.ge.s32.totalorder %s26_s15, 2  ;;  %p169_p2 = scmp.lt.s32.totalorder %s424_s14, 3 }
   0x5   : > { %s493_s15 = smov (%p28_p1, %s26_s15), 0  ;;  %p170_p3 = pnand %p371_p0, %p169_p2 }
   0x6   : > { %p206_p4 = scmp.lt.s32.totalorder (!%p170_p3), %s416_s12, 1  ;;  %v426_v0 = vmov (!%p170_p3), 0  }
   0x7   : > { %173 = sbr.rel (%p170_p3) target bundleno = 163 (0xa3), region = 28  ;;  %401 = vset.pattern.permute.xlu0 (!%p170_p3), %v426_v0 }
   0xe   : > { %s495_s12 = smov (!%p206_p4, %s416_s12), 1 }
   0xf   : > { %s372_s16 = sshll.u32 %s495_s12, 3  ;;  %s228_s25 = scalar_lea.vmem %s489_s3, %s495_s12 }
  0x10   : > { %s216_s19 = scalar_lea.vmem %s487_s1, %s372_s16  ;;  %s212_s22 = scalar_lea.vmem %s486_s0, %s372_s16 }
  0x11   : > { %v230_v1 = vld [vmem:[%s216_s19] sm:$0xff]  ;;  %s222_s28 = scalar_lea.vmem %s488_s2, %s495_s12 }
  0x12   : > { %233 = vperm.xlu0 %401, %v230_v1   ;;  %v229_v2 = vld [vmem:[%s212_s22] sm:$0xff] }
  0x91   : > { %v234_v3 = vpop.permute.xlu0 %233 }
  0x92   : > { %v236_v4 = vmul.f32 %v234_v3, %v229_v2 }
  0x94   : > { %v237_v5 = vrot.slane %v236_v4, 4 }
  0x96   : > { %v238_v6 = vadd.f32 %v237_v5, %v236_v4  ;;  %v246_v7 = vmax.f32 %v236_v4, %v237_v5 }
  0x98   : > { %v239_v8 = vrot.slane %v238_v6, 2  ;;  %v247_v9 = vrot.slane %v246_v7, 2 }
  0x9a   : > { %v240_v10 = vadd.f32 %v239_v8, %v238_v6  ;;  %v248_v11 = vmax.f32 %v246_v7, %v247_v9 }
  0x9c   : > { %v241_v12 = vrot.slane %v240_v10, 1  ;;  %v249_v13 = vrot.slane %v248_v11, 1 }
  0x9e   : > { %v242_v14 = vadd.f32 %v241_v12, %v240_v10  ;;  %v250_v15 = vmax.f32 %v248_v11, %v249_v13 }
  0xa0   : > { %v243_v16 = vmul.f32 0.125, %v242_v14  ;;  %251 = vst [vmem:[%s228_s25] sm:$0x1] %v250_v15 }
  0xa2   : > { %244 = vst [vmem:[%s222_s28] sm:$0x1] %v243_v16 }
  0xa3 PF: > { %s14_s14 = sadd.s32 1, %s424_s14   ;;  %s490_s12 = smov %s420_s13 }
  0xa4   : > { %p11_p5 = scmp.ge.s32.totalorder %s14_s14, 4   ;;  %s491_s13 = smov %s493_s15 }
  0xa6   :  { %13 = sbr.rel (!%p11_p5) target bundleno = 2 (0x2), region = 73 }

// kernel: mam_ffc_block_forward.45
= control target key start
LH: loop header
LB: loop body
LE: loop exit
PB: predicated region body
PF: predicated region fallthrough
CT: control target
= control target key end

     0   :  { %s447_s12 = smov 0   ;;  %s449_s13 = smov 0   ;;  %s486_s0 = inlined_call_operand.vmem [shape: f32[2,8,128], index: 0, kind: input, shape index: {}]   ;;  %s487_s1 = inlined_call_operand.vmem [shape: f32[2,8,1], index: 1, kind: input, shape index: {}]   ;;  %s488_s2 = inlined_call_operand.vmem [shape: f32[2,1,128], index: 2, kind: input, shape index: {}]   ;;  %s489_s3 = inlined_call_operand.vmem [shape: bf16[2,8,128], index: 3, kind: output, shape index: {}]  }
   0x1   :  { %s451_s14 = smov 0  }
   0x2 LB: > { %s25_s15 = sadd.s32 1, %s420_s13  ;;  %p365_p0 = scmp.ge.s32.totalorder %s424_s14, 1  ;;  %s424_s14 = sphi %s451_s14, %s13_s14   ;;  %s420_s13 = sphi %s449_s13, %s491_s13   ;;  %s416_s12 = sphi %s447_s12, %s490_s12  }
   0x3   : > { %p27_p1 = scmp.ge.s32.totalorder %s25_s15, 2  ;;  %p177_p2 = scmp.lt.s32.totalorder %s424_s14, 3 }
   0x5   : > { %s493_s15 = smov (%p27_p1, %s25_s15), 0  ;;  %p178_p3 = pnand %p365_p0, %p177_p2 }
   0x6   : > { %p215_p4 = scmp.lt.s32.totalorder (!%p178_p3), %s416_s12, 1  ;;  %v426_v0 = vmov (!%p178_p3), 0   ;;  %v255_v6 = vlaneseq (!%p178_p3) }
   0x7   : > { %181 = sbr.rel (%p178_p3) target bundleno = 153 (0x99), region = 32  ;;  %397 = vset.pattern.permute.xlu0 (!%p178_p3), %v426_v0 }
   0x8   : > { %v256_v7 = vshrl.u32 (!%p178_p3), %v255_v6, 7 }
   0xa   : > { %v257_v8 = vsub.s32 (!%p178_p3), 0, %v256_v7 }
   0xe   : > { %s495_s12 = smov (!%p215_p4, %s416_s12), 1 }
   0xf   : > { %s366_s16 = sshll.u32 %s495_s12, 3  ;;  %s231_s22 = scalar_lea.vmem %s488_s2, %s495_s12 }
  0x10   : > { %s225_s19 = scalar_lea.vmem %s487_s1, %s366_s16  ;;  %v247_v2 = vld [vmem:[%s231_s22] sm:$0x1]  ;;  %s221_s25 = scalar_lea.vmem %s486_s0, %s366_s16 }
  0x11   : > { %v240_v1 = vld [vmem:[%s225_s19] sm:$0xff]  ;;  %v369_v3 = vmul.f32 -1.442695, %v247_v2  ;;  %s368_s26 = sshll.u32 %s495_s12, 2 }
  0x12   : > { %243 = vperm.xlu0 %397, %v240_v1   ;;  %v239_v10 = vld [vmem:[%s221_s25] sm:$0xff]  ;;  %s238_s29 = scalar_lea.vmem %s489_s3, %s368_s26 }
  0x13   : > { %398 = vpow2.f32 %v369_v3 }
  0x1d   : > { %v399_v4 = vpop.eup %398 }
  0x1e   : > { %v251_v5 = vadd.f32 1.0, %v399_v4 }
  0x20   : > { %400 = vrcp.f32 %v251_v5 }
  0x2a   : > { %v401_v9 = vpop.eup %400 }
  0x2b   : > { %v258_v11 = vrot.slane %v401_v9, %v257_v8 }
  0x91   : > { %v244_v12 = vpop.permute.xlu0 %243 }
  0x92   : > { %v246_v13 = vmul.f32 %v244_v12, %v239_v10 }
  0x94   : > { %v260_v14 = vmul.f32 %v258_v11, %v246_v13 }
  0x96   : > { %v261_v15 = vpack.c.bf16 %v260_v14, %v260_v14 }
  0x98   : > { %262 = vst [vmem:[%s238_s29] sm:$0xf] %v261_v15 }
  0x99 PF: > { %s13_s14 = sadd.s32 1, %s424_s14   ;;  %s490_s12 = smov %s420_s13 }
  0x9a   : > { %p10_p5 = scmp.ge.s32.totalorder %s13_s14, 4   ;;  %s491_s13 = smov %s493_s15 }
  0x9c   :  { %12 = sbr.rel (!%p10_p5) target bundleno = 2 (0x2), region = 68 }

// kernel: mam_ffc_block_forward.46
= control target key start
LH: loop header
LB: loop body
LE: loop exit
PB: predicated region body
PF: predicated region fallthrough
CT: control target
= control target key end

     0   :  { %s452_s9 = smov 0   ;;  %s454_s10 = smov 0   ;;  %s488_s0 = inlined_call_operand.vmem [shape: bf16[8,8], index: 0, kind: input, shape index: {}]   ;;  %s489_s1 = inlined_call_operand.vmem [shape: bf16[2,8,128], index: 1, kind: input, shape index: {}]   ;;  %s490_s2 = inlined_call_operand.vmem [shape: f32[2,8,128], index: 2, kind: output, shape index: {}]  }
   0x1   :  { %s456_s11 = smov 0  }
   0x2 LB: > { %s31_s12 = sadd.s32 1, %s429_s10  ;;  %p371_p0 = scmp.ge.s32.totalorder %s433_s11, 1  ;;  %s433_s11 = sphi %s456_s11, %s12_s11   ;;  %s429_s10 = sphi %s454_s10, %s492_s10   ;;  %s425_s9 = sphi %s452_s9, %s491_s9  }
   0x3   : > { %p33_p1 = scmp.ge.s32.totalorder %s31_s12, 2  ;;  %p151_p2 = scmp.lt.s32.totalorder %s433_s11, 3 }
   0x5   : > { %s494_s12 = smov (%p33_p1, %s31_s12), 0  ;;  %p152_p3 = pnand %p371_p0, %p151_p2 }
   0x6   : > { %p188_p4 = scmp.lt.s32.totalorder (!%p152_p3), %s425_s9, 1  ;;  %v435_v0 = vmov (!%p152_p3), 0.0   ;;  %vm436_vm0 = vmmov (!%p152_p3), 0   ;;  %vm218_vm1 = vcmask (!%p152_p3), 1043456   ;;  %v212_v3 = vld [vmem:[%s488_s0] sm:$0xf] (!%p152_p3) }
   0x7   : > { %155 = sbr.rel (%p152_p3) target bundleno = 237 (0xed), region = 28  ;;  %379 = vmatprep.subr.bf16.mxu0 (!%p152_p3), %v435_v0  ;;  %381 = vmatprep.mubr.msk.bf16.mxu0 (!%p152_p3), %vm436_vm0, %v435_v0  ;;  %vm214_vm2 = vcmask (!%p152_p3), 64512  }
   0xe   : > { %s496_s9 = smov (!%p188_p4, %s425_s9), 1 }
   0xf   : > { %s372_s13 = sshll.u32 %s496_s9, 2  ;;  %s373_s19 = sshll.u32 %s496_s9, 3 }
  0x10   : > { %s197_s16 = scalar_lea.vmem %s489_s1, %s372_s13  ;;  %s204_s22 = scalar_lea.vmem %s490_s2, %s373_s19 }
  0x11   : > { %v213_v1 = vld [vmem:[%s197_s16] sm:$0xf] }
  0x12   : > { %v220_v2 = vsel %vm218_vm1, %v213_v1, 0 }
  0x13   : > { %380 = vmatpush3.bf16.msra.mxu0 %v220_v2 }
  0x16   : > { %382 = vmatmul.mubr.msk.bf16.vlgmr.msra.gmra.mrb[0].mxu0 %vm214_vm2, %v212_v3 }
  0xe9   : > { %v256_v4 = vpop.f32.mrb[0].mxu0 }
  0xea   : > { %v268_v5 = vmax.f32 %v256_v4, 0.0  ;;  %v383_v6 = vpop.f32.mrb[1].mxu0 }
  0xeb   : > { %v259_v7 = vpop.f32.mrb[2].mxu0 }
  0xec   : > { %269 = vst [vmem:[%s204_s22] sm:$0xff] %v268_v5  ;;  %v384_v8 = vpop.f32.mrb[3].mxu0 }
  0xed PF: > { %s12_s11 = sadd.s32 1, %s433_s11   ;;  %s491_s9 = smov %s429_s10 }
  0xee   : > { %p9_p5 = scmp.ge.s32.totalorder %s12_s11, 4   ;;  %s492_s10 = smov %s494_s12 }
  0xf0   :  { %11 = sbr.rel (!%p9_p5) target bundleno = 2 (0x2), region = 69 }

// kernel: mam_ffc_block_forward.44
= control target key start
LH: loop header
LB: loop body
LE: loop exit
PB: predicated region body
PF: predicated region fallthrough
CT: control target
= control target key end

     0   :  { %7 = vsyncpa [#allocation3], 0  ;;  %s1157_s9 = smov 0   ;;  %s1490_s0 = inlined_call_operand.vmem [shape: f32[98], index: 0, kind: input, shape index: {}]   ;;  %s1491_s1 = inlined_call_operand.vmem [shape: f32[2,2,14,14], index: 1, kind: input, shape index: {}]   ;;  %s1492_s2 = inlined_call_operand.vmem [shape: f32[2,1,8,8], index: 2, kind: output, shape index: {}]  }
   0x1 LB: > { %s966_s10 = sadd.s32 4294967295, %s1133_s9   ;;  %p968_p0 = scmp.ge.s32.totalorder %s1133_s9, 1  ;;  %s1133_s9 = sphi %s1157_s9, %s13_s9  }
   0x2   : > { %p91_p1 = scmp.lt.s32.totalorder %s1133_s9, 3  ;;  %s104_s13 = sshll.u32 %s1490_s0, 4  ;;  %s105_s13 = int_to_ptr.vmem [resolvable:$true] %s104_s13 }
   0x3   : > { %p1091_p3 = scmp.eq.s32.totalorder %s966_s10, 0  ;;  %s1108_s15 = scalar_lea.vmem %s105_s13, 16 }
   0x4   : > { %p1168_p2 = pnand %p968_p0, %p91_p1  ;;  %p1109_p6 = scmp.ne.s32.totalorder %s105_s13, %s1108_s15 }
   0x5   : > { %p1116_p10 = scmp.lt.s32.totalorder %s105_s13, %s105_s13  ;;  %p1117_p11 = scmp.lt.s32.totalorder %s1108_s15, %s1108_s15 }
   0x6   : > { %p1087_p4 = pneg %p1168_p2 }
   0x7   : > { %p1118_p12 = por %p1117_p11, %p1116_p10 }
   0x8   : > { %p1088_p5 = pnand %p1091_p3, %p1087_p4 }
   0xa   : > { %p1110_p7 = pneg %p1088_p5 }
   0xc   : > { %p1111_p8 = pnand %p1110_p7, %p1109_p6 }
   0xe   : > { %p1112_p9 = pneg %p1111_p8 }
  0x10   : > { %p1119_p13 = pnand %p1118_p12, %p1112_p9 }
  0x12   : > { %1122 = shalt.err (!%p1119_p13)
}
  0x13   : > { %s1135_s16 = smov [#allocation2]   ;;  %125 = sbr.rel (%p1168_p2) target bundleno = 350 (0x15e), region = 28 }
  0x14   : > { %1090 = dma.vmem_to_smem (!%p1088_p5), %s105_s13, 16, %s1135_s16, [#allocation3]  }
  0x1a   : > { %1128 = dma.done.wait (%p1091_p3), [#allocation3], 16  }
  0x1b   : > { %1130 = vsyncadd (%p1091_p3), [#allocation3], 4294967280 }
  0x1c   : > { %131 = sfence }
  0x1d   : > { %p147_p0 = scmp.lt.s32.totalorder %s966_s10, 1  ;;  %s976_s17 = sld [smem:[#allocation2 + $0x1]]  ;;  %vm899_vm0 = vcmask 64512  }
  0x1e   : > { %s978_s18 = sld [smem:[#allocation2 + $0x3]]  ;;  %s977_s19 = sld [smem:[#allocation2 + $0x2]] }
  0x1f   : > { %s1495_s10 = smov (!%p147_p0, %s966_s10), 1  ;;  %s979_s24 = sld [smem:[#allocation2 + $0x4]] }
  0x20   : > { %s1082_s20 = sshll.u32 %s1495_s10, 5  ;;  %s980_s25 = sld [smem:[#allocation2 + $0x5]] }
  0x21   : > { %s1185_s23 = scalar_lea.vmem %s1491_s1, %s1082_s20  ;;  %s981_s26 = sld [smem:[#allocation2 + $0x6]] }
  0x22   : > { %v1188_v0 = vld [vmem:[%s1185_s23] sm:$0xff]  ;;  %s983_s27 = sld [smem:[#allocation2 + $0x8]]  ;;  %s1136_s28 = smov 127  }
  0x23   : > { %v162_v1 = vstv %s976_s17  ;;  %s984_s29 = sld [smem:[#allocation2 + $0x9]]  ;;  %s1137_s30 = smov 125   ;;  %v1201_v13 = vld [vmem:[%s1185_s23 + $0x1] sm:$0xff] }
  0x24   : > { %v163_v2 = vmul.f32 %v162_v1, %v1188_v0  ;;  %v178_v3 = vstv %s978_s18  ;;  %v170_v5 = vstv %s977_s19  ;;  %s985_s3 = sld [smem:[#allocation2 + $0xa]]  ;;  %s986_s4 = sld [smem:[#allocation2 + $0xb]]  ;;  %v1216_v26 = vld [vmem:[%s1185_s23 + $0x2] sm:$0xff] }
  0x25   : > { %v179_v4 = vmul.f32 %v178_v3, %v1188_v0  ;;  %v171_v6 = vmul.f32 %v170_v5, %v1188_v0  ;;  %v186_v7 = vstv %s979_s24  ;;  %s1138_s5 = smov 126   ;;  %s1139_s6 = smov 124   ;;  %v1231_v39 = vld [vmem:[%s1185_s23 + $0x3] sm:$0xff] }
  0x26   : > { %165 = vrot.lane.b32.xlu0 %v163_v2, %s1136_s28  ;;  %v187_v8 = vmul.f32 %v186_v7, %v1188_v0  ;;  %v194_v9 = vstv %s980_s25  ;;  %s987_s7 = sld [smem:[#allocation2 + $0xc]]  ;;  %s988_s8 = sld [smem:[#allocation2 + $0xd]]  ;;  %v1246_v52 = vld [vmem:[%s1185_s23 + $0x4] sm:$0xff] }
  0x27   : > { %181 = vrot.lane.b32.xlu1 %v179_v4, %s1137_s30  ;;  %v195_v10 = vmul.f32 %v194_v9, %v1188_v0  ;;  %v202_v11 = vstv %s981_s26  ;;  %s1140_s11 = smov 123   ;;  %s1141_s12 = smov 122   ;;  %v1261_v2 = vld [vmem:[%s1185_s23 + $0x5] sm:$0xff] }
  0x28   : > { %v203_v12 = vmul.f32 %v202_v11, %v1188_v0  ;;  %v215_v14 = vstv %s983_s27  ;;  %s990_s13 = sld [smem:[#allocation2 + $0xf]]  ;;  %s991_s14 = sld [smem:[#allocation2 + $0x10]] }
  0x29   : > { %v223_v15 = vstv %s984_s29  ;;  %v216_v16 = vmul.f32 %v215_v14, %v1201_v13  ;;  %s992_s15 = sld [smem:[#allocation2 + $0x11]]  ;;  %s993_s16 = sld [smem:[#allocation2 + $0x12]] }
  0x2a   : > { %173 = vrot.lane.b32.xlu0 %v171_v6, %s1138_s5  ;;  %v224_v17 = vmul.f32 %v223_v15, %v1201_v13  ;;  %v231_v18 = vstv %s985_s3  ;;  %v239_v19 = vstv %s986_s4  ;;  %s994_s17 = sld [smem:[#allocation2 + $0x13]]  ;;  %s995_s18 = sld [smem:[#allocation2 + $0x14]] }
  0x2b   : > { %189 = vrot.lane.b32.xlu1 %v187_v8, %s1139_s6  ;;  %v232_v20 = vmul.f32 %v231_v18, %v1201_v13  ;;  %v240_v21 = vmul.f32 %v239_v19, %v1201_v13  ;;  %s997_s19 = sld [smem:[#allocation2 + $0x16]]  ;;  %s998_s20 = sld [smem:[#allocation2 + $0x17]] }
  0x2c   : > { %v247_v22 = vstv %s987_s7  ;;  %v255_v23 = vstv %s988_s8  ;;  %s999_s21 = sld [smem:[#allocation2 + $0x18]]  ;;  %s1000_s22 = sld [smem:[#allocation2 + $0x19]] }
  0x2d   : > { %v248_v24 = vmul.f32 %v247_v22, %v1201_v13  ;;  %v256_v25 = vmul.f32 %v255_v23, %v1201_v13  ;;  %s1001_s24 = sld [smem:[#allocation2 + $0x1a]]  ;;  %s1002_s25 = sld [smem:[#allocation2 + $0x1b]] }
  0x2e   : > { %197 = vrot.lane.b32.xlu0 %v195_v10, %s1140_s11  ;;  %v268_v27 = vstv %s990_s13  ;;  %v276_v28 = vstv %s991_s14  ;;  %s1004_s26 = sld [smem:[#allocation2 + $0x1d]]  ;;  %s1005_s27 = sld [smem:[#allocation2 + $0x1e]] }
  0x2f   : > { %205 = vrot.lane.b32.xlu1 %v203_v12, %s1141_s12  ;;  %v269_v29 = vmul.f32 %v268_v27, %v1216_v26  ;;  %v277_v30 = vmul.f32 %v276_v28, %v1216_v26  ;;  %v284_v31 = vstv %s992_s15  ;;  %v292_v32 = vstv %s993_s16  ;;  %s1006_s29 = sld [smem:[#allocation2 + $0x1f]]  ;;  %s1007_s3 = sld [smem:[#allocation2 + $0x20]] }
  0x30   : > { %v285_v33 = vmul.f32 %v284_v31, %v1216_v26  ;;  %v293_v34 = vmul.f32 %v292_v32, %v1216_v26  ;;  %v300_v35 = vstv %s994_s17  ;;  %v308_v36 = vstv %s995_s18  ;;  %s1008_s4 = sld [smem:[#allocation2 + $0x21]]  ;;  %s1009_s7 = sld [smem:[#allocation2 + $0x22]] }
  0x31   : > { %v301_v37 = vmul.f32 %v300_v35, %v1216_v26  ;;  %v309_v38 = vmul.f32 %v308_v36, %v1216_v26  ;;  %v321_v40 = vstv %s997_s19  ;;  %v329_v41 = vstv %s998_s20  ;;  %s1011_s8 = sld [smem:[#allocation2 + $0x24]]  ;;  %s1012_s13 = sld [smem:[#allocation2 + $0x25]] }
  0x32   : > { %218 = vrot.lane.b32.xlu0 %v216_v16, %s1136_s28  ;;  %v322_v42 = vmul.f32 %v321_v40, %v1231_v39  ;;  %v330_v43 = vmul.f32 %v329_v41, %v1231_v39  ;;  %v337_v44 = vstv %s999_s21  ;;  %v345_v45 = vstv %s1000_s22  ;;  %s1013_s14 = sld [smem:[#allocation2 + $0x26]]  ;;  %s1014_s15 = sld [smem:[#allocation2 + $0x27]]  ;;  %v1276_v16 = vld [vmem:[%s1185_s23 + $0x6] sm:$0xff] }
  0x33   : > { %226 = vrot.lane.b32.xlu1 %v224_v17, %s1138_s5  ;;  %v338_v46 = vmul.f32 %v337_v44, %v1231_v39  ;;  %v346_v47 = vmul.f32 %v345_v45, %v1231_v39  ;;  %v353_v48 = vstv %s1001_s24  ;;  %v361_v49 = vstv %s1002_s25  ;;  %s1015_s16 = sld [smem:[#allocation2 + $0x28]]  ;;  %s1016_s17 = sld [smem:[#allocation2 + $0x29]]  ;;  %v1306_v44 = vld [vmem:[%s1185_s23 + $0x11] sm:$0xff] }
  0x34   : > { %v354_v50 = vmul.f32 %v353_v48, %v1231_v39  ;;  %v362_v51 = vmul.f32 %v361_v49, %v1231_v39  ;;  %v374_v53 = vstv %s1004_s26  ;;  %v382_v54 = vstv %s1005_s27  ;;  %s1018_s18 = sld [smem:[#allocation2 + $0x2b]]  ;;  %s1019_s19 = sld [smem:[#allocation2 + $0x2c]] }
  0x35   : > { %v375_v55 = vmul.f32 %v374_v53, %v1246_v52  ;;  %v383_v56 = vmul.f32 %v382_v54, %v1246_v52  ;;  %v390_v57 = vstv %s1006_s29  ;;  %v398_v58 = vstv %s1007_s3  ;;  %s1020_s20 = sld [smem:[#allocation2 + $0x2d]]  ;;  %s1021_s21 = sld [smem:[#allocation2 + $0x2e]] }
  0x36   : > { %234 = vrot.lane.b32.xlu0 %v232_v20, %s1137_s30  ;;  %v391_v59 = vmul.f32 %v390_v57, %v1246_v52  ;;  %v399_v60 = vmul.f32 %v398_v58, %v1246_v52  ;;  %v406_v61 = vstv %s1008_s4  ;;  %v414_v62 = vstv %s1009_s7  ;;  %s1022_s22 = sld [smem:[#allocation2 + $0x2f]]  ;;  %s1023_s24 = sld [smem:[#allocation2 + $0x30]]  ;;  %v1321_v58 = vld [vmem:[%s1185_s23 + $0x12] sm:$0xff] }
  0x37   : > { %242 = vrot.lane.b32.xlu1 %v240_v21, %s1139_s6  ;;  %v407_v63 = vmul.f32 %v406_v61, %v1246_v52  ;;  %v415_v1 = vmul.f32 %v414_v62, %v1246_v52  ;;  %v427_v3 = vstv %s1011_s8  ;;  %v435_v4 = vstv %s1012_s13  ;;  %s1026_s25 = sld [smem:[#allocation2 + $0x32]]  ;;  %s1027_s26 = sld [smem:[#allocation2 + $0x33]] }
  0x38   : > { %v428_v5 = vmul.f32 %v427_v3, %v1261_v2  ;;  %v436_v6 = vmul.f32 %v435_v4, %v1261_v2  ;;  %v443_v7 = vstv %s1013_s14  ;;  %v451_v8 = vstv %s1014_s15  ;;  %s1028_s27 = sld [smem:[#allocation2 + $0x34]]  ;;  %s1029_s29 = sld [smem:[#allocation2 + $0x35]] }
  0x39   : > { %v444_v9 = vmul.f32 %v443_v7, %v1261_v2  ;;  %v452_v10 = vmul.f32 %v451_v8, %v1261_v2  ;;  %v459_v11 = vstv %s1015_s16  ;;  %v467_v12 = vstv %s1016_s17  ;;  %s1030_s3 = sld [smem:[#allocation2 + $0x36]]  ;;  %s1031_s4 = sld [smem:[#allocation2 + $0x37]] }
  0x3a   : > { %250 = vrot.lane.b32.xlu0 %v248_v24, %s1140_s11  ;;  %v460_v14 = vmul.f32 %v459_v11, %v1261_v2  ;;  %v468_v15 = vmul.f32 %v467_v12, %v1261_v2  ;;  %v480_v17 = vstv %s1018_s18  ;;  %v488_v18 = vstv %s1019_s19  ;;  %s1034_s7 = sld [smem:[#allocation2 + $0x39]]  ;;  %s1035_s8 = sld [smem:[#allocation2 + $0x3a]]  ;;  %v1341_v11 = vld [vmem:[%s1185_s23 + $0x13] sm:$0xff] }
  0x3b   : > { %258 = vrot.lane.b32.xlu1 %v256_v25, %s1141_s12  ;;  %v481_v19 = vmul.f32 %v480_v17, %v1276_v16  ;;  %v489_v20 = vmul.f32 %v488_v18, %v1276_v16  ;;  %v496_v21 = vstv %s1020_s20  ;;  %v504_v22 = vstv %s1021_s21  ;;  %s1036_s13 = sld [smem:[#allocation2 + $0x3b]]  ;;  %s1037_s14 = sld [smem:[#allocation2 + $0x3c]] }
  0x3c   : > { %v497_v23 = vmul.f32 %v496_v21, %v1276_v16  ;;  %v505_v24 = vmul.f32 %v504_v22, %v1276_v16  ;;  %v512_v25 = vstv %s1022_s22  ;;  %v520_v27 = vstv %s1023_s24  ;;  %s1038_s15 = sld [smem:[#allocation2 + $0x3d]]  ;;  %s1039_s16 = sld [smem:[#allocation2 + $0x3e]] }
  0x3d   : > { %v513_v28 = vmul.f32 %v512_v25, %v1276_v16  ;;  %v534_v31 = vstv %s1026_s25  ;;  %v542_v32 = vstv %s1027_s26  ;;  %s1042_s17 = sld [smem:[#allocation2 + $0x40]]  ;;  %s1043_s18 = sld [smem:[#allocation2 + $0x41]] }
  0x3e   : > { %271 = vrot.lane.b32.xlu0 %v269_v29, %s1136_s28  ;;  %v521_v29 = vmul.f32 %v520_v27, %v1276_v16  ;;  %v550_v35 = vstv %s1028_s27  ;;  %v558_v36 = vstv %s1029_s29  ;;  %s1044_s19 = sld [smem:[#allocation2 + $0x42]]  ;;  %s1045_s20 = sld [smem:[#allocation2 + $0x43]] }
  0x3f   : > { %279 = vrot.lane.b32.xlu1 %v277_v30, %s1138_s5  ;;  %v1291_v30 = vld [vmem:[%s1185_s23 + $0x10] sm:$0xff]  ;;  %v566_v40 = vstv %s1030_s3  ;;  %v574_v41 = vstv %s1031_s4  ;;  %s1046_s21 = sld [smem:[#allocation2 + $0x44]]  ;;  %s157_s22 = sld [smem:[#allocation2]] }
  0x40   : > { %v587_v45 = vstv %s1034_s7  ;;  %s1047_s24 = sld [smem:[#allocation2 + $0x45]]  ;;  %s1050_s25 = sld [smem:[#allocation2 + $0x47]] }
  0x41   : > { %v603_v49 = vstv %s1036_s13  ;;  %s1051_s26 = sld [smem:[#allocation2 + $0x48]]  ;;  %s1331_s27 = sld [smem:[#allocation2 + $0x49]] }
  0x42   : > { %287 = vrot.lane.b32.xlu0 %v285_v33, %s1137_s30  ;;  %v535_v33 = vmul.f32 %v1291_v30, %v534_v31  ;;  %v619_v54 = vstv %s1038_s15  ;;  %s1333_s29 = sld [smem:[#allocation2 + $0x4a]]  ;;  %s1343_s3 = sld [smem:[#allocation2 + $0x4b]] }
  0x43   : > { %295 = vrot.lane.b32.xlu1 %v293_v34, %s1139_s6  ;;  %v543_v34 = vmul.f32 %v1291_v30, %v542_v32  ;;  %s1345_s4 = sld [smem:[#allocation2 + $0x7]]  ;;  %s1347_s7 = sld [smem:[#allocation2 + $0x4c]] }
  0x44   : > { %s1357_s13 = sld [smem:[#allocation2 + $0x4f]]  ;;  %s1368_s15 = sld [smem:[#allocation2 + $0x51]] }
  0x46   : > { %303 = vrot.lane.b32.xlu0 %v301_v37, %s1140_s11  ;;  %v551_v37 = vmul.f32 %v1291_v30, %v550_v35  ;;  %v680_v7 = vstv %s1047_s24  ;;  %v693_v12 = vstv %s1050_s25  ;;  %s1415_s24 = sld [smem:[#allocation2 + $0x59]]  ;;  %s1418_s25 = sld [smem:[#allocation2 + $0x5a]] }
  0x47   : > { %311 = vrot.lane.b32.xlu1 %v309_v38, %s1141_s12  ;;  %v559_v38 = vmul.f32 %v1291_v30, %v558_v36 }
  0x48   : > { %v717_v22 = vstv %s1333_s29  ;;  %s1431_s29 = sld [smem:[#allocation2 + $0x5d]] }
  0x49   : > { %v211_v32 = vstv %s1345_s4  ;;  %s1441_s4 = sld [smem:[#allocation2 + $0x5f]] }
  0x4a   : > { %324 = vrot.lane.b32.xlu0 %v322_v42, %s1136_s28  ;;  %v567_v42 = vmul.f32 %v1291_v30, %v566_v40 }
  0x4b   : > { %332 = vrot.lane.b32.xlu1 %v330_v43, %s1138_s5  ;;  %v575_v43 = vmul.f32 %v1291_v30, %v574_v41  ;;  %v1376_v41 = vld [vmem:[%s1185_s23 + $0x14] sm:$0xff] }
  0x4e   : > { %340 = vrot.lane.b32.xlu0 %v338_v46, %s1137_s30  ;;  %v595_v46 = vstv %s1035_s8  ;;  %s1354_s8 = sld [smem:[#allocation2 + $0x4e]] }
  0x4f   : > { %348 = vrot.lane.b32.xlu1 %v346_v47, %s1139_s6  ;;  %v588_v47 = vmul.f32 %v1306_v44, %v587_v45  ;;  %v596_v48 = vmul.f32 %v1306_v44, %v595_v46  ;;  %v754_v45 = vstv %s1357_s13  ;;  %s1057_s13 = sld [smem:[#allocation2 + $0x4d]] }
  0x52   : > { %356 = vrot.lane.b32.xlu0 %v354_v50, %s1140_s11  ;;  %v611_v50 = vstv %s1037_s14  ;;  %s1364_s14 = sld [smem:[#allocation2 + $0x50]] }
  0x53   : > { %364 = vrot.lane.b32.xlu1 %v362_v51, %s1141_s12  ;;  %v604_v51 = vmul.f32 %v1306_v44, %v603_v49  ;;  %v612_v53 = vmul.f32 %v1306_v44, %v611_v50  ;;  %v755_v49 = vmul.f32 %v1376_v41, %v754_v45 }
  0x56   : > { %377 = vrot.lane.b32.xlu0 %v375_v55, %s1136_s28  ;;  %v627_v55 = vstv %s1039_s16  ;;  %s1379_s16 = sld [smem:[#allocation2 + $0x52]] }
  0x57   : > { %385 = vrot.lane.b32.xlu1 %v383_v56, %s1138_s5  ;;  %v620_v56 = vmul.f32 %v1306_v44, %v619_v54  ;;  %v628_v57 = vmul.f32 %v1306_v44, %v627_v55 }
  0x58   : > { %v762_v50 = vstv %s1364_s14  ;;  %s1065_s14 = sld [smem:[#allocation2 + $0x54]] }
  0x5a   : > { %393 = vrot.lane.b32.xlu0 %v391_v59, %s1137_s30  ;;  %v640_v59 = vstv %s1042_s17  ;;  %s1382_s17 = sld [smem:[#allocation2 + $0x53]] }
  0x5b   : > { %401 = vrot.lane.b32.xlu1 %v399_v60, %s1139_s6  ;;  %v648_v60 = vstv %s1043_s18  ;;  %v641_v61 = vmul.f32 %v1321_v58, %v640_v59  ;;  %s1384_s18 = sld [smem:[#allocation2 + $0xe]] }
  0x5c   : > { %v649_v62 = vmul.f32 %v1321_v58, %v648_v60  ;;  %v778_v60 = vstv %s1379_s16  ;;  %s975_s16 = sshll.u32 %s1495_s10, 3 }
  0x5e   : > { %409 = vrot.lane.b32.xlu0 %v407_v63, %s1140_s11  ;;  %v656_v63 = vstv %s1044_s19  ;;  %s1391_s19 = sld [smem:[#allocation2 + $0x55]] }
  0x5f   : > { %417 = vrot.lane.b32.xlu1 %v415_v1, %s1141_s12  ;;  %v664_v1 = vstv %s1045_s20  ;;  %v657_v3 = vmul.f32 %v1321_v58, %v656_v63  ;;  %s1394_s20 = sld [smem:[#allocation2 + $0x56]] }
  0x60   : > { %v665_v4 = vmul.f32 %v1321_v58, %v664_v1 }
  0x62   : > { %430 = vrot.lane.b32.xlu0 %v428_v5, %s1136_s28  ;;  %v672_v5 = vstv %s1046_s21  ;;  %s1401_s21 = sld [smem:[#allocation2 + $0x57]] }
  0x63   : > { %438 = vrot.lane.b32.xlu1 %v436_v6, %s1138_s5  ;;  %v158_v6 = vstv %s157_s22  ;;  %v673_v8 = vmul.f32 %v1321_v58, %v672_v5  ;;  %s1404_s22 = sld [smem:[#allocation2 + $0x58]] }
  0x66   : > { %446 = vrot.lane.b32.xlu0 %v444_v9, %s1137_s30  ;;  %v159_v9 = vmul.f32 %v158_v6, %v1188_v0  ;;  %v694_v0 = vmul.f32 %v1341_v11, %v693_v12 }
  0x67   : > { %454 = vrot.lane.b32.xlu1 %v452_v10, %s1139_s6  ;;  %v681_v10 = vmul.f32 %v1321_v58, %v680_v7  ;;  %v1412_v7 = vld [vmem:[%s1185_s23 + $0x15] sm:$0xff] }
  0x6a   : > { %462 = vrot.lane.b32.xlu0 %v460_v14, %s1140_s11 }
  0x6b   : > { %470 = vrot.lane.b32.xlu1 %v468_v15, %s1141_s12  ;;  %v701_v15 = vstv %s1051_s26  ;;  %s1426_s26 = sld [smem:[#allocation2 + $0x5c]] }
  0x6e   : > { %483 = vrot.lane.b32.xlu0 %v481_v19, %s1136_s28  ;;  %v702_v19 = vmul.f32 %v1341_v11, %v701_v15 }
  0x6f   : > { %491 = vrot.lane.b32.xlu1 %v489_v20, %s1138_s5  ;;  %v709_v20 = vstv %s1331_s27  ;;  %s1428_s27 = sld [smem:[#allocation2 + $0x15]] }
  0x70   : > { %v710_v25 = vmul.f32 %v1341_v11, %v709_v20 }
  0x72   : > { %499 = vrot.lane.b32.xlu0 %v497_v23, %s1137_s30 }
  0x73   : > { %507 = vrot.lane.b32.xlu1 %v505_v24, %s1139_s6 }
  0x76   : > { %515 = vrot.lane.b32.xlu0 %v513_v28, %s1140_s11  ;;  %v718_v28 = vmul.f32 %v1341_v11, %v717_v22 }
  0x77   : > { %523 = vrot.lane.b32.xlu1 %v521_v29, %s1141_s12  ;;  %v725_v29 = vstv %s1343_s3  ;;  %s1438_s3 = sld [smem:[#allocation2 + $0x5e]] }
  0x78   : > { %v726_v36 = vmul.f32 %v1341_v11, %v725_v29  ;;  %v839_v29 = vstv %s1418_s25 }
  0x7a   : > { %537 = vrot.lane.b32.xlu0 %v535_v33, %s1136_s28  ;;  %v733_v33 = vstv %s1347_s7  ;;  %s1451_s7 = sld [smem:[#allocation2 + $0x60]] }
  0x7b   : > { %545 = vrot.lane.b32.xlu1 %v543_v34, %s1138_s5  ;;  %v734_v40 = vmul.f32 %v1341_v11, %v733_v33 }
  0x7e   : > { %553 = vrot.lane.b32.xlu0 %v551_v37, %s1137_s30 }
  0x7f   : > { %561 = vrot.lane.b32.xlu1 %v559_v38, %s1139_s6  ;;  %v212_v38 = vmul.f32 %v211_v32, %v1201_v13 }
  0x82   : > { %569 = vrot.lane.b32.xlu0 %v567_v42, %s1140_s11  ;;  %v746_v42 = vstv %s1354_s8  ;;  %s1079_s8 = sld [smem:[#allocation2 + $0x61]] }
  0x83   : > { %577 = vrot.lane.b32.xlu1 %v575_v43, %s1141_s12  ;;  %v747_v13 = vmul.f32 %v1376_v41, %v746_v42  ;;  %v860_v42 = vstv %s1431_s29 }
  0x86   : > { %590 = vrot.lane.b32.xlu0 %v588_v47, %s1136_s28 }
  0x87   : > { %598 = vrot.lane.b32.xlu1 %v596_v48, %s1138_s5 }
  0x8a   : > { %606 = vrot.lane.b32.xlu0 %v604_v51, %s1137_s30 }
  0x8b   : > { %614 = vrot.lane.b32.xlu1 %v612_v53, %s1139_s6  ;;  %v770_v53 = vstv %s1368_s15  ;;  %s1073_s15 = sld [smem:[#allocation2 + $0x5b]] }
  0x8c   : > { %v771_v59 = vmul.f32 %v1376_v41, %v770_v53 }
  0x8e   : > { %622 = vrot.lane.b32.xlu0 %v620_v56, %s1140_s11  ;;  %v763_v56 = vmul.f32 %v1376_v41, %v762_v50 }
  0x8f   : > { %630 = vrot.lane.b32.xlu1 %v628_v57, %s1141_s12 }
  0x92   : > { %643 = vrot.lane.b32.xlu0 %v641_v61, %s1136_s28 }
  0x93   : > { %651 = vrot.lane.b32.xlu1 %v649_v62, %s1138_s5  ;;  %v786_v62 = vstv %s1382_s17 }
  0x94   : > { %v787_v6 = vmul.f32 %v1376_v41, %v786_v62 }
  0x96   : > { %659 = vrot.lane.b32.xlu0 %v657_v3, %s1137_s30  ;;  %v264_v3 = vstv %s1384_s18 }
  0x97   : > { %667 = vrot.lane.b32.xlu1 %v665_v4, %s1139_s6  ;;  %v779_v4 = vmul.f32 %v1376_v41, %v778_v60  ;;  %v892_v60 = vstv %s1079_s8 }
  0x98   : > { %v166_v14 = vpop.permute.xlu0 %165 }
  0x99   : > { %v182_v17 = vpop.permute.xlu1 %181  ;;  %v168_v18 = vadd.f32 %v166_v14, %v159_v9  ;;  %v265_v14 = vmul.f32 %v264_v3, %v1216_v26 }
  0x9a   : > { %675 = vrot.lane.b32.xlu0 %v673_v8, %s1140_s11  ;;  %v799_v8 = vstv %s1391_s19  ;;  %s155_s19 = scalar_lea.vmem %s1492_s2, %s975_s16 }
  0x9b   : > { %683 = vrot.lane.b32.xlu1 %v681_v10, %s1141_s12  ;;  %v807_v10 = vstv %s1394_s20 }
  0x9c   : > { %v174_v21 = vpop.permute.xlu0 %173 }
  0x9d   : > { %v176_v23 = vadd.f32 %v174_v21, %v168_v18  ;;  %v190_v24 = vpop.permute.xlu1 %189  ;;  %v808_v18 = vmul.f32 %v1412_v7, %v807_v10  ;;  %v823_v21 = vstv %s1404_s22 }
  0x9e   : > { %696 = vrot.lane.b32.xlu0 %v694_v0, %s1136_s28 }
  0x9f   : > { %v184_v27 = vadd.f32 %v182_v17, %v176_v23  ;;  %704 = vrot.lane.b32.xlu1 %v702_v19, %s1138_s5  ;;  %v800_v17 = vmul.f32 %v1412_v7, %v799_v8  ;;  %v815_v19 = vstv %s1401_s21 }
  0xa0   : > { %v198_v31 = vpop.permute.xlu0 %197  ;;  %v816_v23 = vmul.f32 %v1412_v7, %v815_v19 }
  0xa1   : > { %v192_v34 = vadd.f32 %v190_v24, %v184_v27  ;;  %v206_v35 = vpop.permute.xlu1 %205  ;;  %v831_v27 = vstv %s1415_s24 }
  0xa2   : > { %712 = vrot.lane.b32.xlu0 %v710_v25, %s1137_s30  ;;  %v824_v25 = vmul.f32 %v1412_v7, %v823_v21  ;;  %v832_v33 = vmul.f32 %v1412_v7, %v831_v27 }
  0xa3   : > { %v200_v37 = vadd.f32 %v198_v31, %v192_v34  ;;  %720 = vrot.lane.b32.xlu1 %v718_v28, %s1139_s6 }
  0xa4   : > { %v219_v43 = vpop.permute.xlu0 %218 }
  0xa5   : > { %v208_v46 = vadd.f32 %v206_v35, %v200_v37  ;;  %v227_v47 = vpop.permute.xlu1 %226  ;;  %v840_v35 = vmul.f32 %v1412_v7, %v839_v29  ;;  %v852_v37 = vstv %s1426_s26 }
  0xa6   : > { %728 = vrot.lane.b32.xlu0 %v726_v36, %s1140_s11  ;;  %v1448_v36 = vld [vmem:[%s1185_s23 + $0x16] sm:$0xff]  ;;  %s1003_s23 = sld [smem:[#allocation2 + $0x1c]] }
  0xa7   : > { %v213_v48 = vadd.f32 %v212_v38, %v208_v46  ;;  %736 = vrot.lane.b32.xlu1 %v734_v40, %s1141_s12  ;;  %v317_v38 = vstv %s1428_s27  ;;  %v853_v46 = vmul.f32 %v1448_v36, %v852_v37  ;;  %v893_v3 = vmul.f32 %v1448_v36, %v892_v60 }
  0xa8   : > { %v235_v51 = vpop.permute.xlu0 %234 }
  0xa9   : > { %v221_v54 = vadd.f32 %v219_v43, %v213_v48  ;;  %v243_v55 = vpop.permute.xlu1 %242  ;;  %v861_v48 = vmul.f32 %v1448_v36, %v860_v42 }
  0xaa   : > { %749 = vrot.lane.b32.xlu0 %v747_v13, %s1136_s28  ;;  %v318_v13 = vmul.f32 %v317_v38, %v1231_v39  ;;  %v884_v39 = vstv %s1451_s7 }
  0xab   : > { %v229_v57 = vadd.f32 %v227_v47, %v221_v54  ;;  %757 = vrot.lane.b32.xlu1 %v755_v49, %s1138_s5  ;;  %v868_v49 = vstv %s1438_s3 }
  0xac   : > { %v251_v61 = vpop.permute.xlu0 %250  ;;  %v370_v8 = vstv %s1003_s23 }
  0xad   : > { %v237_v63 = vadd.f32 %v235_v51, %v229_v57  ;;  %v259_v1 = vpop.permute.xlu1 %258  ;;  %v876_v51 = vstv %s1441_s4 }
  0xae   : > { %765 = vrot.lane.b32.xlu0 %v763_v56, %s1137_s30  ;;  %v877_v57 = vmul.f32 %v1448_v36, %v876_v51 }
  0xaf   : > { %v245_v5 = vadd.f32 %v243_v55, %v237_v63  ;;  %773 = vrot.lane.b32.xlu1 %v771_v59, %s1139_s6  ;;  %v869_v55 = vmul.f32 %v1448_v36, %v868_v49  ;;  %v885_v63 = vmul.f32 %v1448_v36, %v884_v39 }
  0xb0   : > { %v272_v9 = vpop.permute.xlu0 %271 }
  0xb1   : > { %v253_v12 = vadd.f32 %v251_v61, %v245_v5  ;;  %v280_v15 = vpop.permute.xlu1 %279 }
  0xb2   : > { %781 = vrot.lane.b32.xlu0 %v779_v4, %s1140_s11 }
  0xb3   : > { %v261_v0 = vadd.f32 %v259_v1, %v253_v12  ;;  %789 = vrot.lane.b32.xlu1 %v787_v6, %s1141_s12 }
  0xb4   : > { %v288_v20 = vpop.permute.xlu0 %287 }
  0xb5   : > { %v266_v26 = vadd.f32 %v265_v14, %v261_v0  ;;  %v296_v22 = vpop.permute.xlu1 %295  ;;  %v371_v14 = vmul.f32 %v370_v8, %v1246_v52 }
  0xb6   : > { %802 = vrot.lane.b32.xlu0 %v800_v17, %s1136_s28 }
  0xb7   : > { %v274_v24 = vadd.f32 %v272_v9, %v266_v26  ;;  %810 = vrot.lane.b32.xlu1 %v808_v18, %s1138_s5 }
  0xb8   : > { %v304_v28 = vpop.permute.xlu0 %303 }
  0xb9   : > { %v282_v31 = vadd.f32 %v280_v15, %v274_v24  ;;  %v312_v32 = vpop.permute.xlu1 %311 }
  0xba   : > { %818 = vrot.lane.b32.xlu0 %v816_v23, %s1137_s30 }
  0xbb   : > { %v290_v34 = vadd.f32 %v288_v20, %v282_v31  ;;  %826 = vrot.lane.b32.xlu1 %v824_v25, %s1139_s6 }
  0xbc   : > { %v325_v40 = vpop.permute.xlu0 %324 }
  0xbd   : > { %v298_v43 = vadd.f32 %v296_v22, %v290_v34  ;;  %v333_v45 = vpop.permute.xlu1 %332 }
  0xbe   : > { %834 = vrot.lane.b32.xlu0 %v832_v33, %s1140_s11 }
  0xbf   : > { %v306_v47 = vadd.f32 %v304_v28, %v298_v43  ;;  %842 = vrot.lane.b32.xlu1 %v840_v35, %s1141_s12 }
  0xc0   : > { %v341_v50 = vpop.permute.xlu0 %340 }
  0xc1   : > { %v314_v53 = vadd.f32 %v312_v32, %v306_v47  ;;  %v349_v54 = vpop.permute.xlu1 %348 }
  0xc2   : > { %855 = vrot.lane.b32.xlu0 %v853_v46, %s1136_s28  ;;  %s1010_s28 = sld [smem:[#allocation2 + $0x23]] }
  0xc3   : > { %v319_v56 = vadd.f32 %v318_v13, %v314_v53  ;;  %863 = vrot.lane.b32.xlu1 %v861_v48, %s1138_s5  ;;  %s1025_s5 = sld [smem:[#allocation2 + $0x31]] }
  0xc4   : > { %v357_v59 = vpop.permute.xlu0 %356 }
  0xc5   : > { %v327_v61 = vadd.f32 %v325_v40, %v319_v56  ;;  %v365_v62 = vpop.permute.xlu1 %364 }
  0xc6   : > { %871 = vrot.lane.b32.xlu0 %v869_v55, %s1137_s30  ;;  %s1017_s30 = sld [smem:[#allocation2 + $0x2a]] }
  0xc7   : > { %v335_v1 = vadd.f32 %v333_v45, %v327_v61  ;;  %879 = vrot.lane.b32.xlu1 %v877_v57, %s1139_s6  ;;  %s1033_s6 = sld [smem:[#allocation2 + $0x38]] }
  0xc8   : > { %v378_v4 = vpop.permute.xlu0 %377  ;;  %v423_v24 = vstv %s1010_s28 }
  0xc9   : > { %v343_v5 = vadd.f32 %v341_v50, %v335_v1  ;;  %v386_v6 = vpop.permute.xlu1 %385  ;;  %v424_v31 = vmul.f32 %v423_v24, %v1261_v2  ;;  %v530_v60 = vstv %s1025_s5 }
  0xca   : > { %887 = vrot.lane.b32.xlu0 %v885_v63, %s1140_s11  ;;  %v531_v1 = vmul.f32 %v1291_v30, %v530_v60  ;;  %s1041_s11 = sld [smem:[#allocation2 + $0x3f]] }
  0xcb   : > { %v351_v9 = vadd.f32 %v349_v54, %v343_v5  ;;  %895 = vrot.lane.b32.xlu1 %v893_v3, %s1141_s12  ;;  %s1049_s12 = sld [smem:[#allocation2 + $0x46]] }
  0xcc   : > { %v394_v10 = vpop.permute.xlu0 %393  ;;  %v476_v46 = vstv %s1017_s30 }
  0xcd   : > { %v359_v12 = vadd.f32 %v357_v59, %v351_v9  ;;  %v402_v15 = vpop.permute.xlu1 %401  ;;  %v477_v49 = vmul.f32 %v476_v46, %v1276_v16 }
  0xcf   : > { %v367_v17 = vadd.f32 %v365_v62, %v359_v12 }
  0xd0   : > { %v410_v0 = vpop.permute.xlu0 %409 }
  0xd1   : > { %v372_v18 = vadd.f32 %v371_v14, %v367_v17  ;;  %v418_v19 = vpop.permute.xlu1 %417  ;;  %v583_v14 = vstv %s1033_s6 }
  0xd3   : > { %v380_v20 = vadd.f32 %v378_v4, %v372_v18  ;;  %v584_v18 = vmul.f32 %v1306_v44, %v583_v14 }
  0xd4   : > { %v431_v21 = vpop.permute.xlu0 %430 }
  0xd5   : > { %v388_v26 = vadd.f32 %v386_v6, %v380_v20  ;;  %v439_v22 = vpop.permute.xlu1 %438 }
  0xd7   : > { %v396_v23 = vadd.f32 %v394_v10, %v388_v26 }
  0xd8   : > { %v447_v25 = vpop.permute.xlu0 %446 }
  0xd9   : > { %v404_v27 = vadd.f32 %v402_v15, %v396_v23  ;;  %v455_v28 = vpop.permute.xlu1 %454 }
  0xdb   : > { %v412_v29 = vadd.f32 %v410_v0, %v404_v27  ;;  %v636_v27 = vstv %s1041_s11 }
  0xdc   : > { %v463_v32 = vpop.permute.xlu0 %462 }
  0xdd   : > { %v420_v52 = vadd.f32 %v418_v19, %v412_v29  ;;  %v471_v33 = vpop.permute.xlu1 %470 }
  0xdf   : > { %v425_v34 = vadd.f32 %v424_v31, %v420_v52  ;;  %v637_v52 = vmul.f32 %v1321_v58, %v636_v27 }
  0xe0   : > { %v484_v35 = vpop.permute.xlu0 %483 }
  0xe1   : > { %v433_v37 = vadd.f32 %v431_v21, %v425_v34  ;;  %v492_v38 = vpop.permute.xlu1 %491 }
  0xe3   : > { %v441_v40 = vadd.f32 %v439_v22, %v433_v37 }
  0xe4   : > { %v500_v42 = vpop.permute.xlu0 %499 }
  0xe5   : > { %v449_v43 = vadd.f32 %v447_v25, %v441_v40  ;;  %v508_v45 = vpop.permute.xlu1 %507 }
  0xe7   : > { %v457_v47 = vadd.f32 %v455_v28, %v449_v43 }
  0xe8   : > { %v516_v13 = vpop.permute.xlu0 %515 }
  0xe9   : > { %v465_v48 = vadd.f32 %v463_v32, %v457_v47  ;;  %v524_v50 = vpop.permute.xlu1 %523 }
  0xeb   : > { %v473_v2 = vadd.f32 %v471_v33, %v465_v48 }
  0xec   : > { %v538_v51 = vpop.permute.xlu0 %537 }
  0xed   : > { %v478_v53 = vadd.f32 %v477_v49, %v473_v2  ;;  %v546_v54 = vpop.permute.xlu1 %545 }
  0xef   : > { %v486_v55 = vadd.f32 %v484_v35, %v478_v53 }
  0xf0   : > { %v554_v56 = vpop.permute.xlu0 %553 }
  0xf1   : > { %v494_v57 = vadd.f32 %v492_v38, %v486_v55  ;;  %v562_v39 = vpop.permute.xlu1 %561 }
  0xf3   : > { %v502_v59 = vadd.f32 %v500_v42, %v494_v57  ;;  %v742_v57 = vstv %s1057_s13 }
  0xf4   : > { %v570_v62 = vpop.permute.xlu0 %569 }
  0xf5   : > { %v510_v61 = vadd.f32 %v508_v45, %v502_v59  ;;  %v578_v3 = vpop.permute.xlu1 %577  ;;  %v689_v45 = vstv %s1049_s12 }
  0xf6   : > { %v690_v48 = vmul.f32 %v1341_v11, %v689_v45 }
  0xf7   : > { %v518_v63 = vadd.f32 %v516_v13, %v510_v61  ;;  %v743_v61 = vmul.f32 %v1376_v41, %v742_v57 }
  0xf8   : > { %v591_v16 = vpop.permute.xlu0 %590 }
  0xf9   : > { %v526_v4 = vadd.f32 %v524_v50, %v518_v63  ;;  %v599_v6 = vpop.permute.xlu1 %598 }
  0xfb   : > { %v532_v5 = vadd.f32 %v531_v1, %v526_v4 }
  0xfc   : > { %v607_v10 = vpop.permute.xlu0 %606 }
  0xfd   : > { %v540_v8 = vadd.f32 %v538_v51, %v532_v5  ;;  %v615_v15 = vpop.permute.xlu1 %614 }
  0xff   : > { %v548_v9 = vadd.f32 %v546_v54, %v540_v8  ;;  %v795_v8 = vstv %s1065_s14 }
 0x100   : > { %v623_v19 = vpop.permute.xlu0 %622 }
 0x101   : > { %v556_v12 = vadd.f32 %v554_v56, %v548_v9  ;;  %v631_v21 = vpop.permute.xlu1 %630 }
 0x103   : > { %v564_v17 = vadd.f32 %v562_v39, %v556_v12 }
 0x104   : > { %v644_v26 = vpop.permute.xlu0 %643 }
 0x105   : > { %v572_v0 = vadd.f32 %v570_v62, %v564_v17  ;;  %v652_v23 = vpop.permute.xlu1 %651 }
 0x107   : > { %v580_v20 = vadd.f32 %v578_v3, %v572_v0 }
 0x108   : > { %v660_v28 = vpop.permute.xlu0 %659 }
 0x109   : > { %v585_v30 = vadd.f32 %v584_v18, %v580_v20  ;;  %v668_v31 = vpop.permute.xlu1 %667 }
 0x10b   : > { %v593_v22 = vadd.f32 %v591_v16, %v585_v30 }
 0x10c   : > { %v676_v34 = vpop.permute.xlu0 %675 }
 0x10d   : > { %v601_v24 = vadd.f32 %v599_v6, %v593_v22  ;;  %v684_v35 = vpop.permute.xlu1 %683  ;;  %v848_v22 = vstv %s1073_s15 }
 0x10e   : > { %v849_v27 = vmul.f32 %v1448_v36, %v848_v22 }
 0x10f   : > { %v609_v25 = vadd.f32 %v607_v10, %v601_v24 }
 0x110   : > { %v697_v38 = vpop.permute.xlu0 %696 }
 0x111   : > { %v617_v29 = vadd.f32 %v615_v15, %v609_v25  ;;  %v705_v42 = vpop.permute.xlu1 %704  ;;  %v796_v15 = vmul.f32 %v1412_v7, %v795_v8 }
 0x113   : > { %v625_v32 = vadd.f32 %v623_v19, %v617_v29 }
 0x114   : > { %v713_v47 = vpop.permute.xlu0 %712 }
 0x115   : > { %v633_v33 = vadd.f32 %v631_v21, %v625_v32  ;;  %v721_v49 = vpop.permute.xlu1 %720 }
 0x117   : > { %v638_v44 = vadd.f32 %v637_v52, %v633_v33 }
 0x118   : > { %v729_v2 = vpop.permute.xlu0 %728 }
 0x119   : > { %v646_v37 = vadd.f32 %v644_v26, %v638_v44  ;;  %v737_v53 = vpop.permute.xlu1 %736 }
 0x11b   : > { %v654_v40 = vadd.f32 %v652_v23, %v646_v37 }
 0x11c   : > { %v750_v55 = vpop.permute.xlu0 %749 }
 0x11d   : > { %v662_v43 = vadd.f32 %v660_v28, %v654_v40  ;;  %v758_v39 = vpop.permute.xlu1 %757 }
 0x11f   : > { %v670_v46 = vadd.f32 %v668_v31, %v662_v43 }
 0x120   : > { %v766_v62 = vpop.permute.xlu0 %765 }
 0x121   : > { %v678_v13 = vadd.f32 %v676_v34, %v670_v46  ;;  %v774_v1 = vpop.permute.xlu1 %773 }
 0x123   : > { %v686_v50 = vadd.f32 %v684_v35, %v678_v13 }
 0x124   : > { %v782_v4 = vpop.permute.xlu0 %781 }
 0x125   : > { %v691_v58 = vadd.f32 %v690_v48, %v686_v50  ;;  %v790_v5 = vpop.permute.xlu1 %789 }
 0x127   : > { %v699_v51 = vadd.f32 %v697_v38, %v691_v58 }
 0x128   : > { %v803_v9 = vpop.permute.xlu0 %802 }
 0x129   : > { %v707_v54 = vadd.f32 %v705_v42, %v699_v51  ;;  %v811_v12 = vpop.permute.xlu1 %810 }
 0x12b   : > { %v715_v56 = vadd.f32 %v713_v47, %v707_v54 }
 0x12c   : > { %v819_v0 = vpop.permute.xlu0 %818 }
 0x12d   : > { %v723_v59 = vadd.f32 %v721_v49, %v715_v56  ;;  %v827_v18 = vpop.permute.xlu1 %826 }
 0x12f   : > { %v731_v60 = vadd.f32 %v729_v2, %v723_v59 }
 0x130   : > { %v835_v21 = vpop.permute.xlu0 %834 }
 0x131   : > { %v739_v63 = vadd.f32 %v737_v53, %v731_v60  ;;  %v843_v26 = vpop.permute.xlu1 %842 }
 0x133   : > { %v744_v11 = vadd.f32 %v743_v61, %v739_v63 }
 0x134   : > { %v856_v24 = vpop.permute.xlu0 %855 }
 0x135   : > { %v752_v3 = vadd.f32 %v750_v55, %v744_v11  ;;  %v864_v28 = vpop.permute.xlu1 %863 }
 0x137   : > { %v760_v16 = vadd.f32 %v758_v39, %v752_v3 }
 0x138   : > { %v872_v31 = vpop.permute.xlu0 %871 }
 0x139   : > { %v768_v6 = vadd.f32 %v766_v62, %v760_v16  ;;  %v880_v52 = vpop.permute.xlu1 %879 }
 0x13b   : > { %v776_v10 = vadd.f32 %v774_v1, %v768_v6 }
 0x13c   : > { %v888_v44 = vpop.permute.xlu0 %887 }
 0x13d   : > { %v784_v14 = vadd.f32 %v782_v4, %v776_v10  ;;  %v896_v37 = vpop.permute.xlu1 %895 }
 0x13f   : > { %v792_v17 = vadd.f32 %v790_v5, %v784_v14 }
 0x141   : > { %v797_v41 = vadd.f32 %v796_v15, %v792_v17 }
 0x143   : > { %v805_v19 = vadd.f32 %v803_v9, %v797_v41 }
 0x145   : > { %v813_v20 = vadd.f32 %v811_v12, %v805_v19 }
 0x147   : > { %v821_v30 = vadd.f32 %v819_v0, %v813_v20 }
 0x149   : > { %v829_v23 = vadd.f32 %v827_v18, %v821_v30 }
 0x14b   : > { %v837_v25 = vadd.f32 %v835_v21, %v829_v23 }
 0x14d   : > { %v845_v29 = vadd.f32 %v843_v26, %v837_v25 }
 0x14f   : > { %v850_v7 = vadd.f32 %v849_v27, %v845_v29 }
 0x151   : > { %v858_v32 = vadd.f32 %v856_v24, %v850_v7 }
 0x153   : > { %v866_v33 = vadd.f32 %v864_v28, %v858_v32 }
 0x155   : > { %v874_v34 = vadd.f32 %v872_v31, %v866_v33 }
 0x157   : > { %v882_v35 = vadd.f32 %v880_v52, %v874_v34 }
 0x159   : > { %v890_v38 = vadd.f32 %v888_v44, %v882_v35 }
 0x15b   : > { %v898_v40 = vadd.f32 %v896_v37, %v890_v38 }
 0x15d   : > { %900 = vst.msk [vmem:[%s155_s19] sm:$0xff] %vm899_vm0, %v898_v40 }
 0x15e PF: > { %s13_s9 = sadd.s32 1, %s1133_s9  }
 0x15f   : > { %p10_p1 = scmp.ge.s32.totalorder %s13_s9, 4  }
 0x161   :  { %12 = sbr.rel (!%p10_p1) target bundleno = 1 (0x1), region = 64 }
 0x168   :  { %920 = vsyncpa [#allocation3], 1 }
 0x169   :  { %922 = vsyncpa [#allocation3 + $0x1], 1 }

// kernel: tile.9
= control target key start
LH: loop header
LB: loop body
LE: loop exit
PB: predicated region body
PF: predicated region fallthrough
CT: control target
= control target key end

     0   :  { %vm642_vm0 = vcmask 1047556   ;;  %s1240_s10 = smov 8   ;;  %vm644_vm1 = vcmask 64512   ;;  %vm789_vm2 = vcmask 130112   ;;  %s1811_s0 = inlined_call_operand.vmem [shape: f32[2,4,2,8,2,8], index: 0, kind: input, shape index: {}]   ;;  %s1812_s1 = inlined_call_operand.vmem [shape: f32[2,4,16,16], index: 1, kind: output, shape index: {}]  }
   0x1   :  { %v1202_v0 = vld [vmem:[%s1811_s0 + $0xe] sm:$0x3]  ;;  %v1203_v1 = vld [vmem:[%s1811_s0 + $0xc] sm:$0x3]  ;;  %v1204_v2 = vld [vmem:[%s1811_s0 + $0xa] sm:$0x3] }
   0x2   :  { %608 = vst [vmem:[#allocation0 + $0x38] sm:$0x3] %v1202_v0  ;;  %613 = vst [vmem:[#allocation0 + $0x30] sm:$0x3] %v1203_v1  ;;  %v1205_v3 = vld [vmem:[%s1811_s0 + $0x8] sm:$0x3] }
   0x3   :  { %618 = vst [vmem:[#allocation0 + $0x28] sm:$0x3] %v1204_v2  ;;  %v1206_v4 = vld [vmem:[%s1811_s0 + $0x6] sm:$0x3]  ;;  %v1207_v5 = vld [vmem:[%s1811_s0 + $0x4] sm:$0x3] }
   0x4   :  { %623 = vst [vmem:[#allocation0 + $0x20] sm:$0x3] %v1205_v3  ;;  %628 = vst [vmem:[#allocation0 + $0x18] sm:$0x3] %v1206_v4  ;;  %v1208_v6 = vld [vmem:[%s1811_s0 + $0x2] sm:$0x3] }
   0x5   :  { %633 = vst [vmem:[#allocation0 + $0x10] sm:$0x3] %v1207_v5  ;;  %v638_v7 = vld [vmem:[%s1811_s0] sm:$0x3]  ;;  %637 = vst [vmem:[#allocation0 + $0x8] sm:$0x3] %v1208_v6 }
   0x6   :  { %639 = vst [vmem:[#allocation0] sm:$0x3] %v638_v7  ;;  %v1138_v8 = vld [vmem:[%s1811_s0 + $0x8e] sm:$0x3]  ;;  %v1139_v9 = vld [vmem:[%s1811_s0 + $0x8c] sm:$0x3] }
   0x7   :  { %v1140_v10 = vld [vmem:[%s1811_s0 + $0x8a] sm:$0x3]  ;;  %288 = vst [vmem:[#allocation0 + $0x238] sm:$0x3] %v1138_v8  ;;  %293 = vst [vmem:[#allocation0 + $0x230] sm:$0x3] %v1139_v9 }
   0x8   :  { %298 = vst [vmem:[#allocation0 + $0x228] sm:$0x3] %v1140_v10  ;;  %v1141_v11 = vld [vmem:[%s1811_s0 + $0x88] sm:$0x3]  ;;  %v1142_v12 = vld [vmem:[%s1811_s0 + $0x86] sm:$0x3] }
   0x9   :  { %v1143_v13 = vld [vmem:[%s1811_s0 + $0x84] sm:$0x3]  ;;  %303 = vst [vmem:[#allocation0 + $0x220] sm:$0x3] %v1141_v11  ;;  %308 = vst [vmem:[#allocation0 + $0x218] sm:$0x3] %v1142_v12 }
   0xa   :  { %313 = vst [vmem:[#allocation0 + $0x210] sm:$0x3] %v1143_v13  ;;  %v1144_v14 = vld [vmem:[%s1811_s0 + $0x82] sm:$0x3]  ;;  %v1145_v15 = vld [vmem:[%s1811_s0 + $0x80] sm:$0x3] }
   0xb   :  { %v1170_v16 = vld [vmem:[%s1811_s0 + $0x4e] sm:$0x3]  ;;  %318 = vst [vmem:[#allocation0 + $0x208] sm:$0x3] %v1144_v14  ;;  %323 = vst [vmem:[#allocation0 + $0x200] sm:$0x3] %v1145_v15 }
   0xc   :  { %448 = vst [vmem:[#allocation0 + $0x138] sm:$0x3] %v1170_v16  ;;  %v1171_v17 = vld [vmem:[%s1811_s0 + $0x4c] sm:$0x3]  ;;  %v1172_v18 = vld [vmem:[%s1811_s0 + $0x4a] sm:$0x3] }
   0xd   :  { %v1173_v19 = vld [vmem:[%s1811_s0 + $0x48] sm:$0x3]  ;;  %453 = vst [vmem:[#allocation0 + $0x130] sm:$0x3] %v1171_v17  ;;  %458 = vst [vmem:[#allocation0 + $0x128] sm:$0x3] %v1172_v18 }
   0xe   :  { %463 = vst [vmem:[#allocation0 + $0x120] sm:$0x3] %v1173_v19  ;;  %v1174_v20 = vld [vmem:[%s1811_s0 + $0x46] sm:$0x3]  ;;  %v1175_v21 = vld [vmem:[%s1811_s0 + $0x44] sm:$0x3] }
   0xf   :  { %v1176_v22 = vld [vmem:[%s1811_s0 + $0x42] sm:$0x3]  ;;  %468 = vst [vmem:[#allocation0 + $0x118] sm:$0x3] %v1174_v20  ;;  %473 = vst [vmem:[#allocation0 + $0x110] sm:$0x3] %v1175_v21 }
  0x10   :  { %478 = vst [vmem:[#allocation0 + $0x108] sm:$0x3] %v1176_v22  ;;  %v1177_v23 = vld [vmem:[%s1811_s0 + $0x40] sm:$0x3]  ;;  %v1106_v24 = vld [vmem:[%s1811_s0 + $0xce] sm:$0x3] }
  0x11   :  { %v1107_v25 = vld [vmem:[%s1811_s0 + $0xcc] sm:$0x3]  ;;  %v784_v26 = vld [vmem:[#allocation0 + $0x1] ss:$8 sm:$0xf0]  }
  0x12   :  { %483 = vst [vmem:[#allocation0 + $0x100] sm:$0x3] %v1177_v23  ;;  %128 = vst [vmem:[#allocation0 + $0x338] sm:$0x3] %v1106_v24  ;;  %v1108_v27 = vld [vmem:[%s1811_s0 + $0xca] sm:$0x3] }
  0x13   :  { %133 = vst [vmem:[#allocation0 + $0x330] sm:$0x3] %v1107_v25  ;;  %v782_v28 = vld [vmem:[#allocation0 + $0x1] ss:$8 sm:$0xf]  }
  0x14   :  { %138 = vst [vmem:[#allocation0 + $0x328] sm:$0x3] %v1108_v27  ;;  %v1109_v29 = vld [vmem:[%s1811_s0 + $0xc8] sm:$0x3]  ;;  %v786_v30 = vsel %vm642_vm0, %v784_v26, %v782_v28  ;;  %v1110_v31 = vld [vmem:[%s1811_s0 + $0xc6] sm:$0x3] }
  0x15   :  { %143 = vst [vmem:[#allocation0 + $0x320] sm:$0x3] %v1109_v29  ;;  %v1111_v32 = vld [vmem:[%s1811_s0 + $0xc4] sm:$0x3]  ;;  %v1112_v33 = vld [vmem:[%s1811_s0 + $0xc2] sm:$0x3]  ;;  %787 = vrot.lane.b32.xlu0 %v786_v30, %s1240_s10 }
  0x16   :  { %v805_v34 = vld [vmem:[#allocation0 + $0x201] ss:$8 sm:$0xf0]   ;;  %148 = vst [vmem:[#allocation0 + $0x318] sm:$0x3] %v1110_v31 }
  0x17   :  { %153 = vst [vmem:[#allocation0 + $0x310] sm:$0x3] %v1111_v32  ;;  %158 = vst [vmem:[#allocation0 + $0x308] sm:$0x3] %v1112_v33  ;;  %v1113_v35 = vld [vmem:[%s1811_s0 + $0xc0] sm:$0x3] }
  0x18   :  { %v803_v36 = vld [vmem:[#allocation0 + $0x201] ss:$8 sm:$0xf]   ;;  %163 = vst [vmem:[#allocation0 + $0x300] sm:$0x3] %v1113_v35 }
  0x19   :  { %v1194_v37 = vld [vmem:[%s1811_s0 + $0x1e] sm:$0x3]  ;;  %v807_v38 = vsel %vm642_vm0, %v805_v34, %v803_v36  ;;  %v794_v39 = vld [vmem:[#allocation0 + $0x101] ss:$8 sm:$0xf0]  }
  0x1a   :  { %568 = vst [vmem:[#allocation0 + $0x78] sm:$0x3] %v1194_v37  ;;  %v1195_v40 = vld [vmem:[%s1811_s0 + $0x1c] sm:$0x3]  ;;  %808 = vrot.lane.b32.xlu1 %v807_v38, %s1240_s10  ;;  %v1196_v41 = vld [vmem:[%s1811_s0 + $0x1a] sm:$0x3] }
  0x1b   :  { %573 = vst [vmem:[#allocation0 + $0x70] sm:$0x3] %v1195_v40  ;;  %v1197_v42 = vld [vmem:[%s1811_s0 + $0x18] sm:$0x3]  ;;  %v1198_v43 = vld [vmem:[%s1811_s0 + $0x16] sm:$0x3] }
  0x1c   :  { %v792_v44 = vld [vmem:[#allocation0 + $0x101] ss:$8 sm:$0xf]   ;;  %578 = vst [vmem:[#allocation0 + $0x68] sm:$0x3] %v1196_v41 }
  0x1d   :  { %583 = vst [vmem:[#allocation0 + $0x60] sm:$0x3] %v1197_v42  ;;  %588 = vst [vmem:[#allocation0 + $0x58] sm:$0x3] %v1198_v43  ;;  %v1199_v45 = vld [vmem:[%s1811_s0 + $0x14] sm:$0x3]  ;;  %v796_v46 = vsel %vm642_vm0, %v794_v39, %v792_v44 }
  0x1e   :  { %593 = vst [vmem:[#allocation0 + $0x50] sm:$0x3] %v1199_v45  ;;  %v1200_v47 = vld [vmem:[%s1811_s0 + $0x12] sm:$0x3]  ;;  %v1201_v48 = vld [vmem:[%s1811_s0 + $0x10] sm:$0x3]  ;;  %797 = vrot.lane.b32.xlu0 %v796_v46, %s1240_s10 }
  0x1f   :  { %v1162_v49 = vld [vmem:[%s1811_s0 + $0x5e] sm:$0x3]  ;;  %v816_v50 = vld [vmem:[#allocation0 + $0x301] ss:$8 sm:$0xf0]  }
  0x20   :  { %598 = vst [vmem:[#allocation0 + $0x48] sm:$0x3] %v1200_v47  ;;  %603 = vst [vmem:[#allocation0 + $0x40] sm:$0x3] %v1201_v48  ;;  %v1163_v51 = vld [vmem:[%s1811_s0 + $0x5c] sm:$0x3] }
  0x21   :  { %408 = vst [vmem:[#allocation0 + $0x178] sm:$0x3] %v1162_v49  ;;  %413 = vst [vmem:[#allocation0 + $0x170] sm:$0x3] %v1163_v51  ;;  %v1164_v52 = vld [vmem:[%s1811_s0 + $0x5a] sm:$0x3] }
  0x22   :  { %v1165_v53 = vld [vmem:[%s1811_s0 + $0x58] sm:$0x3]  ;;  %v1166_v54 = vld [vmem:[%s1811_s0 + $0x56] sm:$0x3]  ;;  %418 = vst [vmem:[#allocation0 + $0x168] sm:$0x3] %v1164_v52 }
  0x23   :  { %v814_v55 = vld [vmem:[#allocation0 + $0x301] ss:$8 sm:$0xf]   ;;  %423 = vst [vmem:[#allocation0 + $0x160] sm:$0x3] %v1165_v53 }
  0x24   :  { %428 = vst [vmem:[#allocation0 + $0x158] sm:$0x3] %v1166_v54  ;;  %v1167_v56 = vld [vmem:[%s1811_s0 + $0x54] sm:$0x3]  ;;  %v818_v57 = vsel %vm642_vm0, %v816_v50, %v814_v55  ;;  %v1168_v58 = vld [vmem:[%s1811_s0 + $0x52] sm:$0x3] }
  0x25   :  { %433 = vst [vmem:[#allocation0 + $0x150] sm:$0x3] %v1167_v56  ;;  %v1169_v59 = vld [vmem:[%s1811_s0 + $0x50] sm:$0x3]  ;;  %v1130_v60 = vld [vmem:[%s1811_s0 + $0x9e] sm:$0x3]  ;;  %819 = vrot.lane.b32.xlu1 %v818_v57, %s1240_s10 }
  0x26   :  { %438 = vst [vmem:[#allocation0 + $0x148] sm:$0x3] %v1168_v58  ;;  %443 = vst [vmem:[#allocation0 + $0x140] sm:$0x3] %v1169_v59  ;;  %v1131_v61 = vld [vmem:[%s1811_s0 + $0x9c] sm:$0x3] }
  0x27   :  { %248 = vst [vmem:[#allocation0 + $0x278] sm:$0x3] %v1130_v60  ;;  %v1132_v62 = vld [vmem:[%s1811_s0 + $0x9a] sm:$0x3]  ;;  %v1133_v63 = vld [vmem:[%s1811_s0 + $0x98] sm:$0x3] }
  0x28   :  { %v827_v0 = vld [vmem:[#allocation0 + $0x41] ss:$8 sm:$0xf0]   ;;  %253 = vst [vmem:[#allocation0 + $0x270] sm:$0x3] %v1131_v61 }
  0x29   :  { %258 = vst [vmem:[#allocation0 + $0x268] sm:$0x3] %v1132_v62  ;;  %263 = vst [vmem:[#allocation0 + $0x260] sm:$0x3] %v1133_v63  ;;  %v1134_v1 = vld [vmem:[%s1811_s0 + $0x96] sm:$0x3] }
  0x2a   :  { %268 = vst [vmem:[#allocation0 + $0x258] sm:$0x3] %v1134_v1  ;;  %v1135_v2 = vld [vmem:[%s1811_s0 + $0x94] sm:$0x3]  ;;  %v1136_v3 = vld [vmem:[%s1811_s0 + $0x92] sm:$0x3] }
  0x2b   :  { %v1137_v4 = vld [vmem:[%s1811_s0 + $0x90] sm:$0x3]  ;;  %273 = vst [vmem:[#allocation0 + $0x250] sm:$0x3] %v1135_v2  ;;  %278 = vst [vmem:[#allocation0 + $0x248] sm:$0x3] %v1136_v3 }
  0x2c   :  { %v825_v5 = vld [vmem:[#allocation0 + $0x41] ss:$8 sm:$0xf]   ;;  %283 = vst [vmem:[#allocation0 + $0x240] sm:$0x3] %v1137_v4 }
  0x2d   :  { %v1098_v6 = vld [vmem:[%s1811_s0 + $0xde] sm:$0x3]  ;;  %v829_v7 = vsel %vm642_vm0, %v827_v0, %v825_v5  ;;  %v1099_v8 = vld [vmem:[%s1811_s0 + $0xdc] sm:$0x3]  ;;  %v1100_v9 = vld [vmem:[%s1811_s0 + $0xda] sm:$0x3] }
  0x2e   :  { %88 = vst [vmem:[#allocation0 + $0x378] sm:$0x3] %v1098_v6  ;;  %v1101_v10 = vld [vmem:[%s1811_s0 + $0xd8] sm:$0x3]  ;;  %830 = vrot.lane.b32.xlu0 %v829_v7, %s1240_s10  ;;  %93 = vst [vmem:[#allocation0 + $0x370] sm:$0x3] %v1099_v8 }
  0x2f   :  { %v838_v11 = vld [vmem:[#allocation0 + $0x141] ss:$8 sm:$0xf0]   ;;  %98 = vst [vmem:[#allocation0 + $0x368] sm:$0x3] %v1100_v9 }
  0x30   :  { %103 = vst [vmem:[#allocation0 + $0x360] sm:$0x3] %v1101_v10  ;;  %v1102_v12 = vld [vmem:[%s1811_s0 + $0xd6] sm:$0x3]  ;;  %v1103_v13 = vld [vmem:[%s1811_s0 + $0xd4] sm:$0x3] }
  0x31   :  { %108 = vst [vmem:[#allocation0 + $0x358] sm:$0x3] %v1102_v12  ;;  %v1104_v14 = vld [vmem:[%s1811_s0 + $0xd2] sm:$0x3]  ;;  %v1105_v15 = vld [vmem:[%s1811_s0 + $0xd0] sm:$0x3] }
  0x32   :  { %v836_v16 = vld [vmem:[#allocation0 + $0x141] ss:$8 sm:$0xf]   ;;  %113 = vst [vmem:[#allocation0 + $0x350] sm:$0x3] %v1103_v13 }
  0x33   :  { %118 = vst [vmem:[#allocation0 + $0x348] sm:$0x3] %v1104_v14  ;;  %123 = vst [vmem:[#allocation0 + $0x340] sm:$0x3] %v1105_v15  ;;  %v1186_v17 = vld [vmem:[%s1811_s0 + $0x2e] sm:$0x3]  ;;  %v840_v18 = vsel %vm642_vm0, %v838_v11, %v836_v16 }
  0x34   :  { %v849_v19 = vld [vmem:[#allocation0 + $0x241] ss:$8 sm:$0xf0]   ;;  %528 = vst [vmem:[#allocation0 + $0xb8] sm:$0x3] %v1186_v17  ;;  %841 = vrot.lane.b32.xlu1 %v840_v18, %s1240_s10 }
  0x35   :  { %v1187_v20 = vld [vmem:[%s1811_s0 + $0x2c] sm:$0x3]  ;;  %v1188_v21 = vld [vmem:[%s1811_s0 + $0x2a] sm:$0x3]  ;;  %v1189_v22 = vld [vmem:[%s1811_s0 + $0x28] sm:$0x3] }
  0x36   :  { %533 = vst [vmem:[#allocation0 + $0xb0] sm:$0x3] %v1187_v20  ;;  %v1190_v23 = vld [vmem:[%s1811_s0 + $0x26] sm:$0x3]  ;;  %538 = vst [vmem:[#allocation0 + $0xa8] sm:$0x3] %v1188_v21 }
  0x37   :  { %v847_v24 = vld [vmem:[#allocation0 + $0x241] ss:$8 sm:$0xf]   ;;  %543 = vst [vmem:[#allocation0 + $0xa0] sm:$0x3] %v1189_v22 }
  0x38   :  { %548 = vst [vmem:[#allocation0 + $0x98] sm:$0x3] %v1190_v23  ;;  %v1191_v25 = vld [vmem:[%s1811_s0 + $0x24] sm:$0x3]  ;;  %v851_v26 = vsel %vm642_vm0, %v849_v19, %v847_v24  ;;  %v1192_v27 = vld [vmem:[%s1811_s0 + $0x22] sm:$0x3] }
  0x39   :  { %553 = vst [vmem:[#allocation0 + $0x90] sm:$0x3] %v1191_v25  ;;  %v1193_v28 = vld [vmem:[%s1811_s0 + $0x20] sm:$0x3]  ;;  %v1154_v29 = vld [vmem:[%s1811_s0 + $0x6e] sm:$0x3]  ;;  %852 = vrot.lane.b32.xlu0 %v851_v26, %s1240_s10 }
  0x3a   :  { %v860_v30 = vld [vmem:[#allocation0 + $0x341] ss:$8 sm:$0xf0]   ;;  %558 = vst [vmem:[#allocation0 + $0x88] sm:$0x3] %v1192_v27 }
  0x3b   :  { %563 = vst [vmem:[#allocation0 + $0x80] sm:$0x3] %v1193_v28  ;;  %368 = vst [vmem:[#allocation0 + $0x1b8] sm:$0x3] %v1154_v29  ;;  %v1155_v31 = vld [vmem:[%s1811_s0 + $0x6c] sm:$0x3] }
  0x3c   :  { %373 = vst [vmem:[#allocation0 + $0x1b0] sm:$0x3] %v1155_v31  ;;  %v1156_v32 = vld [vmem:[%s1811_s0 + $0x6a] sm:$0x3]  ;;  %v1157_v33 = vld [vmem:[%s1811_s0 + $0x68] sm:$0x3] }
  0x3d   :  { %v1158_v34 = vld [vmem:[%s1811_s0 + $0x66] sm:$0x3]  ;;  %v858_v35 = vld [vmem:[#allocation0 + $0x341] ss:$8 sm:$0xf]  }
  0x3e   :  { %378 = vst [vmem:[#allocation0 + $0x1a8] sm:$0x3] %v1156_v32  ;;  %383 = vst [vmem:[#allocation0 + $0x1a0] sm:$0x3] %v1157_v33  ;;  %v1159_v36 = vld [vmem:[%s1811_s0 + $0x64] sm:$0x3]  ;;  %v862_v37 = vsel %vm642_vm0, %v860_v30, %v858_v35 }
  0x3f   :  { %388 = vst [vmem:[#allocation0 + $0x198] sm:$0x3] %v1158_v34  ;;  %393 = vst [vmem:[#allocation0 + $0x190] sm:$0x3] %v1159_v36  ;;  %v1160_v38 = vld [vmem:[%s1811_s0 + $0x62] sm:$0x3]  ;;  %863 = vrot.lane.b32.xlu1 %v862_v37, %s1240_s10 }
  0x40   :  { %v1161_v39 = vld [vmem:[%s1811_s0 + $0x60] sm:$0x3]  ;;  %v1122_v40 = vld [vmem:[%s1811_s0 + $0xae] sm:$0x3]  ;;  %398 = vst [vmem:[#allocation0 + $0x188] sm:$0x3] %v1160_v38 }
  0x41   :  { %403 = vst [vmem:[#allocation0 + $0x180] sm:$0x3] %v1161_v39  ;;  %208 = vst [vmem:[#allocation0 + $0x2b8] sm:$0x3] %v1122_v40  ;;  %v1123_v41 = vld [vmem:[%s1811_s0 + $0xac] sm:$0x3] }
  0x42   :  { %v1124_v42 = vld [vmem:[%s1811_s0 + $0xaa] sm:$0x3]  ;;  %v1125_v43 = vld [vmem:[%s1811_s0 + $0xa8] sm:$0x3]  ;;  %213 = vst [vmem:[#allocation0 + $0x2b0] sm:$0x3] %v1123_v41 }
  0x43   :  { %v871_v44 = vld [vmem:[#allocation0 + $0x81] ss:$8 sm:$0xf0]   ;;  %218 = vst [vmem:[#allocation0 + $0x2a8] sm:$0x3] %v1124_v42 }
  0x44   :  { %223 = vst [vmem:[#allocation0 + $0x2a0] sm:$0x3] %v1125_v43  ;;  %v1126_v45 = vld [vmem:[%s1811_s0 + $0xa6] sm:$0x3]  ;;  %v1127_v46 = vld [vmem:[%s1811_s0 + $0xa4] sm:$0x3] }
  0x45   :  { %228 = vst [vmem:[#allocation0 + $0x298] sm:$0x3] %v1126_v45  ;;  %v1128_v47 = vld [vmem:[%s1811_s0 + $0xa2] sm:$0x3]  ;;  %v1129_v48 = vld [vmem:[%s1811_s0 + $0xa0] sm:$0x3] }
  0x46   :  { %v869_v49 = vld [vmem:[#allocation0 + $0x81] ss:$8 sm:$0xf]   ;;  %233 = vst [vmem:[#allocation0 + $0x290] sm:$0x3] %v1127_v46 }
  0x47   :  { %238 = vst [vmem:[#allocation0 + $0x288] sm:$0x3] %v1128_v47  ;;  %243 = vst [vmem:[#allocation0 + $0x280] sm:$0x3] %v1129_v48  ;;  %v1090_v50 = vld [vmem:[%s1811_s0 + $0xee] sm:$0x3]  ;;  %v873_v51 = vsel %vm642_vm0, %v871_v44, %v869_v49 }
  0x48   :  { %48 = vst [vmem:[#allocation0 + $0x3b8] sm:$0x3] %v1090_v50  ;;  %v1091_v52 = vld [vmem:[%s1811_s0 + $0xec] sm:$0x3]  ;;  %v1092_v53 = vld [vmem:[%s1811_s0 + $0xea] sm:$0x3]  ;;  %874 = vrot.lane.b32.xlu0 %v873_v51, %s1240_s10 }
  0x49   :  { %v1093_v54 = vld [vmem:[%s1811_s0 + $0xe8] sm:$0x3]  ;;  %53 = vst [vmem:[#allocation0 + $0x3b0] sm:$0x3] %v1091_v52  ;;  %58 = vst [vmem:[#allocation0 + $0x3a8] sm:$0x3] %v1092_v53 }
  0x4a   :  { %v882_v55 = vld [vmem:[#allocation0 + $0x181] ss:$8 sm:$0xf0]   ;;  %63 = vst [vmem:[#allocation0 + $0x3a0] sm:$0x3] %v1093_v54 }
  0x4b   :  { %v1094_v56 = vld [vmem:[%s1811_s0 + $0xe6] sm:$0x3]  ;;  %v1095_v57 = vld [vmem:[%s1811_s0 + $0xe4] sm:$0x3]  ;;  %v1096_v58 = vld [vmem:[%s1811_s0 + $0xe2] sm:$0x3] }
  0x4c   :  { %68 = vst [vmem:[#allocation0 + $0x398] sm:$0x3] %v1094_v56  ;;  %v1097_v59 = vld [vmem:[%s1811_s0 + $0xe0] sm:$0x3]  ;;  %73 = vst [vmem:[#allocation0 + $0x390] sm:$0x3] %v1095_v57 }
  0x4d   :  { %v880_v60 = vld [vmem:[#allocation0 + $0x181] ss:$8 sm:$0xf]   ;;  %78 = vst [vmem:[#allocation0 + $0x388] sm:$0x3] %v1096_v58 }
  0x4e   :  { %83 = vst [vmem:[#allocation0 + $0x380] sm:$0x3] %v1097_v59  ;;  %v1178_v61 = vld [vmem:[%s1811_s0 + $0x3e] sm:$0x3]  ;;  %v884_v62 = vsel %vm642_vm0, %v882_v55, %v880_v60  ;;  %v1179_v0 = vld [vmem:[%s1811_s0 + $0x3c] sm:$0x3] }
  0x4f   :  { %v893_v63 = vld [vmem:[#allocation0 + $0x281] ss:$8 sm:$0xf0]   ;;  %488 = vst [vmem:[#allocation0 + $0xf8] sm:$0x3] %v1178_v61  ;;  %885 = vrot.lane.b32.xlu1 %v884_v62, %s1240_s10 }
  0x50   :  { %493 = vst [vmem:[#allocation0 + $0xf0] sm:$0x3] %v1179_v0  ;;  %v1180_v1 = vld [vmem:[%s1811_s0 + $0x3a] sm:$0x3]  ;;  %v1181_v2 = vld [vmem:[%s1811_s0 + $0x38] sm:$0x3] }
  0x51   :  { %v1182_v3 = vld [vmem:[%s1811_s0 + $0x36] sm:$0x3]  ;;  %v891_v4 = vld [vmem:[#allocation0 + $0x281] ss:$8 sm:$0xf]  }
  0x52   :  { %498 = vst [vmem:[#allocation0 + $0xe8] sm:$0x3] %v1180_v1  ;;  %503 = vst [vmem:[#allocation0 + $0xe0] sm:$0x3] %v1181_v2  ;;  %v1183_v5 = vld [vmem:[%s1811_s0 + $0x34] sm:$0x3]  ;;  %v895_v6 = vsel %vm642_vm0, %v893_v63, %v891_v4 }
  0x53   :  { %508 = vst [vmem:[#allocation0 + $0xd8] sm:$0x3] %v1182_v3  ;;  %513 = vst [vmem:[#allocation0 + $0xd0] sm:$0x3] %v1183_v5  ;;  %v1184_v7 = vld [vmem:[%s1811_s0 + $0x32] sm:$0x3]  ;;  %896 = vrot.lane.b32.xlu0 %v895_v6, %s1240_s10 }
  0x54   :  { %v1185_v8 = vld [vmem:[%s1811_s0 + $0x30] sm:$0x3]  ;;  %v1146_v9 = vld [vmem:[%s1811_s0 + $0x7e] sm:$0x3]  ;;  %518 = vst [vmem:[#allocation0 + $0xc8] sm:$0x3] %v1184_v7 }
  0x55   :  { %v904_v10 = vld [vmem:[#allocation0 + $0x381] ss:$8 sm:$0xf0]   ;;  %523 = vst [vmem:[#allocation0 + $0xc0] sm:$0x3] %v1185_v8 }
  0x56   :  { %328 = vst [vmem:[#allocation0 + $0x1f8] sm:$0x3] %v1146_v9  ;;  %v1147_v11 = vld [vmem:[%s1811_s0 + $0x7c] sm:$0x3]  ;;  %v1148_v12 = vld [vmem:[%s1811_s0 + $0x7a] sm:$0x3] }
  0x57   :  { %333 = vst [vmem:[#allocation0 + $0x1f0] sm:$0x3] %v1147_v11  ;;  %v1149_v13 = vld [vmem:[%s1811_s0 + $0x78] sm:$0x3]  ;;  %v1150_v14 = vld [vmem:[%s1811_s0 + $0x76] sm:$0x3] }
  0x58   :  { %v902_v15 = vld [vmem:[#allocation0 + $0x381] ss:$8 sm:$0xf]   ;;  %338 = vst [vmem:[#allocation0 + $0x1e8] sm:$0x3] %v1148_v12 }
  0x59   :  { %343 = vst [vmem:[#allocation0 + $0x1e0] sm:$0x3] %v1149_v13  ;;  %348 = vst [vmem:[#allocation0 + $0x1d8] sm:$0x3] %v1150_v14  ;;  %v1151_v16 = vld [vmem:[%s1811_s0 + $0x74] sm:$0x3]  ;;  %v906_v17 = vsel %vm642_vm0, %v904_v10, %v902_v15 }
  0x5a   :  { %353 = vst [vmem:[#allocation0 + $0x1d0] sm:$0x3] %v1151_v16  ;;  %v1152_v18 = vld [vmem:[%s1811_s0 + $0x72] sm:$0x3]  ;;  %v1153_v19 = vld [vmem:[%s1811_s0 + $0x70] sm:$0x3]  ;;  %907 = vrot.lane.b32.xlu1 %v906_v17, %s1240_s10 }
  0x5b   :  { %v1114_v20 = vld [vmem:[%s1811_s0 + $0xbe] sm:$0x3]  ;;  %358 = vst [vmem:[#allocation0 + $0x1c8] sm:$0x3] %v1152_v18  ;;  %363 = vst [vmem:[#allocation0 + $0x1c0] sm:$0x3] %v1153_v19 }
  0x5c   :  { %168 = vst [vmem:[#allocation0 + $0x2f8] sm:$0x3] %v1114_v20  ;;  %v1115_v21 = vld [vmem:[%s1811_s0 + $0xbc] sm:$0x3]  ;;  %v1116_v22 = vld [vmem:[%s1811_s0 + $0xba] sm:$0x3] }
  0x5d   :  { %v1117_v23 = vld [vmem:[%s1811_s0 + $0xb8] sm:$0x3]  ;;  %173 = vst [vmem:[#allocation0 + $0x2f0] sm:$0x3] %v1115_v21  ;;  %178 = vst [vmem:[#allocation0 + $0x2e8] sm:$0x3] %v1116_v22 }
  0x5e   :  { %v915_v24 = vld [vmem:[#allocation0 + $0xc1] ss:$8 sm:$0xf0]   ;;  %183 = vst [vmem:[#allocation0 + $0x2e0] sm:$0x3] %v1117_v23 }
  0x5f   :  { %v1118_v25 = vld [vmem:[%s1811_s0 + $0xb6] sm:$0x3]  ;;  %v1119_v26 = vld [vmem:[%s1811_s0 + $0xb4] sm:$0x3]  ;;  %v1120_v27 = vld [vmem:[%s1811_s0 + $0xb2] sm:$0x3] }
  0x60   :  { %188 = vst [vmem:[#allocation0 + $0x2d8] sm:$0x3] %v1118_v25  ;;  %v1121_v28 = vld [vmem:[%s1811_s0 + $0xb0] sm:$0x3]  ;;  %193 = vst [vmem:[#allocation0 + $0x2d0] sm:$0x3] %v1119_v26 }
  0x61   :  { %v913_v29 = vld [vmem:[#allocation0 + $0xc1] ss:$8 sm:$0xf]   ;;  %198 = vst [vmem:[#allocation0 + $0x2c8] sm:$0x3] %v1120_v27 }
  0x62   :  { %203 = vst [vmem:[#allocation0 + $0x2c0] sm:$0x3] %v1121_v28  ;;  %v1082_v30 = vld [vmem:[%s1811_s0 + $0xfe] sm:$0x3]  ;;  %v917_v31 = vsel %vm642_vm0, %v915_v24, %v913_v29  ;;  %v1083_v32 = vld [vmem:[%s1811_s0 + $0xfc] sm:$0x3] }
  0x63   :  { %8 = vst [vmem:[#allocation0 + $0x3f8] sm:$0x3] %v1082_v30  ;;  %v1084_v33 = vld [vmem:[%s1811_s0 + $0xfa] sm:$0x3]  ;;  %v1085_v34 = vld [vmem:[%s1811_s0 + $0xf8] sm:$0x3]  ;;  %918 = vrot.lane.b32.xlu0 %v917_v31, %s1240_s10 }
  0x64   :  { %v926_v35 = vld [vmem:[#allocation0 + $0x1c1] ss:$8 sm:$0xf0]   ;;  %13 = vst [vmem:[#allocation0 + $0x3f0] sm:$0x3] %v1083_v32 }
  0x65   :  { %18 = vst [vmem:[#allocation0 + $0x3e8] sm:$0x3] %v1084_v33  ;;  %23 = vst [vmem:[#allocation0 + $0x3e0] sm:$0x3] %v1085_v34  ;;  %v1086_v36 = vld [vmem:[%s1811_s0 + $0xf6] sm:$0x3] }
  0x66   :  { %28 = vst [vmem:[#allocation0 + $0x3d8] sm:$0x3] %v1086_v36  ;;  %v1087_v37 = vld [vmem:[%s1811_s0 + $0xf4] sm:$0x3]  ;;  %v1088_v38 = vld [vmem:[%s1811_s0 + $0xf2] sm:$0x3] }
  0x67   :  { %v1089_v39 = vld [vmem:[%s1811_s0 + $0xf0] sm:$0x3]  ;;  %33 = vst [vmem:[#allocation0 + $0x3d0] sm:$0x3] %v1087_v37  ;;  %38 = vst [vmem:[#allocation0 + $0x3c8] sm:$0x3] %v1088_v38 }
  0x68   :  { %v924_v40 = vld [vmem:[#allocation0 + $0x1c1] ss:$8 sm:$0xf]   ;;  %43 = vst [vmem:[#allocation0 + $0x3c0] sm:$0x3] %v1089_v39 }
  0x69   :  { %v640_v41 = vld [vmem:[#allocation0] ss:$8 sm:$0xf]   ;;  %v928_v42 = vsel %vm642_vm0, %v926_v35, %v924_v40  ;;  %v937_v43 = vld [vmem:[#allocation0 + $0x2c1] ss:$8 sm:$0xf0]  }
  0x6a   :  { %v641_v44 = vld [vmem:[#allocation0] ss:$8 sm:$0xf0]   ;;  %929 = vrot.lane.b32.xlu1 %v928_v42, %s1240_s10  ;;  %v935_v48 = vld [vmem:[#allocation0 + $0x2c1] ss:$8 sm:$0xf]  }
  0x6b   :  { %v643_v45 = vsel %vm642_vm0, %v641_v44, %v640_v41  ;;  %v710_v46 = vld [vmem:[#allocation0 + $0x200] ss:$8 sm:$0xf]   ;;  %v939_v51 = vsel %vm642_vm0, %v937_v43, %v935_v48 }
  0x6c   :  { %v712_v47 = vld [vmem:[#allocation0 + $0x200] ss:$8 sm:$0xf0]   ;;  %645 = vst.msk [vmem:[%s1812_s1] sm:$0xff] %vm644_vm1, %v643_v45   ;;  %940 = vrot.lane.b32.xlu0 %v939_v51, %s1240_s10 }
  0x6d   :  { %v714_v49 = vsel %vm642_vm0, %v712_v47, %v710_v46  ;;  %v674_v50 = vld [vmem:[#allocation0 + $0x100] ss:$8 sm:$0xf]   ;;  %v948_v54 = vld [vmem:[#allocation0 + $0x3c1] ss:$8 sm:$0xf0]  }
  0x6e   :  { %1216 = vst.msk [vmem:[%s1812_s1 + $0x40] sm:$0xff] %vm644_vm1, %v714_v49   ;;  %v676_v52 = vld [vmem:[#allocation0 + $0x100] ss:$8 sm:$0xf0]  }
  0x6f   :  { %v746_v53 = vld [vmem:[#allocation0 + $0x300] ss:$8 sm:$0xf]   ;;  %v678_v55 = vsel %vm642_vm0, %v676_v52, %v674_v50  ;;  %v946_v60 = vld [vmem:[#allocation0 + $0x3c1] ss:$8 sm:$0xf]  }
  0x70   :  { %v748_v56 = vld [vmem:[#allocation0 + $0x300] ss:$8 sm:$0xf0]   ;;  %1212 = vst.msk [vmem:[%s1812_s1 + $0x20] sm:$0xff] %vm644_vm1, %v678_v55   ;;  %v950_v63 = vsel %vm642_vm0, %v948_v54, %v946_v60 }
  0x71   :  { %v750_v57 = vsel %vm642_vm0, %v748_v56, %v746_v53  ;;  %v647_v58 = vld [vmem:[#allocation0 + $0x40] ss:$8 sm:$0xf]   ;;  %951 = vrot.lane.b32.xlu1 %v950_v63, %s1240_s10 }
  0x72   :  { %v649_v59 = vld [vmem:[#allocation0 + $0x40] ss:$8 sm:$0xf0]   ;;  %1220 = vst.msk [vmem:[%s1812_s1 + $0x60] sm:$0xff] %vm644_vm1, %v750_v57  }
  0x73   :  { %v651_v61 = vsel %vm642_vm0, %v649_v59, %v647_v58  ;;  %v683_v62 = vld [vmem:[#allocation0 + $0x140] ss:$8 sm:$0xf]  }
  0x74   :  { %1209 = vst.msk [vmem:[%s1812_s1 + $0x8] sm:$0xff] %vm644_vm1, %v651_v61   ;;  %v685_v0 = vld [vmem:[#allocation0 + $0x140] ss:$8 sm:$0xf0]  }
  0x75   :  { %v719_v1 = vld [vmem:[#allocation0 + $0x240] ss:$8 sm:$0xf]   ;;  %v687_v2 = vsel %vm642_vm0, %v685_v0, %v683_v62 }
  0x76   :  { %v721_v3 = vld [vmem:[#allocation0 + $0x240] ss:$8 sm:$0xf0]   ;;  %1213 = vst.msk [vmem:[%s1812_s1 + $0x28] sm:$0xff] %vm644_vm1, %v687_v2  }
  0x77   :  { %v755_v4 = vld [vmem:[#allocation0 + $0x340] ss:$8 sm:$0xf]   ;;  %v723_v5 = vsel %vm642_vm0, %v721_v3, %v719_v1 }
  0x78   :  { %v757_v6 = vld [vmem:[#allocation0 + $0x340] ss:$8 sm:$0xf0]   ;;  %1217 = vst.msk [vmem:[%s1812_s1 + $0x48] sm:$0xff] %vm644_vm1, %v723_v5  }
  0x79   :  { %v656_v7 = vld [vmem:[#allocation0 + $0x80] ss:$8 sm:$0xf]   ;;  %v759_v8 = vsel %vm642_vm0, %v757_v6, %v755_v4 }
  0x7a   :  { %v658_v9 = vld [vmem:[#allocation0 + $0x80] ss:$8 sm:$0xf0]   ;;  %1221 = vst.msk [vmem:[%s1812_s1 + $0x68] sm:$0xff] %vm644_vm1, %v759_v8  }
  0x7b   :  { %v692_v10 = vld [vmem:[#allocation0 + $0x180] ss:$8 sm:$0xf]   ;;  %v660_v11 = vsel %vm642_vm0, %v658_v9, %v656_v7 }
  0x7c   :  { %v694_v12 = vld [vmem:[#allocation0 + $0x180] ss:$8 sm:$0xf0]   ;;  %1210 = vst.msk [vmem:[%s1812_s1 + $0x10] sm:$0xff] %vm644_vm1, %v660_v11  }
  0x7d   :  { %v728_v13 = vld [vmem:[#allocation0 + $0x280] ss:$8 sm:$0xf]   ;;  %v696_v14 = vsel %vm642_vm0, %v694_v12, %v692_v10 }
  0x7e   :  { %v730_v15 = vld [vmem:[#allocation0 + $0x280] ss:$8 sm:$0xf0]   ;;  %1214 = vst.msk [vmem:[%s1812_s1 + $0x30] sm:$0xff] %vm644_vm1, %v696_v14  }
  0x7f   :  { %v764_v16 = vld [vmem:[#allocation0 + $0x380] ss:$8 sm:$0xf]   ;;  %v732_v17 = vsel %vm642_vm0, %v730_v15, %v728_v13 }
  0x80   :  { %v766_v18 = vld [vmem:[#allocation0 + $0x380] ss:$8 sm:$0xf0]   ;;  %1218 = vst.msk [vmem:[%s1812_s1 + $0x50] sm:$0xff] %vm644_vm1, %v732_v17  }
  0x81   :  { %v665_v19 = vld [vmem:[#allocation0 + $0xc0] ss:$8 sm:$0xf]   ;;  %v768_v20 = vsel %vm642_vm0, %v766_v18, %v764_v16 }
  0x82   :  { %v667_v21 = vld [vmem:[#allocation0 + $0xc0] ss:$8 sm:$0xf0]   ;;  %1222 = vst.msk [vmem:[%s1812_s1 + $0x70] sm:$0xff] %vm644_vm1, %v768_v20  }
  0x83   :  { %v701_v22 = vld [vmem:[#allocation0 + $0x1c0] ss:$8 sm:$0xf]   ;;  %v669_v23 = vsel %vm642_vm0, %v667_v21, %v665_v19 }
  0x84   :  { %v703_v24 = vld [vmem:[#allocation0 + $0x1c0] ss:$8 sm:$0xf0]   ;;  %1211 = vst.msk [vmem:[%s1812_s1 + $0x18] sm:$0xff] %vm644_vm1, %v669_v23  }
  0x85   :  { %v737_v25 = vld [vmem:[#allocation0 + $0x2c0] ss:$8 sm:$0xf]   ;;  %v705_v26 = vsel %vm642_vm0, %v703_v24, %v701_v22 }
  0x86   :  { %v739_v27 = vld [vmem:[#allocation0 + $0x2c0] ss:$8 sm:$0xf0]   ;;  %1215 = vst.msk [vmem:[%s1812_s1 + $0x38] sm:$0xff] %vm644_vm1, %v705_v26  }
  0x87   :  { %v773_v28 = vld [vmem:[#allocation0 + $0x3c0] ss:$8 sm:$0xf]   ;;  %v741_v29 = vsel %vm642_vm0, %v739_v27, %v737_v25  ;;  %v788_v32 = vpop.permute.xlu0 %787  }
  0x88   :  { %v775_v30 = vld [vmem:[#allocation0 + $0x3c0] ss:$8 sm:$0xf0]   ;;  %1219 = vst.msk [vmem:[%s1812_s1 + $0x58] sm:$0xff] %vm644_vm1, %v741_v29  }
  0x89   :  { %v777_v31 = vsel %vm642_vm0, %v775_v30, %v773_v28  ;;  %790 = vst.msk [vmem:[%s1812_s1] sm:$0xff] %vm789_vm2, %v788_v32  }
  0x8a   :  { %1223 = vst.msk [vmem:[%s1812_s1 + $0x78] sm:$0xff] %vm644_vm1, %v777_v31  }
  0x8c   :  { %v809_v33 = vpop.permute.xlu1 %808  }
  0x8d   :  { %1225 = vst.msk [vmem:[%s1812_s1 + $0x40] sm:$0xff] %vm789_vm2, %v809_v33  }
  0x90   :  { %v798_v34 = vpop.permute.xlu0 %797  }
  0x91   :  { %1224 = vst.msk [vmem:[%s1812_s1 + $0x20] sm:$0xff] %vm789_vm2, %v798_v34  }
  0x97   :  { %v820_v35 = vpop.permute.xlu1 %819  }
  0x98   :  { %1226 = vst.msk [vmem:[%s1812_s1 + $0x60] sm:$0xff] %vm789_vm2, %v820_v35  }
  0xa0   :  { %v831_v36 = vpop.permute.xlu0 %830  }
  0xa1   :  { %1227 = vst.msk [vmem:[%s1812_s1 + $0x8] sm:$0xff] %vm789_vm2, %v831_v36  }
  0xa6   :  { %v842_v37 = vpop.permute.xlu1 %841  }
  0xa7   :  { %1228 = vst.msk [vmem:[%s1812_s1 + $0x28] sm:$0xff] %vm789_vm2, %v842_v37  }
  0xab   :  { %v853_v38 = vpop.permute.xlu0 %852  }
  0xac   :  { %1229 = vst.msk [vmem:[%s1812_s1 + $0x48] sm:$0xff] %vm789_vm2, %v853_v38  }
  0xb1   :  { %v864_v39 = vpop.permute.xlu1 %863  }
  0xb2   :  { %1230 = vst.msk [vmem:[%s1812_s1 + $0x68] sm:$0xff] %vm789_vm2, %v864_v39  }
  0xba   :  { %v875_v40 = vpop.permute.xlu0 %874  }
  0xbb   :  { %1231 = vst.msk [vmem:[%s1812_s1 + $0x10] sm:$0xff] %vm789_vm2, %v875_v40  }
  0xc1   :  { %v886_v41 = vpop.permute.xlu1 %885  }
  0xc2   :  { %1232 = vst.msk [vmem:[%s1812_s1 + $0x30] sm:$0xff] %vm789_vm2, %v886_v41  }
  0xc5   :  { %v897_v42 = vpop.permute.xlu0 %896  }
  0xc6   :  { %1233 = vst.msk [vmem:[%s1812_s1 + $0x50] sm:$0xff] %vm789_vm2, %v897_v42  }
  0xcc   :  { %v908_v43 = vpop.permute.xlu1 %907  }
  0xcd   :  { %1234 = vst.msk [vmem:[%s1812_s1 + $0x70] sm:$0xff] %vm789_vm2, %v908_v43  }
  0xd5   :  { %v919_v44 = vpop.permute.xlu0 %918  }
  0xd6   :  { %1235 = vst.msk [vmem:[%s1812_s1 + $0x18] sm:$0xff] %vm789_vm2, %v919_v44  }
  0xdc   :  { %v930_v45 = vpop.permute.xlu1 %929  }
  0xdd   :  { %1236 = vst.msk [vmem:[%s1812_s1 + $0x38] sm:$0xff] %vm789_vm2, %v930_v45  }
  0xde   :  { %v941_v46 = vpop.permute.xlu0 %940  }
  0xdf   :  { %1237 = vst.msk [vmem:[%s1812_s1 + $0x58] sm:$0xff] %vm789_vm2, %v941_v46  }
  0xe3   :  { %v952_v47 = vpop.permute.xlu1 %951  }
  0xe4   :  { %1238 = vst.msk [vmem:[%s1812_s1 + $0x78] sm:$0xff] %vm789_vm2, %v952_v47  }

// kernel: mam_ffc_block_forward.37
= control target key start
LH: loop header
LB: loop body
LE: loop exit
PB: predicated region body
PF: predicated region fallthrough
CT: control target
= control target key end

     0   :  { %s390_s9 = smov 0   ;;  %s392_s10 = smov 0   ;;  %s423_s0 = inlined_call_operand.vmem [shape: f32[2,8,256], index: 0, kind: input, shape index: {}]   ;;  %s424_s1 = inlined_call_operand.vmem [shape: f32[2,8,1], index: 1, kind: output, shape index: {0}]   ;;  %s425_s2 = inlined_call_operand.vmem [shape: f32[2,8,1], index: 2, kind: output, shape index: {1}]  }
   0x1   :  { %s394_s11 = smov 0  }
   0x2 LB: > { %s25_s12 = sadd.s32 1, %s369_s10  ;;  %p319_p0 = scmp.ge.s32.totalorder %s373_s11, 1  ;;  %s373_s11 = sphi %s394_s11, %s13_s11   ;;  %s369_s10 = sphi %s392_s10, %s427_s10   ;;  %s365_s9 = sphi %s390_s9, %s426_s9  }
   0x3   : > { %p27_p1 = scmp.ge.s32.totalorder %s25_s12, 2  ;;  %p134_p2 = scmp.lt.s32.totalorder %s373_s11, 3 }
   0x5   : > { %s429_s12 = smov (%p27_p1, %s25_s12), 0  ;;  %p135_p3 = pnand %p319_p0, %p134_p2 }
   0x6   : > { %p164_p4 = scmp.lt.s32.totalorder (!%p135_p3), %s365_s9, 1  ;;  %vm212_vm0 = vcmask (!%p135_p3), 7168  }
   0x7   : > { %138 = sbr.rel (%p135_p3) target bundleno = 167 (0xa7), region = 24 }
   0xe   : > { %s431_s9 = smov (!%p164_p4, %s365_s9), 1 }
   0xf   : > { %s326_s13 = sshll.u32 %s431_s9, 4  ;;  %s322_s17 = sshll.u32 %s431_s9, 3 }
  0x10   : > { %s171_s16 = scalar_lea.vmem %s423_s0, %s326_s13  ;;  %s176_s20 = scalar_lea.vmem %s424_s1, %s322_s17 }
  0x11   : > { %v181_v0 = vld [vmem:[%s171_s16] sm:$0xff]  ;;  %v182_v1 = vld [vmem:[%s171_s16 + $0x8] sm:$0xff]  ;;  %s180_s23 = scalar_lea.vmem %s425_s2, %s322_s17 }
  0x12   : > { %v194_v2 = vadd.f32 %v182_v1, %v181_v0  ;;  %v199_v3 = vmax.f32 %v181_v0, %v182_v1 }
  0x14   : > { %195 = vadd.xlane.f32.xlu0 %v194_v2 }
  0x18   : > { %200 = vmax.xlane.f32.xlu0 %v199_v3 }
  0xa1   : > { %v196_v4 = vpop.xlane.xlu0 %195 }
  0xa2   : > { %215 = vst.msk [vmem:[%s176_s20] sm:$0xff] %vm212_vm0, %v196_v4 }
  0xa5   : > { %v201_v5 = vpop.xlane.xlu0 %200 }
  0xa6   : > { %216 = vst.msk [vmem:[%s180_s23] sm:$0xff] %vm212_vm0, %v201_v5 }
  0xa7 PF: > { %s13_s11 = sadd.s32 1, %s373_s11   ;;  %s426_s9 = smov %s369_s10 }
  0xa8   : > { %p10_p5 = scmp.ge.s32.totalorder %s13_s11, 4   ;;  %s427_s10 = smov %s429_s12 }
  0xaa   :  { %12 = sbr.rel (!%p10_p5) target bundleno = 2 (0x2), region = 66 }

// kernel: mam_ffc_block_forward.38
= control target key start
LH: loop header
LB: loop body
LE: loop exit
PB: predicated region body
PF: predicated region fallthrough
CT: control target
= control target key end

     0   :  { %s548_s12 = smov 0   ;;  %s550_s13 = smov 0   ;;  %s592_s0 = inlined_call_operand.vmem [shape: f32[2,8,256], index: 0, kind: input, shape index: {}]   ;;  %s593_s1 = inlined_call_operand.vmem [shape: f32[2,8,1], index: 1, kind: input, shape index: {}]   ;;  %s594_s2 = inlined_call_operand.vmem [shape: f32[2,1,256], index: 2, kind: output, shape index: {0}]   ;;  %s595_s3 = inlined_call_operand.vmem [shape: f32[2,1,256], index: 3, kind: output, shape index: {1}]  }
   0x1   :  { %s552_s14 = smov 0  }
   0x2 LB: > { %s26_s15 = sadd.s32 1, %s520_s13  ;;  %p466_p0 = scmp.ge.s32.totalorder %s524_s14, 1  ;;  %s524_s14 = sphi %s552_s14, %s14_s14   ;;  %s520_s13 = sphi %s550_s13, %s597_s13   ;;  %s516_s12 = sphi %s548_s12, %s596_s12  }
   0x3   : > { %p28_p1 = scmp.ge.s32.totalorder %s26_s15, 2  ;;  %p172_p2 = scmp.lt.s32.totalorder %s524_s14, 3 }
   0x5   : > { %s599_s15 = smov (%p28_p1, %s26_s15), 0  ;;  %p173_p3 = pnand %p466_p0, %p172_p2 }
   0x6   : > { %p216_p4 = scmp.lt.s32.totalorder (!%p173_p3), %s516_s12, 1  ;;  %v526_v0 = vmov (!%p173_p3), 0   ;;  %v527_v9 = vmov (!%p173_p3), 1966171168   ;;  %v277_v11 = vlaneseq (!%p173_p3) }
   0x7   : > { %176 = sbr.rel (%p173_p3) target bundleno = 169 (0xa9), region = 28  ;;  %501 = vset.pattern.permute.xlu0 (!%p173_p3), %v526_v0  ;;  %v275_v10 = vunpack.c.l.s4 (!%p173_p3), %v527_v9 }
   0x8   : > { %v278_v21 = vshrl.u32 (!%p173_p3), %v277_v11, 7  ;;  %vm291_vm0 = vcmp.lt.s32.totalorder (!%p173_p3), %v277_v11, 256 }
   0x9   : > { %v276_v20 = vunpack.c.0.s8 (!%p173_p3), %v275_v10 }
   0xb   : > { %v279_v30 = vsub.s32 (!%p173_p3), %v276_v20, %v278_v21 }
   0xe   : > { %s601_s12 = smov (!%p216_p4, %s516_s12), 1 }
   0xf   : > { %s469_s16 = sshll.u32 %s601_s12, 3  ;;  %s474_s20 = sshll.u32 %s601_s12, 4 }
  0x10   : > { %s228_s19 = scalar_lea.vmem %s593_s1, %s469_s16  ;;  %s223_s23 = scalar_lea.vmem %s592_s0, %s474_s20 }
  0x11   : > { %v249_v1 = vld [vmem:[%s228_s19] sm:$0xff]  ;;  %v248_v3 = vld [vmem:[%s223_s23 + $0x8] sm:$0xff]  ;;  %s470_s24 = sshll.u32 %s601_s12, 1 }
  0x12   : > { %252 = vperm.xlu0 %501, %v249_v1   ;;  %v247_v2 = vld [vmem:[%s223_s23] sm:$0xff]  ;;  %s245_s27 = scalar_lea.vmem %s595_s3, %s470_s24  ;;  %s236_s30 = scalar_lea.vmem %s594_s2, %s470_s24 }
  0x91   : > { %v253_v4 = vpop.permute.xlu0 %252 }
  0x92   : > { %v255_v5 = vmul.f32 %v253_v4, %v247_v2  ;;  %v256_v6 = vmul.f32 %v253_v4, %v248_v3 }
  0x94   : > { %v257_v7 = vrot.slane %v255_v5, 4  ;;  %v263_v8 = vrot.slane %v256_v6, 4 }
  0x96   : > { %v258_v12 = vadd.f32 %v257_v7, %v255_v5  ;;  %v264_v13 = vadd.f32 %v263_v8, %v256_v6  ;;  %v295_v14 = vmax.f32 %v255_v5, %v257_v7  ;;  %v301_v15 = vmax.f32 %v256_v6, %v263_v8 }
  0x98   : > { %v259_v16 = vrot.slane %v258_v12, 2  ;;  %v265_v17 = vrot.slane %v264_v13, 2  ;;  %v296_v18 = vrot.slane %v295_v14, 2  ;;  %v302_v19 = vrot.slane %v301_v15, 2 }
  0x9a   : > { %v260_v22 = vadd.f32 %v259_v16, %v258_v12  ;;  %v266_v23 = vadd.f32 %v265_v17, %v264_v13  ;;  %v297_v24 = vmax.f32 %v295_v14, %v296_v18  ;;  %v303_v25 = vmax.f32 %v301_v15, %v302_v19 }
  0x9c   : > { %v261_v26 = vrot.slane %v260_v22, 1  ;;  %v267_v27 = vrot.slane %v266_v23, 1  ;;  %v298_v28 = vrot.slane %v297_v24, 1  ;;  %v304_v29 = vrot.slane %v303_v25, 1 }
  0x9e   : > { %v262_v31 = vadd.f32 %v261_v26, %v260_v22  ;;  %v268_v32 = vadd.f32 %v267_v27, %v266_v23  ;;  %v299_v33 = vmax.f32 %v297_v24, %v298_v28  ;;  %v305_v34 = vmax.f32 %v303_v25, %v304_v29 }
  0xa0   : > { %v269_v35 = vmul.f32 0.125, %v262_v31  ;;  %v270_v36 = vmul.f32 0.125, %v268_v32  ;;  %v308_v37 = vcombine.low %v299_v33, %v305_v34 }
  0xa2   : > { %v273_v38 = vcombine.low %v269_v35, %v270_v36  ;;  %v315_v39 = vrot.slane %v308_v37, %v279_v30 }
  0xa4   : > { %v280_v40 = vrot.slane %v273_v38, %v279_v30  ;;  %v322_v41 = vrot.slane %v315_v39, %v279_v30 }
  0xa6   : > { %v287_v42 = vrot.slane %v280_v40, %v279_v30  ;;  %324 = vst.msk [vmem:[%s245_s27] sm:$0x3] %vm291_vm0, %v322_v41 }
  0xa8   : > { %293 = vst.msk [vmem:[%s236_s30] sm:$0x3] %vm291_vm0, %v287_v42 }
  0xa9 PF: > { %s14_s14 = sadd.s32 1, %s524_s14   ;;  %s596_s12 = smov %s520_s13 }
  0xaa   : > { %p11_p5 = scmp.ge.s32.totalorder %s14_s14, 4   ;;  %s597_s13 = smov %s599_s15 }
  0xac   :  { %13 = sbr.rel (!%p11_p5) target bundleno = 2 (0x2), region = 73 }

// kernel: mam_ffc_block_forward.40
= control target key start
LH: loop header
LB: loop body
LE: loop exit
PB: predicated region body
PF: predicated region fallthrough
CT: control target
= control target key end

     0   :  { %s506_s12 = smov 0   ;;  %s508_s13 = smov 0   ;;  %s550_s0 = inlined_call_operand.vmem [shape: f32[2,8,256], index: 0, kind: input, shape index: {}]   ;;  %s551_s1 = inlined_call_operand.vmem [shape: f32[2,8,1], index: 1, kind: input, shape index: {}]   ;;  %s552_s2 = inlined_call_operand.vmem [shape: f32[2,1,256], index: 2, kind: input, shape index: {}]   ;;  %s553_s3 = inlined_call_operand.vmem [shape: bf16[2,8,256], index: 3, kind: output, shape index: {}]  }
   0x1   :  { %s510_s14 = smov 0  }
   0x2 LB: > { %s25_s15 = sadd.s32 1, %s479_s13  ;;  %p417_p0 = scmp.ge.s32.totalorder %s483_s14, 1  ;;  %s483_s14 = sphi %s510_s14, %s13_s14   ;;  %s479_s13 = sphi %s508_s13, %s555_s13   ;;  %s475_s12 = sphi %s506_s12, %s554_s12  }
   0x3   : > { %p27_p1 = scmp.ge.s32.totalorder %s25_s15, 2  ;;  %p183_p2 = scmp.lt.s32.totalorder %s483_s14, 3 }
   0x5   : > { %s557_s15 = smov (%p27_p1, %s25_s15), 0  ;;  %p184_p3 = pnand %p417_p0, %p183_p2 }
   0x6   : > { %p228_p4 = scmp.lt.s32.totalorder (!%p184_p3), %s475_s12, 1  ;;  %v485_v0 = vmov (!%p184_p3), 0   ;;  %v278_v6 = vlaneseq (!%p184_p3) }
   0x7   : > { %187 = sbr.rel (%p184_p3) target bundleno = 153 (0x99), region = 32  ;;  %456 = vset.pattern.permute.xlu0 (!%p184_p3), %v485_v0 }
   0x8   : > { %v279_v7 = vshrl.u32 (!%p184_p3), %v278_v6, 7 }
   0xa   : > { %v280_v8 = vsub.s32 (!%p184_p3), 0, %v279_v7  ;;  %v284_v9 = vsub.s32 (!%p184_p3), 1, %v279_v7 }
   0xe   : > { %s559_s12 = smov (!%p228_p4, %s475_s12), 1 }
   0xf   : > { %s420_s16 = sshll.u32 %s559_s12, 3  ;;  %s421_s20 = sshll.u32 %s559_s12, 1 }
  0x10   : > { %s240_s19 = scalar_lea.vmem %s551_s1, %s420_s16  ;;  %s248_s23 = scalar_lea.vmem %s552_s2, %s421_s20 }
  0x11   : > { %v262_v1 = vld [vmem:[%s240_s19] sm:$0xff]  ;;  %s428_s24 = sshll.u32 %s559_s12, 4  ;;  %s258_s30 = scalar_lea.vmem %s553_s3, %s420_s16 }
  0x12   : > { %265 = vperm.xlu0 %456, %v262_v1   ;;  %v270_v2 = vld [vmem:[%s248_s23] sm:$0x3]  ;;  %s235_s27 = scalar_lea.vmem %s550_s0, %s428_s24 }
  0x13   : > { %v424_v3 = vmul.f32 -1.442695, %v270_v2  ;;  %v260_v11 = vld [vmem:[%s235_s27] sm:$0xff]  ;;  %v261_v12 = vld [vmem:[%s235_s27 + $0x8] sm:$0xff] }
  0x15   : > { %457 = vpow2.f32 %v424_v3 }
  0x1f   : > { %v458_v4 = vpop.eup %457 }
  0x20   : > { %v274_v5 = vadd.f32 1.0, %v458_v4 }
  0x22   : > { %459 = vrcp.f32 %v274_v5 }
  0x2c   : > { %v460_v10 = vpop.eup %459 }
  0x2d   : > { %v281_v13 = vrot.slane %v460_v10, %v280_v8  ;;  %v285_v14 = vrot.slane %v460_v10, %v284_v9 }
  0x91   : > { %v266_v15 = vpop.permute.xlu0 %265 }
  0x92   : > { %v268_v16 = vmul.f32 %v266_v15, %v260_v11  ;;  %v269_v17 = vmul.f32 %v266_v15, %v261_v12 }
  0x94   : > { %v288_v18 = vmul.f32 %v281_v13, %v268_v16  ;;  %v289_v19 = vmul.f32 %v285_v14, %v269_v17 }
  0x96   : > { %v430_v20 = vpack.c.bf16 %v289_v19, %v288_v18 }
  0x98   : > { %298 = vst [vmem:[%s258_s30] sm:$0xff] %v430_v20 }
  0x99 PF: > { %s13_s14 = sadd.s32 1, %s483_s14   ;;  %s554_s12 = smov %s479_s13 }
  0x9a   : > { %p10_p5 = scmp.ge.s32.totalorder %s13_s14, 4   ;;  %s555_s13 = smov %s557_s15 }
  0x9c   :  { %12 = sbr.rel (!%p10_p5) target bundleno = 2 (0x2), region = 68 }

// kernel: mam_ffc_block_forward.41
= control target key start
LH: loop header
LB: loop body
LE: loop exit
PB: predicated region body
PF: predicated region fallthrough
CT: control target
= control target key end

     0   :  { %s498_s9 = smov 0   ;;  %s500_s10 = smov 0   ;;  %s534_s0 = inlined_call_operand.vmem [shape: bf16[8,8], index: 0, kind: input, shape index: {}]   ;;  %s535_s1 = inlined_call_operand.vmem [shape: bf16[2,8,256], index: 1, kind: input, shape index: {}]   ;;  %s536_s2 = inlined_call_operand.vmem [shape: f32[2,8,256], index: 2, kind: output, shape index: {}]  }
   0x1   :  { %s502_s11 = smov 0  }
   0x2 LB: > { %s31_s12 = sadd.s32 1, %s476_s10  ;;  %p418_p0 = scmp.ge.s32.totalorder %s480_s11, 1  ;;  %s480_s11 = sphi %s502_s11, %s12_s11   ;;  %s476_s10 = sphi %s500_s10, %s538_s10   ;;  %s472_s9 = sphi %s498_s9, %s537_s9  }
   0x3   : > { %p33_p1 = scmp.ge.s32.totalorder %s31_s12, 2  ;;  %p155_p2 = scmp.lt.s32.totalorder %s480_s11, 3 }
   0x5   : > { %s540_s12 = smov (%p33_p1, %s31_s12), 0  ;;  %p156_p3 = pnand %p418_p0, %p155_p2 }
   0x6   : > { %p198_p4 = scmp.lt.s32.totalorder (!%p156_p3), %s472_s9, 1  ;;  %v482_v0 = vmov (!%p156_p3), 0   ;;  %vm241_vm0 = vcmask (!%p156_p3), 1043456   ;;  %v230_v5 = vld [vmem:[%s534_s0] sm:$0xf] (!%p156_p3)  ;;  %vm237_vm1 = vcmask (!%p156_p3), 64512  }
   0x7   : > { %159 = sbr.rel (%p156_p3) target bundleno = 240 (0xf0), region = 28  ;;  %280 = vmatprep.mubr.bf16.mxu0 (!%p156_p3), %v482_v0 }
   0xe   : > { %s542_s9 = smov (!%p198_p4, %s472_s9), 1 }
   0xf   : > { %s429_s13 = sshll.u32 %s542_s9, 3  ;;  %s430_s19 = sshll.u32 %s542_s9, 4 }
  0x10   : > { %s209_s16 = scalar_lea.vmem %s535_s1, %s429_s13  ;;  %s219_s22 = scalar_lea.vmem %s536_s2, %s430_s19 }
  0x11   : > { %v231_v1 = vld [vmem:[%s209_s16] sm:$0xff] }
  0x12   : > { %v424_v2 = vcombine.high %v231_v1, %v231_v1  ;;  %v423_v3 = vcombine.low %v231_v1, %v231_v1 }
  0x14   : > { %425 = vmatprep.subr.msk.bf16.mxu0 %vm241_vm0, %v424_v2  ;;  %v243_v4 = vsel %vm241_vm0, %v423_v3, 0 }
  0x15   : > { %249 = vmatpush1.bf16.msra.mxu0 %v243_v4 }
  0x18   : > { %426 = vmatmul.mubr.msk.bf16.vlgmr.msra.gmra.mrb[0].mxu0 %vm237_vm1, %v230_v5 }
  0xeb   : > { %v282_v6 = vpop.f32.mrb[0].mxu0 }
  0xec   : > { %v298_v7 = vmax.f32 %v282_v6, 0.0  ;;  %v284_v8 = vpop.f32.mrb[1].mxu0 }
  0xed   : > { %v299_v9 = vmax.f32 %v284_v8, 0.0  ;;  %v286_v10 = vpop.f32.mrb[2].mxu0 }
  0xee   : > { %300 = vst [vmem:[%s219_s22] sm:$0xff] %v298_v7  ;;  %v287_v11 = vpop.f32.mrb[3].mxu0 }
  0xef   : > { %301 = vst [vmem:[%s219_s22 + $0x8] sm:$0xff] %v299_v9 }
  0xf0 PF: > { %s12_s11 = sadd.s32 1, %s480_s11   ;;  %s537_s9 = smov %s476_s10 }
  0xf1   : > { %p9_p5 = scmp.ge.s32.totalorder %s12_s11, 4   ;;  %s538_s10 = smov %s540_s12 }
  0xf3   :  { %11 = sbr.rel (!%p9_p5) target bundleno = 2 (0x2), region = 69 }

// kernel: mam_ffc_block_forward.47
= control target key start
LH: loop header
LB: loop body
LE: loop exit
PB: predicated region body
PF: predicated region fallthrough
CT: control target
= control target key end

     0   :  { %s497_s9 = smov 0   ;;  %s499_s10 = smov 0   ;;  %s533_s0 = inlined_call_operand.vmem [shape: bf16[8,4], index: 0, kind: input, shape index: {}]   ;;  %s534_s1 = inlined_call_operand.vmem [shape: bf16[2,4,256], index: 1, kind: input, shape index: {}]   ;;  %s535_s2 = inlined_call_operand.vmem [shape: f32[2,8,256], index: 2, kind: output, shape index: {}]  }
   0x1   :  { %s501_s11 = smov 0  }
   0x2 LB: > { %s31_s12 = sadd.s32 1, %s475_s10  ;;  %p420_p0 = scmp.ge.s32.totalorder %s479_s11, 1  ;;  %s479_s11 = sphi %s501_s11, %s12_s11   ;;  %s475_s10 = sphi %s499_s10, %s537_s10   ;;  %s471_s9 = sphi %s497_s9, %s536_s9  }
   0x3   : > { %p33_p1 = scmp.ge.s32.totalorder %s31_s12, 2  ;;  %p155_p2 = scmp.lt.s32.totalorder %s479_s11, 3 }
   0x5   : > { %s539_s12 = smov (%p33_p1, %s31_s12), 0  ;;  %p156_p3 = pnand %p420_p0, %p155_p2 }
   0x6   : > { %p198_p4 = scmp.lt.s32.totalorder (!%p156_p3), %s471_s9, 1  ;;  %v481_v0 = vmov (!%p156_p3), 0   ;;  %vm245_vm0 = vcmask (!%p156_p3), 1041408   ;;  %v230_v4 = vld [vmem:[%s533_s0] sm:$0xf] (!%p156_p3)  ;;  %vm241_vm1 = vcmask (!%p156_p3), 31744  }
   0x7   : > { %159 = sbr.rel (%p156_p3) target bundleno = 239 (0xef), region = 28  ;;  %284 = vmatprep.mubr.bf16.mxu0 (!%p156_p3), %v481_v0 }
   0xe   : > { %s541_s9 = smov (!%p198_p4, %s471_s9), 1 }
   0xf   : > { %s430_s13 = sshll.u32 %s541_s9, 2  ;;  %s431_s19 = sshll.u32 %s541_s9, 4 }
  0x10   : > { %s209_s16 = scalar_lea.vmem %s534_s1, %s430_s13  ;;  %s219_s22 = scalar_lea.vmem %s535_s2, %s431_s19 }
  0x11   : > { %v425_v1 = vld.sshfl [vmem:[%s209_s16] sm:$0x33 pattern:$0x76325410] }
  0x12   : > { %v240_v2 = vcombine.high %v425_v1, %v425_v1  ;;  %v247_v3 = vsel %vm245_vm0, %v425_v1, 0 }
  0x14   : > { %426 = vmatprep.subr.msk.bf16.mxu0 %vm245_vm0, %v240_v2 }
  0x15   : > { %253 = vmatpush1.bf16.msra.mxu0 %v247_v3 }
  0x18   : > { %427 = vmatmul.mubr.msk.bf16.vlgmr.msra.gmra.mrb[0].mxu0 %vm241_vm1, %v230_v4 }
  0xeb   : > { %v286_v5 = vpop.f32.mrb[0].mxu0 }
  0xec   : > { %302 = vst [vmem:[%s219_s22] sm:$0xff] %v286_v5  ;;  %v288_v6 = vpop.f32.mrb[1].mxu0 }
  0xed   : > { %303 = vst [vmem:[%s219_s22 + $0x8] sm:$0xff] %v288_v6  ;;  %v290_v7 = vpop.f32.mrb[2].mxu0 }
  0xee   : > { %v291_v8 = vpop.f32.mrb[3].mxu0 }
  0xef PF: > { %s12_s11 = sadd.s32 1, %s479_s11   ;;  %s536_s9 = smov %s475_s10 }
  0xf0   : > { %p9_p5 = scmp.ge.s32.totalorder %s12_s11, 4   ;;  %s537_s10 = smov %s539_s12 }
  0xf2   :  { %11 = sbr.rel (!%p9_p5) target bundleno = 2 (0x2), region = 69 }

// kernel: mam_ffc_block_forward.48
= control target key start
LH: loop header
LB: loop body
LE: loop exit
PB: predicated region body
PF: predicated region fallthrough
CT: control target
= control target key end

     0   :  { %s770_s21 = smov 0   ;;  %s772_s22 = smov 0   ;;  %s829_s0 = inlined_call_operand.vmem [shape: f32[2,16,256], index: 0, kind: input, shape index: {}]   ;;  %s830_s1 = inlined_call_operand.vmem [shape: f32[2,8,1], index: 1, kind: input, shape index: {}]   ;;  %s831_s2 = inlined_call_operand.vmem [shape: f32[2,1,256], index: 2, kind: input, shape index: {}]   ;;  %s832_s3 = inlined_call_operand.vmem [shape: f32[2,8,256], index: 3, kind: input, shape index: {}]   ;;  %s833_s4 = inlined_call_operand.vmem [shape: f32[2,8,256], index: 4, kind: output, shape index: {0}]   ;;  %s834_s5 = inlined_call_operand.vmem [shape: f32[2,8,1], index: 5, kind: output, shape index: {1}]   ;;  %s835_s6 = inlined_call_operand.vmem [shape: f32[2,8,1], index: 6, kind: output, shape index: {2}]  }
   0x1   :  { %s774_s23 = smov 0  }
   0x2 LB: > { %s29_s24 = sadd.s32 1, %s728_s22  ;;  %p661_p0 = scmp.ge.s32.totalorder %s732_s23, 1  ;;  %s732_s23 = sphi %s774_s23, %s17_s23   ;;  %s728_s22 = sphi %s772_s22, %s837_s22   ;;  %s724_s21 = sphi %s770_s21, %s836_s21  }
   0x3   : > { %p31_p1 = scmp.ge.s32.totalorder %s29_s24, 2  ;;  %p281_p2 = scmp.lt.s32.totalorder %s732_s23, 3 }
   0x5   : > { %s839_s24 = smov (%p31_p1, %s29_s24), 0  ;;  %p282_p3 = pnand %p661_p0, %p281_p2 }
   0x6   : > { %p350_p4 = scmp.lt.s32.totalorder (!%p282_p3), %s724_s21, 1  ;;  %v734_v0 = vmov (!%p282_p3), 0   ;;  %v419_v6 = vlaneseq (!%p282_p3)  ;;  %vm455_vm0 = vcmask (!%p282_p3), 7168  }
   0x7   : > { %285 = sbr.rel (%p282_p3) target bundleno = 299 (0x12b), region = 36  ;;  %705 = vset.pattern.permute.xlu0 (!%p282_p3), %v734_v0 }
   0x8   : > { %v420_v7 = vshrl.u32 (!%p282_p3), %v419_v6, 7 }
   0xa   : > { %v421_v8 = vsub.s32 (!%p282_p3), 0, %v420_v7  ;;  %v425_v9 = vsub.s32 (!%p282_p3), 1, %v420_v7 }
   0xe   : > { %s841_s21 = smov (!%p350_p4, %s724_s21), 1 }
   0xf   : > { %s791_s25 = sshll.u32 %s841_s21, 3  ;;  %s665_s29 = sshll.u32 %s841_s21, 1 }
  0x10   : > { %s363_s28 = scalar_lea.vmem %s830_s1, %s791_s25  ;;  %s371_s8 = scalar_lea.vmem %s831_s2, %s665_s29 }
  0x11   : > { %v403_v1 = vld [vmem:[%s363_s28] sm:$0xff]  ;;  %s677_s9 = sshll.u32 %s841_s21, 5  ;;  %s678_s13 = sshll.u32 %s841_s21, 4 }
  0x12   : > { %406 = vperm.xlu0 %705, %v403_v1   ;;  %v411_v2 = vld [vmem:[%s371_s8] sm:$0x3]  ;;  %s557_s12 = scalar_lea.vmem %s829_s0, %s677_s9  ;;  %s381_s16 = scalar_lea.vmem %s832_s3, %s678_s13 }
  0x13   : > { %v674_v3 = vmul.f32 -1.442695, %v411_v2  ;;  %v672_v11 = vld [vmem:[%s557_s12 + $0x10] sm:$0xff]  ;;  %v673_v12 = vld [vmem:[%s557_s12 + $0x18] sm:$0xff]  ;;  %v431_v18 = vld [vmem:[%s381_s16] sm:$0xff]  ;;  %s391_s19 = scalar_lea.vmem %s833_s4, %s678_s13  ;;  %s396_s26 = scalar_lea.vmem %s834_s5, %s791_s25 }
  0x14   : > { %v432_v19 = vld [vmem:[%s381_s16 + $0x8] sm:$0xff]  ;;  %s400_s29 = scalar_lea.vmem %s835_s6, %s791_s25 }
  0x15   : > { %706 = vpow2.f32 %v674_v3 }
  0x1f   : > { %v707_v4 = vpop.eup %706 }
  0x20   : > { %v415_v5 = vadd.f32 1.0, %v707_v4 }
  0x22   : > { %708 = vrcp.f32 %v415_v5 }
  0x2c   : > { %v709_v10 = vpop.eup %708 }
  0x2d   : > { %v422_v13 = vrot.slane %v709_v10, %v421_v8  ;;  %v426_v14 = vrot.slane %v709_v10, %v425_v9 }
  0x91   : > { %v407_v15 = vpop.permute.xlu0 %406 }
  0x92   : > { %v409_v16 = vmul.f32 %v672_v11, %v407_v15  ;;  %v410_v17 = vmul.f32 %v673_v12, %v407_v15 }
  0x94   : > { %v429_v20 = vmul.f32 %v422_v13, %v409_v16  ;;  %v430_v21 = vmul.f32 %v426_v14, %v410_v17 }
  0x96   : > { %v433_v22 = vadd.f32 %v431_v18, %v429_v20  ;;  %v434_v23 = vadd.f32 %v432_v19, %v430_v21 }
  0x98   : > { %435 = vst [vmem:[%s391_s19] sm:$0xff] %v433_v22  ;;  %436 = vst [vmem:[%s391_s19 + $0x8] sm:$0xff] %v434_v23  ;;  %v437_v24 = vadd.f32 %v434_v23, %v433_v22  ;;  %v440_v25 = vmul.f32 %v433_v22, %v433_v22  ;;  %v441_v26 = vmul.f32 %v434_v23, %v434_v23 }
  0x9a   : > { %438 = vadd.xlane.f32.xlu0 %v437_v24  ;;  %v442_v27 = vadd.f32 %v441_v26, %v440_v25 }
  0x9c   : > { %443 = vadd.xlane.f32.xlu1 %v442_v27 }
 0x127   : > { %v439_v28 = vpop.xlane.xlu0 %438 }
 0x128   : > { %458 = vst.msk [vmem:[%s396_s26] sm:$0xff] %vm455_vm0, %v439_v28 }
 0x129   : > { %v444_v29 = vpop.xlane.xlu1 %443 }
 0x12a   : > { %459 = vst.msk [vmem:[%s400_s29] sm:$0xff] %vm455_vm0, %v444_v29 }
 0x12b PF: > { %s17_s23 = sadd.s32 1, %s732_s23   ;;  %s836_s21 = smov %s728_s22 }
 0x12c   : > { %p14_p5 = scmp.ge.s32.totalorder %s17_s23, 4   ;;  %s837_s22 = smov %s839_s24 }
 0x12e   :  { %16 = sbr.rel (!%p14_p5) target bundleno = 2 (0x2), region = 99 }

// kernel: mam_ffc_block_forward.49
= control target key start
LH: loop header
LB: loop body
LE: loop exit
PB: predicated region body
PF: predicated region fallthrough
CT: control target
= control target key end

     0   :  { %s496_s15 = smov 0   ;;  %s498_s16 = smov 0   ;;  %s538_s0 = inlined_call_operand.vmem [shape: f32[2,8,256], index: 0, kind: input, shape index: {}]   ;;  %s539_s1 = inlined_call_operand.vmem [shape: f32[2,8,256], index: 1, kind: input, shape index: {}]   ;;  %s540_s2 = inlined_call_operand.vmem [shape: f32[8,1], index: 2, kind: input, shape index: {}]   ;;  %s541_s3 = inlined_call_operand.vmem [shape: f32[8,1], index: 3, kind: input, shape index: {}]   ;;  %s542_s4 = inlined_call_operand.vmem [shape: f32[2,8,256], index: 4, kind: output, shape index: {}]  }
   0x1   :  { %s500_s17 = smov 0  }
   0x2 LB: > { %s26_s18 = sadd.s32 1, %s464_s16  ;;  %p408_p0 = scmp.ge.s32.totalorder %s468_s17, 1  ;;  %s468_s17 = sphi %s500_s17, %s14_s17   ;;  %s464_s16 = sphi %s498_s16, %s544_s16   ;;  %s460_s15 = sphi %s496_s15, %s543_s15  }
   0x3   : > { %p28_p1 = scmp.ge.s32.totalorder %s26_s18, 2  ;;  %p200_p2 = scmp.lt.s32.totalorder %s468_s17, 3 }
   0x5   : > { %s546_s18 = smov (%p28_p1, %s26_s18), 0  ;;  %p201_p3 = pnand %p408_p0, %p200_p2 }
   0x6   : > { %v279_v0 = vld [vmem:[%s540_s2] sm:$0xff] (!%p201_p3)  ;;  %v470_v1 = vmov (!%p201_p3), 0   ;;  %p244_p4 = scmp.lt.s32.totalorder (!%p201_p3), %s460_s15, 1 }
   0x7   : > { %204 = sbr.rel (%p201_p3) target bundleno = 145 (0x91), region = 36  ;;  %445 = vset.pattern.permute.xlu0 (!%p201_p3), %v470_v1  ;;  %v287_v2 = vld [vmem:[%s541_s3] sm:$0xff] (!%p201_p3) }
   0x8   : > { %282 = vperm.xlu0 (!%p201_p3), %445, %v279_v0  }
   0xc   : > { %290 = vperm.xlu0 (!%p201_p3), %445, %v287_v2  }
   0xe   : > { %s548_s15 = smov (!%p244_p4, %s460_s15), 1 }
   0xf   : > { %s417_s23 = sshll.u32 %s548_s15, 4 }
  0x10   : > { %s261_s26 = scalar_lea.vmem %s539_s1, %s417_s23  ;;  %s251_s29 = scalar_lea.vmem %s538_s0, %s417_s23 }
  0x11   : > { %v277_v3 = vld [vmem:[%s261_s26] sm:$0xff]  ;;  %v278_v5 = vld [vmem:[%s261_s26 + $0x8] sm:$0xff]  ;;  %s271_s6 = scalar_lea.vmem %s542_s4, %s417_s23 }
  0x12   : > { %v273_v6 = vld [vmem:[%s251_s29] sm:$0xff]  ;;  %v274_v7 = vld [vmem:[%s251_s29 + $0x8] sm:$0xff] }
  0x13   : > { %v275_v10 = vmul.f32 3.0, %v273_v6  ;;  %v276_v11 = vmul.f32 3.0, %v274_v7 }
  0x87   : > { %v283_v4 = vpop.permute.xlu0 %282 }
  0x88   : > { %v285_v8 = vsub.f32 %v277_v3, %v283_v4  ;;  %v286_v9 = vsub.f32 %v278_v5, %v283_v4 }
  0x8b   : > { %v291_v12 = vpop.permute.xlu0 %290 }
  0x8c   : > { %v293_v13 = vmul.f32 %v291_v12, %v285_v8  ;;  %v294_v14 = vmul.f32 %v291_v12, %v286_v9 }
  0x8e   : > { %v295_v15 = vadd.f32 %v293_v13, %v275_v10  ;;  %v296_v16 = vadd.f32 %v294_v14, %v276_v11 }
  0x90   : > { %297 = vst [vmem:[%s271_s6] sm:$0xff] %v295_v15  ;;  %298 = vst [vmem:[%s271_s6 + $0x8] sm:$0xff] %v296_v16 }
  0x91 PF: > { %s14_s17 = sadd.s32 1, %s468_s17   ;;  %s543_s15 = smov %s464_s16 }
  0x92   : > { %p11_p5 = scmp.ge.s32.totalorder %s14_s17, 4   ;;  %s544_s16 = smov %s546_s18 }
  0x94   :  { %13 = sbr.rel (!%p11_p5) target bundleno = 2 (0x2), region = 69 }

// kernel: mam_ffc_block_forward.25
= control target key start
LH: loop header
LB: loop body
LE: loop exit
PB: predicated region body
PF: predicated region fallthrough
CT: control target
= control target key end

     0   :  { %s751_s15 = smov 0   ;;  %s753_s16 = smov 0   ;;  %s798_s0 = inlined_call_operand.vmem [shape: bf16[8,72], index: 0, kind: input, shape index: {}]   ;;  %s799_s1 = inlined_call_operand.vmem [shape: bf16[2,72,256], index: 1, kind: input, shape index: {}]   ;;  %s800_s2 = inlined_call_operand.vmem [shape: f32[2,8,256], index: 2, kind: output, shape index: {0}]   ;;  %s801_s3 = inlined_call_operand.vmem [shape: f32[2,8,1], index: 3, kind: output, shape index: {1}]   ;;  %s802_s4 = inlined_call_operand.vmem [shape: f32[2,8,1], index: 4, kind: output, shape index: {2}]  }
   0x1   :  { %s755_s17 = smov 0  }
   0x2 LB: > { %s34_s18 = sadd.s32 1, %s719_s16  ;;  %p640_p0 = scmp.ge.s32.totalorder %s723_s17, 1  ;;  %s723_s17 = sphi %s755_s17, %s15_s17   ;;  %s719_s16 = sphi %s753_s16, %s804_s16   ;;  %s715_s15 = sphi %s751_s15, %s803_s15  }
   0x3   : > { %p36_p1 = scmp.ge.s32.totalorder %s34_s18, 2  ;;  %p212_p2 = scmp.lt.s32.totalorder %s723_s17, 3 }
   0x5   : > { %s806_s18 = smov (%p36_p1, %s34_s18), 0  ;;  %p213_p3 = pnand %p640_p0, %p212_p2 }
   0x6   : > { %p269_p4 = scmp.lt.s32.totalorder (!%p213_p3), %s715_s15, 1  ;;  %v725_v0 = vmov (!%p213_p3), 0   ;;  %vm369_vm0 = vcmask (!%p213_p3), 1043456   ;;  %v310_v13 = vld [vmem:[%s798_s0] sm:$0xf] (!%p213_p3)  ;;  %vm365_vm1 = vcmask (!%p213_p3), 588800  }
   0x7   : > { %216 = sbr.rel (%p213_p3) target bundleno = 401 (0x191), region = 28  ;;  %408 = vmatprep.mubr.bf16.mxu0 (!%p213_p3), %v725_v0  ;;  %vm457_vm2 = vcmask (!%p213_p3), 7168  }
   0xe   : > { %s808_s15 = smov (!%p269_p4, %s715_s15), 1 }
   0xf   : > { %s661_s19 = smul.u32 72, %s808_s15  ;;  %s660_s25 = sshll.u32 %s808_s15, 4 }
  0x10   : > { %s291_s28 = scalar_lea.vmem %s800_s2, %s660_s25  ;;  %s644_s29 = sshll.u32 %s808_s15, 3 }
  0x11   : > { %s280_s22 = scalar_lea.vmem %s799_s1, %s661_s19  ;;  %s296_s6 = scalar_lea.vmem %s801_s3, %s644_s29 }
  0x12   : > { %v687_v1 = vld [vmem:[%s280_s22 + $0x4] ss:$8 sps:$4 sm:$0xff]   ;;  %v689_v2 = vld [vmem:[%s280_s22] ss:$8 sps:$4 sm:$0xff]   ;;  %v690_v3 = vld [vmem:[%s280_s22 + $0x14] ss:$8 sps:$4 sm:$0xff]   ;;  %s300_s9 = scalar_lea.vmem %s802_s4, %s644_s29 }
  0x13   : > { %376 = vmatprep.subr.bf16.mxu0 %v687_v1  ;;  %v692_v4 = vld [vmem:[%s280_s22 + $0x10] ss:$8 sps:$4 sm:$0xff]   ;;  %v693_v5 = vld [vmem:[%s280_s22 + $0x24] ss:$8 sps:$4 sm:$0xff]   ;;  %v695_v6 = vld [vmem:[%s280_s22 + $0x20] ss:$8 sps:$4 sm:$0xff]  }
  0x14   : > { %377 = vmatpush1.bf16.msra.mxu0 %v689_v2  ;;  %v696_v7 = vld [vmem:[%s280_s22 + $0x34] ss:$8 sps:$4 sm:$0xff]   ;;  %v319_v8 = vld [vmem:[%s280_s22 + $0x40] sm:$0xff]  ;;  %v698_v9 = vld [vmem:[%s280_s22 + $0x30] ss:$8 sps:$4 sm:$0xff]  }
  0x15   : > { %378 = vmatprep.subr.bf16.mxu0 %v690_v3  ;;  %v655_v10 = vcombine.high %v319_v8, %v319_v8  ;;  %v654_v11 = vcombine.low %v319_v8, %v319_v8 }
  0x17   : > { %v371_v12 = vsel %vm369_vm0, %v654_v11, 0 }
  0x18   : > { %379 = vmatpush1.bf16.msra.mxu0 %v692_v4 }
  0x19   : > { %380 = vmatprep.subr.bf16.mxu0 %v693_v5 }
  0x1c   : > { %381 = vmatpush1.bf16.msra.mxu0 %v695_v6 }
  0x1d   : > { %382 = vmatprep.subr.bf16.mxu0 %v696_v7 }
  0x20   : > { %383 = vmatpush1.bf16.msra.mxu0 %v698_v9 }
  0x21   : > { %656 = vmatprep.subr.msk.bf16.mxu0 %vm369_vm0, %v655_v10 }
  0x24   : > { %385 = vmatpush1.bf16.msra.mxu0 %v371_v12 }
  0x27   : > { %657 = vmatmul.mubr.msk.bf16.vlgmr.msra.gmra.mrb[0].mxu0 %vm365_vm1, %v310_v13 }
  0xfa   : > { %v410_v14 = vpop.f32.mrb[0].mxu0 }
  0xfb   : > { %426 = vst [vmem:[%s291_s28] sm:$0xff] %v410_v14  ;;  %v412_v15 = vpop.f32.mrb[1].mxu0 }
  0xfc   : > { %427 = vst [vmem:[%s291_s28 + $0x8] sm:$0xff] %v412_v15  ;;  %v414_v16 = vpop.f32.mrb[2].mxu0  ;;  %v439_v17 = vadd.f32 %v412_v15, %v410_v14  ;;  %v444_v18 = vmax.f32 %v410_v14, %v412_v15 }
  0xfd   : > { %v415_v19 = vpop.f32.mrb[3].mxu0 }
  0xfe   : > { %440 = vadd.xlane.f32.xlu0 %v439_v17 }
 0x102   : > { %445 = vmax.xlane.f32.xlu0 %v444_v18 }
 0x18b   : > { %v441_v20 = vpop.xlane.xlu0 %440 }
 0x18c   : > { %460 = vst.msk [vmem:[%s296_s6] sm:$0xff] %vm457_vm2, %v441_v20 }
 0x18f   : > { %v446_v21 = vpop.xlane.xlu0 %445 }
 0x190   : > { %461 = vst.msk [vmem:[%s300_s9] sm:$0xff] %vm457_vm2, %v446_v21 }
 0x191 PF: > { %s15_s17 = sadd.s32 1, %s723_s17   ;;  %s803_s15 = smov %s719_s16 }
 0x192   : > { %p12_p5 = scmp.ge.s32.totalorder %s15_s17, 4   ;;  %s804_s16 = smov %s806_s18 }
 0x194   :  { %14 = sbr.rel (!%p12_p5) target bundleno = 2 (0x2), region = 93 }

// kernel: mam_ffc_block_forward.29
= control target key start
LH: loop header
LB: loop body
LE: loop exit
PB: predicated region body
PF: predicated region fallthrough
CT: control target
= control target key end

     0   :  { %s548_s12 = smov 0   ;;  %s550_s13 = smov 0   ;;  %s592_s0 = inlined_call_operand.vmem [shape: f32[2,16,256], index: 0, kind: input, shape index: {}]   ;;  %s593_s1 = inlined_call_operand.vmem [shape: f32[2,8,1], index: 1, kind: input, shape index: {}]   ;;  %s594_s2 = inlined_call_operand.vmem [shape: f32[2,1,256], index: 2, kind: output, shape index: {0}]   ;;  %s595_s3 = inlined_call_operand.vmem [shape: f32[2,1,256], index: 3, kind: output, shape index: {1}]  }
   0x1   :  { %s552_s14 = smov 0  }
   0x2 LB: > { %s26_s15 = sadd.s32 1, %s520_s13  ;;  %p466_p0 = scmp.ge.s32.totalorder %s524_s14, 1  ;;  %s524_s14 = sphi %s552_s14, %s14_s14   ;;  %s520_s13 = sphi %s550_s13, %s597_s13   ;;  %s516_s12 = sphi %s548_s12, %s596_s12  }
   0x3   : > { %p28_p1 = scmp.ge.s32.totalorder %s26_s15, 2  ;;  %p172_p2 = scmp.lt.s32.totalorder %s524_s14, 3 }
   0x5   : > { %s599_s15 = smov (%p28_p1, %s26_s15), 0  ;;  %p173_p3 = pnand %p466_p0, %p172_p2 }
   0x6   : > { %p216_p4 = scmp.lt.s32.totalorder (!%p173_p3), %s516_s12, 1  ;;  %v526_v0 = vmov (!%p173_p3), 0   ;;  %v527_v9 = vmov (!%p173_p3), 1966171168   ;;  %v277_v11 = vlaneseq (!%p173_p3) }
   0x7   : > { %176 = sbr.rel (%p173_p3) target bundleno = 169 (0xa9), region = 28  ;;  %501 = vset.pattern.permute.xlu0 (!%p173_p3), %v526_v0  ;;  %v275_v10 = vunpack.c.l.s4 (!%p173_p3), %v527_v9 }
   0x8   : > { %v278_v21 = vshrl.u32 (!%p173_p3), %v277_v11, 7  ;;  %vm291_vm0 = vcmp.lt.s32.totalorder (!%p173_p3), %v277_v11, 256 }
   0x9   : > { %v276_v20 = vunpack.c.0.s8 (!%p173_p3), %v275_v10 }
   0xb   : > { %v279_v30 = vsub.s32 (!%p173_p3), %v276_v20, %v278_v21 }
   0xe   : > { %s601_s12 = smov (!%p216_p4, %s516_s12), 1 }
   0xf   : > { %s469_s16 = sshll.u32 %s601_s12, 3  ;;  %s474_s20 = sshll.u32 %s601_s12, 5 }
  0x10   : > { %s228_s19 = scalar_lea.vmem %s593_s1, %s469_s16  ;;  %s223_s23 = scalar_lea.vmem %s592_s0, %s474_s20 }
  0x11   : > { %v249_v1 = vld [vmem:[%s228_s19] sm:$0xff]  ;;  %v248_v3 = vld [vmem:[%s223_s23 + $0x8] sm:$0xff]  ;;  %s470_s24 = sshll.u32 %s601_s12, 1 }
  0x12   : > { %252 = vperm.xlu0 %501, %v249_v1   ;;  %v247_v2 = vld [vmem:[%s223_s23] sm:$0xff]  ;;  %s245_s27 = scalar_lea.vmem %s595_s3, %s470_s24  ;;  %s236_s30 = scalar_lea.vmem %s594_s2, %s470_s24 }
  0x91   : > { %v253_v4 = vpop.permute.xlu0 %252 }
  0x92   : > { %v255_v5 = vmul.f32 %v253_v4, %v247_v2  ;;  %v256_v6 = vmul.f32 %v253_v4, %v248_v3 }
  0x94   : > { %v257_v7 = vrot.slane %v255_v5, 4  ;;  %v263_v8 = vrot.slane %v256_v6, 4 }
  0x96   : > { %v258_v12 = vadd.f32 %v257_v7, %v255_v5  ;;  %v264_v13 = vadd.f32 %v263_v8, %v256_v6  ;;  %v295_v14 = vmax.f32 %v255_v5, %v257_v7  ;;  %v301_v15 = vmax.f32 %v256_v6, %v263_v8 }
  0x98   : > { %v259_v16 = vrot.slane %v258_v12, 2  ;;  %v265_v17 = vrot.slane %v264_v13, 2  ;;  %v296_v18 = vrot.slane %v295_v14, 2  ;;  %v302_v19 = vrot.slane %v301_v15, 2 }
  0x9a   : > { %v260_v22 = vadd.f32 %v259_v16, %v258_v12  ;;  %v266_v23 = vadd.f32 %v265_v17, %v264_v13  ;;  %v297_v24 = vmax.f32 %v295_v14, %v296_v18  ;;  %v303_v25 = vmax.f32 %v301_v15, %v302_v19 }
  0x9c   : > { %v261_v26 = vrot.slane %v260_v22, 1  ;;  %v267_v27 = vrot.slane %v266_v23, 1  ;;  %v298_v28 = vrot.slane %v297_v24, 1  ;;  %v304_v29 = vrot.slane %v303_v25, 1 }
  0x9e   : > { %v262_v31 = vadd.f32 %v261_v26, %v260_v22  ;;  %v268_v32 = vadd.f32 %v267_v27, %v266_v23  ;;  %v299_v33 = vmax.f32 %v297_v24, %v298_v28  ;;  %v305_v34 = vmax.f32 %v303_v25, %v304_v29 }
  0xa0   : > { %v269_v35 = vmul.f32 0.125, %v262_v31  ;;  %v270_v36 = vmul.f32 0.125, %v268_v32  ;;  %v308_v37 = vcombine.low %v299_v33, %v305_v34 }
  0xa2   : > { %v273_v38 = vcombine.low %v269_v35, %v270_v36  ;;  %v315_v39 = vrot.slane %v308_v37, %v279_v30 }
  0xa4   : > { %v280_v40 = vrot.slane %v273_v38, %v279_v30  ;;  %v322_v41 = vrot.slane %v315_v39, %v279_v30 }
  0xa6   : > { %v287_v42 = vrot.slane %v280_v40, %v279_v30  ;;  %324 = vst.msk [vmem:[%s245_s27] sm:$0x3] %vm291_vm0, %v322_v41 }
  0xa8   : > { %293 = vst.msk [vmem:[%s236_s30] sm:$0x3] %vm291_vm0, %v287_v42 }
  0xa9 PF: > { %s14_s14 = sadd.s32 1, %s524_s14   ;;  %s596_s12 = smov %s520_s13 }
  0xaa   : > { %p11_p5 = scmp.ge.s32.totalorder %s14_s14, 4   ;;  %s597_s13 = smov %s599_s15 }
  0xac   :  { %13 = sbr.rel (!%p11_p5) target bundleno = 2 (0x2), region = 73 }

// kernel: mam_ffc_block_forward.31
= control target key start
LH: loop header
LB: loop body
LE: loop exit
PB: predicated region body
PF: predicated region fallthrough
CT: control target
= control target key end

     0   :  { %s497_s12 = smov 0   ;;  %s499_s13 = smov 0   ;;  %s542_s0 = inlined_call_operand.vmem [shape: f32[2,16,256], index: 0, kind: input, shape index: {}]   ;;  %s543_s1 = inlined_call_operand.vmem [shape: f32[2,8,1], index: 1, kind: input, shape index: {}]   ;;  %s544_s2 = inlined_call_operand.vmem [shape: f32[2,1,256], index: 2, kind: input, shape index: {}]   ;;  %s545_s3 = inlined_call_operand.vmem [shape: f32[2,8,256], index: 3, kind: output, shape index: {}]  }
   0x1   :  { %s501_s14 = smov 0  }
   0x2 LB: > { %s25_s15 = sadd.s32 1, %s470_s13  ;;  %p410_p0 = scmp.ge.s32.totalorder %s474_s14, 1  ;;  %s474_s14 = sphi %s501_s14, %s13_s14   ;;  %s470_s13 = sphi %s499_s13, %s547_s13   ;;  %s466_s12 = sphi %s497_s12, %s546_s12  }
   0x3   : > { %p27_p1 = scmp.ge.s32.totalorder %s25_s15, 2  ;;  %p183_p2 = scmp.lt.s32.totalorder %s474_s14, 3 }
   0x5   : > { %s549_s15 = smov (%p27_p1, %s25_s15), 0  ;;  %p184_p3 = pnand %p410_p0, %p183_p2 }
   0x6   : > { %p228_p4 = scmp.lt.s32.totalorder (!%p184_p3), %s466_s12, 1  ;;  %v476_v0 = vmov (!%p184_p3), 0   ;;  %v278_v6 = vlaneseq (!%p184_p3) }
   0x7   : > { %187 = sbr.rel (%p184_p3) target bundleno = 151 (0x97), region = 32  ;;  %447 = vset.pattern.permute.xlu0 (!%p184_p3), %v476_v0 }
   0x8   : > { %v279_v7 = vshrl.u32 (!%p184_p3), %v278_v6, 7 }
   0xa   : > { %v280_v8 = vsub.s32 (!%p184_p3), 0, %v279_v7  ;;  %v284_v9 = vsub.s32 (!%p184_p3), 1, %v279_v7 }
   0xe   : > { %s551_s12 = smov (!%p228_p4, %s466_s12), 1 }
   0xf   : > { %s413_s16 = sshll.u32 %s551_s12, 3  ;;  %s414_s20 = sshll.u32 %s551_s12, 1 }
  0x10   : > { %s240_s19 = scalar_lea.vmem %s543_s1, %s413_s16  ;;  %s248_s23 = scalar_lea.vmem %s544_s2, %s414_s20 }
  0x11   : > { %v262_v1 = vld [vmem:[%s240_s19] sm:$0xff]  ;;  %s420_s24 = sshll.u32 %s551_s12, 5  ;;  %s421_s28 = sshll.u32 %s551_s12, 4 }
  0x12   : > { %265 = vperm.xlu0 %447, %v262_v1   ;;  %v270_v2 = vld [vmem:[%s248_s23] sm:$0x3]  ;;  %s235_s27 = scalar_lea.vmem %s542_s0, %s420_s24  ;;  %s258_s4 = scalar_lea.vmem %s545_s3, %s421_s28 }
  0x13   : > { %v417_v3 = vmul.f32 -1.442695, %v270_v2  ;;  %v260_v11 = vld [vmem:[%s235_s27] sm:$0xff]  ;;  %v261_v12 = vld [vmem:[%s235_s27 + $0x8] sm:$0xff] }
  0x15   : > { %448 = vpow2.f32 %v417_v3 }
  0x1f   : > { %v449_v4 = vpop.eup %448 }
  0x20   : > { %v274_v5 = vadd.f32 1.0, %v449_v4 }
  0x22   : > { %450 = vrcp.f32 %v274_v5 }
  0x2c   : > { %v451_v10 = vpop.eup %450 }
  0x2d   : > { %v281_v13 = vrot.slane %v451_v10, %v280_v8  ;;  %v285_v14 = vrot.slane %v451_v10, %v284_v9 }
  0x91   : > { %v266_v15 = vpop.permute.xlu0 %265 }
  0x92   : > { %v268_v16 = vmul.f32 %v266_v15, %v260_v11  ;;  %v269_v17 = vmul.f32 %v266_v15, %v261_v12 }
  0x94   : > { %v288_v18 = vmul.f32 %v281_v13, %v268_v16  ;;  %v289_v19 = vmul.f32 %v285_v14, %v269_v17 }
  0x96   : > { %290 = vst [vmem:[%s258_s4] sm:$0xff] %v288_v18  ;;  %291 = vst [vmem:[%s258_s4 + $0x8] sm:$0xff] %v289_v19 }
  0x97 PF: > { %s13_s14 = sadd.s32 1, %s474_s14   ;;  %s546_s12 = smov %s470_s13 }
  0x98   : > { %p10_p5 = scmp.ge.s32.totalorder %s13_s14, 4   ;;  %s547_s13 = smov %s549_s15 }
  0x9a   :  { %12 = sbr.rel (!%p10_p5) target bundleno = 2 (0x2), region = 68 }

// kernel: mam_ffc_block_forward.32
= control target key start
LH: loop header
LB: loop body
LE: loop exit
PB: predicated region body
PF: predicated region fallthrough
CT: control target
= control target key end

     0   :  { %s762_s21 = smov 0   ;;  %s764_s22 = smov 0   ;;  %s815_s0 = inlined_call_operand.vmem [shape: f32[2,8,256], index: 0, kind: input, shape index: {}]   ;;  %s816_s1 = inlined_call_operand.vmem [shape: f32[2,8,1], index: 1, kind: input, shape index: {}]   ;;  %s817_s2 = inlined_call_operand.vmem [shape: f32[2,1,256], index: 2, kind: input, shape index: {}]   ;;  %s818_s3 = inlined_call_operand.vmem [shape: f32[2,8,256], index: 3, kind: input, shape index: {}]   ;;  %s819_s4 = inlined_call_operand.vmem [shape: f32[2,8,256], index: 4, kind: output, shape index: {0}]   ;;  %s820_s5 = inlined_call_operand.vmem [shape: f32[2,8,1], index: 5, kind: output, shape index: {1}]   ;;  %s821_s6 = inlined_call_operand.vmem [shape: f32[2,8,1], index: 6, kind: output, shape index: {2}]  }
   0x1   :  { %s766_s23 = smov 0  }
   0x2 LB: > { %s29_s24 = sadd.s32 1, %s720_s22  ;;  %p655_p0 = scmp.ge.s32.totalorder %s724_s23, 1  ;;  %s724_s23 = sphi %s766_s23, %s17_s23   ;;  %s720_s22 = sphi %s764_s22, %s823_s22   ;;  %s716_s21 = sphi %s762_s21, %s822_s21  }
   0x3   : > { %p31_p1 = scmp.ge.s32.totalorder %s29_s24, 2  ;;  %p280_p2 = scmp.lt.s32.totalorder %s724_s23, 3 }
   0x5   : > { %s825_s24 = smov (%p31_p1, %s29_s24), 0  ;;  %p281_p3 = pnand %p655_p0, %p280_p2 }
   0x6   : > { %p348_p4 = scmp.lt.s32.totalorder (!%p281_p3), %s716_s21, 1  ;;  %v726_v0 = vmov (!%p281_p3), 0   ;;  %v416_v6 = vlaneseq (!%p281_p3)  ;;  %vm452_vm0 = vcmask (!%p281_p3), 7168  }
   0x7   : > { %284 = sbr.rel (%p281_p3) target bundleno = 299 (0x12b), region = 36  ;;  %697 = vset.pattern.permute.xlu0 (!%p281_p3), %v726_v0 }
   0x8   : > { %v417_v7 = vshrl.u32 (!%p281_p3), %v416_v6, 7 }
   0xa   : > { %v418_v8 = vsub.s32 (!%p281_p3), 0, %v417_v7  ;;  %v422_v9 = vsub.s32 (!%p281_p3), 1, %v417_v7 }
   0xe   : > { %s827_s21 = smov (!%p348_p4, %s716_s21), 1 }
   0xf   : > { %s780_s25 = sshll.u32 %s827_s21, 3  ;;  %s659_s29 = sshll.u32 %s827_s21, 1 }
  0x10   : > { %s360_s28 = scalar_lea.vmem %s816_s1, %s780_s25  ;;  %s368_s8 = scalar_lea.vmem %s817_s2, %s659_s29 }
  0x11   : > { %v400_v1 = vld [vmem:[%s360_s28] sm:$0xff]  ;;  %s669_s9 = sshll.u32 %s827_s21, 4  ;;  %s393_s21 = scalar_lea.vmem %s820_s5, %s780_s25 }
  0x12   : > { %403 = vperm.xlu0 %697, %v400_v1   ;;  %v408_v2 = vld [vmem:[%s368_s8] sm:$0x3]  ;;  %s355_s12 = scalar_lea.vmem %s815_s0, %s669_s9  ;;  %s378_s15 = scalar_lea.vmem %s818_s3, %s669_s9 }
  0x13   : > { %v666_v3 = vmul.f32 -1.442695, %v408_v2  ;;  %v398_v11 = vld [vmem:[%s355_s12] sm:$0xff]  ;;  %v399_v12 = vld [vmem:[%s355_s12 + $0x8] sm:$0xff]  ;;  %s388_s18 = scalar_lea.vmem %s819_s4, %s669_s9  ;;  %s397_s28 = scalar_lea.vmem %s821_s6, %s780_s25 }
  0x14   : > { %v428_v18 = vld [vmem:[%s378_s15] sm:$0xff]  ;;  %v429_v19 = vld [vmem:[%s378_s15 + $0x8] sm:$0xff] }
  0x15   : > { %698 = vpow2.f32 %v666_v3 }
  0x1f   : > { %v699_v4 = vpop.eup %698 }
  0x20   : > { %v412_v5 = vadd.f32 1.0, %v699_v4 }
  0x22   : > { %700 = vrcp.f32 %v412_v5 }
  0x2c   : > { %v701_v10 = vpop.eup %700 }
  0x2d   : > { %v419_v13 = vrot.slane %v701_v10, %v418_v8  ;;  %v423_v14 = vrot.slane %v701_v10, %v422_v9 }
  0x91   : > { %v404_v15 = vpop.permute.xlu0 %403 }
  0x92   : > { %v406_v16 = vmul.f32 %v404_v15, %v398_v11  ;;  %v407_v17 = vmul.f32 %v404_v15, %v399_v12 }
  0x94   : > { %v426_v20 = vmul.f32 %v419_v13, %v406_v16  ;;  %v427_v21 = vmul.f32 %v423_v14, %v407_v17 }
  0x96   : > { %v430_v22 = vadd.f32 %v428_v18, %v426_v20  ;;  %v431_v23 = vadd.f32 %v429_v19, %v427_v21 }
  0x98   : > { %432 = vst [vmem:[%s388_s18] sm:$0xff] %v430_v22  ;;  %433 = vst [vmem:[%s388_s18 + $0x8] sm:$0xff] %v431_v23  ;;  %v434_v24 = vadd.f32 %v431_v23, %v430_v22  ;;  %v437_v25 = vmul.f32 %v430_v22, %v430_v22  ;;  %v438_v26 = vmul.f32 %v431_v23, %v431_v23 }
  0x9a   : > { %435 = vadd.xlane.f32.xlu0 %v434_v24  ;;  %v439_v27 = vadd.f32 %v438_v26, %v437_v25 }
  0x9c   : > { %440 = vadd.xlane.f32.xlu1 %v439_v27 }
 0x127   : > { %v436_v28 = vpop.xlane.xlu0 %435 }
 0x128   : > { %455 = vst.msk [vmem:[%s393_s21] sm:$0xff] %vm452_vm0, %v436_v28 }
 0x129   : > { %v441_v29 = vpop.xlane.xlu1 %440 }
 0x12a   : > { %456 = vst.msk [vmem:[%s397_s28] sm:$0xff] %vm452_vm0, %v441_v29 }
 0x12b PF: > { %s17_s23 = sadd.s32 1, %s724_s23   ;;  %s822_s21 = smov %s720_s22 }
 0x12c   : > { %p14_p5 = scmp.ge.s32.totalorder %s17_s23, 4   ;;  %s823_s22 = smov %s825_s24 }
 0x12e   :  { %16 = sbr.rel (!%p14_p5) target bundleno = 2 (0x2), region = 99 }

</bundles_post_ra>
